<compile_context>
chip_gen: v6e
topology: v6e:2x2x1
jax: 0.10.0
libtpu: 0.0.40
codegen_flags: <defaults>
</compile_context>

<pallas_src>
import functools

import jax
import jax.numpy as jnp
from jax.experimental import pallas as pl
from jax.experimental.pallas import tpu as pltpu

EPS = 1e-5


# --------------------------- in-kernel helpers ----------------------------

def _upsample2x(x):
    """Nearest-neighbour 2x upsample of an (H, W, C) value, entirely in VMEM."""
    h, w, c = x.shape
    x = jnp.broadcast_to(x[:, None, :, :], (h, 2, w, c)).reshape(2 * h, w, c)
    x = jnp.broadcast_to(x[:, :, None, :], (2 * h, w, 2, c)).reshape(2 * h, 2 * w, c)
    return x


def _zero_pad_hw(x):
    """Zero-pad H and W by 1 on each side: (H, W, C) -> (H+2, W+2, C)."""
    h, w, c = x.shape
    zr = jnp.zeros((1, w, c), x.dtype)
    x = jnp.concatenate([zr, x, zr], axis=0)
    zc = jnp.zeros((h + 2, 1, c), x.dtype)
    return jnp.concatenate([zc, x, zc], axis=1)


def _im2col_3x3(xp, h, w):
    """(H+2, W+2, C) padded input -> (H*W, 9*C) im2col LHS (tap-major, c-minor)."""
    c = xp.shape[-1]
    taps = []
    for k in range(9):
        ky, kx = divmod(k, 3)
        taps.append(xp[ky:ky + h, kx:kx + w, :].reshape(h * w, c))
    return jnp.concatenate(taps, axis=1)


# ------------------------------ fused kernel ------------------------------

def _generator_kernel(*refs, s0, num_conv_layers):
    z_ref, lw_ref, ls_ref, lt_ref = refs[0:4]
    o_ref = refs[-1]

    # Linear layer; linear bias + BatchNorm2d(C0) folded into a per-feature
    # affine.  Weight columns are pre-permuted to pixel-major order so the
    # (HW, C) view below is a pure lane-dense reinterpretation (no transpose).
    y = jnp.dot(z_ref[0], lw_ref[...], preferred_element_type=jnp.float32)
    y = y * ls_ref[...] + lt_ref[...]                        # (1, s0*s0*C0) f32

    nsp = s0 * s0
    c0 = ls_ref.shape[1] // nsp
    rows = [y[0:1, i * c0:(i + 1) * c0] for i in range(nsp)]
    x = jnp.concatenate(rows, axis=0).reshape(s0, s0, c0).astype(jnp.bfloat16)

    h = s0
    for i in range(num_conv_layers):
        w_ref, s_ref, t_ref = refs[4 + 3 * i: 7 + 3 * i]
        cout = w_ref.shape[1]
        h = 2 * h
        # Fused on-chip: nearest upsample + SAME zero-pad + im2col, then a
        # single MXU matmul with K = 9*Cin.
        patches = _im2col_3x3(_zero_pad_hw(_upsample2x(x)), h, h)
        acc = jnp.dot(patches, w_ref[...], preferred_element_type=jnp.float32)
        acc = acc * s_ref[...] + t_ref[...]                  # folded bias + BN
        if i != num_conv_layers - 1:
            acc = jnp.maximum(acc, 0.0)                      # ReLU
            x = acc.astype(jnp.bfloat16).reshape(h, h, cout)
        else:
            o_ref[...] = jnp.tanh(acc).reshape(1, h, h, cout)


# --------------------------- params & wrappers -----------------------------

def init_params(key, im_size=32, latent_size=100, num_channels=3,
                num_conv_layers=3, init_num_features=128):
    init_size = im_size // 2 ** num_conv_layers
    keys = list(jax.random.split(key, 4 + 4 * num_conv_layers))
    ki = iter(keys)
    out_feats = init_size * init_size * init_num_features
    params = {
        "lin_w": 0.05 * jax.random.normal(next(ki), (latent_size, out_feats), jnp.float32),
        "lin_b": 0.05 * jax.random.normal(next(ki), (out_feats,), jnp.float32),
        # BatchNorm2d(init_num_features): (gamma, beta, running_mean, running_var)
        "bn0": (
            1.0 + 0.1 * jax.random.normal(next(ki), (init_num_features,), jnp.float32),
            0.1 * jax.random.normal(next(ki), (init_num_features,), jnp.float32),
            jnp.zeros((init_num_features,), jnp.float32),
            jnp.ones((init_num_features,), jnp.float32),
        ),
        "convs": [],
    }
    cin = init_num_features
    for i in range(num_conv_layers):
        last = i == num_conv_layers - 1
        cout = num_channels if last else init_num_features // 2 ** (i + 1)
        layer = {
            "w": 0.05 * jax.random.normal(next(ki), (3, 3, cin, cout), jnp.float32),  # HWIO
            "b": 0.05 * jax.random.normal(next(ki), (cout,), jnp.float32),
        }
        if not last:
            layer["bn"] = (
                1.0 + 0.1 * jax.random.normal(next(ki), (cout,), jnp.float32),
                0.1 * jax.random.normal(next(ki), (cout,), jnp.float32),
                jnp.zeros((cout,), jnp.float32),
                jnp.ones((cout,), jnp.float32),
            )
        params["convs"].append(layer)
        cin = cout
    cfg = dict(im_size=im_size, latent_size=latent_size, num_channels=num_channels,
               num_conv_layers=num_conv_layers, init_num_features=init_num_features,
               init_size=init_size)
    return params, cfg


def prepare_params(params, cfg):
    """One-time prep: fold BN into affines, permute/pad the linear weight,
    reshape conv weights to im2col form, cast matmul operands to bf16."""
    C0 = cfg["init_num_features"]
    s0 = cfg["init_size"]
    nsp = s0 * s0
    F = nsp * C0
    L = params["lin_w"].shape[0]
    Lp = ((L + 127) // 128) * 128

    # Linear bias + BN0 folded into a per-feature affine (channel-major
    # feature order f = c*nsp + hw, matching torch's .view(B, C, H, W)).
    g, bb, m, v = params["bn0"]
    s_ch = g * jax.lax.rsqrt(v + EPS)
    t_ch = bb - m * s_ch
    s_feat = jnp.repeat(s_ch, nsp)
    t_feat = params["lin_b"] * s_feat + jnp.repeat(t_ch, nsp)

    def to_pixel_major(vec):                       # c-major cols -> hw-major cols
        return vec.reshape(C0, nsp).T.reshape(F)

    lin_w = params["lin_w"].reshape(L, C0, nsp).transpose(0, 2, 1).reshape(L, F)
    lin_w = jnp.pad(lin_w, ((0, Lp - L), (0, 0))).astype(jnp.bfloat16)

    kp = {
        "lin_w": lin_w,                                            # (Lp, F) bf16
        "lin_s": to_pixel_major(s_feat).reshape(1, F).astype(jnp.float32),
        "lin_t": to_pixel_major(t_feat).reshape(1, F).astype(jnp.float32),
        "convs": [],
    }
    n = cfg["num_conv_layers"]
    for i, layer in enumerate(params["convs"]):
        cin, cout = layer["w"].shape[2], layer["w"].shape[3]
        wk = layer["w"].reshape(9 * cin, cout).astype(jnp.bfloat16)   # im2col RHS
        if i != n - 1:
            g, bb, m, v = layer["bn"]
            s_c = g * jax.lax.rsqrt(v + EPS)
            t_c = (layer["b"] - m) * s_c + bb
        else:
            s_c = jnp.ones((cout,), jnp.float32)
            t_c = layer["b"]
        kp["convs"].append((wk,
                            s_c.reshape(1, cout).astype(jnp.float32),
                            t_c.reshape(1, cout).astype(jnp.float32)))
    return kp


def generator_forward(z, kparams, cfg):
    B = z.shape[0]
    im = cfg["im_size"]
    cimg = cfg["num_channels"]
    s0 = cfg["init_size"]
    n = cfg["num_conv_layers"]
    Lp, F = kparams["lin_w"].shape
    L = z.shape[1]

    zp = jnp.pad(z, ((0, 0), (0, Lp - L))).astype(jnp.bfloat16).reshape(B, 1, Lp)

    in_specs = [
        pl.BlockSpec((1, 1, Lp), lambda b: (b, 0, 0)),
        pl.BlockSpec((Lp, F), lambda b: (0, 0)),
        pl.BlockSpec((1, F), lambda b: (0, 0)),
        pl.BlockSpec((1, F), lambda b: (0, 0)),
    ]
    args = [zp, kparams["lin_w"], kparams["lin_s"], kparams["lin_t"]]
    for wk, s_c, t_c in kparams["convs"]:
        kcin, cout = wk.shape
        in_specs += [
            pl.BlockSpec((kcin, cout), lambda b: (0, 0)),
            pl.BlockSpec((1, cout), lambda b: (0, 0)),
            pl.BlockSpec((1, cout), lambda b: (0, 0)),
        ]
        args += [wk, s_c, t_c]

    kernel = functools.partial(_generator_kernel, s0=s0, num_conv_layers=n)
    out_nhwc = pl.pallas_call(
        kernel,
        out_shape=jax.ShapeDtypeStruct((B, im, im, cimg), jnp.float32),
        grid=(B,),
        in_specs=in_specs,
        out_specs=pl.BlockSpec((1, im, im, cimg), lambda b: (b, 0, 0, 0)),
        compiler_params=pltpu.CompilerParams(
            dimension_semantics=("parallel",),
            vmem_limit_bytes=32 * 1024 * 1024),
    )(*args)
    # Final NHWC -> NCHW transpose stays in XLA (only B*3*32*32*4 = 24 KB).
    return jnp.transpose(out_nhwc, (0, 3, 1, 2))


def reference_forward(z, params, cfg):
    """Pure-JAX f32 reference (same math, no Pallas) for a correctness check."""
    B = z.shape[0]
    C0, s0 = cfg["init_num_features"], cfg["init_size"]
    y = z @ params["lin_w"] + params["lin_b"]
    x = y.reshape(B, C0, s0, s0)
    g, bb, m, v = params["bn0"]
    sc = (g * jax.lax.rsqrt(v + EPS))[None, :, None, None]
    x = (x - m[None, :, None, None]) * sc + bb[None, :, None, None]
    x = jnp.transpose(x, (0, 2, 3, 1))
    n = cfg["num_conv_layers"]
    for i, layer in enumerate(params["convs"]):
        x = jnp.repeat(jnp.repeat(x, 2, axis=1), 2, axis=2)
        x = jax.lax.conv_general_dilated(
            x, layer["w"], (1, 1), "SAME",
            dimension_numbers=("NHWC", "HWIO", "NHWC")) + layer["b"]
        if i != n - 1:
            g, bb, m, v = layer["bn"]
            x = (x - m) * (g * jax.lax.rsqrt(v + EPS)) + bb
            x = jnp.maximum(x, 0.0)
        else:
            x = jnp.tanh(x)
    return jnp.transpose(x, (0, 3, 1, 2))


if __name__ == "__main__":
    key = jax.random.PRNGKey(0)
    pkey, zkey = jax.random.split(key)
    # Module defaults: im_size=32, latent_size=100, 3 conv layers, 128 features.
    params, cfg = init_params(pkey)
    B = 2
    z = jax.random.normal(zkey, (B, cfg["latent_size"]), dtype=jnp.float32)

    kparams = prepare_params(params, cfg)
    fwd = jax.jit(functools.partial(generator_forward, cfg=cfg))
    out = jax.block_until_ready(fwd(z, kparams))
    assert out.shape == (B, cfg["num_channels"], cfg["im_size"], cfg["im_size"]), out.shape

    ref = jax.block_until_ready(reference_forward(z, params, cfg))
    max_err = float(jnp.max(jnp.abs(out - ref)))
    # bf16 matmul operands (f32 accumulation / affines / activations).
    assert jnp.allclose(out, ref, atol=2e-2, rtol=2e-2), f"max abs err {max_err}"

    print("KERNEL_OK")
</pallas_src>

<mosaic_0001>
module attributes {stable_mosaic.version = 11 : i64} {
  func.func @_generator_kernel(%arg0: i32, %arg1: memref<1x1x128xbf16, #tpu.memory_space<vmem>>, %arg2: memref<128x2048xbf16, #tpu.memory_space<vmem>>, %arg3: memref<1x2048xf32, #tpu.memory_space<vmem>>, %arg4: memref<1x2048xf32, #tpu.memory_space<vmem>>, %arg5: memref<1152x64xbf16, #tpu.memory_space<vmem>>, %arg6: memref<1x64xf32, #tpu.memory_space<vmem>>, %arg7: memref<1x64xf32, #tpu.memory_space<vmem>>, %arg8: memref<576x32xbf16, #tpu.memory_space<vmem>>, %arg9: memref<1x32xf32, #tpu.memory_space<vmem>>, %arg10: memref<1x32xf32, #tpu.memory_space<vmem>>, %arg11: memref<288x3xbf16, #tpu.memory_space<vmem>>, %arg12: memref<1x3xf32, #tpu.memory_space<vmem>>, %arg13: memref<1x3xf32, #tpu.memory_space<vmem>>, %arg14: memref<1x32x32x3xf32, #tpu.memory_space<vmem>>) attributes {dimension_semantics = [#tpu.dimension_semantics<parallel>], iteration_bounds = array<i64: 2>, scalar_prefetch = 0 : i64, scratch_operands = 0 : i64, tpu.core_type = #tpu.core_type<tc>, window_params = [{transform_indices = @transform_0, window_bounds = array<i64: 1, 1, 128>}, {pipeline_mode = #tpu.pipeline_mode<synchronous>, transform_indices = @transform_1, window_bounds = array<i64: 128, 2048>}, {pipeline_mode = #tpu.pipeline_mode<synchronous>, transform_indices = @transform_2, window_bounds = array<i64: 1, 2048>}, {pipeline_mode = #tpu.pipeline_mode<synchronous>, transform_indices = @transform_3, window_bounds = array<i64: 1, 2048>}, {pipeline_mode = #tpu.pipeline_mode<synchronous>, transform_indices = @transform_4, window_bounds = array<i64: 1152, 64>}, {pipeline_mode = #tpu.pipeline_mode<synchronous>, transform_indices = @transform_5, window_bounds = array<i64: 1, 64>}, {pipeline_mode = #tpu.pipeline_mode<synchronous>, transform_indices = @transform_6, window_bounds = array<i64: 1, 64>}, {pipeline_mode = #tpu.pipeline_mode<synchronous>, transform_indices = @transform_7, window_bounds = array<i64: 576, 32>}, {pipeline_mode = #tpu.pipeline_mode<synchronous>, transform_indices = @transform_8, window_bounds = array<i64: 1, 32>}, {pipeline_mode = #tpu.pipeline_mode<synchronous>, transform_indices = @transform_9, window_bounds = array<i64: 1, 32>}, {pipeline_mode = #tpu.pipeline_mode<synchronous>, transform_indices = @transform_10, window_bounds = array<i64: 288, 3>}, {pipeline_mode = #tpu.pipeline_mode<synchronous>, transform_indices = @transform_11, window_bounds = array<i64: 1, 3>}, {pipeline_mode = #tpu.pipeline_mode<synchronous>, transform_indices = @transform_12, window_bounds = array<i64: 1, 3>}, {transform_indices = @transform_13, window_bounds = array<i64: 1, 32, 32, 3>}]} {
    %c0 = arith.constant 0 : index
    %c0_0 = arith.constant 0 : index
    %c0_1 = arith.constant 0 : index
    %0 = vector.load %arg1[%c0, %c0_0, %c0_1] : memref<1x1x128xbf16, #tpu.memory_space<vmem>>, vector<1x1x128xbf16>
    %1 = vector.shape_cast %0 : vector<1x1x128xbf16> to vector<1x128xbf16>
    %c0_2 = arith.constant 0 : index
    %c0_3 = arith.constant 0 : index
    %2 = vector.load %arg2[%c0_2, %c0_3] : memref<128x2048xbf16, #tpu.memory_space<vmem>>, vector<128x2048xbf16>
    %cst = arith.constant dense<0.000000e+00> : vector<1x2048xf32>
    %3 = tpu.matmul %1, %2, %cst {dimension_numbers = #tpu.dot_dimension_numbers<[1], [0], [0], [1], [0, 0, 1, 1], [], []>} : vector<1x128xbf16>, vector<128x2048xbf16>, vector<1x2048xf32> -> vector<1x2048xf32>
    %c0_4 = arith.constant 0 : index
    %c0_5 = arith.constant 0 : index
    %4 = vector.load %arg3[%c0_4, %c0_5] : memref<1x2048xf32, #tpu.memory_space<vmem>>, vector<1x2048xf32>
    %5 = arith.mulf %3, %4 : vector<1x2048xf32>
    %c0_6 = arith.constant 0 : index
    %c0_7 = arith.constant 0 : index
    %6 = vector.load %arg4[%c0_6, %c0_7] : memref<1x2048xf32, #tpu.memory_space<vmem>>, vector<1x2048xf32>
    %7 = arith.addf %5, %6 : vector<1x2048xf32>
    %8 = vector.extract_strided_slice %7 {offsets = [0, 0], sizes = [1, 128], strides = [1, 1]} : vector<1x2048xf32> to vector<1x128xf32>
    %9 = vector.extract_strided_slice %7 {offsets = [0, 128], sizes = [1, 128], strides = [1, 1]} : vector<1x2048xf32> to vector<1x128xf32>
    %10 = vector.extract_strided_slice %7 {offsets = [0, 256], sizes = [1, 128], strides = [1, 1]} : vector<1x2048xf32> to vector<1x128xf32>
    %11 = vector.extract_strided_slice %7 {offsets = [0, 384], sizes = [1, 128], strides = [1, 1]} : vector<1x2048xf32> to vector<1x128xf32>
    %12 = vector.extract_strided_slice %7 {offsets = [0, 512], sizes = [1, 128], strides = [1, 1]} : vector<1x2048xf32> to vector<1x128xf32>
    %13 = vector.extract_strided_slice %7 {offsets = [0, 640], sizes = [1, 128], strides = [1, 1]} : vector<1x2048xf32> to vector<1x128xf32>
    %14 = vector.extract_strided_slice %7 {offsets = [0, 768], sizes = [1, 128], strides = [1, 1]} : vector<1x2048xf32> to vector<1x128xf32>
    %15 = vector.extract_strided_slice %7 {offsets = [0, 896], sizes = [1, 128], strides = [1, 1]} : vector<1x2048xf32> to vector<1x128xf32>
    %16 = vector.extract_strided_slice %7 {offsets = [0, 1024], sizes = [1, 128], strides = [1, 1]} : vector<1x2048xf32> to vector<1x128xf32>
    %17 = vector.extract_strided_slice %7 {offsets = [0, 1152], sizes = [1, 128], strides = [1, 1]} : vector<1x2048xf32> to vector<1x128xf32>
    %18 = vector.extract_strided_slice %7 {offsets = [0, 1280], sizes = [1, 128], strides = [1, 1]} : vector<1x2048xf32> to vector<1x128xf32>
    %19 = vector.extract_strided_slice %7 {offsets = [0, 1408], sizes = [1, 128], strides = [1, 1]} : vector<1x2048xf32> to vector<1x128xf32>
    %20 = vector.extract_strided_slice %7 {offsets = [0, 1536], sizes = [1, 128], strides = [1, 1]} : vector<1x2048xf32> to vector<1x128xf32>
    %21 = vector.extract_strided_slice %7 {offsets = [0, 1664], sizes = [1, 128], strides = [1, 1]} : vector<1x2048xf32> to vector<1x128xf32>
    %22 = vector.extract_strided_slice %7 {offsets = [0, 1792], sizes = [1, 128], strides = [1, 1]} : vector<1x2048xf32> to vector<1x128xf32>
    %23 = vector.extract_strided_slice %7 {offsets = [0, 1920], sizes = [1, 128], strides = [1, 1]} : vector<1x2048xf32> to vector<1x128xf32>
    %24 = tpu.concatenate %8, %9, %10, %11, %12, %13, %14, %15, %16, %17, %18, %19, %20, %21, %22, %23 in 0 : vector<1x128xf32>, vector<1x128xf32>, vector<1x128xf32>, vector<1x128xf32>, vector<1x128xf32>, vector<1x128xf32>, vector<1x128xf32>, vector<1x128xf32>, vector<1x128xf32>, vector<1x128xf32>, vector<1x128xf32>, vector<1x128xf32>, vector<1x128xf32>, vector<1x128xf32>, vector<1x128xf32>, vector<1x128xf32> -> vector<16x128xf32>
    %25 = vector.shape_cast %24 : vector<16x128xf32> to vector<4x4x128xf32>
    %26 = arith.truncf %25 : vector<4x4x128xf32> to vector<4x4x128xbf16>
    %27 = vector.shape_cast %26 : vector<4x4x128xbf16> to vector<4x1x4x128xbf16>
    %28 = vector.shape_cast %27 : vector<4x1x4x128xbf16> to vector<4x1x4x128xbf16>
    %29 = vector.broadcast %28 : vector<4x1x4x128xbf16> to vector<4x2x4x128xbf16>
    %30 = vector.shape_cast %29 : vector<4x2x4x128xbf16> to vector<8x4x128xbf16>
    %31 = vector.shape_cast %30 : vector<8x4x128xbf16> to vector<8x4x1x128xbf16>
    %32 = vector.shape_cast %31 : vector<8x4x1x128xbf16> to vector<8x4x1x128xbf16>
    %33 = vector.broadcast %32 : vector<8x4x1x128xbf16> to vector<8x4x2x128xbf16>
    %34 = vector.shape_cast %33 : vector<8x4x2x128xbf16> to vector<8x8x128xbf16>
    %cst_8 = arith.constant 0.000000e+00 : bf16
    %35 = vector.broadcast %cst_8 : bf16 to vector<1x8x128xbf16>
    %36 = tpu.concatenate %35, %34, %35 in 0 : vector<1x8x128xbf16>, vector<8x8x128xbf16>, vector<1x8x128xbf16> -> vector<10x8x128xbf16>
    %cst_9 = arith.constant 0.000000e+00 : bf16
    %37 = vector.broadcast %cst_9 : bf16 to vector<10x1x128xbf16>
    %38 = tpu.concatenate %37, %36, %37 in 1 : vector<10x1x128xbf16>, vector<10x8x128xbf16>, vector<10x1x128xbf16> -> vector<10x10x128xbf16>
    %39 = vector.extract_strided_slice %38 {offsets = [0, 0, 0], sizes = [8, 8, 128], strides = [1, 1, 1]} : vector<10x10x128xbf16> to vector<8x8x128xbf16>
    %40 = vector.shape_cast %39 : vector<8x8x128xbf16> to vector<64x128xbf16>
    %41 = vector.extract_strided_slice %38 {offsets = [0, 1, 0], sizes = [8, 8, 128], strides = [1, 1, 1]} : vector<10x10x128xbf16> to vector<8x8x128xbf16>
    %42 = vector.shape_cast %41 : vector<8x8x128xbf16> to vector<64x128xbf16>
    %43 = vector.extract_strided_slice %38 {offsets = [0, 2, 0], sizes = [8, 8, 128], strides = [1, 1, 1]} : vector<10x10x128xbf16> to vector<8x8x128xbf16>
    %44 = vector.shape_cast %43 : vector<8x8x128xbf16> to vector<64x128xbf16>
    %45 = vector.extract_strided_slice %38 {offsets = [1, 0, 0], sizes = [8, 8, 128], strides = [1, 1, 1]} : vector<10x10x128xbf16> to vector<8x8x128xbf16>
    %46 = vector.shape_cast %45 : vector<8x8x128xbf16> to vector<64x128xbf16>
    %47 = vector.extract_strided_slice %38 {offsets = [1, 1, 0], sizes = [8, 8, 128], strides = [1, 1, 1]} : vector<10x10x128xbf16> to vector<8x8x128xbf16>
    %48 = vector.shape_cast %47 : vector<8x8x128xbf16> to vector<64x128xbf16>
    %49 = vector.extract_strided_slice %38 {offsets = [1, 2, 0], sizes = [8, 8, 128], strides = [1, 1, 1]} : vector<10x10x128xbf16> to vector<8x8x128xbf16>
    %50 = vector.shape_cast %49 : vector<8x8x128xbf16> to vector<64x128xbf16>
    %51 = vector.extract_strided_slice %38 {offsets = [2, 0, 0], sizes = [8, 8, 128], strides = [1, 1, 1]} : vector<10x10x128xbf16> to vector<8x8x128xbf16>
    %52 = vector.shape_cast %51 : vector<8x8x128xbf16> to vector<64x128xbf16>
    %53 = vector.extract_strided_slice %38 {offsets = [2, 1, 0], sizes = [8, 8, 128], strides = [1, 1, 1]} : vector<10x10x128xbf16> to vector<8x8x128xbf16>
    %54 = vector.shape_cast %53 : vector<8x8x128xbf16> to vector<64x128xbf16>
    %55 = vector.extract_strided_slice %38 {offsets = [2, 2, 0], sizes = [8, 8, 128], strides = [1, 1, 1]} : vector<10x10x128xbf16> to vector<8x8x128xbf16>
    %56 = vector.shape_cast %55 : vector<8x8x128xbf16> to vector<64x128xbf16>
    %57 = tpu.concatenate %40, %42, %44, %46, %48, %50, %52, %54, %56 in 1 : vector<64x128xbf16>, vector<64x128xbf16>, vector<64x128xbf16>, vector<64x128xbf16>, vector<64x128xbf16>, vector<64x128xbf16>, vector<64x128xbf16>, vector<64x128xbf16>, vector<64x128xbf16> -> vector<64x1152xbf16>
    %c0_10 = arith.constant 0 : index
    %c0_11 = arith.constant 0 : index
    %58 = vector.load %arg5[%c0_10, %c0_11] : memref<1152x64xbf16, #tpu.memory_space<vmem>>, vector<1152x64xbf16>
    %cst_12 = arith.constant dense<0.000000e+00> : vector<64x64xf32>
    %59 = tpu.matmul %57, %58, %cst_12 {dimension_numbers = #tpu.dot_dimension_numbers<[1], [0], [0], [1], [0, 0, 1, 1], [], []>} : vector<64x1152xbf16>, vector<1152x64xbf16>, vector<64x64xf32> -> vector<64x64xf32>
    %c0_13 = arith.constant 0 : index
    %c0_14 = arith.constant 0 : index
    %60 = vector.load %arg6[%c0_13, %c0_14] : memref<1x64xf32, #tpu.memory_space<vmem>>, vector<1x64xf32>
    %61 = vector.broadcast %60 : vector<1x64xf32> to vector<64x64xf32>
    %62 = arith.mulf %59, %61 : vector<64x64xf32>
    %c0_15 = arith.constant 0 : index
    %c0_16 = arith.constant 0 : index
    %63 = vector.load %arg7[%c0_15, %c0_16] : memref<1x64xf32, #tpu.memory_space<vmem>>, vector<1x64xf32>
    %64 = vector.broadcast %63 : vector<1x64xf32> to vector<64x64xf32>
    %65 = arith.addf %62, %64 : vector<64x64xf32>
    %cst_17 = arith.constant 0.000000e+00 : f32
    %66 = vector.broadcast %cst_17 : f32 to vector<64x64xf32>
    %67 = arith.maximumf %65, %66 : vector<64x64xf32>
    %68 = arith.truncf %67 : vector<64x64xf32> to vector<64x64xbf16>
    %69 = vector.shape_cast %68 : vector<64x64xbf16> to vector<8x8x64xbf16>
    %70 = vector.shape_cast %69 : vector<8x8x64xbf16> to vector<8x1x8x64xbf16>
    %71 = vector.shape_cast %70 : vector<8x1x8x64xbf16> to vector<8x1x8x64xbf16>
    %72 = vector.broadcast %71 : vector<8x1x8x64xbf16> to vector<8x2x8x64xbf16>
    %73 = vector.shape_cast %72 : vector<8x2x8x64xbf16> to vector<16x8x64xbf16>
    %74 = vector.shape_cast %73 : vector<16x8x64xbf16> to vector<16x8x1x64xbf16>
    %75 = vector.shape_cast %74 : vector<16x8x1x64xbf16> to vector<16x8x1x64xbf16>
    %76 = vector.broadcast %75 : vector<16x8x1x64xbf16> to vector<16x8x2x64xbf16>
    %77 = vector.shape_cast %76 : vector<16x8x2x64xbf16> to vector<16x16x64xbf16>
    %cst_18 = arith.constant 0.000000e+00 : bf16
    %78 = vector.broadcast %cst_18 : bf16 to vector<1x16x64xbf16>
    %79 = tpu.concatenate %78, %77, %78 in 0 : vector<1x16x64xbf16>, vector<16x16x64xbf16>, vector<1x16x64xbf16> -> vector<18x16x64xbf16>
    %cst_19 = arith.constant 0.000000e+00 : bf16
    %80 = vector.broadcast %cst_19 : bf16 to vector<18x1x64xbf16>
    %81 = tpu.concatenate %80, %79, %80 in 1 : vector<18x1x64xbf16>, vector<18x16x64xbf16>, vector<18x1x64xbf16> -> vector<18x18x64xbf16>
    %82 = vector.extract_strided_slice %81 {offsets = [0, 0, 0], sizes = [16, 16, 64], strides = [1, 1, 1]} : vector<18x18x64xbf16> to vector<16x16x64xbf16>
    %83 = vector.shape_cast %82 : vector<16x16x64xbf16> to vector<256x64xbf16>
    %84 = vector.extract_strided_slice %81 {offsets = [0, 1, 0], sizes = [16, 16, 64], strides = [1, 1, 1]} : vector<18x18x64xbf16> to vector<16x16x64xbf16>
    %85 = vector.shape_cast %84 : vector<16x16x64xbf16> to vector<256x64xbf16>
    %86 = vector.extract_strided_slice %81 {offsets = [0, 2, 0], sizes = [16, 16, 64], strides = [1, 1, 1]} : vector<18x18x64xbf16> to vector<16x16x64xbf16>
    %87 = vector.shape_cast %86 : vector<16x16x64xbf16> to vector<256x64xbf16>
    %88 = vector.extract_strided_slice %81 {offsets = [1, 0, 0], sizes = [16, 16, 64], strides = [1, 1, 1]} : vector<18x18x64xbf16> to vector<16x16x64xbf16>
    %89 = vector.shape_cast %88 : vector<16x16x64xbf16> to vector<256x64xbf16>
    %90 = vector.extract_strided_slice %81 {offsets = [1, 1, 0], sizes = [16, 16, 64], strides = [1, 1, 1]} : vector<18x18x64xbf16> to vector<16x16x64xbf16>
    %91 = vector.shape_cast %90 : vector<16x16x64xbf16> to vector<256x64xbf16>
    %92 = vector.extract_strided_slice %81 {offsets = [1, 2, 0], sizes = [16, 16, 64], strides = [1, 1, 1]} : vector<18x18x64xbf16> to vector<16x16x64xbf16>
    %93 = vector.shape_cast %92 : vector<16x16x64xbf16> to vector<256x64xbf16>
    %94 = vector.extract_strided_slice %81 {offsets = [2, 0, 0], sizes = [16, 16, 64], strides = [1, 1, 1]} : vector<18x18x64xbf16> to vector<16x16x64xbf16>
    %95 = vector.shape_cast %94 : vector<16x16x64xbf16> to vector<256x64xbf16>
    %96 = vector.extract_strided_slice %81 {offsets = [2, 1, 0], sizes = [16, 16, 64], strides = [1, 1, 1]} : vector<18x18x64xbf16> to vector<16x16x64xbf16>
    %97 = vector.shape_cast %96 : vector<16x16x64xbf16> to vector<256x64xbf16>
    %98 = vector.extract_strided_slice %81 {offsets = [2, 2, 0], sizes = [16, 16, 64], strides = [1, 1, 1]} : vector<18x18x64xbf16> to vector<16x16x64xbf16>
    %99 = vector.shape_cast %98 : vector<16x16x64xbf16> to vector<256x64xbf16>
    %100 = tpu.concatenate %83, %85, %87, %89, %91, %93, %95, %97, %99 in 1 : vector<256x64xbf16>, vector<256x64xbf16>, vector<256x64xbf16>, vector<256x64xbf16>, vector<256x64xbf16>, vector<256x64xbf16>, vector<256x64xbf16>, vector<256x64xbf16>, vector<256x64xbf16> -> vector<256x576xbf16>
    %c0_20 = arith.constant 0 : index
    %c0_21 = arith.constant 0 : index
    %101 = vector.load %arg8[%c0_20, %c0_21] : memref<576x32xbf16, #tpu.memory_space<vmem>>, vector<576x32xbf16>
    %cst_22 = arith.constant dense<0.000000e+00> : vector<256x32xf32>
    %102 = tpu.matmul %100, %101, %cst_22 {dimension_numbers = #tpu.dot_dimension_numbers<[1], [0], [0], [1], [0, 0, 1, 1], [], []>} : vector<256x576xbf16>, vector<576x32xbf16>, vector<256x32xf32> -> vector<256x32xf32>
    %c0_23 = arith.constant 0 : index
    %c0_24 = arith.constant 0 : index
    %103 = vector.load %arg9[%c0_23, %c0_24] : memref<1x32xf32, #tpu.memory_space<vmem>>, vector<1x32xf32>
    %104 = vector.broadcast %103 : vector<1x32xf32> to vector<256x32xf32>
    %105 = arith.mulf %102, %104 : vector<256x32xf32>
    %c0_25 = arith.constant 0 : index
    %c0_26 = arith.constant 0 : index
    %106 = vector.load %arg10[%c0_25, %c0_26] : memref<1x32xf32, #tpu.memory_space<vmem>>, vector<1x32xf32>
    %107 = vector.broadcast %106 : vector<1x32xf32> to vector<256x32xf32>
    %108 = arith.addf %105, %107 : vector<256x32xf32>
    %cst_27 = arith.constant 0.000000e+00 : f32
    %109 = vector.broadcast %cst_27 : f32 to vector<256x32xf32>
    %110 = arith.maximumf %108, %109 : vector<256x32xf32>
    %111 = arith.truncf %110 : vector<256x32xf32> to vector<256x32xbf16>
    %112 = vector.shape_cast %111 : vector<256x32xbf16> to vector<16x16x32xbf16>
    %113 = vector.shape_cast %112 : vector<16x16x32xbf16> to vector<16x1x16x32xbf16>
    %114 = vector.shape_cast %113 : vector<16x1x16x32xbf16> to vector<16x1x16x32xbf16>
    %115 = vector.broadcast %114 : vector<16x1x16x32xbf16> to vector<16x2x16x32xbf16>
    %116 = vector.shape_cast %115 : vector<16x2x16x32xbf16> to vector<32x16x32xbf16>
    %117 = vector.shape_cast %116 : vector<32x16x32xbf16> to vector<32x16x1x32xbf16>
    %118 = vector.shape_cast %117 : vector<32x16x1x32xbf16> to vector<32x16x1x32xbf16>
    %119 = vector.broadcast %118 : vector<32x16x1x32xbf16> to vector<32x16x2x32xbf16>
    %120 = vector.shape_cast %119 : vector<32x16x2x32xbf16> to vector<32x32x32xbf16>
    %cst_28 = arith.constant 0.000000e+00 : bf16
    %121 = vector.broadcast %cst_28 : bf16 to vector<1x32x32xbf16>
    %122 = tpu.concatenate %121, %120, %121 in 0 : vector<1x32x32xbf16>, vector<32x32x32xbf16>, vector<1x32x32xbf16> -> vector<34x32x32xbf16>
    %cst_29 = arith.constant 0.000000e+00 : bf16
    %123 = vector.broadcast %cst_29 : bf16 to vector<34x1x32xbf16>
    %124 = tpu.concatenate %123, %122, %123 in 1 : vector<34x1x32xbf16>, vector<34x32x32xbf16>, vector<34x1x32xbf16> -> vector<34x34x32xbf16>
    %125 = vector.extract_strided_slice %124 {offsets = [0, 0, 0], sizes = [32, 32, 32], strides = [1, 1, 1]} : vector<34x34x32xbf16> to vector<32x32x32xbf16>
    %126 = vector.shape_cast %125 : vector<32x32x32xbf16> to vector<1024x32xbf16>
    %127 = vector.extract_strided_slice %124 {offsets = [0, 1, 0], sizes = [32, 32, 32], strides = [1, 1, 1]} : vector<34x34x32xbf16> to vector<32x32x32xbf16>
    %128 = vector.shape_cast %127 : vector<32x32x32xbf16> to vector<1024x32xbf16>
    %129 = vector.extract_strided_slice %124 {offsets = [0, 2, 0], sizes = [32, 32, 32], strides = [1, 1, 1]} : vector<34x34x32xbf16> to vector<32x32x32xbf16>
    %130 = vector.shape_cast %129 : vector<32x32x32xbf16> to vector<1024x32xbf16>
    %131 = vector.extract_strided_slice %124 {offsets = [1, 0, 0], sizes = [32, 32, 32], strides = [1, 1, 1]} : vector<34x34x32xbf16> to vector<32x32x32xbf16>
    %132 = vector.shape_cast %131 : vector<32x32x32xbf16> to vector<1024x32xbf16>
    %133 = vector.extract_strided_slice %124 {offsets = [1, 1, 0], sizes = [32, 32, 32], strides = [1, 1, 1]} : vector<34x34x32xbf16> to vector<32x32x32xbf16>
    %134 = vector.shape_cast %133 : vector<32x32x32xbf16> to vector<1024x32xbf16>
    %135 = vector.extract_strided_slice %124 {offsets = [1, 2, 0], sizes = [32, 32, 32], strides = [1, 1, 1]} : vector<34x34x32xbf16> to vector<32x32x32xbf16>
    %136 = vector.shape_cast %135 : vector<32x32x32xbf16> to vector<1024x32xbf16>
    %137 = vector.extract_strided_slice %124 {offsets = [2, 0, 0], sizes = [32, 32, 32], strides = [1, 1, 1]} : vector<34x34x32xbf16> to vector<32x32x32xbf16>
    %138 = vector.shape_cast %137 : vector<32x32x32xbf16> to vector<1024x32xbf16>
    %139 = vector.extract_strided_slice %124 {offsets = [2, 1, 0], sizes = [32, 32, 32], strides = [1, 1, 1]} : vector<34x34x32xbf16> to vector<32x32x32xbf16>
    %140 = vector.shape_cast %139 : vector<32x32x32xbf16> to vector<1024x32xbf16>
    %141 = vector.extract_strided_slice %124 {offsets = [2, 2, 0], sizes = [32, 32, 32], strides = [1, 1, 1]} : vector<34x34x32xbf16> to vector<32x32x32xbf16>
    %142 = vector.shape_cast %141 : vector<32x32x32xbf16> to vector<1024x32xbf16>
    %143 = tpu.concatenate %126, %128, %130, %132, %134, %136, %138, %140, %142 in 1 : vector<1024x32xbf16>, vector<1024x32xbf16>, vector<1024x32xbf16>, vector<1024x32xbf16>, vector<1024x32xbf16>, vector<1024x32xbf16>, vector<1024x32xbf16>, vector<1024x32xbf16>, vector<1024x32xbf16> -> vector<1024x288xbf16>
    %c0_30 = arith.constant 0 : index
    %c0_31 = arith.constant 0 : index
    %144 = vector.load %arg11[%c0_30, %c0_31] : memref<288x3xbf16, #tpu.memory_space<vmem>>, vector<288x3xbf16>
    %cst_32 = arith.constant dense<0.000000e+00> : vector<1024x3xf32>
    %145 = tpu.matmul %143, %144, %cst_32 {dimension_numbers = #tpu.dot_dimension_numbers<[1], [0], [0], [1], [0, 0, 1, 1], [], []>} : vector<1024x288xbf16>, vector<288x3xbf16>, vector<1024x3xf32> -> vector<1024x3xf32>
    %c0_33 = arith.constant 0 : index
    %c0_34 = arith.constant 0 : index
    %146 = vector.load %arg12[%c0_33, %c0_34] : memref<1x3xf32, #tpu.memory_space<vmem>>, vector<1x3xf32>
    %147 = vector.broadcast %146 : vector<1x3xf32> to vector<1024x3xf32>
    %148 = arith.mulf %145, %147 : vector<1024x3xf32>
    %c0_35 = arith.constant 0 : index
    %c0_36 = arith.constant 0 : index
    %149 = vector.load %arg13[%c0_35, %c0_36] : memref<1x3xf32, #tpu.memory_space<vmem>>, vector<1x3xf32>
    %150 = vector.broadcast %149 : vector<1x3xf32> to vector<1024x3xf32>
    %151 = arith.addf %148, %150 : vector<1024x3xf32>
    %152 = math.tanh %151 : vector<1024x3xf32>
    %153 = vector.shape_cast %152 : vector<1024x3xf32> to vector<1x32x32x3xf32>
    %c0_37 = arith.constant 0 : index
    %c0_38 = arith.constant 0 : index
    %c0_39 = arith.constant 0 : index
    %c0_40 = arith.constant 0 : index
    %154 = vector.load %arg14[%c0_37, %c0_38, %c0_39, %c0_40] : memref<1x32x32x3xf32, #tpu.memory_space<vmem>>, vector<1x32x32x3xf32>
    tpu.vector_store %arg14[%c0_37, %c0_38, %c0_39, %c0_40], %153 {strides = array<i32>} : memref<1x32x32x3xf32, #tpu.memory_space<vmem>>, vector<1x32x32x3xf32>,
    return
  }
  func.func @transform_0(%arg0: i32) -> (i32, i32, i32) {
    %c0_i32 = arith.constant 0 : i32
    %c0_i32_0 = arith.constant 0 : i32
    %c0_i32_1 = arith.constant 0 : i32
    return %arg0, %c0_i32, %c0_i32_0 : i32, i32, i32
  }
  func.func @transform_1(%arg0: i32) -> (i32, i32) {
    %c0_i32 = arith.constant 0 : i32
    %c0_i32_0 = arith.constant 0 : i32
    %c0_i32_1 = arith.constant 0 : i32
    return %c0_i32, %c0_i32_0 : i32, i32
  }
  func.func @transform_2(%arg0: i32) -> (i32, i32) {
    %c0_i32 = arith.constant 0 : i32
    %c0_i32_0 = arith.constant 0 : i32
    %c0_i32_1 = arith.constant 0 : i32
    return %c0_i32, %c0_i32_0 : i32, i32
  }
  func.func @transform_3(%arg0: i32) -> (i32, i32) {
    %c0_i32 = arith.constant 0 : i32
    %c0_i32_0 = arith.constant 0 : i32
    %c0_i32_1 = arith.constant 0 : i32
    return %c0_i32, %c0_i32_0 : i32, i32
  }
  func.func @transform_4(%arg0: i32) -> (i32, i32) {
    %c0_i32 = arith.constant 0 : i32
    %c0_i32_0 = arith.constant 0 : i32
    %c0_i32_1 = arith.constant 0 : i32
    return %c0_i32, %c0_i32_0 : i32, i32
  }
  func.func @transform_5(%arg0: i32) -> (i32, i32) {
    %c0_i32 = arith.constant 0 : i32
    %c0_i32_0 = arith.constant 0 : i32
    %c0_i32_1 = arith.constant 0 : i32
    return %c0_i32, %c0_i32_0 : i32, i32
  }
  func.func @transform_6(%arg0: i32) -> (i32, i32) {
    %c0_i32 = arith.constant 0 : i32
    %c0_i32_0 = arith.constant 0 : i32
    %c0_i32_1 = arith.constant 0 : i32
    return %c0_i32, %c0_i32_0 : i32, i32
  }
  func.func @transform_7(%arg0: i32) -> (i32, i32) {
    %c0_i32 = arith.constant 0 : i32
    %c0_i32_0 = arith.constant 0 : i32
    %c0_i32_1 = arith.constant 0 : i32
    return %c0_i32, %c0_i32_0 : i32, i32
  }
  func.func @transform_8(%arg0: i32) -> (i32, i32) {
    %c0_i32 = arith.constant 0 : i32
    %c0_i32_0 = arith.constant 0 : i32
    %c0_i32_1 = arith.constant 0 : i32
    return %c0_i32, %c0_i32_0 : i32, i32
  }
  func.func @transform_9(%arg0: i32) -> (i32, i32) {
    %c0_i32 = arith.constant 0 : i32
    %c0_i32_0 = arith.constant 0 : i32
    %c0_i32_1 = arith.constant 0 : i32
    return %c0_i32, %c0_i32_0 : i32, i32
  }
  func.func @transform_10(%arg0: i32) -> (i32, i32) {
    %c0_i32 = arith.constant 0 : i32
    %c0_i32_0 = arith.constant 0 : i32
    %c0_i32_1 = arith.constant 0 : i32
    return %c0_i32, %c0_i32_0 : i32, i32
  }
  func.func @transform_11(%arg0: i32) -> (i32, i32) {
    %c0_i32 = arith.constant 0 : i32
    %c0_i32_0 = arith.constant 0 : i32
    %c0_i32_1 = arith.constant 0 : i32
    return %c0_i32, %c0_i32_0 : i32, i32
  }
  func.func @transform_12(%arg0: i32) -> (i32, i32) {
    %c0_i32 = arith.constant 0 : i32
    %c0_i32_0 = arith.constant 0 : i32
    %c0_i32_1 = arith.constant 0 : i32
    return %c0_i32, %c0_i32_0 : i32, i32
  }
  func.func @transform_13(%arg0: i32) -> (i32, i32, i32, i32) {
    %c0_i32 = arith.constant 0 : i32
    %c0_i32_0 = arith.constant 0 : i32
    %c0_i32_1 = arith.constant 0 : i32
    %c0_i32_2 = arith.constant 0 : i32
    return %arg0, %c0_i32, %c0_i32_0, %c0_i32_1 : i32, i32, i32, i32
  }
}

</mosaic_0001>

<bundles_post_ra>
// kernel: generator_forward.1
= control target key start
LH: loop header
LB: loop body
LE: loop exit
PB: predicated region body
PF: predicated region fallthrough
CT: control target
= control target key end

     0   :  { %s17678_s25 = smov 0   ;;  %s25553_s0 = inlined_call_operand.vmem [shape: bf16[2,1,128], index: 0, kind: input, shape index: {}]   ;;  %s25554_s1 = inlined_call_operand.vmem [shape: bf16[128,2048], index: 1, kind: input, shape index: {}]   ;;  %s25555_s2 = inlined_call_operand.vmem [shape: f32[1,2048], index: 2, kind: input, shape index: {}]   ;;  %s25556_s3 = inlined_call_operand.vmem [shape: f32[1,2048], index: 3, kind: input, shape index: {}]   ;;  %s25557_s4 = inlined_call_operand.vmem [shape: bf16[1152,64], index: 4, kind: input, shape index: {}]   ;;  %s25558_s5 = inlined_call_operand.vmem [shape: f32[1,64], index: 5, kind: input, shape index: {}]   ;;  %s25559_s6 = inlined_call_operand.vmem [shape: f32[1,64], index: 6, kind: input, shape index: {}]   ;;  %s25560_s7 = inlined_call_operand.vmem [shape: bf16[576,32], index: 7, kind: input, shape index: {}]   ;;  %s25561_s8 = inlined_call_operand.vmem [shape: f32[1,32], index: 8, kind: input, shape index: {}]   ;;  %s25562_s9 = inlined_call_operand.vmem [shape: f32[1,32], index: 9, kind: input, shape index: {}]   ;;  %s25563_s10 = inlined_call_operand.vmem [shape: bf16[288,3], index: 10, kind: input, shape index: {}]   ;;  %s25564_s11 = inlined_call_operand.vmem [shape: f32[1,3], index: 11, kind: input, shape index: {}]   ;;  %s25565_s12 = inlined_call_operand.vmem [shape: f32[1,3], index: 12, kind: input, shape index: {}]   ;;  %s25566_s13 = inlined_call_operand.vmem [shape: f32[2,32,32,3], index: 13, kind: output, shape index: {}]  }
   0x1 LB: > { %s15887_s26 = sadd.s32 4294967295, %s17601_s25   ;;  %p15891_p0 = scmp.ge.s32.totalorder %s17601_s25, 1  ;;  %s17601_s25 = sphi %s17678_s25, %s23_s25  }
   0x2   : > { %p385_p1 = scmp.lt.s32.totalorder %s17601_s25, 3 }
   0x4   : > { %p386_p2 = pnand %p15891_p0, %p385_p1 }
   0x6   : > { %389 = sbr.rel (%p386_p2) target bundleno = 2383 (0x94f), region = 72 }
   0xb   : > { %v549_v0 = vld [vmem:[%s25554_s1 + $0x380] sm:$0xff]  ;;  %v550_v2 = vld [vmem:[%s25554_s1 + $0x388] sm:$0xff]  ;;  %v25567_v8 = vmov 0   ;;  %p427_p3 = scmp.lt.s32.totalorder %s15887_s26, 1  ;;  %v551_v63 = vld [vmem:[%s25554_s1 + $0x390] sm:$0xff]  ;;  %vm1775_vm0 = vcmask 1040384  }
   0xc   : > { %v557_v1 = vld [vmem:[%s25554_s1 + $0x3c0] sm:$0xff]  ;;  %v558_v4 = vld [vmem:[%s25554_s1 + $0x3c8] sm:$0xff]  ;;  %1237 = vmatprep.mubr.bf16.mxu0 %v25567_v8  ;;  %1278 = vmatprep.mubr.bf16.mxu1 %v25567_v8  ;;  %vm1777_vm1 = vcmask 1041408   ;;  %vm1779_vm2 = vcmask 1042432   ;;  %vm1781_vm3 = vcmask 1043456   ;;  %vm1783_vm4 = vcmask 1044480  }
   0xd   : > { %v16007_v3 = vcombine.high %v549_v0, %v557_v1  ;;  %v16006_v5 = vcombine.low %v549_v0, %v557_v1  ;;  %v533_v6 = vld [vmem:[%s25554_s1 + $0x300] sm:$0xff]  ;;  %v16009_v9 = vcombine.high %v550_v2, %v558_v4  ;;  %v16008_v10 = vcombine.low %v550_v2, %v558_v4  ;;  %v534_v12 = vld [vmem:[%s25554_s1 + $0x308] sm:$0xff]  ;;  %s26546_s26 = smov (!%p427_p3, %s15887_s26), 1  ;;  %v559_v0 = vld [vmem:[%s25554_s1 + $0x3d0] sm:$0xff]  ;;  %s17605_s29 = smov 64  }
   0xe   : > { %v541_v7 = vld [vmem:[%s25554_s1 + $0x340] sm:$0xff]  ;;  %v542_v13 = vld [vmem:[%s25554_s1 + $0x348] sm:$0xff]  ;;  %v552_v1 = vld [vmem:[%s25554_s1 + $0x398] sm:$0xff]  ;;  %s17806_s24 = scalar_lea.vmem %s25553_s0, %s26546_s26  ;;  %vm1785_vm5 = vcmask 1045504   ;;  %vm1787_vm6 = vcmask 1046528   ;;  %vm2373_vm11 = vcmask 1046532  }
   0xf   : > { %v15991_v11 = vcombine.high %v533_v6, %v541_v7  ;;  %v517_v14 = vld [vmem:[%s25554_s1 + $0x280] sm:$0xff]  ;;  %1205 = vmatprep.subr.bf16.mxu0 %v16007_v3  ;;  %v15993_v15 = vcombine.high %v534_v12, %v542_v13  ;;  %v518_v17 = vld [vmem:[%s25554_s1 + $0x288] sm:$0xff]  ;;  %1246 = vmatprep.subr.bf16.mxu1 %v16009_v9  ;;  %v15990_v19 = vcombine.low %v533_v6, %v541_v7  ;;  %v560_v2 = vld [vmem:[%s25554_s1 + $0x3d8] sm:$0xff]  ;;  %vm2259_vm7 = vsmask.f32 256  ;;  %s17606_s27 = smov 32  }
  0x10   : > { %v525_v16 = vld [vmem:[%s25554_s1 + $0x2c0] sm:$0xff]  ;;  %v526_v18 = vld [vmem:[%s25554_s1 + $0x2c8] sm:$0xff]  ;;  %1206 = vmatpush1.bf16.msra.mxu0 %v16006_v5  ;;  %1247 = vmatpush1.bf16.msra.mxu1 %v16008_v10  ;;  %v15992_v20 = vcombine.low %v534_v12, %v542_v13  ;;  %v16011_v5 = vcombine.high %v551_v63, %v559_v0  ;;  %v16013_v6 = vcombine.high %v552_v1, %v560_v2  ;;  %v535_v7 = vld [vmem:[%s25554_s1 + $0x310] sm:$0xff]  ;;  %vm2267_vm8 = vsmask.f32 4352  ;;  %s17607_s16 = smov 96  }
  0x11   : > { %1207 = vmatprep.subr.bf16.mxu0 %v15991_v11  ;;  %v15975_v21 = vcombine.high %v517_v14, %v525_v16  ;;  %1248 = vmatprep.subr.bf16.mxu1 %v15993_v15  ;;  %v15977_v22 = vcombine.high %v518_v17, %v526_v18  ;;  %v501_v23 = vld [vmem:[%s25554_s1 + $0x200] sm:$0xff]  ;;  %v502_v25 = vld [vmem:[%s25554_s1 + $0x208] sm:$0xff]  ;;  %v15974_v27 = vcombine.low %v517_v14, %v525_v16  ;;  %v543_v9 = vld [vmem:[%s25554_s1 + $0x350] sm:$0xff]  ;;  %vm2299_vm13 = vsmask.f32 3328 }
  0x12   : > { %v509_v24 = vld [vmem:[%s25554_s1 + $0x240] sm:$0xff]  ;;  %v510_v26 = vld [vmem:[%s25554_s1 + $0x248] sm:$0xff]  ;;  %v15976_v28 = vcombine.low %v518_v17, %v526_v18  ;;  %v536_v10 = vld [vmem:[%s25554_s1 + $0x318] sm:$0xff]  ;;  %v16010_v13 = vcombine.low %v551_v63, %v559_v0  ;;  %v16012_v14 = vcombine.low %v552_v1, %v560_v2  ;;  %v15995_v15 = vcombine.high %v535_v7, %v543_v9 }
  0x13   : > { %v15959_v29 = vcombine.high %v501_v23, %v509_v24  ;;  %v15961_v30 = vcombine.high %v502_v25, %v510_v26  ;;  %v485_v31 = vld [vmem:[%s25554_s1 + $0x180] sm:$0xff]  ;;  %v486_v33 = vld [vmem:[%s25554_s1 + $0x188] sm:$0xff]  ;;  %v15958_v35 = vcombine.low %v501_v23, %v509_v24  ;;  %v15960_v36 = vcombine.low %v502_v25, %v510_v26  ;;  %v544_v11 = vld [vmem:[%s25554_s1 + $0x358] sm:$0xff] }
  0x14   : > { %1208 = vmatpush1.bf16.msra.mxu0 %v15990_v19  ;;  %1249 = vmatpush1.bf16.msra.mxu1 %v15992_v20  ;;  %v493_v32 = vld [vmem:[%s25554_s1 + $0x1c0] sm:$0xff]  ;;  %v494_v34 = vld [vmem:[%s25554_s1 + $0x1c8] sm:$0xff]  ;;  %v15997_v16 = vcombine.high %v536_v10, %v544_v11  ;;  %v519_v17 = vld [vmem:[%s25554_s1 + $0x290] sm:$0xff]  ;;  %vm2300_vm14 = vsmask.f32 7440 }
  0x15   : > { %1209 = vmatprep.subr.bf16.mxu0 %v15975_v21  ;;  %1250 = vmatprep.subr.bf16.mxu1 %v15977_v22  ;;  %v15943_v37 = vcombine.high %v485_v31, %v493_v32  ;;  %v15945_v38 = vcombine.high %v486_v33, %v494_v34  ;;  %v469_v39 = vld [vmem:[%s25554_s1 + $0x100] sm:$0xff]  ;;  %v470_v41 = vld [vmem:[%s25554_s1 + $0x108] sm:$0xff]  ;;  %v15942_v43 = vcombine.low %v485_v31, %v493_v32  ;;  %v527_v18 = vld [vmem:[%s25554_s1 + $0x2d0] sm:$0xff] }
  0x16   : > { %v477_v40 = vld [vmem:[%s25554_s1 + $0x140] sm:$0xff]  ;;  %v478_v42 = vld [vmem:[%s25554_s1 + $0x148] sm:$0xff]  ;;  %v15944_v44 = vcombine.low %v486_v33, %v494_v34  ;;  %v520_v19 = vld [vmem:[%s25554_s1 + $0x298] sm:$0xff]  ;;  %v15994_v21 = vcombine.low %v535_v7, %v543_v9  ;;  %v15996_v22 = vcombine.low %v536_v10, %v544_v11  ;;  %v15979_v23 = vcombine.high %v519_v17, %v527_v18 }
  0x17   : > { %v15927_v45 = vcombine.high %v469_v39, %v477_v40  ;;  %v15929_v46 = vcombine.high %v470_v41, %v478_v42  ;;  %v453_v47 = vld [vmem:[%s25554_s1 + $0x80] sm:$0xff]  ;;  %v454_v49 = vld [vmem:[%s25554_s1 + $0x88] sm:$0xff]  ;;  %v15926_v51 = vcombine.low %v469_v39, %v477_v40  ;;  %v15928_v52 = vcombine.low %v470_v41, %v478_v42  ;;  %v528_v20 = vld [vmem:[%s25554_s1 + $0x2d8] sm:$0xff] }
  0x18   : > { %1210 = vmatpush1.bf16.msra.mxu0 %v15974_v27  ;;  %1251 = vmatpush1.bf16.msra.mxu1 %v15976_v28  ;;  %v461_v48 = vld [vmem:[%s25554_s1 + $0xc0] sm:$0xff]  ;;  %v462_v50 = vld [vmem:[%s25554_s1 + $0xc8] sm:$0xff]  ;;  %v15981_v24 = vcombine.high %v520_v19, %v528_v20  ;;  %v503_v25 = vld [vmem:[%s25554_s1 + $0x210] sm:$0xff] }
  0x19   : > { %1211 = vmatprep.subr.bf16.mxu0 %v15959_v29  ;;  %1252 = vmatprep.subr.bf16.mxu1 %v15961_v30  ;;  %v15911_v53 = vcombine.high %v453_v47, %v461_v48  ;;  %v15913_v54 = vcombine.high %v454_v49, %v462_v50  ;;  %v437_v55 = vld [vmem:[%s25554_s1] sm:$0xff]  ;;  %v438_v57 = vld [vmem:[%s25554_s1 + $0x8] sm:$0xff]  ;;  %v15910_v59 = vcombine.low %v453_v47, %v461_v48  ;;  %v511_v26 = vld [vmem:[%s25554_s1 + $0x250] sm:$0xff] }
  0x1a   : > { %v445_v56 = vld [vmem:[%s25554_s1 + $0x40] sm:$0xff]  ;;  %v446_v58 = vld [vmem:[%s25554_s1 + $0x48] sm:$0xff]  ;;  %v15912_v60 = vcombine.low %v454_v49, %v462_v50  ;;  %v504_v27 = vld [vmem:[%s25554_s1 + $0x218] sm:$0xff]  ;;  %v15978_v29 = vcombine.low %v519_v17, %v527_v18  ;;  %v15980_v30 = vcombine.low %v520_v19, %v528_v20  ;;  %v15963_v31 = vcombine.high %v503_v25, %v511_v26 }
  0x1b   : > { %v15895_v61 = vcombine.high %v437_v55, %v445_v56  ;;  %v15897_v62 = vcombine.high %v438_v57, %v446_v58  ;;  %v15894_v3 = vcombine.low %v437_v55, %v445_v56  ;;  %v15896_v4 = vcombine.low %v438_v57, %v446_v58  ;;  %v17821_v12 = vld [vmem:[%s17806_s24] sm:$0x1]  ;;  %v512_v28 = vld [vmem:[%s25554_s1 + $0x258] sm:$0xff]  ;;  %v487_v32 = vld [vmem:[%s25554_s1 + $0x190] sm:$0xff] }
  0x1c   : > { %1212 = vmatpush1.bf16.msra.mxu0 %v15958_v35  ;;  %1253 = vmatpush1.bf16.msra.mxu1 %v15960_v36  ;;  %v15965_v33 = vcombine.high %v504_v27, %v512_v28  ;;  %v495_v34 = vld [vmem:[%s25554_s1 + $0x1d0] sm:$0xff]  ;;  %v488_v35 = vld [vmem:[%s25554_s1 + $0x198] sm:$0xff]  ;;  %v15964_v40 = vcombine.low %v504_v27, %v512_v28  ;;  %v561_v63 = vld [vmem:[%s25554_s1 + $0x3e0] sm:$0xff] }
  0x1d   : > { %1213 = vmatprep.subr.bf16.mxu0 %v15943_v37  ;;  %1254 = vmatprep.subr.bf16.mxu1 %v15945_v38  ;;  %v496_v36 = vld [vmem:[%s25554_s1 + $0x1d8] sm:$0xff]  ;;  %v15962_v37 = vcombine.low %v503_v25, %v511_v26  ;;  %v471_v38 = vld [vmem:[%s25554_s1 + $0x110] sm:$0xff]  ;;  %v15947_v41 = vcombine.high %v487_v32, %v495_v34  ;;  %v554_v2 = vld [vmem:[%s25554_s1 + $0x3a8] sm:$0xff] }
  0x1e   : > { %v479_v39 = vld [vmem:[%s25554_s1 + $0x150] sm:$0xff]  ;;  %v472_v42 = vld [vmem:[%s25554_s1 + $0x118] sm:$0xff]  ;;  %v15948_v48 = vcombine.low %v488_v35, %v496_v36  ;;  %v545_v7 = vld [vmem:[%s25554_s1 + $0x360] sm:$0xff] }
  0x1f   : > { %v463_v47 = vld [vmem:[%s25554_s1 + $0xd0] sm:$0xff]  ;;  %v15931_v49 = vcombine.high %v471_v38, %v479_v39  ;;  %v456_v50 = vld [vmem:[%s25554_s1 + $0x98] sm:$0xff]  ;;  %v538_v11 = vld [vmem:[%s25554_s1 + $0x328] sm:$0xff] }
  0x20   : > { %1214 = vmatpush1.bf16.msra.mxu0 %v15942_v43  ;;  %1255 = vmatpush1.bf16.msra.mxu1 %v15944_v44  ;;  %v480_v43 = vld [vmem:[%s25554_s1 + $0x158] sm:$0xff]  ;;  %v15949_v44 = vcombine.high %v488_v35, %v496_v36  ;;  %v447_v55 = vld [vmem:[%s25554_s1 + $0x50] sm:$0xff]  ;;  %v529_v17 = vld [vmem:[%s25554_s1 + $0x2e0] sm:$0xff] }
  0x21   : > { %1215 = vmatprep.subr.bf16.mxu0 %v15927_v45  ;;  %1256 = vmatprep.subr.bf16.mxu1 %v15929_v46  ;;  %v15946_v45 = vcombine.low %v487_v32, %v495_v34  ;;  %v455_v46 = vld [vmem:[%s25554_s1 + $0x90] sm:$0xff]  ;;  %v15932_v56 = vcombine.low %v472_v42, %v480_v43  ;;  %v440_v58 = vld [vmem:[%s25554_s1 + $0x18] sm:$0xff]  ;;  %v522_v20 = vld [vmem:[%s25554_s1 + $0x2a8] sm:$0xff] }
  0x22   : > { %v15915_v57 = vcombine.high %v455_v46, %v463_v47  ;;  %v513_v25 = vld [vmem:[%s25554_s1 + $0x260] sm:$0xff]  ;;  %v506_v28 = vld [vmem:[%s25554_s1 + $0x228] sm:$0xff]  ;;  %vm18272_vm9 = vmand %vm1775_vm0, %vm2259_vm7 }
  0x23   : > { %v489_v32 = vld [vmem:[%s25554_s1 + $0x1a0] sm:$0xff]  ;;  %v490_v36 = vld [vmem:[%s25554_s1 + $0x1a8] sm:$0xff]  ;;  %vm18289_vm10 = vmand %vm1783_vm4, %vm2267_vm8 }
  0x24   : > { %1216 = vmatpush1.bf16.msra.mxu0 %v15926_v51  ;;  %1257 = vmatpush1.bf16.msra.mxu1 %v15928_v52  ;;  %v464_v51 = vld [vmem:[%s25554_s1 + $0xd8] sm:$0xff]  ;;  %v15933_v52 = vcombine.high %v472_v42, %v480_v43  ;;  %vm18349_vm12 = vmor %vm1779_vm2, %vm2373_vm11 }
  0x25   : > { %1217 = vmatprep.subr.bf16.mxu0 %v15911_v53  ;;  %1258 = vmatprep.subr.bf16.mxu1 %v15913_v54  ;;  %v15930_v53 = vcombine.low %v471_v38, %v479_v39  ;;  %v439_v54 = vld [vmem:[%s25554_s1 + $0x10] sm:$0xff]  ;;  %v15916_v0 = vcombine.low %v456_v50, %v464_v51  ;;  %vm18390_vm15 = vmor %vm2299_vm13, %vm2300_vm14 }
  0x26   : > { %v15899_v1 = vcombine.high %v439_v54, %v447_v55 }
  0x28   : > { %1218 = vmatpush1.bf16.msra.mxu0 %v15910_v59  ;;  %1259 = vmatpush1.bf16.msra.mxu1 %v15912_v60  ;;  %v448_v59 = vld [vmem:[%s25554_s1 + $0x58] sm:$0xff]  ;;  %v15917_v60 = vcombine.high %v456_v50, %v464_v51 }
  0x29   : > { %1219 = vmatprep.subr.bf16.mxu0 %v15895_v61  ;;  %1260 = vmatprep.subr.bf16.mxu1 %v15897_v62  ;;  %v15914_v61 = vcombine.low %v455_v46, %v463_v47  ;;  %v553_v62 = vld [vmem:[%s25554_s1 + $0x3a0] sm:$0xff]  ;;  %v15900_v9 = vcombine.low %v440_v58, %v448_v59 }
  0x2a   : > { %v16015_v10 = vcombine.high %v553_v62, %v561_v63 }
  0x2c   : > { %1220 = vmatpush1.bf16.msra.mxu0 %v15894_v3  ;;  %1261 = vmatpush1.bf16.msra.mxu1 %v15896_v4  ;;  %v562_v3 = vld [vmem:[%s25554_s1 + $0x3e8] sm:$0xff]  ;;  %v15901_v4 = vcombine.high %v440_v58, %v448_v59 }
  0x2d   : > { %1287 = vmatprep.subr.bf16.mxu0 %v16011_v5  ;;  %1328 = vmatprep.subr.bf16.mxu1 %v16013_v6  ;;  %v15898_v5 = vcombine.low %v439_v54, %v447_v55  ;;  %v537_v6 = vld [vmem:[%s25554_s1 + $0x320] sm:$0xff]  ;;  %v16016_v18 = vcombine.low %v554_v2, %v562_v3 }
  0x2e   : > { %v15999_v19 = vcombine.high %v537_v6, %v545_v7 }
  0x2f   : > { %1238 = vmatmul.mubr.bf16.vlgmr.msra.gmra.mxu0 %v17821_v12  ;;  %1279 = vmatmul.mubr.bf16.vlgmr.msra.gmra.mxu1 %v17821_v12 }
  0x30   : > { %1288 = vmatpush1.bf16.msra.mxu0 %v16010_v13  ;;  %1329 = vmatpush1.bf16.msra.mxu1 %v16012_v14  ;;  %v546_v13 = vld [vmem:[%s25554_s1 + $0x368] sm:$0xff]  ;;  %v16017_v14 = vcombine.high %v554_v2, %v562_v3 }
  0x31   : > { %1289 = vmatprep.subr.bf16.mxu0 %v15995_v15  ;;  %1330 = vmatprep.subr.bf16.mxu1 %v15997_v16  ;;  %v16014_v15 = vcombine.low %v553_v62, %v561_v63  ;;  %v521_v16 = vld [vmem:[%s25554_s1 + $0x2a0] sm:$0xff]  ;;  %v16000_v26 = vcombine.low %v538_v11, %v546_v13 }
  0x32   : > { %1319 = vmatprep.mubr.bf16.mxu0 %v25567_v8  ;;  %1360 = vmatprep.mubr.bf16.mxu1 %v25567_v8  ;;  %v15983_v27 = vcombine.high %v521_v16, %v529_v17 }
  0x34   : > { %1290 = vmatpush1.bf16.msra.mxu0 %v15994_v21  ;;  %1331 = vmatpush1.bf16.msra.mxu1 %v15996_v22  ;;  %v530_v21 = vld [vmem:[%s25554_s1 + $0x2e8] sm:$0xff]  ;;  %v16001_v22 = vcombine.high %v538_v11, %v546_v13 }
  0x35   : > { %1291 = vmatprep.subr.bf16.mxu0 %v15979_v23  ;;  %1332 = vmatprep.subr.bf16.mxu1 %v15981_v24  ;;  %v15998_v23 = vcombine.low %v537_v6, %v545_v7  ;;  %v505_v24 = vld [vmem:[%s25554_s1 + $0x220] sm:$0xff]  ;;  %v15984_v34 = vcombine.low %v522_v20, %v530_v21 }
  0x36   : > { %v15967_v35 = vcombine.high %v505_v24, %v513_v25  ;;  %v15966_v39 = vcombine.low %v505_v24, %v513_v25  ;;  %v532_v24 = vld [vmem:[%s25554_s1 + $0x2f8] sm:$0xff] }
  0x38   : > { %1292 = vmatpush1.bf16.msra.mxu0 %v15978_v29  ;;  %1333 = vmatpush1.bf16.msra.mxu1 %v15980_v30  ;;  %v514_v29 = vld [vmem:[%s25554_s1 + $0x268] sm:$0xff]  ;;  %v15985_v30 = vcombine.high %v522_v20, %v530_v21 }
  0x39   : > { %1293 = vmatprep.subr.bf16.mxu0 %v15963_v31  ;;  %1334 = vmatprep.subr.bf16.mxu1 %v15965_v33  ;;  %v15982_v31 = vcombine.low %v521_v16, %v529_v17  ;;  %v497_v33 = vld [vmem:[%s25554_s1 + $0x1e0] sm:$0xff]  ;;  %v15969_v38 = vcombine.high %v506_v28, %v514_v29  ;;  %v15968_v42 = vcombine.low %v506_v28, %v514_v29 }
  0x3a   : > { %v15951_v43 = vcombine.high %v489_v32, %v497_v33  ;;  %v15950_v47 = vcombine.low %v489_v32, %v497_v33  ;;  %v491_v33 = vld [vmem:[%s25554_s1 + $0x1b0] sm:$0xff] }
  0x3c   : > { %1294 = vmatpush1.bf16.msra.mxu0 %v15962_v37  ;;  %1335 = vmatpush1.bf16.msra.mxu1 %v15964_v40  ;;  %v498_v37 = vld [vmem:[%s25554_s1 + $0x1e8] sm:$0xff]  ;;  %v473_v40 = vld [vmem:[%s25554_s1 + $0x120] sm:$0xff] }
  0x3d   : > { %1295 = vmatprep.subr.bf16.mxu0 %v15947_v41  ;;  %1336 = vmatprep.subr.bf16.mxu1 %v15949_v44  ;;  %v481_v41 = vld [vmem:[%s25554_s1 + $0x160] sm:$0xff]  ;;  %v474_v44 = vld [vmem:[%s25554_s1 + $0x128] sm:$0xff]  ;;  %v15953_v46 = vcombine.high %v490_v36, %v498_v37  ;;  %v15952_v50 = vcombine.low %v490_v36, %v498_v37  ;;  %v492_v37 = vld [vmem:[%s25554_s1 + $0x1b8] sm:$0xff] }
  0x3e   : > { %v15935_v51 = vcombine.high %v473_v40, %v481_v41  ;;  %v15934_v55 = vcombine.low %v473_v40, %v481_v41  ;;  %v475_v41 = vld [vmem:[%s25554_s1 + $0x130] sm:$0xff] }
  0x40   : > { %1296 = vmatpush1.bf16.msra.mxu0 %v15946_v45  ;;  %1337 = vmatpush1.bf16.msra.mxu1 %v15948_v48  ;;  %v482_v45 = vld [vmem:[%s25554_s1 + $0x168] sm:$0xff]  ;;  %v457_v48 = vld [vmem:[%s25554_s1 + $0xa0] sm:$0xff] }
  0x41   : > { %1297 = vmatprep.subr.bf16.mxu0 %v15931_v49  ;;  %1338 = vmatprep.subr.bf16.mxu1 %v15933_v52  ;;  %v465_v49 = vld [vmem:[%s25554_s1 + $0xe0] sm:$0xff]  ;;  %v458_v52 = vld [vmem:[%s25554_s1 + $0xa8] sm:$0xff]  ;;  %v15937_v54 = vcombine.high %v474_v44, %v482_v45  ;;  %v15936_v58 = vcombine.low %v474_v44, %v482_v45  ;;  %v483_v44 = vld [vmem:[%s25554_s1 + $0x170] sm:$0xff] }
  0x42   : > { %v15919_v59 = vcombine.high %v457_v48, %v465_v49  ;;  %v15918_v63 = vcombine.low %v457_v48, %v465_v49  ;;  %v459_v49 = vld [vmem:[%s25554_s1 + $0xb0] sm:$0xff] }
  0x44   : > { %1298 = vmatpush1.bf16.msra.mxu0 %v15930_v53  ;;  %1339 = vmatpush1.bf16.msra.mxu1 %v15932_v56  ;;  %v466_v53 = vld [vmem:[%s25554_s1 + $0xe8] sm:$0xff]  ;;  %v441_v56 = vld [vmem:[%s25554_s1 + $0x20] sm:$0xff] }
  0x45   : > { %1299 = vmatprep.subr.bf16.mxu0 %v15915_v57  ;;  %1340 = vmatprep.subr.bf16.mxu1 %v15917_v60  ;;  %v449_v57 = vld [vmem:[%s25554_s1 + $0x60] sm:$0xff]  ;;  %v442_v60 = vld [vmem:[%s25554_s1 + $0x28] sm:$0xff]  ;;  %v15921_v62 = vcombine.high %v458_v52, %v466_v53  ;;  %v15920_v2 = vcombine.low %v458_v52, %v466_v53  ;;  %v15939_v52 = vcombine.high %v475_v41, %v483_v44  ;;  %v460_v53 = vld [vmem:[%s25554_s1 + $0xb8] sm:$0xff] }
  0x46   : > { %v15903_v3 = vcombine.high %v441_v56, %v449_v57  ;;  %v15902_v7 = vcombine.low %v441_v56, %v449_v57  ;;  %v15938_v56 = vcombine.low %v475_v41, %v483_v44  ;;  %v443_v57 = vld [vmem:[%s25554_s1 + $0x30] sm:$0xff]  ;;  %v17235_v41 = vld [vmem:[%s25557_s4 + $0x1f8] sm:$0xff]  }
  0x48   : > { %1300 = vmatpush1.bf16.msra.mxu0 %v15914_v61  ;;  %1341 = vmatpush1.bf16.msra.mxu1 %v15916_v0  ;;  %v450_v61 = vld [vmem:[%s25554_s1 + $0x68] sm:$0xff]  ;;  %v555_v0 = vld [vmem:[%s25554_s1 + $0x3b0] sm:$0xff] }
  0x49   : > { %1301 = vmatprep.subr.bf16.mxu0 %v15899_v1  ;;  %1342 = vmatprep.subr.bf16.mxu1 %v15901_v4  ;;  %v563_v1 = vld [vmem:[%s25554_s1 + $0x3f0] sm:$0xff]  ;;  %v556_v4 = vld [vmem:[%s25554_s1 + $0x3b8] sm:$0xff]  ;;  %v15905_v6 = vcombine.high %v442_v60, %v450_v61  ;;  %v15904_v11 = vcombine.low %v442_v60, %v450_v61 }
  0x4a   : > { %v16019_v13 = vcombine.high %v555_v0, %v563_v1  ;;  %v16018_v17 = vcombine.low %v555_v0, %v563_v1  ;;  %v444_v61 = vld [vmem:[%s25554_s1 + $0x38] sm:$0xff] }
  0x4c   : > { %1302 = vmatpush1.bf16.msra.mxu0 %v15898_v5  ;;  %1343 = vmatpush1.bf16.msra.mxu1 %v15900_v9  ;;  %v564_v5 = vld [vmem:[%s25554_s1 + $0x3f8] sm:$0xff]  ;;  %v539_v9 = vld [vmem:[%s25554_s1 + $0x330] sm:$0xff] }
  0x4d   : > { %1369 = vmatprep.subr.bf16.mxu0 %v16015_v10  ;;  %1410 = vmatprep.subr.bf16.mxu1 %v16017_v14  ;;  %v547_v10 = vld [vmem:[%s25554_s1 + $0x370] sm:$0xff]  ;;  %v540_v14 = vld [vmem:[%s25554_s1 + $0x338] sm:$0xff]  ;;  %v16021_v16 = vcombine.high %v556_v4, %v564_v5  ;;  %v16020_v20 = vcombine.low %v556_v4, %v564_v5 }
  0x4e   : > { %v16003_v21 = vcombine.high %v539_v9, %v547_v10  ;;  %v16002_v25 = vcombine.low %v539_v9, %v547_v10  ;;  %v17204_v9 = vld [vmem:[%s25557_s4 + $0xb8] sm:$0xff]   ;;  %v17205_v10 = vld [vmem:[%s25557_s4 + $0xf0] sm:$0xff]  }
  0x4f   : > { %1320 = vmatmul.mubr.bf16.vlgmr.msra.gmra.mxu0 %v17821_v12  ;;  %1361 = vmatmul.mubr.bf16.vlgmr.msra.gmra.mxu1 %v17821_v12 }
  0x50   : > { %1370 = vmatpush1.bf16.msra.mxu0 %v16014_v15  ;;  %1411 = vmatpush1.bf16.msra.mxu1 %v16016_v18  ;;  %v548_v15 = vld [vmem:[%s25554_s1 + $0x378] sm:$0xff]  ;;  %v523_v18 = vld [vmem:[%s25554_s1 + $0x2b0] sm:$0xff] }
  0x51   : > { %1371 = vmatprep.subr.bf16.mxu0 %v15999_v19  ;;  %1412 = vmatprep.subr.bf16.mxu1 %v16001_v22  ;;  %v531_v19 = vld [vmem:[%s25554_s1 + $0x2f0] sm:$0xff]  ;;  %v16005_v22 = vcombine.high %v540_v14, %v548_v15  ;;  %v16004_v28 = vcombine.low %v540_v14, %v548_v15  ;;  %v17208_v14 = vld [vmem:[%s25557_s4 + $0x38] sm:$0xff]   ;;  %v17209_v15 = vld [vmem:[%s25557_s4 + $0xe8] sm:$0xff]  }
  0x52   : > { %1401 = vmatprep.mubr.bf16.mxu0 %v25567_v8  ;;  %1442 = vmatprep.mubr.bf16.mxu1 %v25567_v8  ;;  %v15987_v29 = vcombine.high %v523_v18, %v531_v19  ;;  %v15986_v32 = vcombine.low %v523_v18, %v531_v19  ;;  %v17212_v18 = vld [vmem:[%s25557_s4 + $0x30] sm:$0xff]   ;;  %v17213_v19 = vld [vmem:[%s25557_s4 + $0xe0] sm:$0xff]  }
  0x54   : > { %1372 = vmatpush1.bf16.msra.mxu0 %v15998_v23  ;;  %1413 = vmatpush1.bf16.msra.mxu1 %v16000_v26  ;;  %v524_v23 = vld [vmem:[%s25554_s1 + $0x2b8] sm:$0xff]  ;;  %v507_v26 = vld [vmem:[%s25554_s1 + $0x230] sm:$0xff] }
  0x55   : > { %1373 = vmatprep.subr.bf16.mxu0 %v15983_v27  ;;  %1414 = vmatprep.subr.bf16.mxu1 %v15985_v30  ;;  %v515_v27 = vld [vmem:[%s25554_s1 + $0x270] sm:$0xff]  ;;  %v508_v30 = vld [vmem:[%s25554_s1 + $0x238] sm:$0xff] }
  0x56   : > { %v15971_v36 = vcombine.high %v507_v26, %v515_v27  ;;  %v15970_v40 = vcombine.low %v507_v26, %v515_v27  ;;  %v17220_v26 = vld [vmem:[%s25557_s4 + $0x20] sm:$0xff]   ;;  %v17221_v27 = vld [vmem:[%s25557_s4 + $0xd0] sm:$0xff]  }
  0x58   : > { %1374 = vmatpush1.bf16.msra.mxu0 %v15982_v31  ;;  %1415 = vmatpush1.bf16.msra.mxu1 %v15984_v34  ;;  %v15989_v31 = vcombine.high %v524_v23, %v532_v24  ;;  %v499_v34 = vld [vmem:[%s25554_s1 + $0x1f0] sm:$0xff] }
  0x59   : > { %1375 = vmatprep.subr.bf16.mxu0 %v15967_v35  ;;  %1416 = vmatprep.subr.bf16.mxu1 %v15969_v38  ;;  %v15988_v35 = vcombine.low %v524_v23, %v532_v24  ;;  %v15954_v48 = vcombine.low %v491_v33, %v499_v34  ;;  %v17217_v23 = vld [vmem:[%s25557_s4 + $0xd8] sm:$0xff]  }
  0x5a   : > { %v17218_v24 = vld [vmem:[%s25557_s4 + $0x98] sm:$0xff]  }
  0x5c   : > { %1376 = vmatpush1.bf16.msra.mxu0 %v15966_v39  ;;  %1417 = vmatpush1.bf16.msra.mxu1 %v15968_v42  ;;  %v500_v39 = vld [vmem:[%s25554_s1 + $0x1f8] sm:$0xff] }
  0x5d   : > { %1377 = vmatprep.subr.bf16.mxu0 %v15951_v43  ;;  %1418 = vmatprep.subr.bf16.mxu1 %v15953_v46  ;;  %v15955_v43 = vcombine.high %v491_v33, %v499_v34  ;;  %v15957_v45 = vcombine.high %v492_v37, %v500_v39  ;;  %v476_v46 = vld [vmem:[%s25554_s1 + $0x138] sm:$0xff]  ;;  %v17228_v33 = vld [vmem:[%s25557_s4 + $0x10] sm:$0xff]   ;;  %v17229_v34 = vld [vmem:[%s25557_s4 + $0xc0] sm:$0xff]  }
  0x60   : > { %1378 = vmatpush1.bf16.msra.mxu0 %v15950_v47  ;;  %1419 = vmatpush1.bf16.msra.mxu1 %v15952_v50  ;;  %v484_v47 = vld [vmem:[%s25554_s1 + $0x178] sm:$0xff]  ;;  %v467_v50 = vld [vmem:[%s25554_s1 + $0xf0] sm:$0xff] }
  0x61   : > { %1379 = vmatprep.subr.bf16.mxu0 %v15935_v51  ;;  %1420 = vmatprep.subr.bf16.mxu1 %v15937_v54  ;;  %v15956_v51 = vcombine.low %v492_v37, %v500_v39  ;;  %v468_v54 = vld [vmem:[%s25554_s1 + $0xf8] sm:$0xff]  ;;  %v15923_v60 = vcombine.high %v459_v49, %v467_v50  ;;  %v15922_v0 = vcombine.low %v459_v49, %v467_v50  ;;  %v17232_v37 = vld [vmem:[%s25557_s4 + $0x8] sm:$0xff]   ;;  %v17234_v39 = vld [vmem:[%s25557_s4] sm:$0xff]  }
  0x62   : > { %v15924_v1 = vcombine.low %v460_v53, %v468_v54 }
  0x64   : > { %1380 = vmatpush1.bf16.msra.mxu0 %v15934_v55  ;;  %1421 = vmatpush1.bf16.msra.mxu1 %v15936_v58  ;;  %v15941_v55 = vcombine.high %v476_v46, %v484_v47  ;;  %v451_v58 = vld [vmem:[%s25554_s1 + $0x70] sm:$0xff] }
  0x65   : > { %1381 = vmatprep.subr.bf16.mxu0 %v15919_v59  ;;  %1422 = vmatprep.subr.bf16.mxu1 %v15921_v62  ;;  %v15940_v59 = vcombine.low %v476_v46, %v484_v47  ;;  %v452_v62 = vld [vmem:[%s25554_s1 + $0x78] sm:$0xff]  ;;  %v15906_v4 = vcombine.low %v443_v57, %v451_v58  ;;  %v1537_v46 = vlaneseq }
  0x66   : > { %v15908_v5 = vcombine.low %v444_v61, %v452_v62 }
  0x68   : > { %1382 = vmatpush1.bf16.msra.mxu0 %v15918_v63  ;;  %1423 = vmatpush1.bf16.msra.mxu1 %v15920_v2  ;;  %v15925_v63 = vcombine.high %v460_v53, %v468_v54  ;;  %v15907_v2 = vcombine.high %v443_v57, %v451_v58  ;;  %v1533_v53 = vld [vmem:[%s25555_s2] sm:$0xff] }
  0x69   : > { %1383 = vmatprep.subr.bf16.mxu0 %v15903_v3  ;;  %1424 = vmatprep.subr.bf16.mxu1 %v15905_v6  ;;  %v15909_v3 = vcombine.high %v444_v61, %v452_v62  ;;  %v17585_v6 = vld [vmem:[%s17806_s24] sm:$0x1]  ;;  %s16466_s24 = sshll.u32 %s26546_s26, 10 }
  0x6a   : > { %s24788_s21 = scalar_lea.vmem %s25566_s13, %s16466_s24 }
  0x6c   : > { %1384 = vmatpush1.bf16.msra.mxu0 %v15902_v7  ;;  %1425 = vmatpush1.bf16.msra.mxu1 %v15904_v11  ;;  %v17203_v7 = vld [vmem:[%s25557_s4 + $0xf8] sm:$0xff]   ;;  %v17206_v11 = vld [vmem:[%s25557_s4 + $0xb0] sm:$0xff]  }
  0x6d   : > { %1451 = vmatprep.subr.bf16.mxu0 %v16019_v13  ;;  %1492 = vmatprep.subr.bf16.mxu1 %v16021_v16  ;;  %v17207_v13 = vld [vmem:[%s25557_s4 + $0x78] sm:$0xff]   ;;  %v17210_v16 = vld [vmem:[%s25557_s4 + $0xa8] sm:$0xff]  }
  0x6f   : > { %1402 = vmatmul.mubr.bf16.vlgmr.msra.gmra.mxu0 %v17821_v12  ;;  %1443 = vmatmul.mubr.bf16.vlgmr.msra.gmra.mxu1 %v17821_v12  ;;  %v516_v12 = vld [vmem:[%s25554_s1 + $0x278] sm:$0xff] }
  0x70   : > { %1452 = vmatpush1.bf16.msra.mxu0 %v16018_v17  ;;  %1493 = vmatpush1.bf16.msra.mxu1 %v16020_v20  ;;  %v15973_v38 = vcombine.high %v508_v30, %v516_v12  ;;  %v15972_v42 = vcombine.low %v508_v30, %v516_v12  ;;  %v17211_v17 = vld [vmem:[%s25557_s4 + $0x70] sm:$0xff]   ;;  %v17214_v20 = vld [vmem:[%s25557_s4 + $0xa0] sm:$0xff]   ;;  %v17224_v30 = vld [vmem:[%s25557_s4 + $0x18] sm:$0xff]  }
  0x71   : > { %1453 = vmatprep.subr.bf16.mxu0 %v16003_v21  ;;  %1494 = vmatprep.subr.bf16.mxu1 %v16005_v22  ;;  %v17215_v21 = vld [vmem:[%s25557_s4 + $0x68] sm:$0xff]  }
  0x72   : > { %1483 = vmatprep.mubr.bf16.mxu0 %v25567_v8  ;;  %1524 = vmatprep.mubr.bf16.mxu1 %v25567_v8  ;;  %v17216_v22 = vld [vmem:[%s25557_s4 + $0x28] sm:$0xff]  }
  0x73   : > { %v17225_v12 = vld [vmem:[%s25557_s4 + $0xc8] sm:$0xff]  }
  0x74   : > { %1454 = vmatpush1.bf16.msra.mxu0 %v16002_v25  ;;  %1495 = vmatpush1.bf16.msra.mxu1 %v16004_v28  ;;  %v17219_v25 = vld [vmem:[%s25557_s4 + $0x60] sm:$0xff]   ;;  %v17222_v28 = vld [vmem:[%s25557_s4 + $0x90] sm:$0xff]  }
  0x75   : > { %1455 = vmatprep.subr.bf16.mxu0 %v15987_v29  ;;  %1496 = vmatprep.subr.bf16.mxu1 %v15989_v31  ;;  %v17223_v29 = vld [vmem:[%s25557_s4 + $0x58] sm:$0xff]   ;;  %v17226_v31 = vld [vmem:[%s25557_s4 + $0x88] sm:$0xff]  }
  0x78   : > { %1456 = vmatpush1.bf16.msra.mxu0 %v15986_v32  ;;  %1497 = vmatpush1.bf16.msra.mxu1 %v15988_v35  ;;  %v17227_v32 = vld [vmem:[%s25557_s4 + $0x50] sm:$0xff]   ;;  %v17230_v35 = vld [vmem:[%s25557_s4 + $0x80] sm:$0xff]  }
  0x79   : > { %1457 = vmatprep.subr.bf16.mxu0 %v15971_v36  ;;  %1498 = vmatprep.subr.bf16.mxu1 %v15973_v38  ;;  %v17231_v36 = vld [vmem:[%s25557_s4 + $0x48] sm:$0xff]   ;;  %v17233_v38 = vld [vmem:[%s25557_s4 + $0x40] sm:$0xff]  }
  0x7c   : > { %1458 = vmatpush1.bf16.msra.mxu0 %v15970_v40  ;;  %1499 = vmatpush1.bf16.msra.mxu1 %v15972_v42 }
  0x7d   : > { %1459 = vmatprep.subr.bf16.mxu0 %v15955_v43  ;;  %1500 = vmatprep.subr.bf16.mxu1 %v15957_v45  ;;  %v17239_v43 = vld [vmem:[%s25557_s4 + $0x178] sm:$0xff]  }
  0x80   : > { %1460 = vmatpush1.bf16.msra.mxu0 %v15954_v48  ;;  %1501 = vmatpush1.bf16.msra.mxu1 %v15956_v51  ;;  %v18202_v51 = vshrl.u32 %v1537_v46, 7 }
  0x81   : > { %1461 = vmatprep.subr.bf16.mxu0 %v15939_v52  ;;  %1502 = vmatprep.subr.bf16.mxu1 %v15941_v55 }
  0x82   : > { %v18205_v52 = vsub.s32 1, %v18202_v51  ;;  %v18211_v54 = vsub.s32 2, %v18202_v51  ;;  %v18218_v57 = vsub.s32 0, %v18202_v51  ;;  %v18221_v58 = vsub.s32 3, %v18202_v51 }
  0x84   : > { %1462 = vmatpush1.bf16.msra.mxu0 %v15938_v56  ;;  %1503 = vmatpush1.bf16.msra.mxu1 %v15940_v59  ;;  %v1544_v55 = vrot.slane %v1533_v53, %v18205_v52  ;;  %v1633_v56 = vld [vmem:[%s25556_s3] sm:$0xff]  ;;  %25786 = vst [vmem:[#allocation2_spill] sm:$0xff] %v18218_v57  ;;  %v1548_v59 = vrot.slane %v1533_v53, %v18211_v54 }
  0x85   : > { %1463 = vmatprep.subr.bf16.mxu0 %v15923_v60  ;;  %1504 = vmatprep.subr.bf16.mxu1 %v15925_v63  ;;  %v1644_v61 = vrot.slane %v1633_v56, %v18205_v52  ;;  %v1540_v62 = vrot.slane %v1533_v53, %v18218_v57  ;;  %v1552_v63 = vrot.slane %v1533_v53, %v18221_v58 }
  0x88   : > { %1464 = vmatpush1.bf16.msra.mxu0 %v15922_v0  ;;  %1505 = vmatpush1.bf16.msra.mxu1 %v15924_v1  ;;  %v1648_v1 = vrot.slane %v1633_v56, %v18211_v54 }
  0x89   : > { %1465 = vmatprep.subr.bf16.mxu0 %v15907_v2  ;;  %1506 = vmatprep.subr.bf16.mxu1 %v15909_v3  ;;  %v1640_v3 = vrot.slane %v1633_v56, %v18218_v57 }
  0x8c   : > { %1466 = vmatpush1.bf16.msra.mxu0 %v15906_v4  ;;  %1507 = vmatpush1.bf16.msra.mxu1 %v15908_v5  ;;  %v18230_v4 = vsub.s32 4, %v18202_v51 }
  0x8d   : > { %16515 = vmatprep.subr.bf16.mxu1 %v17203_v7  ;;  %16475 = vmatprep.subr.bf16.mxu0 %v17207_v13  ;;  %v1652_v7 = vrot.slane %v1633_v56, %v18221_v58 }
  0x8f   : > { %1484 = vmatmul.mubr.bf16.vlgmr.msra.gmra.mxu0 %v17585_v6  ;;  %1525 = vmatmul.mubr.bf16.vlgmr.msra.gmra.mxu1 %v17585_v6 }
  0x90   : > { %16516 = vmatpush3.bf16.msra.mxu1 %v17204_v9  ;;  %16476 = vmatpush3.bf16.msra.mxu0 %v17208_v14  ;;  %v18234_v9 = vsub.s32 6, %v18202_v51  ;;  %v18240_v14 = vsub.s32 7, %v18202_v51 }
  0x91   : > { %16517 = vmatprep.subr.bf16.mxu1 %v17205_v10  ;;  %16477 = vmatprep.subr.bf16.mxu0 %v17211_v17 }
  0x94   : > { %16518 = vmatpush3.bf16.msra.mxu1 %v17206_v11  ;;  %16478 = vmatpush3.bf16.msra.mxu0 %v17212_v18  ;;  %v18237_v11 = vsub.s32 5, %v18202_v51  ;;  %v1564_v18 = vrot.slane %v1533_v53, %v18234_v9 }
  0x95   : > { %16519 = vmatprep.subr.bf16.mxu1 %v17209_v15  ;;  %16479 = vmatprep.subr.bf16.mxu0 %v17215_v21  ;;  %v1556_v15 = vrot.slane %v1533_v53, %v18230_v4 }
  0x96   : > { %v1560_v21 = vrot.slane %v1533_v53, %v18237_v11 }
  0x98   : > { %16520 = vmatpush3.bf16.msra.mxu1 %v17210_v16  ;;  %16480 = vmatpush3.bf16.msra.mxu0 %v17216_v22 }
  0x99   : > { %16521 = vmatprep.subr.bf16.mxu1 %v17213_v19  ;;  %16481 = vmatprep.subr.bf16.mxu0 %v17219_v25  ;;  %v1568_v25 = vrot.slane %v1533_v53, %v18240_v14 }
  0x9c   : > { %16522 = vmatpush3.bf16.msra.mxu1 %v17214_v20  ;;  %16482 = vmatpush3.bf16.msra.mxu0 %v17220_v26  ;;  %v1656_v20 = vrot.slane %v1633_v56, %v18230_v4  ;;  %v17604_v26 = vmov 1966171168  }
  0x9d   : > { %16523 = vmatprep.subr.bf16.mxu1 %v17217_v23  ;;  %16483 = vmatprep.subr.bf16.mxu0 %v17223_v29 }
  0xa0   : > { %16524 = vmatpush3.bf16.msra.mxu1 %v17218_v24  ;;  %16484 = vmatpush3.bf16.msra.mxu0 %v17224_v30  ;;  %v1664_v24 = vrot.slane %v1633_v56, %v18234_v9  ;;  %v1660_v30 = vrot.slane %v1633_v56, %v18237_v11 }
  0xa1   : > { %16525 = vmatprep.subr.bf16.mxu1 %v17221_v27  ;;  %16485 = vmatprep.subr.bf16.mxu0 %v17227_v32  ;;  %v1811_v27 = vunpack.c.l.s4 %v17604_v26 }
  0xa4   : > { %16526 = vmatpush3.bf16.msra.mxu1 %v17222_v28  ;;  %16486 = vmatpush3.bf16.msra.mxu0 %v17228_v33  ;;  %v1668_v33 = vrot.slane %v1633_v56, %v18240_v14 }
  0xa5   : > { %16527 = vmatprep.subr.bf16.mxu1 %v17225_v12  ;;  %16487 = vmatprep.subr.bf16.mxu0 %v17231_v36 }
  0xa8   : > { %16528 = vmatpush3.bf16.msra.mxu1 %v17226_v31  ;;  %16488 = vmatpush3.bf16.msra.mxu0 %v17232_v37 }
  0xa9   : > { %16529 = vmatprep.subr.bf16.mxu1 %v17229_v34  ;;  %16489 = vmatprep.subr.bf16.mxu0 %v17233_v38 }
  0xac   : > { %16530 = vmatpush3.bf16.msra.mxu1 %v17230_v35  ;;  %16490 = vmatpush3.bf16.msra.mxu0 %v17234_v39 }
  0xad   : > { %16595 = vmatprep.subr.bf16.mxu1 %v17235_v41  ;;  %16555 = vmatprep.subr.bf16.mxu0 %v17239_v43  ;;  %v1812_v41 = vunpack.c.0.s8 %v1811_v27 }
  0xef   : > { %v1239_v40 = vpop.f32.mrf.mxu0  ;;  %v1280_v42 = vpop.f32.mrf.mxu1 }
  0xf0   : > { %v1619_v0 = vmul.f32 %v1548_v59, %v1280_v42  ;;  %v1617_v5 = vmul.f32 %v1540_v62, %v1239_v40  ;;  %v18256_v59 = vsub.s32 %v1812_v41, %v18202_v51 }
  0xf1   : > { %v1241_v44 = vpop.f32.mrf.mxu0  ;;  %v1282_v45 = vpop.f32.mrf.mxu1 }
  0xf2   : > { %v1618_v60 = vmul.f32 %v1544_v55, %v1241_v44  ;;  %v1620_v6 = vmul.f32 %v1552_v63, %v1282_v45  ;;  %v1719_v10 = vadd.f32 %v1648_v1, %v1619_v0  ;;  %v1717_v16 = vadd.f32 %v1640_v3, %v1617_v5  ;;  %25787 = vst [vmem:[#allocation3_spill] sm:$0xff] %v18256_v59 }
  0xf3   : > { %v1243_v47 = vpop.f32.mrf.mxu0  ;;  %v1284_v48 = vpop.f32.mrf.mxu1 }
  0xf4   : > { %v1718_v2 = vadd.f32 %v1644_v61, %v1618_v60  ;;  %v1720_v17 = vadd.f32 %v1652_v7, %v1620_v6  ;;  %v1737_v19 = vrot.slane %v1719_v10, 6 }
  0xf5   : > { %v1244_v49 = vpop.f32.mrf.mxu0  ;;  %v1285_v50 = vpop.f32.mrf.mxu1 }
  0xf6   : > { %v1734_v13 = vrot.slane %v1718_v2, 7  ;;  %v1740_v12 = vrot.slane %v1720_v17, 5 }
  0xf8   : > { %v1776_v22 = vsel %vm1775_vm0, %v1717_v16, %v1734_v13  ;;  %v18266_v13 = vrot.slane %v25567_v8, 7 }
  0xf9   : > { %v1778_v34 = vsel %vm1777_vm1, %v1776_v22, %v1737_v19 }
  0xfa   : > { %v1780_v45 = vsel %vm1779_vm2, %v1778_v34, %v1740_v12  ;;  %25788 = vst [vmem:[#allocation4_spill] sm:$0xff] %v18266_v13 }
 0x10f   : > { %v1321_v23 = vpop.f32.mrf.mxu0  ;;  %v1362_v29 = vpop.f32.mrf.mxu1 }
 0x110   : > { %v1621_v28 = vmul.f32 %v1556_v15, %v1321_v23  ;;  %v1623_v31 = vmul.f32 %v1564_v18, %v1362_v29  ;;  %v25789_v23 = vmov 0 }
 0x111   : > { %v1323_v32 = vpop.f32.mrf.mxu0  ;;  %v1364_v37 = vpop.f32.mrf.mxu1  ;;  %v25790_v23 = vsel %vm18272_vm9, 4294967295, %v25789_v23 }
 0x112   : > { %v1721_v35 = vadd.f32 %v1656_v20, %v1621_v28  ;;  %v1622_v36 = vmul.f32 %v1560_v21, %v1323_v32  ;;  %v1723_v38 = vadd.f32 %v1664_v24, %v1623_v31  ;;  %v1624_v39 = vmul.f32 %v1568_v25, %v1364_v37  ;;  %25791 = vst [vmem:[#allocation5_spill] sm:$0xff] %v25790_v23 }
 0x113   : > { %v1325_v40 = vpop.f32.mrf.mxu0  ;;  %v1366_v44 = vpop.f32.mrf.mxu1 }
 0x114   : > { %v1743_v42 = vrot.slane %v1721_v35, 4  ;;  %v1722_v43 = vadd.f32 %v1660_v30, %v1622_v36  ;;  %v1749_v46 = vrot.slane %v1723_v38, 2  ;;  %v1724_v47 = vadd.f32 %v1668_v33, %v1624_v39 }
 0x115   : > { %v1326_v48 = vpop.f32.mrf.mxu0  ;;  %v1367_v53 = vpop.f32.mrf.mxu1  ;;  %v18285_v35 = vsel %vm18272_vm9, 0, %v18266_v13 }
 0x116   : > { %v1782_v49 = vsel %vm1781_vm3, %v1780_v45, %v1743_v42  ;;  %v1746_v50 = vrot.slane %v1722_v43, 3  ;;  %v1752_v55 = vrot.slane %v1724_v47, 1  ;;  %25792 = vst [vmem:[#allocation6_spill] sm:$0xff] %v18285_v35  ;;  %v18303_v53 = vld [vmem:[%s25555_s2 + $0x8] sm:$0xff] }
 0x118   : > { %v1784_v56 = vsel %vm1783_vm4, %v1782_v49, %v1746_v50 }
 0x119   : > { %v1786_v60 = vsel %vm1785_vm5, %v1784_v56, %v1749_v46 }
 0x11a   : > { %v1788_v61 = vsel %vm1787_vm6, %v1786_v60, %v1752_v55  ;;  %v18308_v55 = vsel %vm18289_vm10, %v18285_v35, 0  ;;  %v1580_v60 = vrot.slane %v18303_v53, %v18211_v54 }
 0x11b   : > { %v1798_v62 = vcombine.high %v1788_v61, %v1788_v61  ;;  %v1802_v63 = vpack.c.bf16 %v1788_v61, %v1788_v61 }
 0x11d   : > { %v1803_v0 = vpack.c.bf16 %v1798_v62, %v1798_v62  ;;  %v1816_v1 = vrot.slane %v1802_v63, %v18256_v59 }
 0x11f   : > { %v1817_v2 = vcombine.high %v1816_v1, %v1816_v1  ;;  %v1824_v3 = vrot.slane %v1816_v1, %v18256_v59  ;;  %v1838_v5 = vrot.slane %v1803_v0, %v18256_v59  ;;  %v18317_v1 = vld [vmem:[%s25556_s3 + $0x8] sm:$0xff] }
 0x121   : > { %v1831_v6 = vrot.slane %v1817_v2, %v18256_v59  ;;  %v1839_v7 = vcombine.high %v1838_v5, %v1838_v5  ;;  %v1846_v51 = vrot.slane %v1838_v5, %v18256_v59  ;;  %v1899_v10 = vunpack.i.h.s16 %v1824_v3 }
 0x122   : > { %v16022_v15 = vpack.i.b16 %v1824_v3, %v1824_v3  ;;  %v1572_v2 = vrot.slane %v18303_v53, %v18218_v57  ;;  %v1680_v3 = vrot.slane %v18317_v1, %v18211_v54  ;;  %v1576_v5 = vrot.slane %v18303_v53, %v18205_v52 }
 0x123   : > { %v1853_v16 = vrot.slane %v1839_v7, %v18256_v59  ;;  %v1901_v17 = vunpack.i.h.s16 %v1831_v6  ;;  %v1903_v18 = vunpack.i.h.s16 %v1846_v51  ;;  %v1915_v19 = vpack.i.b16 %v1899_v10, %v1899_v10 }
 0x124   : > { %v16023_v20 = vpack.i.b16 %v1831_v6, %v1831_v6  ;;  %v16024_v21 = vpack.i.b16 %v1846_v51, %v1846_v51  ;;  %v1933_v22 = vrot.slane %v16022_v15, %v18218_v57  ;;  %v1584_v51 = vrot.slane %v18303_v53, %v18221_v58 }
 0x125   : > { %v1905_v24 = vunpack.i.h.s16 %v1853_v16  ;;  %v1917_v25 = vpack.i.b16 %v1901_v17, %v1901_v17  ;;  %v1919_v26 = vpack.i.b16 %v1903_v18, %v1903_v18  ;;  %v16025_v27 = vpack.i.b16 %v1853_v16, %v1853_v16 }
 0x126   : > { %v1937_v28 = vrot.slane %v1915_v19, %v18218_v57  ;;  %v1941_v29 = vrot.slane %v16023_v20, %v18218_v57  ;;  %v1949_v30 = vrot.slane %v16024_v21, %v18218_v57  ;;  %v1995_v12 = vpack.i.b16 %v1933_v22, %v1933_v22 }
 0x127   : > { %v1921_v31 = vpack.i.b16 %v1905_v24, %v1905_v24  ;;  %v1945_v32 = vrot.slane %v1917_v25, %v18218_v57  ;;  %v1953_v33 = vrot.slane %v1919_v26, %v18218_v57  ;;  %v1957_v34 = vrot.slane %v16025_v27, %v18218_v57 }
 0x128   : > { %v2002_v36 = vpack.i.b16 %v1937_v28, %v1937_v28  ;;  %v2009_v37 = vpack.i.b16 %v1941_v29, %v1941_v29  ;;  %v2023_v38 = vpack.i.b16 %v1949_v30, %v1949_v30  ;;  %v2000_v44 = vrot.slane %v1995_v12, %v18218_v57 }
 0x129   : > { %v1961_v40 = vrot.slane %v1921_v31, %v18218_v57  ;;  %v2016_v41 = vpack.i.b16 %v1945_v32, %v1945_v32  ;;  %v2030_v42 = vpack.i.b16 %v1953_v33, %v1953_v33  ;;  %v2037_v43 = vpack.i.b16 %v1957_v34, %v1957_v34 }
 0x12a   : > { %v2007_v45 = vrot.slane %v2002_v36, %v18218_v57  ;;  %v2014_v46 = vrot.slane %v2009_v37, %v18218_v57  ;;  %v2028_v48 = vrot.slane %v2023_v38, %v18218_v57  ;;  %v1676_v17 = vrot.slane %v18317_v1, %v18205_v52 }
 0x12b   : > { %v2021_v47 = vrot.slane %v2016_v41, %v18218_v57  ;;  %v2035_v49 = vrot.slane %v2030_v42, %v18218_v57  ;;  %v2044_v50 = vpack.i.b16 %v1961_v40, %v1961_v40  ;;  %v2042_v61 = vrot.slane %v2037_v43, %v18218_v57 }
 0x12c   : > { %v2122_v56 = vcombine.low %v2000_v44, %v2007_v45  ;;  %v1684_v18 = vrot.slane %v18317_v1, %v18221_v58  ;;  %v16030_v54 = vcombine.low %v18308_v55, %v18308_v55  ;;  %v1672_v26 = vrot.slane %v18317_v1, %v18218_v57 }
 0x12d   : > { %v2049_v62 = vrot.slane %v2044_v50, %v18218_v57  ;;  %v2123_v63 = vcombine.low %v2014_v46, %v2021_v47  ;;  %v2146_v0 = vcombine.low %v2028_v48, %v2035_v49  ;;  %v16031_v44 = vcombine.high %v18308_v55, %v18308_v55 }
 0x12e   : > { %v2130_v10 = vrot.slane %v2122_v56, %v18256_v59  ;;  %v2303_v33 = vshrl.u32 %v16030_v54, 16  ;;  %v2306_v40 = vshll.u32 %v16030_v54, 16  ;;  %v16040_v50 = vrot.slane %v16030_v54, 9 }
 0x12f   : > { %v2147_v6 = vcombine.low %v2042_v61, %v2049_v62  ;;  %v1403_v7 = vpop.f32.mrf.mxu0  ;;  %v2137_v15 = vrot.slane %v2123_v63, %v18256_v59  ;;  %v1444_v16 = vpop.f32.mrf.mxu1  ;;  %v2154_v22 = vrot.slane %v2146_v0, %v18256_v59 }
 0x130   : > { %v1627_v19 = vmul.f32 %v1580_v60, %v1444_v16  ;;  %v1625_v25 = vmul.f32 %v1572_v2, %v1403_v7  ;;  %v2305_v62 = vrot.slane %v2303_v33, 4  ;;  %v2308_v63 = vrot.slane %v2306_v40, 5 }
 0x131   : > { %v1405_v20 = vpop.f32.mrf.mxu0  ;;  %v2138_v21 = vcombine.low %v2130_v10, %v2137_v15  ;;  %v2161_v24 = vrot.slane %v2147_v6, %v18256_v59  ;;  %v1446_v28 = vpop.f32.mrf.mxu1  ;;  %v2377_v2 = vrot.slane %v16031_v44, 5 }
 0x132   : > { %v1626_v27 = vmul.f32 %v1576_v5, %v1405_v20  ;;  %v1727_v52 = vadd.f32 %v1680_v3, %v1627_v19  ;;  %v1628_v29 = vmul.f32 %v1584_v51, %v1446_v28  ;;  %v1725_v41 = vadd.f32 %v1672_v26, %v1625_v25 }
 0x133   : > { %v1407_v30 = vpop.f32.mrf.mxu0  ;;  %v2145_v58 = vrot.slane %v2138_v21, %v18256_v59  ;;  %v2162_v12 = vcombine.low %v2154_v22, %v2161_v24  ;;  %v1448_v32 = vpop.f32.mrf.mxu1  ;;  %v18365_v54 = vsel %vm18349_vm12, %v16040_v50, %v2377_v2  ;;  %v17240_v2 = vld [vmem:[%s25557_s4 + $0x138] sm:$0xff]  }
 0x134   : > { %v1726_v31 = vadd.f32 %v1676_v17, %v1626_v27  ;;  %v1758_v34 = vrot.slane %v1727_v52, 6  ;;  %v1728_v36 = vadd.f32 %v1684_v18, %v1628_v29  ;;  %v2309_v17 = vor.u32 %v2308_v63, %v2305_v62 }
 0x135   : > { %v1408_v37 = vpop.f32.mrf.mxu0  ;;  %v2226_v38 = vshrl.u32 %v2145_v58, 16  ;;  %v1449_v43 = vpop.f32.mrf.mxu1  ;;  %v2169_v45 = vrot.slane %v2162_v12, %v18256_v59  ;;  %v2229_v48 = vshll.u32 %v2145_v58, 16  ;;  %v2312_v18 = vshll.u32 %v16031_v44, 16  ;;  %v17236_v58 = vld [vmem:[%s25557_s4 + $0x1b8] sm:$0xff]  }
 0x136   : > { %v1755_v42 = vrot.slane %v1726_v31, 7  ;;  %v1761_v46 = vrot.slane %v1728_v36, 5  ;;  %v2310_v52 = vrot.slane %v2309_v17, 4 }
 0x137   : > { %v2228_v47 = vrot.slane %v2226_v38, 7  ;;  %v2233_v56 = vshrl.u32 %v2169_v45, 16  ;;  %v2236_v5 = vshll.u32 %v2169_v45, 16  ;;  %v2314_v29 = vrot.slane %v2312_v18, 5  ;;  %v17238_v45 = vld [vmem:[%s25557_s4 + $0x1b0] sm:$0xff]  }
 0x138   : > { %v1789_v49 = vsel %vm1775_vm0, %v1725_v41, %v1755_v42  ;;  %v1588_v18 = vrot.slane %v18303_v53, %v18230_v4  ;;  %vm4988_vm0 = vsmask.f32 7424 }
 0x139   : > { %v1790_v60 = vsel %vm1777_vm1, %v1789_v49, %v1758_v34  ;;  %v2231_v61 = vor.u32 %v2229_v48, %v2228_v47  ;;  %v2235_v3 = vrot.slane %v2233_v56, 7  ;;  %v17237_v34 = vld [vmem:[%s25557_s4 + $0x1f0] sm:$0xff]   ;;  %v17241_v49 = vld [vmem:[%s25557_s4 + $0x1e8] sm:$0xff]   ;;  %vm5193_vm1 = vcmask 523264  }
 0x13a   : > { %v18346_v0 = vsel %vm1779_vm2, %v1790_v60, %v1761_v46  ;;  %v18399_v46 = vsel %vm18390_vm15, %v2310_v52, %v2314_v29  ;;  %v1696_v29 = vrot.slane %v18317_v1, %v18234_v9  ;;  %vm13318_vm2 = vcmask 261120  }
 0x13b   : > { %v2262_v7 = vsel %vm18272_vm9, 0, %v2231_v61  ;;  %v2238_v10 = vor.u32 %v2236_v5, %v2235_v3  ;;  %v17242_v3 = vld [vmem:[%s25557_s4 + $0x1a8] sm:$0xff]  }
 0x13c   : > { %v18357_v51 = vsel %vm18289_vm10, %v2262_v7, 0 }
 0x13d   : > { %v16032_v15 = vcombine.low %v18357_v51, %v18357_v51  ;;  %v16033_v16 = vcombine.high %v18357_v51, %v18357_v51  ;;  %v2263_v19 = vsel %vm18272_vm9, 0, %v2238_v10  ;;  %v16045_v5 = vcombine.low %v18308_v55, %v18357_v51  ;;  %v17243_v10 = vld [vmem:[%s25557_s4 + $0x170] sm:$0xff]  }
 0x13e   : > { %v18371_v22 = vsel %vm18289_vm10, %v2263_v19, 0  ;;  %v1596_v19 = vrot.slane %v18303_v53, %v18234_v9  ;;  %v17248_v9 = vld [vmem:[%s25557_s4 + $0x128] sm:$0xff]  }
 0x13f   : > { %3128 = vmatprep.mubr.bf16.mxu1 %v16032_v15  ;;  %v16041_v20 = vrot.slane %v16032_v15, 9  ;;  %v2381_v21 = vrot.slane %v16033_v16, 5  ;;  %v2317_v24 = vshrl.u32 %v16032_v15, 16  ;;  %v16034_v25 = vcombine.low %v18371_v22, %v18371_v22 }
 0x140   : > { %v2320_v26 = vshll.u32 %v16032_v15, 16  ;;  %v16035_v27 = vcombine.high %v18371_v22, %v18371_v22  ;;  %v2326_v32 = vshll.u32 %v16033_v16, 16  ;;  %v17245_v16 = vld [vmem:[%s25557_s4 + $0x1e0] sm:$0xff]  }
 0x141   : > { %v18379_v28 = vsel %vm18349_vm12, %v16041_v20, %v2381_v21  ;;  %v2319_v30 = vrot.slane %v2317_v24, 4  ;;  %v2331_v33 = vshrl.u32 %v16034_v25, 16  ;;  %v2334_v37 = vshll.u32 %v16034_v25, 16  ;;  %v17244_v20 = vld [vmem:[%s25557_s4 + $0x130] sm:$0xff]   ;;  %v17246_v21 = vld [vmem:[%s25557_s4 + $0x1a0] sm:$0xff]  }
 0x142   : > { %v16053_v12 = vcombine.low %v18365_v54, %v18379_v28  ;;  %v2322_v31 = vrot.slane %v2320_v26, 5  ;;  %v16042_v38 = vrot.slane %v16034_v25, 9  ;;  %v2385_v40 = vrot.slane %v16035_v27, 5  ;;  %v17247_v26 = vld [vmem:[%s25557_s4 + $0x168] sm:$0xff]  }
 0x143   : > { %v2333_v42 = vrot.slane %v2331_v33, 4  ;;  %v2336_v43 = vrot.slane %v2334_v37, 5  ;;  %v2340_v44 = vshll.u32 %v16035_v27, 16  ;;  %v2328_v48 = vrot.slane %v2326_v32, 5  ;;  %v17249_v27 = vld [vmem:[%s25557_s4 + $0x1d8] sm:$0xff]  }
 0x144   : > { %3129 = vmatmul.mubr.bf16.vlgmr.msra.gmra.mxu1 %v16053_v12  ;;  %v2323_v41 = vor.u32 %v2322_v31, %v2319_v30  ;;  %v18406_v56 = vsel %vm18349_vm12, %v16042_v38, %v2385_v40  ;;  %v1688_v24 = vrot.slane %v18317_v1, %v18230_v4  ;;  %v1600_v30 = vrot.slane %v18303_v53, %v18240_v14 }
 0x145   : > { %3136 = vmatprep.mubr.bf16.mxu1 %v16034_v25  ;;  %16596 = vmatpush3.bf16.msra.mxu1 %v17236_v58  ;;  %v2337_v50 = vor.u32 %v2336_v43, %v2333_v42  ;;  %v2342_v63 = vrot.slane %v2340_v44, 5  ;;  %v18424_v7 = vcombine.low %v18379_v28, %v18406_v56  ;;  %v1592_v25 = vrot.slane %v18303_v53, %v18237_v11  ;;  %v17250_v53 = vld [vmem:[%s25557_s4 + $0x198] sm:$0xff]  }
 0x146   : > { %v2324_v47 = vrot.slane %v2323_v41, 4  ;;  %16597 = vmatprep.subr.bf16.mxu1 %v17237_v34  ;;  %v1692_v12 = vrot.slane %v18317_v1, %v18237_v11  ;;  %v1700_v33 = vrot.slane %v18317_v1, %v18240_v14  ;;  %v18478_v11 = vcombine.low %v18357_v51, %v18371_v22  ;;  %v17251_v14 = vld [vmem:[%s25557_s4 + $0x160] sm:$0xff]   ;;  %v17253_v1 = vld [vmem:[%s25557_s4 + $0x1d0] sm:$0xff]  }
 0x147   : > { %v2338_v62 = vrot.slane %v2337_v50, 4  ;;  %v17254_v50 = vld [vmem:[%s25557_s4 + $0x190] sm:$0xff]  }
 0x148   : > { %v18410_v60 = vsel %vm18390_vm15, %v2324_v47, %v2328_v48 }
 0x149   : > { %v16049_v61 = vcombine.low %v18399_v46, %v18410_v60  ;;  %16598 = vmatpush3.bf16.msra.mxu1 %v17238_v45  ;;  %v18431_v15 = vsel %vm18390_vm15, %v2338_v62, %v2342_v63  ;;  %v16057_v36 = vcombine.low %v18410_v60, %v18410_v60 }
 0x14a   : > { %16599 = vmatprep.subr.bf16.mxu1 %v17241_v49  ;;  %v18438_v17 = vcombine.low %v18410_v60, %v18431_v15  ;;  %v17252_v49 = vld [vmem:[%s25557_s4 + $0x120] sm:$0xff]   ;;  %v16058_v60 = vcombine.low %v18431_v15, %v18431_v15 }
 0x14b   : > { %3063 = vmatprep.mubr.bf16.mxu0 %v16049_v61 }
 0x14c   : > { %3064 = vmatmul.mubr.bf16.vlgmr.msra.gmra.mxu0 %v16045_v5  ;;  %3137 = vmatmul.mubr.bf16.gmra.mxu1 %v18424_v7 }
 0x14d   : > { %16556 = vmatpush3.bf16.msra.mxu0 %v17240_v2  ;;  %16600 = vmatpush3.bf16.msra.mxu1 %v17242_v3  ;;  %v17255_v2 = vld [vmem:[%s25557_s4 + $0x158] sm:$0xff]   ;;  %v17257_v3 = vld [vmem:[%s25557_s4 + $0x1c8] sm:$0xff]  }
 0x14e   : > { %3071 = vmatprep.mubr.bf16.mxu0 %v18438_v17  ;;  %16557 = vmatprep.subr.bf16.mxu0 %v17243_v10 }
 0x14f   : > { %v1485_v52 = vpop.f32.mrf.mxu0  ;;  %16601 = vmatprep.subr.bf16.mxu1 %v17245_v16  ;;  %v1526_v58 = vpop.f32.mrf.mxu1 }
 0x150   : > { %v1629_v4 = vmul.f32 %v1588_v18, %v1485_v52  ;;  %v1631_v31 = vmul.f32 %v1596_v19, %v1526_v58  ;;  %v17258_v18 = vld [vmem:[%s25557_s4 + $0x188] sm:$0xff]   ;;  %v17260_v52 = vld [vmem:[%s25557_s4 + $0x110] sm:$0xff]  }
 0x151   : > { %v1487_v32 = vpop.f32.mrf.mxu0  ;;  %16558 = vmatpush3.bf16.msra.mxu0 %v17244_v20  ;;  %16602 = vmatpush3.bf16.msra.mxu1 %v17246_v21  ;;  %v1528_v38 = vpop.f32.mrf.mxu1  ;;  %v17259_v20 = vld [vmem:[%s25557_s4 + $0x150] sm:$0xff]   ;;  %v17261_v21 = vld [vmem:[%s25557_s4 + $0x1c0] sm:$0xff]  }
 0x152   : > { %v1729_v34 = vadd.f32 %v1688_v24, %v1629_v4  ;;  %v1630_v37 = vmul.f32 %v1592_v25, %v1487_v32  ;;  %16559 = vmatprep.subr.bf16.mxu0 %v17247_v26  ;;  %16603 = vmatprep.subr.bf16.mxu1 %v17249_v27  ;;  %v1731_v40 = vadd.f32 %v1696_v29, %v1631_v31  ;;  %v17262_v29 = vld [vmem:[%s25557_s4 + $0x180] sm:$0xff]  }
 0x153   : > { %v1632_v41 = vmul.f32 %v1600_v30, %v1528_v38  ;;  %v1489_v42 = vpop.f32.mrf.mxu0  ;;  %v1530_v45 = vpop.f32.mrf.mxu1  ;;  %v17263_v30 = vld [vmem:[%s25557_s4 + $0x148] sm:$0xff]  }
 0x154   : > { %v1764_v43 = vrot.slane %v1729_v34, 4  ;;  %v1730_v44 = vadd.f32 %v1692_v12, %v1630_v37  ;;  %3072 = vmatmul.mubr.bf16.gmra.mxu0 %v18478_v11  ;;  %v1770_v51 = vrot.slane %v1731_v40, 2  ;;  %v17265_v37 = vld [vmem:[%s25557_s4 + $0x140] sm:$0xff]  }
 0x155   : > { %v1732_v47 = vadd.f32 %v1700_v33, %v1632_v41  ;;  %v1490_v48 = vpop.f32.mrf.mxu0  ;;  %16560 = vmatpush3.bf16.msra.mxu0 %v17248_v9  ;;  %16604 = vmatpush3.bf16.msra.mxu1 %v17250_v53  ;;  %v1531_v63 = vpop.f32.mrf.mxu1  ;;  %v17264_v53 = vld [vmem:[%s25557_s4 + $0x108] sm:$0xff]  }
 0x156   : > { %v1792_v61 = vsel %vm1781_vm3, %v18346_v0, %v1764_v43  ;;  %v1767_v62 = vrot.slane %v1730_v44, 3  ;;  %16561 = vmatprep.subr.bf16.mxu0 %v17251_v14  ;;  %16605 = vmatprep.subr.bf16.mxu1 %v17253_v1  ;;  %v17256_v0 = vld [vmem:[%s25557_s4 + $0x118] sm:$0xff]   ;;  %v17266_v48 = vld [vmem:[%s25557_s4 + $0x100] sm:$0xff]   ;;  %vm13455_vm3 = vcmask 785408  }
 0x157   : > { %v1773_v10 = vrot.slane %v1732_v47, 1  ;;  %v18547_v63 = vld [vmem:[%s25557_s4 + $0x238] sm:$0xff]  }
 0x158   : > { %v1793_v5 = vsel %vm1783_vm4, %v1792_v61, %v1767_v62  ;;  %vm15706_vm4 = vcmask 23552  }
 0x159   : > { %v1794_v16 = vsel %vm1785_vm5, %v1793_v5, %v1770_v51  ;;  %16562 = vmatpush3.bf16.msra.mxu0 %v17252_v49  ;;  %16606 = vmatpush3.bf16.msra.mxu1 %v17254_v50 }
 0x15a   : > { %v1795_v19 = vsel %vm1787_vm6, %v1794_v16, %v1773_v10  ;;  %16563 = vmatprep.subr.bf16.mxu0 %v17255_v2  ;;  %16607 = vmatprep.subr.bf16.mxu1 %v17257_v3 }
 0x15b   : > { %v1799_v24 = vcombine.high %v1795_v19, %v1795_v19  ;;  %v1804_v25 = vpack.c.bf16 %v1795_v19, %v1795_v19 }
 0x15d   : > { %v1805_v26 = vpack.c.bf16 %v1799_v24, %v1799_v24  ;;  %v1860_v27 = vrot.slane %v1804_v25, %v18256_v59  ;;  %16564 = vmatpush3.bf16.msra.mxu0 %v17256_v0  ;;  %16608 = vmatpush3.bf16.msra.mxu1 %v17258_v18 }
 0x15e   : > { %16565 = vmatprep.subr.bf16.mxu0 %v17259_v20  ;;  %16609 = vmatprep.subr.bf16.mxu1 %v17261_v21 }
 0x15f   : > { %v1861_v4 = vcombine.high %v1860_v27, %v1860_v27  ;;  %v1868_v58 = vrot.slane %v1860_v27, %v18256_v59  ;;  %v1882_v12 = vrot.slane %v1805_v26, %v18256_v59 }
 0x161   : > { %v1875_v31 = vrot.slane %v1861_v4, %v18256_v59  ;;  %v1883_v32 = vcombine.high %v1882_v12, %v1882_v12  ;;  %v1890_v33 = vrot.slane %v1882_v12, %v18256_v59  ;;  %v1907_v9 = vunpack.i.h.s16 %v1868_v58  ;;  %16566 = vmatpush3.bf16.msra.mxu0 %v17260_v52  ;;  %16610 = vmatpush3.bf16.msra.mxu1 %v17262_v29 }
 0x162   : > { %v16026_v34 = vpack.i.b16 %v1868_v58, %v1868_v58  ;;  %16567 = vmatprep.subr.bf16.mxu0 %v17263_v30 }
 0x163   : > { %v1897_v38 = vrot.slane %v1883_v32, %v18256_v59  ;;  %v1909_v14 = vunpack.i.h.s16 %v1875_v31  ;;  %v1911_v1 = vunpack.i.h.s16 %v1890_v33  ;;  %v1923_v40 = vpack.i.b16 %v1907_v9, %v1907_v9 }
 0x164   : > { %v16027_v41 = vpack.i.b16 %v1875_v31, %v1875_v31  ;;  %v16028_v42 = vpack.i.b16 %v1890_v33, %v1890_v33  ;;  %v1965_v43 = vrot.slane %v16026_v34, %v18218_v57 }
 0x165   : > { %v1913_v44 = vunpack.i.h.s16 %v1897_v38  ;;  %v1925_v45 = vpack.i.b16 %v1909_v14, %v1909_v14  ;;  %v1927_v51 = vpack.i.b16 %v1911_v1, %v1911_v1  ;;  %v16029_v47 = vpack.i.b16 %v1897_v38, %v1897_v38  ;;  %16568 = vmatpush3.bf16.msra.mxu0 %v17264_v53 }
 0x166   : > { %v1969_v49 = vrot.slane %v1923_v40, %v18218_v57  ;;  %v1973_v50 = vrot.slane %v16027_v41, %v18218_v57  ;;  %v1981_v61 = vrot.slane %v16028_v42, %v18218_v57  ;;  %v2051_v62 = vpack.i.b16 %v1965_v43, %v1965_v43  ;;  %16569 = vmatprep.subr.bf16.mxu0 %v17265_v37 }
 0x167   : > { %v1929_v2 = vpack.i.b16 %v1913_v44, %v1913_v44  ;;  %v1977_v3 = vrot.slane %v1925_v45, %v18218_v57  ;;  %v1985_v5 = vrot.slane %v1927_v51, %v18218_v57  ;;  %v1989_v10 = vrot.slane %v16029_v47, %v18218_v57 }
 0x168   : > { %v2058_v16 = vpack.i.b16 %v1969_v49, %v1969_v49  ;;  %v2065_v0 = vpack.i.b16 %v1973_v50, %v1973_v50  ;;  %v2079_v18 = vpack.i.b16 %v1981_v61, %v1981_v61  ;;  %v2056_v25 = vrot.slane %v2051_v62, %v18218_v57 }
 0x169   : > { %v1993_v19 = vrot.slane %v1929_v2, %v18218_v57  ;;  %v2072_v20 = vpack.i.b16 %v1977_v3, %v1977_v3  ;;  %v2086_v21 = vpack.i.b16 %v1985_v5, %v1985_v5  ;;  %v2093_v24 = vpack.i.b16 %v1989_v10, %v1989_v10  ;;  %16570 = vmatpush3.bf16.msra.mxu0 %v17266_v48 }
 0x16a   : > { %v2063_v26 = vrot.slane %v2058_v16, %v18218_v57  ;;  %v2070_v27 = vrot.slane %v2065_v0, %v18218_v57  ;;  %16957 = vmatprep.subr.bf16.mxu0 %v18547_v63  ;;  %v2084_v29 = vrot.slane %v2079_v18, %v18218_v57 }
 0x16b   : > { %v2077_v52 = vrot.slane %v2072_v20, %v18218_v57  ;;  %v2091_v30 = vrot.slane %v2086_v21, %v18218_v57  ;;  %v2100_v4 = vpack.i.b16 %v1993_v19, %v1993_v19  ;;  %v2098_v12 = vrot.slane %v2093_v24, %v18218_v57 }
 0x16c   : > { %v2170_v58 = vcombine.low %v2056_v25, %v2063_v26 }
 0x16d   : > { %v2105_v31 = vrot.slane %v2100_v4, %v18218_v57  ;;  %v2171_v32 = vcombine.low %v2070_v27, %v2077_v52  ;;  %v2194_v33 = vcombine.low %v2084_v29, %v2091_v30 }
 0x16e   : > { %v2178_v53 = vrot.slane %v2170_v58, %v18256_v59 }
 0x16f   : > { %v2195_v9 = vcombine.low %v2098_v12, %v2105_v31  ;;  %v2185_v34 = vrot.slane %v2171_v32, %v18256_v59  ;;  %v2202_v38 = vrot.slane %v2194_v33, %v18256_v59 }
 0x171   : > { %v2186_v37 = vcombine.low %v2178_v53, %v2185_v34  ;;  %v2209_v14 = vrot.slane %v2195_v9, %v18256_v59 }
 0x173   : > { %v2193_v1 = vrot.slane %v2186_v37, %v18256_v59  ;;  %v2210_v40 = vcombine.low %v2202_v38, %v2209_v14 }
 0x175   : > { %v2240_v41 = vshrl.u32 %v2193_v1, 16  ;;  %v2217_v42 = vrot.slane %v2210_v40, %v18256_v59  ;;  %v2243_v44 = vshll.u32 %v2193_v1, 16 }
 0x177   : > { %v2242_v43 = vrot.slane %v2240_v41, 7  ;;  %v2247_v45 = vshrl.u32 %v2217_v42, 16  ;;  %v2250_v48 = vshll.u32 %v2217_v42, 16  ;;  %v16061_v42 = vcombine.low %v18379_v28, %v18379_v28  ;;  %v17269_v28 = vld [vmem:[%s25557_s4 + $0x228] sm:$0xff]  }
 0x179   : > { %v2245_v51 = vor.u32 %v2243_v44, %v2242_v43  ;;  %v2249_v47 = vrot.slane %v2247_v45, 7  ;;  %v17268_v43 = vld [vmem:[%s25557_s4 + $0x230] sm:$0xff]   ;;  %v17271_v44 = vld [vmem:[%s25557_s4 + $0x218] sm:$0xff]  }
 0x17b   : > { %v2264_v49 = vsel %vm18272_vm9, 0, %v2245_v51  ;;  %v2252_v50 = vor.u32 %v2250_v48, %v2249_v47  ;;  %v17272_v51 = vld [vmem:[%s25557_s4 + $0x210] sm:$0xff]   ;;  %v17273_v47 = vld [vmem:[%s25557_s4 + $0x208] sm:$0xff]  }
 0x17c   : > { %v2272_v61 = vsel %vm18289_vm10, %v2264_v49, 0 }
 0x17d   : > { %v16036_v62 = vcombine.low %v2272_v61, %v2272_v61  ;;  %v16037_v2 = vcombine.high %v2272_v61, %v2272_v61  ;;  %v2265_v3 = vsel %vm18272_vm9, 0, %v2252_v50  ;;  %v16047_v5 = vcombine.low %v18371_v22, %v2272_v61 }
 0x17e   : > { %v18577_v10 = vsel %vm18289_vm10, %v2265_v3, 0 }
 0x17f   : > { %3144 = vmatprep.mubr.bf16.mxu1 %v16036_v62  ;;  %v16043_v16 = vrot.slane %v16036_v62, 9  ;;  %v2389_v0 = vrot.slane %v16037_v2, 5  ;;  %v16038_v18 = vcombine.low %v18577_v10, %v18577_v10  ;;  %v2345_v19 = vshrl.u32 %v16036_v62, 16 }
 0x180   : > { %v2348_v20 = vshll.u32 %v16036_v62, 16  ;;  %v16039_v21 = vcombine.high %v18577_v10, %v18577_v10  ;;  %v2354_v52 = vshll.u32 %v16037_v2, 16  ;;  %v16048_v6 = vcombine.low %v2272_v61, %v18577_v10 }
 0x181   : > { %v2390_v24 = vsel %vm18349_vm12, %v16043_v16, %v2389_v0  ;;  %v2347_v25 = vrot.slane %v2345_v19, 4  ;;  %v2359_v22 = vshrl.u32 %v16038_v18, 16  ;;  %v2362_v26 = vshll.u32 %v16038_v18, 16 }
 0x182   : > { %v18586_v39 = vcombine.low %v18406_v56, %v2390_v24  ;;  %v2350_v27 = vrot.slane %v2348_v20, 5  ;;  %v2368_v29 = vshll.u32 %v16039_v21, 16  ;;  %v16044_v58 = vrot.slane %v16038_v18, 9 }
 0x183   : > { %v2361_v30 = vrot.slane %v2359_v22, 4  ;;  %v2364_v4 = vrot.slane %v2362_v26, 5  ;;  %v2393_v12 = vrot.slane %v16039_v21, 5  ;;  %v2356_v9 = vrot.slane %v2354_v52, 5 }
 0x184   : > { %3145 = vmatmul.mubr.bf16.gmra.mxu1 %v18586_v39  ;;  %v2351_v31 = vor.u32 %v2350_v27, %v2347_v25  ;;  %v2370_v34 = vrot.slane %v2368_v29, 5  ;;  %v16065_v45 = vcombine.low %v18577_v10, %v18308_v55  ;;  %v17274_v55 = vld [vmem:[%s25557_s4 + $0x200] sm:$0xff]  }
 0x185   : > { %3152 = vmatprep.mubr.bf16.mxu1 %v16038_v18  ;;  %v2365_v32 = vor.u32 %v2364_v4, %v2361_v30  ;;  %v18591_v37 = vsel %vm18349_vm12, %v16044_v58, %v2393_v12 }
 0x186   : > { %v2352_v33 = vrot.slane %v2351_v31, 4  ;;  %v16056_v41 = vcombine.low %v2390_v24, %v18591_v37  ;;  %v16067_v49 = vcombine.low %v18591_v37, %v18365_v54 }
 0x187   : > { %v2366_v53 = vrot.slane %v2365_v32, 4 }
 0x188   : > { %v2357_v38 = vsel %vm18390_vm15, %v2352_v33, %v2356_v9 }
 0x189   : > { %v16051_v14 = vcombine.low %v18431_v15, %v2357_v38  ;;  %v2371_v1 = vsel %vm18390_vm15, %v2366_v53, %v2370_v34  ;;  %v16059_v15 = vcombine.low %v2357_v38, %v2357_v38 }
 0x18a   : > { %v16052_v40 = vcombine.low %v2357_v38, %v2371_v1  ;;  %v16060_v48 = vcombine.low %v2371_v1, %v2371_v1 }
 0x18b   : > { %3079 = vmatprep.mubr.bf16.mxu0 %v16051_v14 }
 0x18c   : > { %3080 = vmatmul.mubr.bf16.gmra.mxu0 %v16047_v5  ;;  %3153 = vmatmul.mubr.bf16.gmra.mxu1 %v16056_v41 }
 0x18d   : > { %3087 = vmatprep.mubr.bf16.mxu0 %v16052_v40  ;;  %3258 = vmatprep.mubr.bf16.mxu1 %v18438_v17  ;;  %v16062_v17 = vcombine.low %v18406_v56, %v18406_v56  ;;  %v17270_v56 = vld [vmem:[%s25557_s4 + $0x220] sm:$0xff]  }
 0x194   : > { %3088 = vmatmul.mubr.bf16.gmra.mxu0 %v16048_v6  ;;  %3259 = vmatmul.mubr.bf16.vlgmr.msra.gmra.mxu1 %v18478_v11  ;;  %v16063_v11 = vcombine.low %v2390_v24, %v2390_v24 }
 0x195   : > { %3193 = vmatprep.mubr.bf16.mxu0 %v16061_v42  ;;  %3266 = vmatprep.mubr.bf16.mxu1 %v16051_v14 }
 0x19c   : > { %3194 = vmatmul.mubr.bf16.vlgmr.msra.gmra.mxu0 %v16057_v36  ;;  %3267 = vmatmul.mubr.bf16.gmra.mxu1 %v16047_v5 }
 0x19d   : > { %16958 = vmatpush3.bf16.msra.mxu0 %v18547_v63  ;;  %3201 = vmatprep.mubr.bf16.mxu0 %v16062_v17  ;;  %v16066_v63 = vcombine.low %v2371_v1, %v18399_v46  ;;  %v16064_v46 = vcombine.low %v18591_v37, %v18591_v37 }
 0x19e   : > { %3274 = vmatprep.mubr.bf16.mxu1 %v16052_v40  ;;  %16959 = vmatprep.subr.bf16.mxu0 %v17268_v43 }
 0x1a1   : > { %16960 = vmatpush3.bf16.msra.mxu0 %v17268_v43 }
 0x1a2   : > { %16961 = vmatprep.subr.bf16.mxu0 %v17269_v28 }
 0x1a4   : > { %3202 = vmatmul.mubr.bf16.gmra.mxu0 %v16058_v60  ;;  %3275 = vmatmul.mubr.bf16.gmra.mxu1 %v16048_v6 }
 0x1a5   : > { %16962 = vmatpush3.bf16.msra.mxu0 %v17269_v28  ;;  %3209 = vmatprep.mubr.bf16.mxu0 %v16063_v11 }
 0x1a6   : > { %3282 = vmatprep.mubr.bf16.mxu1 %v16066_v63  ;;  %16963 = vmatprep.subr.bf16.mxu0 %v17270_v56 }
 0x1a9   : > { %16964 = vmatpush3.bf16.msra.mxu0 %v17270_v56 }
 0x1aa   : > { %16965 = vmatprep.subr.bf16.mxu0 %v17271_v44 }
 0x1ac   : > { %3210 = vmatmul.mubr.bf16.gmra.mxu0 %v16059_v15  ;;  %3283 = vmatmul.mubr.bf16.gmra.mxu1 %v16065_v45 }
 0x1ad   : > { %16966 = vmatpush3.bf16.msra.mxu0 %v17271_v44  ;;  %3217 = vmatprep.mubr.bf16.mxu0 %v16064_v46 }
 0x1ae   : > { %16967 = vmatprep.subr.bf16.mxu0 %v17272_v51 }
 0x1b1   : > { %16968 = vmatpush3.bf16.msra.mxu0 %v17272_v51 }
 0x1b2   : > { %16969 = vmatprep.subr.bf16.mxu0 %v17273_v47 }
 0x1b4   : > { %3218 = vmatmul.mubr.bf16.gmra.mxu0 %v16060_v48 }
 0x1b5   : > { %16970 = vmatpush3.bf16.msra.mxu0 %v17273_v47  ;;  %16973 = vmatprep.mubr.bf16.mxu0 %v18424_v7 }
 0x1b6   : > { %16971 = vmatprep.subr.bf16.mxu0 %v17274_v55 }
 0x1b9   : > { %16972 = vmatpush3.bf16.msra.mxu0 %v17274_v55 }
 0x1bc   : > { %16974 = vmatmul.mubr.bf16.vlgmr.msra.gmra.mxu0 %v18586_v39 }
 0x1bd   : > { %16977 = vmatprep.mubr.bf16.mxu0 %v16056_v41 }
 0x1c4   : > { %16978 = vmatmul.mubr.bf16.gmra.mxu0 %v16067_v49 }
 0x204   : > { %v16531_v50 = vpop.f32.mrf.mxu1 }
 0x206   : > { %v16532_v61 = vpop.f32.mrf.mxu1 }
 0x207   : > { %v16533_v8 = vadd.f32 %v16532_v61, %v16531_v50 }
 0x208   : > { %v18641_v62 = vpop.f32.mrf.mxu1 }
 0x20a   : > { %v18643_v3 = vpop.f32.mrf.mxu1 }
 0x20c   : > { %v16491_v2 = vpop.f32.mrf.mxu0  ;;  %v16537_v10 = vpop.f32.mrf.mxu1 }
 0x20e   : > { %v16492_v5 = vpop.f32.mrf.mxu0  ;;  %v16538_v7 = vpop.f32.mrf.mxu1 }
 0x210   : > { %v16494_v16 = vpop.f32.mrf.mxu0  ;;  %v16540_v18 = vpop.f32.mrf.mxu1 }
 0x212   : > { %v16495_v0 = vpop.f32.mrf.mxu0  ;;  %v16541_v20 = vpop.f32.mrf.mxu1 }
 0x214   : > { %v16497_v19 = vpop.f32.mrf.mxu0 }
 0x216   : > { %v16498_v21 = vpop.f32.mrf.mxu0 }
 0x217   : > { %v16499_v48 = vadd.f32 %v16498_v21, %v16497_v19  ;;  %v16536_v21 = vadd.f32 %v18643_v3, %v18641_v62 }
 0x218   : > { %v16500_v54 = vpop.f32.mrf.mxu0 }
 0x21a   : > { %v16501_v26 = vpop.f32.mrf.mxu0 }
 0x21b   : > { %v16502_v59 = vadd.f32 %v16501_v26, %v16500_v54 }
 0x244   : > { %v18645_v24 = vpop.f32.mrf.mxu1 }
 0x246   : > { %v18647_v25 = vpop.f32.mrf.mxu1 }
 0x247   : > { %v16545_v54 = vadd.f32 %v18647_v25, %v18645_v24  ;;  %v4992_v24 = vshll.u32 %v18285_v35, 16 }
 0x248   : > { %v18649_v22 = vpop.f32.mrf.mxu1 }
 0x24a   : > { %v18651_v39 = vpop.f32.mrf.mxu1 }
 0x24c   : > { %v16503_v27 = vpop.f32.mrf.mxu0  ;;  %v18653_v52 = vpop.f32.mrf.mxu1 }
 0x24e   : > { %v16504_v29 = vpop.f32.mrf.mxu0  ;;  %v16550_v30 = vpop.f32.mrf.mxu1 }
 0x24f   : > { %v18655_v4 = vadd.f32 %v16504_v29, %v16503_v27  ;;  %v16493_v27 = vadd.f32 %v16492_v5, %v16491_v2  ;;  %v16539_v29 = vadd.f32 %v16538_v7, %v16537_v10 }
 0x250   : > { %v18657_v58 = vpop.f32.mrf.mxu0  ;;  %v18659_v12 = vpop.f32.mrf.mxu1 }
 0x251   : > { %v3139_v57 = vadd.f32 %v16539_v29, %v16499_v48  ;;  %v3147_v62 = vadd.f32 %v16545_v54, %v18655_v4 }
 0x252   : > { %v18661_v31 = vpop.f32.mrf.mxu0  ;;  %v18663_v32 = vpop.f32.mrf.mxu1 }
 0x253   : > { %v16554_v4 = vadd.f32 %v18663_v32, %v18659_v12  ;;  %v4990_v32 = vshrl.u32 %v18285_v35, 16 }
 0x254   : > { %v16509_v33 = vpop.f32.mrf.mxu0  ;;  %v16611_v9 = vpop.f32.mrf.mxu1 }
 0x256   : > { %v16510_v53 = vpop.f32.mrf.mxu0  ;;  %v16612_v34 = vpop.f32.mrf.mxu1 }
 0x257   : > { %v18665_v37 = vadd.f32 %v16510_v53, %v16509_v33 }
 0x258   : > { %v18667_v38 = vpop.f32.mrf.mxu0  ;;  %v18669_v14 = vpop.f32.mrf.mxu1 }
 0x259   : > { %25799 = vst [vmem:[#allocation7_spill] sm:$0xff] %v18669_v14  ;;  %v16542_v14 = vadd.f32 %v16541_v20, %v16540_v18 }
 0x25a   : > { %v18671_v1 = vpop.f32.mrf.mxu0  ;;  %v18673_v40 = vpop.f32.mrf.mxu1 }
 0x25b   : > { %25800 = vst [vmem:[#allocation8_spill] sm:$0xff] %v18673_v40  ;;  %v3142_v2 = vadd.f32 %v16542_v14, %v16502_v59  ;;  %v18702_v14 = vld [vmem:[%s25558_s5] ss:$0 sm:$0xff] }
 0x25c   : > { %v16571_v41 = vpop.f32.mrf.mxu0  ;;  %v16617_v6 = vpop.f32.mrf.mxu1 }
 0x25e   : > { %v16572_v42 = vpop.f32.mrf.mxu0  ;;  %v16618_v36 = vpop.f32.mrf.mxu1 }
 0x25f   : > { %v16619_v10 = vadd.f32 %v16618_v36, %v16617_v6 }
 0x260   : > { %v16574_v43 = vpop.f32.mrf.mxu0  ;;  %v16620_v17 = vpop.f32.mrf.mxu1 }
 0x262   : > { %v16575_v28 = vpop.f32.mrf.mxu0  ;;  %v16621_v56 = vpop.f32.mrf.mxu1  ;;  %v25809_v36 = vld [vmem:[#allocation8_spill] sm:$0xff] }
 0x263   : > { %v16576_v7 = vadd.f32 %v16575_v28, %v16574_v43  ;;  %v16622_v59 = vadd.f32 %v16621_v56, %v16620_v17 }
 0x264   : > { %v16577_v60 = vpop.f32.mrf.mxu0  ;;  %v18675_v44 = vpop.f32.mrf.mxu1 }
 0x265   : > { %25801 = vst [vmem:[#allocation9_spill] sm:$0xff] %v18675_v44  ;;  %v16573_v44 = vadd.f32 %v16572_v42, %v16571_v41  ;;  %v25808_v42 = vld [vmem:[#allocation7_spill] sm:$0xff] }
 0x266   : > { %v16578_v11 = vpop.f32.mrf.mxu0  ;;  %v18679_v51 = vpop.f32.mrf.mxu1  ;;  %v16616_v43 = vadd.f32 %v25809_v36, %v25808_v42 }
 0x267   : > { %25803 = vst [vmem:[#allocation11_spill] sm:$0xff] %v18679_v51  ;;  %v16579_v33 = vadd.f32 %v16578_v11, %v16577_v60  ;;  %v16496_v51 = vadd.f32 %v16495_v0, %v16494_v16  ;;  %v16548_v16 = vadd.f32 %v18651_v39, %v18649_v22  ;;  %v16613_v0 = vadd.f32 %v16612_v34, %v16611_v9 }
 0x268   : > { %v16580_v63 = vpop.f32.mrf.mxu0  ;;  %v18685_v55 = vpop.f32.mrf.mxu1  ;;  %v16514_v34 = vadd.f32 %v18671_v1, %v18667_v38 }
 0x269   : > { %25806 = vst [vmem:[#allocation14_spill] sm:$0xff] %v18685_v55  ;;  %v3134_v61 = vadd.f32 %v16536_v21, %v16496_v51 }
 0x26a   : > { %v16581_v15 = vpop.f32.mrf.mxu0 }
 0x26b   : > { %v16582_v19 = vadd.f32 %v16581_v15, %v16580_v63  ;;  %v3199_v25 = vadd.f32 %v16576_v7, %v3134_v61 }
 0x26c   : > { %v18677_v45 = vpop.f32.mrf.mxu0 }
 0x26d   : > { %25802 = vst [vmem:[#allocation10_spill] sm:$0xff] %v18677_v45  ;;  %v18689_v45 = vpop.f32.mrf.mxu1  ;;  %v3207_v18 = vadd.f32 %v16582_v19, %v3142_v2  ;;  %v3264_v63 = vadd.f32 %v16616_v43, %v3199_v25  ;;  %v25817_v25 = vld [vmem:[#allocation3_spill] sm:$0xff] }
 0x26e   : > { %v18681_v46 = vpop.f32.mrf.mxu0 }
 0x26f   : > { %25804 = vst [vmem:[#allocation12_spill] sm:$0xff] %v18681_v46  ;;  %v3131_v46 = vadd.f32 %v16533_v8, %v16493_v27  ;;  %v16629_v50 = vpop.f32.mrf.mxu1 }
 0x270   : > { %v18683_v47 = vpop.f32.mrf.mxu0 }
 0x271   : > { %25805 = vst [vmem:[#allocation13_spill] sm:$0xff] %v18683_v47  ;;  %v3204_v47 = vadd.f32 %v16579_v33, %v3139_v57  ;;  %v3196_v5 = vadd.f32 %v16573_v44, %v3131_v46  ;;  %v16551_v57 = vadd.f32 %v16550_v30, %v18653_v52  ;;  %v16630_v22 = vpop.f32.mrf.mxu1  ;;  %v18708_v52 = vsel %vm18272_vm9, %v18266_v13, 0 }
 0x272   : > { %v18687_v49 = vpop.f32.mrf.mxu0  ;;  %25807 = vst [vmem:[#allocation15_spill] sm:$0xff] %v18708_v52  ;;  %v16508_v30 = vadd.f32 %v18661_v31, %v18657_v58  ;;  %v3272_v31 = vadd.f32 %v16622_v59, %v3207_v18  ;;  %v4997_v38 = vshll.u32 %v18708_v52, 16  ;;  %v3158_v44 = vadd.f32 %v16554_v4, %v16514_v34 }
 0x273   : > { %v3269_v20 = vadd.f32 %v16619_v10, %v3204_v47  ;;  %v3261_v41 = vadd.f32 %v16613_v0, %v3196_v5  ;;  %v3155_v9 = vadd.f32 %v16551_v57, %v18665_v37  ;;  %v4994_v37 = vrot.slane %v4992_v24, 1  ;;  %v16632_v1 = vpop.f32.mrf.mxu1 }
 0x274   : > { %v16589_v53 = vpop.f32.mrf.mxu0  ;;  %v25810_v15 = vld [vmem:[#allocation10_spill] sm:$0xff]  ;;  %v16631_v47 = vadd.f32 %v16630_v22, %v16629_v50  ;;  %v18735_v10 = vrot.slane %v4997_v38, 1  ;;  %v3150_v59 = vadd.f32 %v16548_v16, %v16508_v30 }
 0x275   : > { %v18733_v5 = vor.u32 %v4994_v37, %v4990_v32  ;;  %v16633_v7 = vpop.f32.mrf.mxu1 }
 0x276   : > { %v16590_v40 = vpop.f32.mrf.mxu0  ;;  %v25811_v51 = vld [vmem:[#allocation12_spill] sm:$0xff]  ;;  %25813 = vst [vmem:[#allocation8_spill] sm:$0xff] %v18735_v10 }
 0x277   : > { %v16591_v3 = vadd.f32 %v16590_v40, %v16589_v53  ;;  %v18720_v40 = vld [vmem:[%s25559_s6] ss:$0 sm:$0xff]  ;;  %v16585_v46 = vadd.f32 %v25811_v51, %v25810_v15  ;;  %25812 = vst [vmem:[#allocation7_spill] sm:$0xff] %v18733_v5  ;;  %v18752_v16 = vsel %vm4988_vm0, %v18733_v5, %v18735_v10 }
 0x278   : > { %v16592_v55 = vpop.f32.mrf.mxu0  ;;  %v25814_v57 = vld [vmem:[#allocation13_spill] sm:$0xff]  ;;  %v25819_v51 = vld [vmem:[#allocation2_spill] sm:$0xff] }
 0x279   : > { %v3220_v28 = vadd.f32 %v16591_v3, %v3155_v9  ;;  %v16588_v0 = vadd.f32 %v18687_v49, %v25814_v57  ;;  %v25815_v3 = vld [vmem:[#allocation9_spill] sm:$0xff]  ;;  %v16634_v9 = vadd.f32 %v16633_v7, %v16632_v1 }
 0x27a   : > { %v16593_v8 = vpop.f32.mrf.mxu0 }
 0x27b   : > { %v16594_v48 = vadd.f32 %v16593_v8, %v16592_v55  ;;  %v3285_v21 = vadd.f32 %v16631_v47, %v3220_v28  ;;  %v3212_v8 = vadd.f32 %v16585_v46, %v3147_v62  ;;  %v3215_v30 = vadd.f32 %v16588_v0, %v3150_v59 }
 0x27c   : > { %v16975_v26 = vpop.f32.mrf.mxu0 }
 0x27d   : > { %v3334_v39 = vadd.f32 %v16975_v26, %v3269_v20  ;;  %v3223_v18 = vadd.f32 %v16594_v48, %v3158_v44  ;;  %v25816_v26 = vld [vmem:[#allocation11_spill] sm:$0xff] }
 0x27e   : > { %v3325_v6 = vpop.f32.mrf.mxu0  ;;  %v16625_v24 = vadd.f32 %v25816_v26, %v25815_v3 }
 0x27f   : > { %v3365_v17 = vmul.f32 %v18702_v14, %v3334_v39  ;;  %v3326_v58 = vadd.f32 %v3325_v6, %v3261_v41  ;;  %v25818_v41 = vld [vmem:[#allocation14_spill] sm:$0xff] }
 0x280   : > { %v16976_v12 = vpop.f32.mrf.mxu0  ;;  %v16628_v4 = vadd.f32 %v18689_v45, %v25818_v41  ;;  %v3288_v45 = vadd.f32 %v16634_v9, %v3223_v18 }
 0x281   : > { %v3380_v60 = vadd.f32 %v18720_v40, %v3365_v17  ;;  %v3363_v56 = vmul.f32 %v18702_v14, %v3326_v58  ;;  %v3337_v11 = vadd.f32 %v16976_v12, %v3272_v31  ;;  %v3277_v17 = vadd.f32 %v16625_v24, %v3212_v8 }
 0x282   : > { %v3328_v27 = vpop.f32.mrf.mxu0  ;;  %v18772_v18 = vadd.f32 %v16628_v4, %v3215_v30 }
 0x283   : > { %v3388_v29 = vmax.f32 %v3380_v60, 0.0  ;;  %v3378_v33 = vadd.f32 %v18720_v40, %v3363_v56  ;;  %v3366_v53 = vmul.f32 %v18702_v14, %v3337_v11  ;;  %v3329_v19 = vadd.f32 %v3328_v27, %v3264_v63 }
 0x284   : > { %v16979_v2 = vpop.f32.mrf.mxu0 }
 0x285   : > { %v16469_v61 = vpack.c.bf16 %v3388_v29, %v3388_v29  ;;  %v3386_v54 = vmax.f32 %v3378_v33, 0.0  ;;  %v3381_v50 = vadd.f32 %v18720_v40, %v3366_v53  ;;  %v3364_v55 = vmul.f32 %v18702_v14, %v3329_v19 }
 0x286   : > { %v3350_v20 = vadd.f32 %v16979_v2, %v3285_v21  ;;  %v3341_v36 = vpop.f32.mrf.mxu0 }
 0x287   : > { %v3472_v22 = vrot.slane %v16469_v61, %v25817_v25  ;;  %v16467_v39 = vpack.c.bf16 %v3386_v54, %v3386_v54  ;;  %v3389_v34 = vmax.f32 %v3381_v50, 0.0  ;;  %v3379_v6 = vadd.f32 %v18720_v40, %v3364_v55 }
 0x288   : > { %v3369_v43 = vmul.f32 %v18702_v14, %v3350_v20  ;;  %v3342_v1 = vadd.f32 %v3341_v36, %v3277_v17  ;;  %v16980_v53 = vpop.f32.mrf.mxu0 }
 0x289   : > { %v3473_v62 = vcombine.high %v3472_v22, %v3472_v22  ;;  %v3480_v42 = vrot.slane %v3472_v22, %v25817_v25  ;;  %v3424_v49 = vrot.slane %v16467_v39, %v25817_v25  ;;  %v16470_v37 = vpack.c.bf16 %v3389_v34, %v3389_v34 }
 0x28a   : > { %v3387_v38 = vmax.f32 %v3379_v6, 0.0  ;;  %v18765_v8 = vadd.f32 %v18720_v40, %v3369_v43  ;;  %v18768_v57 = vmul.f32 %v18702_v14, %v3342_v1  ;;  %v18770_v0 = vadd.f32 %v16980_v53, %v3288_v45  ;;  %v3344_v5 = vpop.f32.mrf.mxu0 }
 0x28b   : > { %v3487_v58 = vrot.slane %v3473_v62, %v25817_v25  ;;  %v3488_v31 = vcombine.high %v3480_v42, %v3480_v42  ;;  %v3627_v28 = vunpack.i.h.s16 %v3480_v42  ;;  %v16158_v12 = vpack.i.b16 %v3480_v42, %v3480_v42 }
 0x28c   : > { %v3425_v32 = vcombine.high %v3424_v49, %v3424_v49  ;;  %v3432_v47 = vrot.slane %v3424_v49, %v25817_v25  ;;  %v3496_v3 = vrot.slane %v16470_v37, %v25817_v25  ;;  %v16468_v26 = vpack.c.bf16 %v3387_v38, %v3387_v38 }
 0x28d   : > { %v3489_v60 = vcombine.high %v3487_v58, %v3487_v58  ;;  %v3629_v56 = vunpack.i.h.s16 %v3487_v58  ;;  %v3631_v11 = vunpack.i.h.s16 %v3488_v31  ;;  %v3691_v63 = vpack.i.b16 %v3627_v28, %v3627_v28 }
 0x28e   : > { %v16159_v44 = vpack.i.b16 %v3487_v58, %v3487_v58  ;;  %v16160_v15 = vpack.i.b16 %v3488_v31, %v3488_v31  ;;  %v3805_v46 = vrot.slane %v16158_v12, %v25819_v51  ;;  %v3439_v55 = vrot.slane %v3425_v32, %v25817_v25 }
 0x28f   : > { %v3633_v48 = vunpack.i.h.s16 %v3489_v60  ;;  %v3693_v27 = vpack.i.b16 %v3629_v56, %v3629_v56  ;;  %v3695_v29 = vpack.i.b16 %v3631_v11, %v3631_v11  ;;  %v16161_v33 = vpack.i.b16 %v3489_v60, %v3489_v60 }
 0x290   : > { %v3809_v19 = vrot.slane %v3691_v63, %v25819_v51  ;;  %v3813_v21 = vrot.slane %v16159_v44, %v25819_v51  ;;  %v3821_v2 = vrot.slane %v16160_v15, %v25819_v51  ;;  %v4107_v7 = vpack.i.b16 %v3805_v46, %v3805_v46 }
 0x291   : > { %v3697_v61 = vpack.i.b16 %v3633_v48, %v3633_v48  ;;  %v3817_v54 = vrot.slane %v3693_v27, %v25819_v51  ;;  %v3825_v50 = vrot.slane %v3695_v29, %v25819_v51  ;;  %v18775_v20 = vrot.slane %v16161_v33, %v25819_v51 }
 0x292   : > { %v18778_v59 = vrot.slane %v4107_v7, %v25819_v51  ;;  %v4114_v24 = vpack.i.b16 %v3809_v19, %v3809_v19  ;;  %v4121_v22 = vpack.i.b16 %v3813_v21, %v3813_v21  ;;  %v4135_v39 = vpack.i.b16 %v3821_v2, %v3821_v2  ;;  %v17281_v19 = vld [vmem:[%s25560_s7 + $0x60] sm:$0xff]  }
 0x293   : > { %v3440_v41 = vcombine.high %v3432_v47, %v3432_v47  ;;  %v18782_v9 = vrot.slane %v3697_v61, %v25819_v51  ;;  %v4128_v34 = vpack.i.b16 %v3817_v54, %v3817_v54  ;;  %v4142_v6 = vpack.i.b16 %v3825_v50, %v3825_v50 }
 0x294   : > { %v3441_v4 = vcombine.high %v3439_v55, %v3439_v55  ;;  %v3611_v62 = vunpack.i.h.s16 %v3432_v47  ;;  %v3613_v42 = vunpack.i.h.s16 %v3439_v55  ;;  %v16150_v36 = vpack.i.b16 %v3432_v47, %v3432_v47 }
 0x295   : > { %v3615_v49 = vunpack.i.h.s16 %v3440_v41  ;;  %v16151_v43 = vpack.i.b16 %v3439_v55, %v3439_v55  ;;  %v16152_v17 = vpack.i.b16 %v3440_v41, %v3440_v41  ;;  %v18795_v44 = vrot.slane %v4114_v24, %v25819_v51 }
 0x296   : > { %v3617_v30 = vunpack.i.h.s16 %v3441_v4  ;;  %v16153_v45 = vpack.i.b16 %v3441_v4, %v3441_v4  ;;  %v3675_v58 = vpack.i.b16 %v3611_v62, %v3611_v62  ;;  %v3677_v31 = vpack.i.b16 %v3613_v42, %v3613_v42 }
 0x297   : > { %v3679_v28 = vpack.i.b16 %v3615_v49, %v3615_v49  ;;  %v3741_v12 = vrot.slane %v16150_v36, %v25819_v51  ;;  %v3749_v37 = vrot.slane %v16151_v43, %v25819_v51  ;;  %v3757_v38 = vrot.slane %v16152_v17, %v25819_v51 }
 0x298   : > { %v3681_v32 = vpack.i.b16 %v3617_v30, %v3617_v30  ;;  %v18788_v1 = vrot.slane %v16153_v45, %v25819_v51  ;;  %v3745_v56 = vrot.slane %v3675_v58, %v25819_v51  ;;  %v3753_v11 = vrot.slane %v3677_v31, %v25819_v51 }
 0x299   : > { %v3995_v63 = vpack.i.b16 %v3741_v12, %v3741_v12  ;;  %v3761_v15 = vrot.slane %v3679_v28, %v25819_v51  ;;  %v4009_v46 = vpack.i.b16 %v3749_v37, %v3749_v37  ;;  %v4023_v47 = vpack.i.b16 %v3757_v38, %v3757_v38 }
 0x29a   : > { %v18799_v48 = vrot.slane %v4121_v22, %v25819_v51  ;;  %v18802_v27 = vrot.slane %v4128_v34, %v25819_v51  ;;  %v18805_v29 = vrot.slane %v4135_v39, %v25819_v51  ;;  %v18808_v33 = vrot.slane %v3681_v32, %v25819_v51 }
 0x29b   : > { %v18811_v53 = vrot.slane %v4142_v6, %v25819_v51  ;;  %v3497_v2 = vcombine.high %v3496_v3, %v3496_v3  ;;  %v18818_v7 = vrot.slane %v3995_v63, %v25819_v51  ;;  %v4002_v61 = vpack.i.b16 %v3745_v56, %v3745_v56 }
 0x29c   : > { %v4016_v54 = vpack.i.b16 %v3753_v11, %v3753_v11  ;;  %v3504_v50 = vrot.slane %v3496_v3, %v25817_v25  ;;  %v18822_v55 = vrot.slane %v4009_v46, %v25819_v51  ;;  %v18825_v24 = vrot.slane %v4023_v47, %v25819_v51 }
 0x29d   : > { %v4030_v22 = vpack.i.b16 %v3761_v15, %v3761_v15  ;;  %v3511_v39 = vrot.slane %v3497_v2, %v25817_v25  ;;  %v3448_v3 = vrot.slane %v16468_v26, %v25817_v25  ;;  %v3392_v63 = vmax.f32 %v18765_v8, 0.0 }
 0x29e   : > { %v3512_v34 = vcombine.high %v3504_v50, %v3504_v50  ;;  %v3635_v6 = vunpack.i.h.s16 %v3504_v50  ;;  %v16162_v4 = vpack.i.b16 %v3504_v50, %v3504_v50  ;;  %v18838_v15 = vrot.slane %v4002_v61, %v25819_v51 }
 0x29f   : > { %v3513_v62 = vcombine.high %v3511_v39, %v3511_v39  ;;  %v3637_v42 = vunpack.i.h.s16 %v3511_v39  ;;  %v16163_v49 = vpack.i.b16 %v3511_v39, %v3511_v39  ;;  %v3449_v26 = vcombine.high %v3448_v3, %v3448_v3 }
 0x2a0   : > { %v3639_v36 = vunpack.i.h.s16 %v3512_v34  ;;  %v3699_v30 = vpack.i.b16 %v3635_v6, %v3635_v6  ;;  %v16164_v43 = vpack.i.b16 %v3512_v34, %v3512_v34  ;;  %v3837_v17 = vrot.slane %v16162_v4, %v25819_v51 }
 0x2a1   : > { %v3641_v45 = vunpack.i.h.s16 %v3513_v62  ;;  %v3701_v58 = vpack.i.b16 %v3637_v42, %v3637_v42  ;;  %v16165_v31 = vpack.i.b16 %v3513_v62, %v3513_v62  ;;  %v3845_v28 = vrot.slane %v16163_v49, %v25819_v51 }
 0x2a2   : > { %v3703_v12 = vpack.i.b16 %v3639_v36, %v3639_v36  ;;  %v3841_v32 = vrot.slane %v3699_v30, %v25819_v51  ;;  %v3853_v37 = vrot.slane %v16164_v43, %v25819_v51  ;;  %v4163_v38 = vpack.i.b16 %v3837_v17, %v3837_v17 }
 0x2a3   : > { %v3705_v56 = vpack.i.b16 %v3641_v45, %v3641_v45  ;;  %v3849_v11 = vrot.slane %v3701_v58, %v25819_v51  ;;  %v18841_v46 = vrot.slane %v4016_v54, %v25819_v51  ;;  %v18844_v47 = vrot.slane %v4030_v22, %v25819_v51 }
 0x2a4   : > { %v3857_v2 = vrot.slane %v3703_v12, %v25819_v51  ;;  %v18848_v50 = vrot.slane %v16165_v31, %v25819_v51  ;;  %v4177_v39 = vpack.i.b16 %v3845_v28, %v3845_v28  ;;  %v18852_v34 = vadd.f32 %v18720_v40, %v18768_v57 }
 0x2a5   : > { %v18856_v8 = vmul.f32 %v18702_v14, %v18770_v0  ;;  %v18859_v61 = vrot.slane %v4163_v38, %v25819_v51  ;;  %v4170_v54 = vpack.i.b16 %v3841_v32, %v3841_v32  ;;  %v4191_v22 = vpack.i.b16 %v3853_v37, %v3853_v37 }
 0x2a6   : > { %v3456_v6 = vrot.slane %v3448_v3, %v25817_v25  ;;  %v18863_v4 = vrot.slane %v3705_v56, %v25819_v51  ;;  %v4184_v62 = vpack.i.b16 %v3849_v11, %v3849_v11  ;;  %v3463_v42 = vrot.slane %v3449_v26, %v25817_v25  ;;  %v17275_v11 = vld [vmem:[%s25560_s7 + $0x78] sm:$0xff]  }
 0x2a7   : > { %v16473_v49 = vpack.c.bf16 %v3392_v63, %v3392_v63  ;;  %v4198_v57 = vpack.i.b16 %v3857_v2, %v3857_v2  ;;  %v17276_v26 = vld [vmem:[%s25560_s7 + $0x38] sm:$0xff]   ;;  %v17277_v63 = vld [vmem:[%s25560_s7 + $0x70] sm:$0xff]   ;;  %16647 = vmatprep.subr.bf16.mxu1 %v17275_v11 }
 0x2a8   : > { %v3464_v36 = vcombine.high %v3456_v6, %v3456_v6  ;;  %v3619_v30 = vunpack.i.h.s16 %v3456_v6  ;;  %v16154_v43 = vpack.i.b16 %v3456_v6, %v3456_v6  ;;  %v3465_v0 = vcombine.high %v3463_v42, %v3463_v42  ;;  %16648 = vmatpush3.bf16.msra.mxu1 %v17276_v26  ;;  %v17290_v26 = vld [vmem:[%s25560_s7 + $0xf0] sm:$0xff]  }
 0x2a9   : > { %v3621_v17 = vunpack.i.h.s16 %v3463_v42  ;;  %v16155_v45 = vpack.i.b16 %v3463_v42, %v3463_v42  ;;  %v3568_v58 = vrot.slane %v16473_v49, %v25817_v25  ;;  %16649 = vmatprep.subr.bf16.mxu1 %v17277_v63 }
 0x2aa   : > { %v3623_v31 = vunpack.i.h.s16 %v3464_v36  ;;  %v3683_v28 = vpack.i.b16 %v3619_v30, %v3619_v30  ;;  %v16156_v12 = vpack.i.b16 %v3464_v36, %v3464_v36  ;;  %v3773_v3 = vrot.slane %v16154_v43, %v25819_v51 }
 0x2ab   : > { %v3625_v32 = vunpack.i.h.s16 %v3465_v0  ;;  %v3685_v37 = vpack.i.b16 %v3621_v17, %v3621_v17  ;;  %v16157_v38 = vpack.i.b16 %v3465_v0, %v3465_v0  ;;  %v3781_v56 = vrot.slane %v16155_v45, %v25819_v51 }
 0x2ac   : > { %v3687_v2 = vpack.i.b16 %v3623_v31, %v3623_v31  ;;  %v3777_v6 = vrot.slane %v3683_v28, %v25819_v51  ;;  %v18880_v42 = vrot.slane %v16156_v12, %v25819_v51  ;;  %v4051_v49 = vpack.i.b16 %v3773_v3, %v3773_v3  ;;  %v17286_v12 = vld [vmem:[%s25560_s7 + $0xf8] sm:$0xff]  }
 0x2ad   : > { %v18883_v36 = vrot.slane %v4177_v39, %v25819_v51  ;;  %v3689_v43 = vpack.i.b16 %v3625_v32, %v3625_v32  ;;  %v4065_v0 = vpack.i.b16 %v3781_v56, %v3781_v56  ;;  %v18888_v17 = vrot.slane %v4170_v54, %v25819_v51  ;;  %v17278_v39 = vld [vmem:[%s25560_s7 + $0x30] sm:$0xff]   ;;  %v17288_v56 = vld [vmem:[%s25560_s7 + $0xb8] sm:$0xff]   ;;  %16759 = vmatprep.subr.bf16.mxu0 %v17286_v12 }
 0x2ae   : > { %v18891_v45 = vrot.slane %v3685_v37, %v25819_v51  ;;  %v18894_v31 = vrot.slane %v16157_v38, %v25819_v51  ;;  %v4058_v28 = vpack.i.b16 %v3777_v6, %v3777_v6  ;;  %v18903_v3 = vrot.slane %v4184_v62, %v25819_v51  ;;  %v17279_v38 = vld [vmem:[%s25560_s7 + $0x68] sm:$0xff]   ;;  %16760 = vmatpush3.bf16.msra.mxu0 %v17288_v56 }
 0x2af   : > { %v18906_v54 = vrot.slane %v4191_v22, %v25819_v51  ;;  %v18909_v32 = vrot.slane %v4198_v57, %v25819_v51  ;;  %v18920_v62 = vrot.slane %v3687_v2, %v25819_v51  ;;  %v18923_v22 = vrot.slane %v4051_v49, %v25819_v51  ;;  %16650 = vmatpush3.bf16.msra.mxu1 %v17278_v39 }
 0x2b0   : > { %v4079_v57 = vpack.i.b16 %v18880_v42, %v18880_v42  ;;  %v3569_v11 = vcombine.high %v3568_v58, %v3568_v58  ;;  %v18931_v63 = vrot.slane %v3689_v43, %v25819_v51  ;;  %v18934_v6 = vrot.slane %v4065_v0, %v25819_v51  ;;  %v17292_v42 = vld [vmem:[%s25560_s7 + $0xb0] sm:$0xff]   ;;  %16651 = vmatprep.subr.bf16.mxu1 %v17279_v38 }
 0x2b1   : > { %v3576_v2 = vrot.slane %v3568_v58, %v25817_v25  ;;  %v3390_v49 = vmax.f32 %v18852_v34, 0.0  ;;  %v18942_v12 = vrot.slane %v4058_v28, %v25819_v51  ;;  %v17280_v34 = vld [vmem:[%s25560_s7 + $0x28] sm:$0xff]   ;;  %v3385_v28 = vadd.f32 %v18720_v40, %v18856_v8  ;;  %16761 = vmatprep.subr.bf16.mxu0 %v17290_v26  ;;  %v17282_v26 = vld [vmem:[%s25560_s7 + $0x20] sm:$0xff]  }
 0x2b2   : > { %v3583_v0 = vrot.slane %v3569_v11, %v25817_v25  ;;  %16762 = vmatpush3.bf16.msra.mxu0 %v17292_v42 }
 0x2b3   : > { %v3584_v58 = vcombine.high %v3576_v2, %v3576_v2  ;;  %v3659_v56 = vunpack.i.h.s16 %v3576_v2  ;;  %v16174_v37 = vpack.i.b16 %v3576_v2, %v3576_v2  ;;  %v16471_v39 = vpack.c.bf16 %v3390_v49, %v3390_v49  ;;  %16652 = vmatpush3.bf16.msra.mxu1 %v17280_v34 }
 0x2b4   : > { %v3585_v60 = vcombine.high %v3583_v0, %v3583_v0  ;;  %v3661_v43 = vunpack.i.h.s16 %v3583_v0  ;;  %v16175_v11 = vpack.i.b16 %v3583_v0, %v3583_v0  ;;  %16653 = vmatprep.subr.bf16.mxu1 %v17281_v19  ;;  %v3345_v34 = vadd.f32 %v3344_v5, %v18772_v18  ;;  %v17284_v5 = vld [vmem:[%s25560_s7 + $0x18] sm:$0xff]  }
 0x2b5   : > { %v3663_v30 = vunpack.i.h.s16 %v3584_v58  ;;  %v3723_v41 = vpack.i.b16 %v3659_v56, %v3659_v56  ;;  %v16176_v21 = vpack.i.b16 %v3584_v58, %v3584_v58  ;;  %v3933_v10 = vrot.slane %v16174_v37, %v25819_v51  ;;  %v17283_v37 = vld [vmem:[%s25560_s7 + $0x58] sm:$0xff]  }
 0x2b6   : > { %v3665_v2 = vunpack.i.h.s16 %v3585_v60  ;;  %v3725_v13 = vpack.i.b16 %v3661_v43, %v3661_v43  ;;  %v16177_v8 = vpack.i.b16 %v3585_v60, %v3585_v60  ;;  %v3941_v38 = vrot.slane %v16175_v11, %v25819_v51 }
 0x2b7   : > { %v3727_v52 = vpack.i.b16 %v3663_v30, %v3663_v30  ;;  %v3937_v49 = vrot.slane %v3723_v41, %v25819_v51  ;;  %v3949_v0 = vrot.slane %v16176_v21, %v25819_v51  ;;  %v4331_v58 = vpack.i.b16 %v3933_v10, %v3933_v10  ;;  %16654 = vmatpush3.bf16.msra.mxu1 %v17282_v26 }
 0x2b8   : > { %v3729_v42 = vpack.i.b16 %v3665_v2, %v3665_v2  ;;  %v3945_v60 = vrot.slane %v3725_v13, %v25819_v51  ;;  %v3393_v43 = vmax.f32 %v3385_v28, 0.0  ;;  %v18970_v56 = vrot.slane %v4079_v57, %v25819_v51  ;;  %16655 = vmatprep.subr.bf16.mxu1 %v17283_v37 }
 0x2b9   : > { %v18975_v21 = vrot.slane %v16177_v8, %v25819_v51  ;;  %v4345_v10 = vpack.i.b16 %v3941_v38, %v3941_v38  ;;  %v3953_v30 = vrot.slane %v3727_v52, %v25819_v51  ;;  %v4338_v11 = vpack.i.b16 %v3937_v49, %v3937_v49  ;;  %v17285_v38 = vld [vmem:[%s25560_s7 + $0x50] sm:$0xff]  }
 0x2ba   : > { %v4359_v13 = vpack.i.b16 %v3949_v0, %v3949_v0  ;;  %v18984_v18 = vrot.slane %v4331_v58, %v25819_v51  ;;  %v3520_v57 = vrot.slane %v16471_v39, %v25817_v25  ;;  %v25821_v28 = vpack.i.b16 %v18788_v1, %v18788_v1 }
 0x2bb   : > { %v25822_v52 = vpack.i.b16 %v18808_v33, %v18808_v33  ;;  %v19003_v26 = vrot.slane %v3729_v42, %v25819_v51  ;;  %v4352_v39 = vpack.i.b16 %v3945_v60, %v3945_v60  ;;  %v16474_v49 = vpack.c.bf16 %v3393_v43, %v3393_v43  ;;  %16656 = vmatpush3.bf16.msra.mxu1 %v17284_v5 }
 0x2bc   : > { %25820 = vst [vmem:[#allocation10_spill] sm:$0xff] %v18984_v18  ;;  %v18991_v2 = vrot.slane %v25821_v28, %v25819_v51  ;;  %v3368_v1 = vmul.f32 %v18702_v14, %v3345_v34  ;;  %v19007_v0 = vrot.slane %v4345_v10, %v25819_v51  ;;  %v3521_v58 = vcombine.high %v3520_v57, %v3520_v57  ;;  %v17287_v14 = vld [vmem:[%s25560_s7 + $0x10] sm:$0xff]  }
 0x2bd   : > { %v18997_v8 = vrot.slane %v25822_v52, %v25819_v51  ;;  %v3528_v37 = vrot.slane %v3520_v57, %v25817_v25  ;;  %v19013_v28 = vrot.slane %v4338_v11, %v25819_v51  ;;  %v19016_v52 = vrot.slane %v4359_v13, %v25819_v51  ;;  %16657 = vmatprep.subr.bf16.mxu1 %v17285_v38  ;;  %v17289_v11 = vld [vmem:[%s25560_s7 + $0x48] sm:$0xff]  }
 0x2be   : > { %25823 = vst [vmem:[#allocation12_spill] sm:$0xff] %v19007_v0  ;;  %v4366_v42 = vpack.i.b16 %v3953_v30, %v3953_v30  ;;  %v3592_v60 = vrot.slane %v16474_v49, %v25817_v25  ;;  %v3535_v43 = vrot.slane %v3521_v58, %v25817_v25  ;;  %v19027_v13 = vrot.slane %v4352_v39, %v25819_v51  ;;  %v17291_v39 = vld [vmem:[%s25560_s7 + $0x8] sm:$0xff]  }
 0x2bf   : > { %25824 = vst [vmem:[#allocation13_spill] sm:$0xff] %v19013_v28  ;;  %25825 = vst [vmem:[#allocation9_spill] sm:$0xff] %v19016_v52  ;;  %v3536_v34 = vcombine.high %v3528_v37, %v3528_v37  ;;  %v3643_v10 = vunpack.i.h.s16 %v3528_v37  ;;  %v16166_v33 = vpack.i.b16 %v3528_v37, %v3528_v37  ;;  %v19032_v57 = vadd.f32 %v18720_v40, %v3368_v1 }
 0x2c0   : > { %25826 = vst [vmem:[#allocation11_spill] sm:$0xff] %v19027_v13  ;;  %v3593_v5 = vcombine.high %v3592_v60, %v3592_v60  ;;  %v3537_v49 = vcombine.high %v3535_v43, %v3535_v43  ;;  %v3645_v58 = vunpack.i.h.s16 %v3535_v43  ;;  %v16167_v37 = vpack.i.b16 %v3535_v43, %v3535_v43  ;;  %16658 = vmatpush3.bf16.msra.mxu1 %v17287_v14 }
 0x2c1   : > { %v3647_v19 = vunpack.i.h.s16 %v3536_v34  ;;  %v3707_v41 = vpack.i.b16 %v3643_v10, %v3643_v10  ;;  %v16168_v38 = vpack.i.b16 %v3536_v34, %v3536_v34  ;;  %v3869_v35 = vrot.slane %v16166_v33, %v25819_v51  ;;  %16659 = vmatprep.subr.bf16.mxu1 %v17289_v11 }
 0x2c2   : > { %v3600_v52 = vrot.slane %v3592_v60, %v25817_v25  ;;  %v3649_v30 = vunpack.i.h.s16 %v3537_v49  ;;  %v3709_v0 = vpack.i.b16 %v3645_v58, %v3645_v58  ;;  %v16169_v40 = vpack.i.b16 %v3537_v49, %v3537_v49 }
 0x2c3   : > { %v3711_v13 = vpack.i.b16 %v3647_v19, %v3647_v19  ;;  %v3873_v1 = vrot.slane %v3707_v41, %v25819_v51  ;;  %v3877_v10 = vrot.slane %v16167_v37, %v25819_v51  ;;  %v3885_v43 = vrot.slane %v16168_v38, %v25819_v51 }
 0x2c4   : > { %v4219_v34 = vpack.i.b16 %v3869_v35, %v3869_v35  ;;  %v3713_v33 = vpack.i.b16 %v3649_v30, %v3649_v30  ;;  %v3881_v60 = vrot.slane %v3709_v0, %v25819_v51  ;;  %v3607_v18 = vrot.slane %v3593_v5, %v25817_v25  ;;  %16660 = vmatpush3.bf16.msra.mxu1 %v17291_v39 }
 0x2c5   : > { %v3889_v14 = vrot.slane %v3711_v13, %v25819_v51  ;;  %v19046_v28 = vrot.slane %v4366_v42, %v25819_v51  ;;  %v4506_v19 = vcombine.low %v18818_v7, %v18838_v15  ;;  %v4507_v41 = vcombine.low %v18822_v55, %v18841_v46 }
 0x2c6   : > { %v4508_v11 = vcombine.low %v18825_v24, %v18844_v47  ;;  %v19055_v35 = vrot.slane %v16169_v40, %v25819_v51  ;;  %v19058_v0 = vrot.slane %v4219_v34, %v25819_v51  ;;  %v3391_v13 = vmax.f32 %v19032_v57, 0.0 }
 0x2c7   : > { %25827 = vst [vmem:[#allocation3_spill] sm:$0xff] %v19046_v28  ;;  %v4509_v42 = vcombine.low %v18991_v2, %v18997_v8  ;;  %v4226_v30 = vpack.i.b16 %v3873_v1, %v3873_v1  ;;  %v4233_v7 = vpack.i.b16 %v3877_v10, %v3877_v10  ;;  %v4247_v15 = vpack.i.b16 %v3885_v43, %v3885_v43 }
 0x2c8   : > { %v3608_v5 = vcombine.high %v3600_v52, %v3600_v52  ;;  %v19064_v55 = vrot.slane %v3713_v33, %v25819_v51  ;;  %v4240_v24 = vpack.i.b16 %v3881_v60, %v3881_v60  ;;  %v4254_v46 = vpack.i.b16 %v3889_v14, %v3889_v14 }
 0x2c9   : > { %v3609_v47 = vcombine.high %v3607_v18, %v3607_v18  ;;  %v3667_v49 = vunpack.i.h.s16 %v3600_v52  ;;  %v3669_v58 = vunpack.i.h.s16 %v3607_v18  ;;  %v16178_v38 = vpack.i.b16 %v3600_v52, %v3600_v52 }
 0x2ca   : > { %v3671_v37 = vunpack.i.h.s16 %v3608_v5  ;;  %v16179_v40 = vpack.i.b16 %v3607_v18, %v3607_v18  ;;  %v16180_v57 = vpack.i.b16 %v3608_v5, %v3608_v5 }
 0x2cb   : > { %v3673_v39 = vunpack.i.h.s16 %v3609_v47  ;;  %v16181_v34 = vpack.i.b16 %v3609_v47, %v3609_v47  ;;  %v3731_v28 = vpack.i.b16 %v3667_v49, %v3667_v49  ;;  %v3733_v2 = vpack.i.b16 %v3669_v58, %v3669_v58 }
 0x2cc   : > { %v3735_v8 = vpack.i.b16 %v3671_v37, %v3671_v37  ;;  %v3965_v1 = vrot.slane %v16178_v38, %v25819_v51  ;;  %v3973_v43 = vrot.slane %v16179_v40, %v25819_v51  ;;  %v3981_v33 = vrot.slane %v16180_v57, %v25819_v51 }
 0x2cd   : > { %v3737_v10 = vpack.i.b16 %v3673_v39, %v3673_v39  ;;  %v19070_v60 = vrot.slane %v16181_v34, %v25819_v51  ;;  %v19075_v18 = vrot.slane %v3731_v28, %v25819_v51  ;;  %v19078_v14 = vrot.slane %v3733_v2, %v25819_v51 }
 0x2ce   : > { %v4387_v5 = vpack.i.b16 %v3965_v1, %v3965_v1  ;;  %v19081_v47 = vrot.slane %v4226_v30, %v25819_v51  ;;  %v19084_v49 = vrot.slane %v4233_v7, %v25819_v51  ;;  %v19087_v58 = vrot.slane %v4240_v24, %v25819_v51 }
 0x2cf   : > { %v19090_v37 = vrot.slane %v4247_v15, %v25819_v51  ;;  %v19093_v38 = vrot.slane %v4254_v46, %v25819_v51  ;;  %v19096_v28 = vrot.slane %v3735_v8, %v25819_v51  ;;  %v4401_v39 = vpack.i.b16 %v3973_v43, %v3973_v43 }
 0x2d0   : > { %v4415_v40 = vpack.i.b16 %v3981_v33, %v3981_v33  ;;  %v19101_v7 = vrot.slane %v3737_v10, %v25819_v51  ;;  %v16472_v57 = vpack.c.bf16 %v3391_v13, %v3391_v13  ;;  %v19106_v15 = vrot.slane %v4387_v5, %v25819_v51 }
 0x2d1   : > { %v4394_v46 = vpack.i.b16 %v19075_v18, %v19075_v18  ;;  %v4408_v34 = vpack.i.b16 %v19078_v14, %v19078_v14  ;;  %v4516_v2 = vrot.slane %v4506_v19, %v25817_v25  ;;  %v4523_v1 = vrot.slane %v4507_v41, %v25817_v25 }
 0x2d2   : > { %25828 = vst [vmem:[#allocation14_spill] sm:$0xff] %v19106_v15  ;;  %v3544_v8 = vrot.slane %v16472_v57, %v25817_v25  ;;  %v4530_v10 = vrot.slane %v4508_v11, %v25817_v25  ;;  %v4537_v43 = vrot.slane %v4509_v42, %v25817_v25  ;;  %v19118_v13 = vrot.slane %v4401_v39, %v25819_v51 }
 0x2d3   : > { %v19121_v33 = vrot.slane %v4415_v40, %v25819_v51  ;;  %v25831_v19 = vpack.i.b16 %v18891_v45, %v18891_v45  ;;  %v4538_v11 = vcombine.low %v4516_v2, %v4523_v1  ;;  %v25832_v39 = vpack.i.b16 %v18920_v62, %v18920_v62 }
 0x2d4   : > { %25829 = vst [vmem:[#allocation2_spill] sm:$0xff] %v19118_v13  ;;  %v3545_v5 = vcombine.high %v3544_v8, %v3544_v8  ;;  %v3552_v41 = vrot.slane %v3544_v8, %v25817_v25  ;;  %v4539_v57 = vcombine.low %v4530_v10, %v4537_v43  ;;  %v25833_v24 = vpack.i.b16 %v18894_v31, %v18894_v31 }
 0x2d5   : > { %25830 = vst [vmem:[#allocation16_spill] sm:$0xff] %v19121_v33  ;;  %v4077_v14 = vrot.slane %v25831_v19, %v25819_v51  ;;  %v4091_v40 = vrot.slane %v25832_v39, %v25819_v51  ;;  %v25834_v45 = vpack.i.b16 %v18931_v63, %v18931_v63  ;;  %v4546_v19 = vrot.slane %v4538_v11, %v25817_v25  ;;  %v17293_v63 = vld [vmem:[%s25560_s7 + $0x40] sm:$0xff]   ;;  %v17296_v33 = vld [vmem:[%s25560_s7 + $0xa8] sm:$0xff]  }
 0x2d6   : > { %v4098_v18 = vrot.slane %v25833_v24, %v25819_v51  ;;  %v3559_v2 = vrot.slane %v3545_v5, %v25817_v25  ;;  %v3560_v1 = vcombine.high %v3552_v41, %v3552_v41  ;;  %v3651_v10 = vunpack.i.h.s16 %v3552_v41  ;;  %v17294_v5 = vld [vmem:[%s25560_s7 + $0xe8] sm:$0xff]   ;;  %16661 = vmatprep.subr.bf16.mxu1 %v17293_v63 }
 0x2d7   : > { %v4105_v8 = vrot.slane %v25834_v45, %v25819_v51  ;;  %v16170_v43 = vpack.i.b16 %v3552_v41, %v3552_v41  ;;  %v4553_v62 = vrot.slane %v4539_v57, %v25817_v25  ;;  %v4555_v39 = vcombine.low %v18923_v22, %v18942_v12  ;;  %v17295_v41 = vld [vmem:[%s25560_s7] sm:$0xff]   ;;  %16763 = vmatprep.subr.bf16.mxu0 %v17294_v5 }
 0x2d8   : > { %v4556_v31 = vcombine.low %v18934_v6, %v4077_v14  ;;  %v3561_v24 = vcombine.high %v3559_v2, %v3559_v2  ;;  %v3653_v42 = vunpack.i.h.s16 %v3559_v2  ;;  %v3655_v30 = vunpack.i.h.s16 %v3560_v1  ;;  %16662 = vmatpush3.bf16.msra.mxu1 %v17295_v41  ;;  %16764 = vmatpush3.bf16.msra.mxu0 %v17296_v33 }
 0x2d9   : > { %v3715_v52 = vpack.i.b16 %v3651_v10, %v3651_v10  ;;  %v16171_v11 = vpack.i.b16 %v3559_v2, %v3559_v2  ;;  %v16172_v22 = vpack.i.b16 %v3560_v1, %v3560_v1  ;;  %v3901_v6 = vrot.slane %v16170_v43, %v25819_v51 }
 0x2da   : > { %v4554_v12 = vcombine.low %v4546_v19, %v4553_v62  ;;  %v3657_v14 = vunpack.i.h.s16 %v3561_v24  ;;  %v3717_v57 = vpack.i.b16 %v3653_v42, %v3653_v42  ;;  %v3719_v45 = vpack.i.b16 %v3655_v30, %v3655_v30 }
 0x2db   : > { %v16173_v10 = vpack.i.b16 %v3561_v24, %v3561_v24  ;;  %v19164_v13 = vrot.slane %v3715_v52, %v25819_v51  ;;  %v19167_v15 = vrot.slane %v16171_v11, %v25819_v51  ;;  %v19170_v2 = vrot.slane %v16172_v22, %v25819_v51  ;;  %v17300_v11 = vld [vmem:[%s25560_s7 + $0xd8] sm:$0xff]  }
 0x2dc   : > { %v4275_v1 = vpack.i.b16 %v3901_v6, %v3901_v6  ;;  %v19173_v30 = vrot.slane %v4394_v46, %v25819_v51  ;;  %v4557_v42 = vcombine.low %v18970_v56, %v4091_v40  ;;  %v4558_v43 = vcombine.low %v4098_v18, %v4105_v8  ;;  %v17297_v46 = vld [vmem:[%s25560_s7 + $0xe0] sm:$0xff]   ;;  %v19190_v56 = vld [vmem:[%s25560_s7 + $0x118] sm:$0xff]  }
 0x2dd   : > { %v4572_v19 = vrot.slane %v4556_v31, %v25817_v25  ;;  %v19178_v52 = vrot.slane %v4408_v34, %v25819_v51  ;;  %v3721_v62 = vpack.i.b16 %v3657_v14, %v3657_v14  ;;  %v19181_v24 = vrot.slane %v3717_v57, %v25819_v51  ;;  %v17299_v8 = vld [vmem:[%s25560_s7 + $0xa0] sm:$0xff]   ;;  %16765 = vmatprep.subr.bf16.mxu0 %v17297_v46 }
 0x2de   : > { %v4565_v63 = vrot.slane %v4555_v39, %v25817_v25  ;;  %v19193_v33 = vrot.slane %v3719_v45, %v25819_v51  ;;  %v19196_v34 = vrot.slane %v16173_v10, %v25819_v51  ;;  %v19199_v18 = vrot.slane %v4275_v1, %v25819_v51  ;;  %16981 = vmatprep.subr.bf16.mxu1 %v19190_v56 }
 0x2df   : > { %v4282_v40 = vpack.i.b16 %v19164_v13, %v19164_v13  ;;  %v4289_v39 = vpack.i.b16 %v19167_v15, %v19167_v15  ;;  %v4303_v31 = vpack.i.b16 %v19170_v2, %v19170_v2  ;;  %v4899_v5 = vshrl.u32 %v4554_v12, 16  ;;  %16766 = vmatpush3.bf16.msra.mxu0 %v17299_v8 }
 0x2e0   : > { %v4902_v41 = vshll.u32 %v4554_v12, 16  ;;  %v4579_v22 = vrot.slane %v4557_v42, %v25817_v25  ;;  %v4586_v6 = vrot.slane %v4558_v43, %v25817_v25  ;;  %v4587_v14 = vcombine.low %v4565_v63, %v4572_v19  ;;  %16767 = vmatprep.subr.bf16.mxu0 %v17300_v11  ;;  %v17301_v43 = vld [vmem:[%s25560_s7 + $0x98] sm:$0xff]  }
 0x2e1   : > { %v25835_v57 = vpack.i.b16 %v18775_v20, %v18775_v20  ;;  %v4901_v10 = vrot.slane %v4899_v5, 7  ;;  %v25836_v12 = vpack.i.b16 %v18782_v9, %v18782_v9  ;;  %v4604_v46 = vcombine.low %v18778_v59, %v18795_v44 }
 0x2e2   : > { %v4605_v42 = vcombine.low %v18799_v48, %v18802_v27  ;;  %v19232_v20 = vrot.slane %v3721_v62, %v25819_v51  ;;  %v4296_v19 = vpack.i.b16 %v19181_v24, %v19181_v24  ;;  %v4588_v63 = vcombine.low %v4579_v22, %v4586_v6 }
 0x2e3   : > { %v4154_v45 = vrot.slane %v25835_v57, %v25819_v51  ;;  %v4161_v1 = vrot.slane %v25836_v12, %v25819_v51  ;;  %v4606_v9 = vcombine.low %v18805_v29, %v18811_v53  ;;  %v4904_v8 = vor.u32 %v4902_v41, %v4901_v10  ;;  %16768 = vmatpush3.bf16.msra.mxu0 %v17301_v43 }
 0x2e4   : > { %v19240_v59 = vsel %vm18272_vm9, %v4901_v10, 0  ;;  %v4595_v44 = vrot.slane %v4587_v14, %v25817_v25  ;;  %v4602_v62 = vrot.slane %v4588_v63, %v25817_v25  ;;  %v4614_v5 = vrot.slane %v4604_v46, %v25817_v25 }
 0x2e5   : > { %v4607_v48 = vcombine.low %v4154_v45, %v4161_v1  ;;  %v5009_v27 = vshll.u32 %v19240_v59, 16  ;;  %v4621_v11 = vrot.slane %v4605_v42, %v25817_v25  ;;  %v19249_v29 = vsel %vm18272_vm9, 0, %v4904_v8 }
 0x2e6   : > { %v4628_v53 = vrot.slane %v4606_v9, %v25817_v25  ;;  %v25837_v22 = vpack.i.b16 %v18863_v4, %v18863_v4  ;;  %5161 = vrot.lane.b32.xlu0 %v19249_v29, %s17605_s29  ;;  %v5002_v14 = vshrl.u32 %v19249_v29, 16  ;;  %v5004_v57 = vshll.u32 %v19249_v29, 16 }
 0x2e7   : > { %v4635_v41 = vrot.slane %v4607_v48, %v25817_v25  ;;  %v4603_v45 = vcombine.low %v4595_v44, %v4602_v62  ;;  %v25838_v10 = vpack.i.b16 %v18848_v50, %v18848_v50  ;;  %v4636_v1 = vcombine.low %v4614_v5, %v4621_v11  ;;  %v17302_v5 = vld [vmem:[%s25560_s7 + $0xd0] sm:$0xff]  }
 0x2e8   : > { %v4217_v6 = vrot.slane %v25837_v22, %v25819_v51  ;;  %v4653_v4 = vcombine.low %v18859_v61, %v18888_v17  ;;  %v4654_v42 = vcombine.low %v18883_v36, %v18903_v3  ;;  %v5006_v43 = vrot.slane %v5004_v57, 1  ;;  %v17303_v61 = vld [vmem:[%s25560_s7 + $0x90] sm:$0xff]   ;;  %16769 = vmatprep.subr.bf16.mxu0 %v17302_v5 }
 0x2e9   : > { %v4210_v12 = vrot.slane %v25838_v10, %v25819_v51  ;;  %v4637_v46 = vcombine.low %v4628_v53, %v4635_v41  ;;  %v5011_v63 = vrot.slane %v5009_v27, 1  ;;  %v4906_v9 = vshrl.u32 %v4603_v45, 16  ;;  %16770 = vmatpush3.bf16.msra.mxu0 %v17303_v61 }
 0x2ea   : > { %v4655_v8 = vcombine.low %v18906_v54, %v18909_v32  ;;  %v4909_v44 = vshll.u32 %v4603_v45, 16  ;;  %v4644_v48 = vrot.slane %v4636_v1, %v25817_v25  ;;  %5143 = vrot.lane.b32.xlu0 %v18752_v16, %s17605_s29  ;;  %v5007_v36 = vor.u32 %v5006_v43, %v5002_v14 }
 0x2eb   : > { %v4651_v50 = vrot.slane %v4637_v46, %v25817_v25  ;;  %v4656_v62 = vcombine.low %v4210_v12, %v4217_v6  ;;  %v4908_v17 = vrot.slane %v4906_v9, 7  ;;  %v4663_v3 = vrot.slane %v4653_v4, %v25817_v25  ;;  %v17305_v4 = vld [vmem:[%s25560_s7 + $0x88] sm:$0xff]  }
 0x2ec   : > { %v4670_v54 = vrot.slane %v4654_v42, %v25817_v25  ;;  %v4310_v32 = vpack.i.b16 %v19193_v33, %v19193_v33  ;;  %v4677_v11 = vrot.slane %v4655_v8, %v25817_v25  ;;  %v19288_v41 = vsel %vm4988_vm0, %v5007_v36, %v5011_v63 }
 0x2ed   : > { %v4652_v27 = vcombine.low %v4644_v48, %v4651_v50  ;;  %v4684_v53 = vrot.slane %v4656_v62, %v25817_v25  ;;  %v4911_v22 = vor.u32 %v4909_v44, %v4908_v17  ;;  %v19292_v16 = vsel %vm18272_vm9, %v4908_v17, 0  ;;  %5145 = vrot.lane.b32.xlu1 %v19288_v41, %s17605_s29 }
 0x2ee   : > { %v4685_v6 = vcombine.low %v4663_v3, %v4670_v54  ;;  %v19298_v14 = vrot.slane %v4282_v40, %v25819_v51  ;;  %v4317_v57 = vpack.i.b16 %v19196_v34, %v19196_v34  ;;  %v25839_v10 = vpack.i.b16 %v19055_v35, %v19055_v35  ;;  %v17304_v34 = vld [vmem:[%s25560_s7 + $0xc8] sm:$0xff]  }
 0x2ef   : > { %v4913_v45 = vshrl.u32 %v4652_v27, 16  ;;  %v19310_v1 = vsel %vm18272_vm9, 0, %v4911_v22  ;;  %v5021_v13 = vshll.u32 %v19292_v16, 16  ;;  %v4916_v40 = vshll.u32 %v4652_v27, 16  ;;  %16771 = vmatprep.subr.bf16.mxu0 %v17304_v34 }
 0x2f0   : > { %v4266_v12 = vrot.slane %v25839_v10, %v25819_v51  ;;  %v4686_v46 = vcombine.low %v4677_v11, %v4684_v53  ;;  %v5014_v42 = vshrl.u32 %v19310_v1, 16  ;;  %v5016_v35 = vshll.u32 %v19310_v1, 16  ;;  %16772 = vmatpush3.bf16.msra.mxu0 %v17305_v4  ;;  %v17307_v10 = vld [vmem:[%s25560_s7 + $0x80] sm:$0xff]  }
 0x2f1   : > { %v4915_v43 = vrot.slane %v4913_v45, 7  ;;  %v4693_v63 = vrot.slane %v4685_v6, %v25817_v25  ;;  %v25840_v8 = vpack.i.b16 %v19064_v55, %v19064_v55  ;;  %v4702_v48 = vcombine.low %v19058_v0, %v19081_v47  ;;  %5163 = vrot.lane.b32.xlu1 %v19310_v1, %s17605_s29  ;;  %v17306_v45 = vld [vmem:[%s25560_s7 + $0xc0] sm:$0xff]  }
 0x2f2   : > { %v4700_v9 = vrot.slane %v4686_v46, %v25817_v25  ;;  %v4703_v50 = vcombine.low %v19084_v49, %v19087_v58  ;;  %v5018_v62 = vrot.slane %v5016_v35, 1  ;;  %v4704_v55 = vcombine.low %v19090_v37, %v19093_v38  ;;  %16773 = vmatprep.subr.bf16.mxu0 %v17306_v45 }
 0x2f3   : > { %v4273_v44 = vrot.slane %v25840_v8, %v25819_v51  ;;  %v4918_v5 = vor.u32 %v4916_v40, %v4915_v43  ;;  %v19335_v61 = vsel %vm18272_vm9, %v4915_v43, 0  ;;  %v4324_v0 = vpack.i.b16 %v19232_v20, %v19232_v20 }
 0x2f4   : > { %v5023_v47 = vrot.slane %v5021_v13, 1  ;;  %v4701_v36 = vcombine.low %v4693_v63, %v4700_v9  ;;  %v5019_v58 = vor.u32 %v5018_v62, %v5014_v42  ;;  %v5033_v3 = vshll.u32 %v19335_v61, 16  ;;  %16774 = vmatpush3.bf16.msra.mxu0 %v17307_v10 }
 0x2f5   : > { %v4705_v49 = vcombine.low %v4266_v12, %v4273_v44  ;;  %v19343_v17 = vsel %vm18272_vm9, 0, %v4918_v5  ;;  %v4719_v54 = vrot.slane %v4703_v50, %v25817_v25  ;;  %v5119_v37 = vrot.slane %v19249_v29, 1 }
 0x2f6   : > { %v5028_v27 = vshll.u32 %v19343_v17, 16  ;;  %v4920_v11 = vshrl.u32 %v4701_v36, 16  ;;  %v4712_v38 = vrot.slane %v4702_v48, %v25817_v25  ;;  %v19351_v20 = vsel %vm4988_vm0, %v5019_v58, %v5023_v47  ;;  %5165 = vrot.lane.b32.xlu1 %v19343_v17, %s17605_s29 }
 0x2f7   : > { %v5026_v53 = vshrl.u32 %v19343_v17, 16  ;;  %v4726_v22 = vrot.slane %v4704_v55, %v25817_v25  ;;  %v4733_v6 = vrot.slane %v4705_v49, %v25817_v25  ;;  %5147 = vrot.lane.b32.xlu0 %v19351_v20, %s17605_s29  ;;  %v4923_v40 = vshll.u32 %v4701_v36, 16 }
 0x2f8   : > { %v5030_v12 = vrot.slane %v5028_v27, 1  ;;  %v4922_v13 = vrot.slane %v4920_v11, 7  ;;  %v4734_v46 = vcombine.low %v4712_v38, %v4719_v54  ;;  %v5035_v34 = vrot.slane %v5033_v3, 1 }
 0x2f9   : > { %v4735_v4 = vcombine.low %v4726_v22, %v4733_v6  ;;  %v4294_v42 = vrot.slane %v4289_v39, %v25819_v51  ;;  %v4301_v35 = vrot.slane %v4296_v19, %v25819_v51  ;;  %v4315_v8 = vrot.slane %v4310_v32, %v25819_v51 }
 0x2fa   : > { %v5031_v43 = vor.u32 %v5030_v12, %v5026_v53  ;;  %v4925_v63 = vor.u32 %v4923_v40, %v4922_v13  ;;  %v19376_v9 = vsel %vm18272_vm9, %v4922_v13, 0  ;;  %v4742_v15 = vrot.slane %v4734_v46, %v25817_v25 }
 0x2fb   : > { %v4749_v39 = vrot.slane %v4735_v4, %v25817_v25  ;;  %v4308_v24 = vrot.slane %v4303_v31, %v25819_v51  ;;  %v4322_v19 = vrot.slane %v4317_v57, %v25819_v51  ;;  %v25841_v44 = vmov 0   ;;  %v25846_v4 = vld [vmem:[#allocation10_spill] sm:$0xff] }
 0x2fc   : > { %14218 = vmatprep.subr.bf16.mxu0 %v25841_v44  ;;  %v19391_v48 = vsel %vm4988_vm0, %v5031_v43, %v5035_v34  ;;  %v19395_v33 = vsel %vm18272_vm9, 0, %v4925_v63  ;;  %v4329_v32 = vrot.slane %v4324_v0, %v25819_v51  ;;  %v4751_v50 = vcombine.low %v19199_v18, %v19298_v14  ;;  %v25845_v34 = vld [vmem:[#allocation13_spill] sm:$0xff] }
 0x2fd   : > { %v5120_v62 = vrot.slane %v19240_v59, 1  ;;  %5149 = vrot.lane.b32.xlu0 %v19391_v48, %s17605_s29  ;;  %v5040_v2 = vshll.u32 %v19395_v33, 16  ;;  %v5045_v31 = vshll.u32 %v19376_v9, 16  ;;  %5167 = vrot.lane.b32.xlu1 %v19395_v33, %s17605_s29  ;;  %v4750_v57 = vcombine.low %v4742_v15, %v4749_v39  ;;  %v25848_v15 = vld [vmem:[#allocation12_spill] sm:$0xff] }
 0x2fe   : > { %v25842_v5 = vpack.i.b16 %v19096_v28, %v19096_v28  ;;  %v4752_v18 = vcombine.low %v4294_v42, %v4301_v35  ;;  %v4753_v14 = vcombine.low %v4308_v24, %v4315_v8  ;;  %v4754_v59 = vcombine.low %v4322_v19, %v4329_v32  ;;  %v25847_v8 = vld [vmem:[#allocation11_spill] sm:$0xff]  ;;  %v25850_v19 = vld [vmem:[#allocation9_spill] sm:$0xff] }
 0x2ff   : > { %v5038_v0 = vshrl.u32 %v19395_v33, 16  ;;  %v5042_v47 = vrot.slane %v5040_v2, 1  ;;  %v19415_v36 = vsel %vm1787_vm6, %v5119_v37, %v5120_v62  ;;  %v4927_v49 = vshrl.u32 %v4750_v57, 16  ;;  %v25849_v24 = vld [vmem:[#allocation3_spill] sm:$0xff] }
 0x300   : > { %v19411_v55 = vrot.slane %v25842_v5, %v25819_v51  ;;  %v4761_v58 = vrot.slane %v4751_v50, %v25817_v25  ;;  %v4768_v3 = vrot.slane %v4752_v18, %v25817_v25  ;;  %v4775_v54 = vrot.slane %v4753_v14, %v25817_v25 }
 0x301   : > { %v4782_v28 = vrot.slane %v4754_v59, %v25817_v25  ;;  %v5043_v27 = vor.u32 %v5042_v47, %v5038_v0  ;;  %v5047_v11 = vrot.slane %v5045_v31, 1  ;;  %v4929_v38 = vrot.slane %v4927_v49, 7 }
 0x302   : > { %v4930_v53 = vshll.u32 %v4750_v57, 16  ;;  %v4783_v22 = vcombine.low %v4761_v58, %v4768_v3  ;;  %v25843_v37 = vpack.i.b16 %v18975_v21, %v18975_v21  ;;  %v25844_v10 = vpack.i.b16 %v19003_v26, %v19003_v26 }
 0x303   : > { %v4784_v6 = vcombine.low %v4775_v54, %v4782_v28  ;;  %v19430_v13 = vsel %vm4988_vm0, %v5043_v27, %v5047_v11  ;;  %v19434_v46 = vsel %vm18272_vm9, %v4929_v38, 0  ;;  %v4800_v42 = vcombine.low %v25846_v4, %v25845_v34 }
 0x304   : > { %v4378_v45 = vrot.slane %v25843_v37, %v25819_v51  ;;  %v4385_v12 = vrot.slane %v25844_v10, %v25819_v51  ;;  %v4932_v40 = vor.u32 %v4930_v53, %v4929_v38  ;;  %5151 = vrot.lane.b32.xlu0 %v19430_v13, %s17605_s29  ;;  %v4791_v21 = vrot.slane %v4783_v22, %v25817_v25  ;;  %v25853_v38 = vld [vmem:[#allocation14_spill] sm:$0xff]  ;;  %v25855_v10 = vld [vmem:[#allocation16_spill] sm:$0xff] }
 0x305   : > { %v4798_v35 = vrot.slane %v4784_v6, %v25817_v25  ;;  %v5057_v26 = vshll.u32 %v19434_v46, 16  ;;  %v5122_v43 = vrot.slane %v19310_v1, 1  ;;  %v4801_v39 = vcombine.low %v25848_v15, %v25847_v8  ;;  %v25854_v37 = vld [vmem:[#allocation2_spill] sm:$0xff] }
 0x306   : > { %v19446_v63 = vsel %vm18272_vm9, 0, %v4932_v40  ;;  %v4802_v32 = vcombine.low %v25850_v19, %v25849_v24  ;;  %v4803_v50 = vcombine.low %v4378_v45, %v4385_v12  ;;  %v4810_v5 = vrot.slane %v4800_v42, %v25817_v25 }
 0x307   : > { %5169 = vrot.lane.b32.xlu1 %v19446_v63, %s17605_s29  ;;  %v4799_v62 = vcombine.low %v4791_v21, %v4798_v35  ;;  %v5050_v2 = vshrl.u32 %v19446_v63, 16  ;;  %v5052_v31 = vshll.u32 %v19446_v63, 16  ;;  %v5059_v57 = vrot.slane %v5057_v26, 1 }
 0x308   : > { %v4817_v18 = vrot.slane %v4801_v39, %v25817_v25  ;;  %v4824_v14 = vrot.slane %v4802_v32, %v25817_v25  ;;  %v4831_v59 = vrot.slane %v4803_v50, %v25817_v25  ;;  %5177 = vrot.lane.b32.xlu0 %v19415_v36, %s17605_s29  ;;  %v25851_v58 = vpack.i.b16 %v19070_v60, %v19070_v60 }
 0x309   : > { %v4934_v0 = vshrl.u32 %v4799_v62, 16  ;;  %v4937_v47 = vshll.u32 %v4799_v62, 16  ;;  %v5054_v49 = vrot.slane %v5052_v31, 1  ;;  %v25852_v27 = vpack.i.b16 %v19101_v7, %v19101_v7 }
 0x30a   : > { %v4434_v3 = vrot.slane %v25851_v58, %v25819_v51  ;;  %v4832_v54 = vcombine.low %v4810_v5, %v4817_v18  ;;  %v4833_v28 = vcombine.low %v4824_v14, %v4831_v59  ;;  %v4849_v53 = vcombine.low %v25853_v38, %v19173_v30 }
 0x30b   : > { %v4441_v11 = vrot.slane %v25852_v27, %v25819_v51  ;;  %v4936_v22 = vrot.slane %v4934_v0, 7  ;;  %v5055_v6 = vor.u32 %v5054_v49, %v5050_v2  ;;  %v4850_v45 = vcombine.low %v25854_v37, %v19178_v52 }
 0x30c   : > { %v4851_v12 = vcombine.low %v25855_v10, %v19411_v55  ;;  %v4840_v60 = vrot.slane %v4832_v54, %v25817_v25  ;;  %v4847_v40 = vrot.slane %v4833_v28, %v25817_v25  ;;  %v4859_v4 = vrot.slane %v4849_v53, %v25817_v25 }
 0x30d   : > { %v4852_v34 = vcombine.low %v4434_v3, %v4441_v11  ;;  %v4939_v7 = vor.u32 %v4937_v47, %v4936_v22  ;;  %v19480_v42 = vsel %vm4988_vm0, %v5055_v6, %v5059_v57  ;;  %v19484_v30 = vsel %vm18272_vm9, %v4936_v22, 0 }
 0x30e   : > { %v4866_v52 = vrot.slane %v4850_v45, %v25817_v25  ;;  %v5123_v21 = vrot.slane %v19292_v16, 1  ;;  %5153 = vrot.lane.b32.xlu1 %v19480_v42, %s17605_s29  ;;  %v4848_v55 = vcombine.low %v4840_v60, %v4847_v40  ;;  %v4873_v26 = vrot.slane %v4851_v12, %v25817_v25 }
 0x30f   : > { %v19492_v35 = vsel %vm18272_vm9, 0, %v4939_v7  ;;  %v4880_v8 = vrot.slane %v4852_v34, %v25817_v25  ;;  %v5069_v16 = vshll.u32 %v19484_v30, 16  ;;  %v5125_v49 = vrot.slane %v19343_v17, 1 }
 0x310   : > { %v4881_v15 = vcombine.low %v4859_v4, %v4866_v52  ;;  %5171 = vrot.lane.b32.xlu0 %v19492_v35, %s17605_s29  ;;  %v5064_v39 = vshll.u32 %v19492_v35, 16  ;;  %v4941_v24 = vshrl.u32 %v4848_v55, 16  ;;  %v19501_v19 = vsel %vm1787_vm6, %v5122_v43, %v5123_v21 }
 0x311   : > { %v4882_v32 = vcombine.low %v4873_v26, %v4880_v8  ;;  %v5062_v50 = vshrl.u32 %v19492_v35, 16  ;;  %v4944_v31 = vshll.u32 %v4848_v55, 16  ;;  %v5071_v14 = vrot.slane %v5069_v16, 1 }
 0x312   : > { %v5066_v62 = vrot.slane %v5064_v39, 1  ;;  %5179 = vrot.lane.b32.xlu1 %v19501_v19, %s17605_s29  ;;  %v4943_v2 = vrot.slane %v4941_v24, 7  ;;  %v4889_v57 = vrot.slane %v4881_v15, %v25817_v25  ;;  %v5126_v27 = vrot.slane %v19335_v61, 1 }
 0x313   : > { %v4896_v5 = vrot.slane %v4882_v32, %v25817_v25  ;;  %v5128_v40 = vrot.slane %v19395_v33, 1  ;;  %v5129_v7 = vrot.slane %v19376_v9, 1  ;;  %v5131_v26 = vrot.slane %v19446_v63, 1 }
 0x314   : > { %v5067_v18 = vor.u32 %v5066_v62, %v5062_v50  ;;  %v4946_v59 = vor.u32 %v4944_v31, %v4943_v2  ;;  %v4986_v43 = vsel %vm18272_vm9, %v4943_v2, 0  ;;  %v19526_v6 = vsel %vm1787_vm6, %v5125_v49, %v5126_v27 }
 0x315   : > { %v4897_v0 = vcombine.low %v4889_v57, %v4896_v5  ;;  %v5081_v28 = vshll.u32 %v4986_v43, 16  ;;  %v19548_v55 = vsel %vm1787_vm6, %v5128_v40, %v5129_v7  ;;  %v5132_v39 = vrot.slane %v19434_v46, 1  ;;  %v25856_v5 = vld [vmem:[#allocation6_spill] sm:$0xff] }
 0x316   : > { %v19511_v47 = vsel %vm4988_vm0, %v5067_v18, %v5071_v14  ;;  %v19516_v58 = vsel %vm18272_vm9, 0, %v4946_v59  ;;  %v5134_v16 = vrot.slane %v19492_v35, 1  ;;  %v5135_v50 = vrot.slane %v19484_v30, 1  ;;  %v25857_v14 = vld [vmem:[#allocation15_spill] sm:$0xff] }
 0x317   : > { %5155 = vrot.lane.b32.xlu0 %v19511_v47, %s17605_s29  ;;  %5173 = vrot.lane.b32.xlu1 %v19516_v58, %s17605_s29  ;;  %v4948_v3 = vshrl.u32 %v4897_v0, 16  ;;  %v5076_v54 = vshll.u32 %v19516_v58, 16  ;;  %v4951_v38 = vshll.u32 %v4897_v0, 16  ;;  %v5074_v53 = vshrl.u32 %v19516_v58, 16 }
 0x318   : > { %v5083_v10 = vrot.slane %v5081_v28, 1  ;;  %v19561_v24 = vsel %vm1787_vm6, %v5131_v26, %v5132_v39  ;;  %v5137_v32 = vrot.slane %v19516_v58, 1  ;;  %v5138_v62 = vrot.slane %v4986_v43, 1 }
 0x319   : > { %v4950_v11 = vrot.slane %v4948_v3, 7  ;;  %v5078_v22 = vrot.slane %v5076_v54, 1  ;;  %v19568_v46 = vsel %vm1787_vm6, %v5134_v16, %v5135_v50  ;;  %v25582_v18 = vrot.slane %v25856_v5, 1  ;;  %v17308_v54 = vld [vmem:[%s25560_s7 + $0x110] sm:$0xff]  }
 0x31a   : > { %v19574_v31 = vsel %vm1787_vm6, %v5137_v32, %v5138_v62  ;;  %v25581_v59 = vrot.slane %v25857_v14, 1 }
 0x31b   : > { %5181 = vrot.lane.b32.xlu0 %v19526_v6, %s17605_s29  ;;  %v4953_v37 = vor.u32 %v4951_v38, %v4950_v11  ;;  %v5079_v45 = vor.u32 %v5078_v22, %v5074_v53  ;;  %v4987_v12 = vsel %vm18272_vm9, %v4950_v11, 0  ;;  %v17309_v53 = vld [vmem:[%s25560_s7 + $0x108] sm:$0xff]  }
 0x31c   : > { %v5093_v4 = vshll.u32 %v4987_v12, 16  ;;  %v5141_v57 = vrot.slane %v4987_v12, 1  ;;  %v19590_v43 = vsel %vm1787_vm6, %v25582_v18, %v25581_v59 }
 0x31d   : > { %v19534_v61 = vsel %vm18272_vm9, 0, %v4953_v37  ;;  %v19537_v60 = vsel %vm4988_vm0, %v5079_v45, %v5083_v10  ;;  %v17310_v37 = vld [vmem:[%s25560_s7 + $0x100] sm:$0xff]  }
 0x31e   : > { %5157 = vrot.lane.b32.xlu1 %v19537_v60, %s17605_s29  ;;  %v5088_v34 = vshll.u32 %v19534_v61, 16  ;;  %v5086_v52 = vshrl.u32 %v19534_v61, 16  ;;  %v5095_v15 = vrot.slane %v5093_v4, 1  ;;  %v5140_v2 = vrot.slane %v19534_v61, 1 }
 0x31f   : > { %5175 = vrot.lane.b32.xlu0 %v19534_v61, %s17605_s29 }
 0x320   : > { %v5090_v21 = vrot.slane %v5088_v34, 1  ;;  %v19579_v30 = vsel %vm1787_vm6, %v5140_v2, %v5141_v57 }
 0x322   : > { %v5091_v8 = vor.u32 %v5090_v21, %v5086_v52  ;;  %5183 = vrot.lane.b32.xlu1 %v19548_v55, %s17605_s29 }
 0x324   : > { %v19555_v9 = vsel %vm4988_vm0, %v5091_v8, %v5095_v15 }
 0x325   : > { %5159 = vrot.lane.b32.xlu0 %v19555_v9, %s17605_s29 }
 0x326   : > { %5185 = vrot.lane.b32.xlu1 %v19561_v24, %s17605_s29 }
 0x329   : > { %5187 = vrot.lane.b32.xlu0 %v19568_v46, %s17605_s29 }
 0x32a   : > { %5189 = vrot.lane.b32.xlu1 %v19574_v31, %s17605_s29 }
 0x32d   : > { %5191 = vrot.lane.b32.xlu0 %v19579_v30, %s17605_s29 }
 0x358   : > { %v5162_v0 = vpop.permute.xlu0 %5161 }
 0x359   : > { %v5223_v49 = vsel %vm5193_vm1, %v19590_v43, %v5162_v0  ;;  %v5226_v27 = vsel %vm5193_vm1, %v19415_v36, %v5162_v0 }
 0x35a   : > { %5640 = vmatprep.mubr.bf16.mxu1 %v5223_v49 }
 0x35c   : > { %v5144_v3 = vpop.permute.xlu0 %5143 }
 0x35d   : > { %v19599_v28 = vsel %vm5193_vm1, %v25856_v5, %v5144_v3 }
 0x35e   : > { %5641 = vmatmul.mubr.bf16.vlgmr.msra.gmra.mxu1 %v19599_v28 }
 0x35f   : > { %16982 = vmatpush3.bf16.msra.mxu1 %v19190_v56  ;;  %5648 = vmatprep.mubr.bf16.mxu1 %v5226_v27  ;;  %v5146_v11 = vpop.permute.xlu1 %5145 }
 0x360   : > { %v5198_v38 = vsel %vm5193_vm1, %v19249_v29, %v5146_v11  ;;  %16983 = vmatprep.subr.bf16.mxu1 %v17308_v54 }
 0x361   : > { %5801 = vmatprep.mubr.bf16.mxu0 %v5198_v38 }
 0x363   : > { %v5164_v22 = vpop.permute.xlu1 %5163  ;;  %16984 = vmatpush3.bf16.msra.mxu1 %v17308_v54 }
 0x364   : > { %16985 = vmatprep.subr.bf16.mxu1 %v17309_v53  ;;  %v5229_v56 = vsel %vm5193_vm1, %v19415_v36, %v5164_v22  ;;  %v5232_v12 = vsel %vm5193_vm1, %v19501_v19, %v5164_v22 }
 0x366   : > { %5649 = vmatmul.mubr.bf16.gmra.mxu1 %v5198_v38 }
 0x367   : > { %5656 = vmatprep.mubr.bf16.mxu1 %v5229_v56  ;;  %16986 = vmatpush3.bf16.msra.mxu1 %v17309_v53 }
 0x368   : > { %16987 = vmatprep.subr.bf16.mxu1 %v17310_v37  ;;  %v5166_v10 = vpop.permute.xlu1 %5165 }
 0x369   : > { %v5148_v29 = vpop.permute.xlu0 %5147  ;;  %v5235_v7 = vsel %vm5193_vm1, %v19501_v19, %v5166_v10  ;;  %v5238_v8 = vsel %vm5193_vm1, %v19526_v6, %v5166_v10 }
 0x36a   : > { %v5201_v4 = vsel %vm5193_vm1, %v19310_v1, %v5148_v29 }
 0x36b   : > { %16988 = vmatpush3.bf16.msra.mxu1 %v17310_v37 }
 0x36c   : > { %17153 = vmatprep.subr.bf16.mxu1 %v25841_v44 }
 0x36e   : > { %5657 = vmatmul.mubr.bf16.gmra.mxu1 %v5198_v38 }
 0x36f   : > { %v5150_v45 = vpop.permute.xlu0 %5149  ;;  %5664 = vmatprep.mubr.bf16.mxu1 %v5232_v12  ;;  %v5168_v34 = vpop.permute.xlu1 %5167 }
 0x370   : > { %v5204_v1 = vsel %vm5193_vm1, %v19343_v17, %v5150_v45  ;;  %v5241_v16 = vsel %vm5193_vm1, %v19526_v6, %v5168_v34  ;;  %v5244_v50 = vsel %vm5193_vm1, %v19548_v55, %v5168_v34 }
 0x376   : > { %v5152_v40 = vpop.permute.xlu0 %5151  ;;  %5665 = vmatmul.mubr.bf16.gmra.mxu1 %v5201_v4 }
 0x377   : > { %5672 = vmatprep.mubr.bf16.mxu1 %v5235_v7  ;;  %v5207_v17 = vsel %vm5193_vm1, %v19395_v33, %v5152_v40 }
 0x379   : > { %v5170_v26 = vpop.permute.xlu1 %5169 }
 0x37a   : > { %v5178_v52 = vpop.permute.xlu0 %5177  ;;  %v5247_v57 = vsel %vm5193_vm1, %v19548_v55, %v5170_v26  ;;  %v5250_v49 = vsel %vm5193_vm1, %v19561_v24, %v5170_v26 }
 0x37b   : > { %v5272_v21 = vsel %vm5193_vm1, %v19288_v41, %v5178_v52 }
 0x37c   : > { %5802 = vmatmul.mubr.bf16.vlgmr.msra.gmra.mxu0 %v5272_v21 }
 0x37d   : > { %5809 = vmatprep.mubr.bf16.mxu0 %v5201_v4 }
 0x37e   : > { %5673 = vmatmul.mubr.bf16.gmra.mxu1 %v5201_v4 }
 0x37f   : > { %5680 = vmatprep.mubr.bf16.mxu1 %v5238_v8 }
 0x380   : > { %v5154_v15 = vpop.permute.xlu1 %5153 }
 0x381   : > { %v5210_v33 = vsel %vm5193_vm1, %v19446_v63, %v5154_v15 }
 0x382   : > { %v5172_v32 = vpop.permute.xlu0 %5171 }
 0x383   : > { %v5253_v27 = vsel %vm5193_vm1, %v19561_v24, %v5172_v32  ;;  %v5256_v11 = vsel %vm5193_vm1, %v19568_v46, %v5172_v32 }
 0x384   : > { %5810 = vmatmul.mubr.bf16.gmra.mxu0 %v5272_v21  ;;  %v5180_v39 = vpop.permute.xlu1 %5179 }
 0x385   : > { %5817 = vmatprep.mubr.bf16.mxu0 %v5201_v4  ;;  %v5276_v41 = vsel %vm5193_vm1, %v19351_v20, %v5180_v39 }
 0x386   : > { %5681 = vmatmul.mubr.bf16.gmra.mxu1 %v5204_v1 }
 0x387   : > { %5688 = vmatprep.mubr.bf16.mxu1 %v5241_v16 }
 0x389   : > { %v5156_v62 = vpop.permute.xlu0 %5155  ;;  %v5174_v0 = vpop.permute.xlu1 %5173 }
 0x38a   : > { %v5213_v63 = vsel %vm5193_vm1, %v19492_v35, %v5156_v62  ;;  %v5259_v53 = vsel %vm5193_vm1, %v19568_v46, %v5174_v0  ;;  %v5262_v37 = vsel %vm5193_vm1, %v19574_v31, %v5174_v0 }
 0x38c   : > { %5818 = vmatmul.mubr.bf16.gmra.mxu0 %v5276_v41 }
 0x38d   : > { %5825 = vmatprep.mubr.bf16.mxu0 %v5204_v1  ;;  %v5182_v2 = vpop.permute.xlu0 %5181 }
 0x38e   : > { %5689 = vmatmul.mubr.bf16.gmra.mxu1 %v5204_v1  ;;  %v5280_v20 = vsel %vm5193_vm1, %v19391_v48, %v5182_v2 }
 0x38f   : > { %5696 = vmatprep.mubr.bf16.mxu1 %v5244_v50 }
 0x390   : > { %v5158_v3 = vpop.permute.xlu1 %5157 }
 0x391   : > { %v5176_v22 = vpop.permute.xlu0 %5175  ;;  %v5216_v35 = vsel %vm5193_vm1, %v19516_v58, %v5158_v3 }
 0x392   : > { %v5265_v45 = vsel %vm5193_vm1, %v19574_v31, %v5176_v22  ;;  %v5268_v10 = vsel %vm5193_vm1, %v19579_v30, %v5176_v22 }
 0x394   : > { %5826 = vmatmul.mubr.bf16.gmra.mxu0 %v5276_v41  ;;  %v5184_v54 = vpop.permute.xlu1 %5183 }
 0x395   : > { %5833 = vmatprep.mubr.bf16.mxu0 %v5204_v1  ;;  %v5284_v48 = vsel %vm5193_vm1, %v19430_v13, %v5184_v54 }
 0x396   : > { %5697 = vmatmul.mubr.bf16.gmra.mxu1 %v5207_v17 }
 0x397   : > { %5704 = vmatprep.mubr.bf16.mxu1 %v5247_v57  ;;  %v5160_v56 = vpop.permute.xlu0 %5159 }
 0x398   : > { %v5186_v38 = vpop.permute.xlu1 %5185  ;;  %v5219_v58 = vsel %vm5193_vm1, %v19534_v61, %v5160_v56 }
 0x399   : > { %v5288_v13 = vsel %vm5193_vm1, %v19480_v42, %v5186_v38 }
 0x39b   : > { %v5188_v29 = vpop.permute.xlu0 %5187 }
 0x39c   : > { %5834 = vmatmul.mubr.bf16.gmra.mxu0 %v5280_v20  ;;  %v5292_v42 = vsel %vm5193_vm1, %v19511_v47, %v5188_v29  ;;  %v5190_v12 = vpop.permute.xlu1 %5189 }
 0x39d   : > { %5841 = vmatprep.mubr.bf16.mxu0 %v5207_v17  ;;  %v5296_v47 = vsel %vm5193_vm1, %v19537_v60, %v5190_v12 }
 0x39e   : > { %5705 = vmatmul.mubr.bf16.gmra.mxu1 %v5207_v17 }
 0x39f   : > { %5712 = vmatprep.mubr.bf16.mxu1 %v5250_v49  ;;  %v5192_v40 = vpop.permute.xlu0 %5191 }
 0x3a4   : > { %5842 = vmatmul.mubr.bf16.gmra.mxu0 %v5280_v20 }
 0x3a5   : > { %5849 = vmatprep.mubr.bf16.mxu0 %v5207_v17 }
 0x3a6   : > { %5713 = vmatmul.mubr.bf16.gmra.mxu1 %v5210_v33 }
 0x3a7   : > { %5720 = vmatprep.mubr.bf16.mxu1 %v5253_v27 }
 0x3ac   : > { %5850 = vmatmul.mubr.bf16.gmra.mxu0 %v5284_v48 }
 0x3ad   : > { %5857 = vmatprep.mubr.bf16.mxu0 %v5210_v33 }
 0x3ae   : > { %5721 = vmatmul.mubr.bf16.gmra.mxu1 %v5210_v33 }
 0x3af   : > { %5728 = vmatprep.mubr.bf16.mxu1 %v5256_v11 }
 0x3b4   : > { %5858 = vmatmul.mubr.bf16.gmra.mxu0 %v5284_v48 }
 0x3b5   : > { %5865 = vmatprep.mubr.bf16.mxu0 %v5210_v33 }
 0x3b6   : > { %5729 = vmatmul.mubr.bf16.gmra.mxu1 %v5213_v63 }
 0x3b7   : > { %5736 = vmatprep.mubr.bf16.mxu1 %v5259_v53 }
 0x3bc   : > { %5866 = vmatmul.mubr.bf16.gmra.mxu0 %v5288_v13 }
 0x3bd   : > { %5873 = vmatprep.mubr.bf16.mxu0 %v5213_v63 }
 0x3be   : > { %5737 = vmatmul.mubr.bf16.gmra.mxu1 %v5213_v63 }
 0x3bf   : > { %5744 = vmatprep.mubr.bf16.mxu1 %v5262_v37 }
 0x3c4   : > { %5874 = vmatmul.mubr.bf16.gmra.mxu0 %v5288_v13 }
 0x3c5   : > { %5881 = vmatprep.mubr.bf16.mxu0 %v5213_v63 }
 0x3c6   : > { %5745 = vmatmul.mubr.bf16.gmra.mxu1 %v5216_v35 }
 0x3c7   : > { %5752 = vmatprep.mubr.bf16.mxu1 %v5265_v45 }
 0x3cc   : > { %5882 = vmatmul.mubr.bf16.gmra.mxu0 %v5292_v42 }
 0x3cd   : > { %5889 = vmatprep.mubr.bf16.mxu0 %v5216_v35 }
 0x3ce   : > { %5753 = vmatmul.mubr.bf16.gmra.mxu1 %v5216_v35 }
 0x3cf   : > { %5760 = vmatprep.mubr.bf16.mxu1 %v5268_v10 }
 0x3d4   : > { %5890 = vmatmul.mubr.bf16.gmra.mxu0 %v5292_v42 }
 0x3d5   : > { %5897 = vmatprep.mubr.bf16.mxu0 %v5216_v35 }
 0x3d6   : > { %5761 = vmatmul.mubr.bf16.gmra.mxu1 %v5219_v58 }
 0x3d7   : > { %16989 = vmatprep.mubr.msk.bf16.mxu1 %vm5193_vm1, %v19415_v36  ;;  %v5300_v36 = vsel %vm5193_vm1, %v19555_v9, %v5192_v40 }
 0x3dc   : > { %5898 = vmatmul.mubr.bf16.gmra.mxu0 %v5296_v47 }
 0x3dd   : > { %5905 = vmatprep.mubr.bf16.mxu0 %v5219_v58 }
 0x3de   : > { %16990 = vmatmul.mubr.msk.bf16.vlgmr.msra.gmra.mxu1 %vm5193_vm1, %v19501_v19 }
 0x3df   : > { %16993 = vmatprep.mubr.msk.bf16.mxu1 %vm5193_vm1, %v19501_v19 }
 0x3e4   : > { %5906 = vmatmul.mubr.bf16.gmra.mxu0 %v5296_v47 }
 0x3e5   : > { %5913 = vmatprep.mubr.bf16.mxu0 %v5219_v58 }
 0x3e6   : > { %16994 = vmatmul.mubr.msk.bf16.gmra.mxu1 %vm5193_vm1, %v19526_v6 }
 0x3e7   : > { %16997 = vmatprep.mubr.msk.bf16.mxu1 %vm5193_vm1, %v19526_v6 }
 0x3ec   : > { %5914 = vmatmul.mubr.bf16.gmra.mxu0 %v5300_v36 }
 0x3ed   : > { %5921 = vmatprep.mubr.bf16.mxu0 %v19599_v28 }
 0x3ee   : > { %16998 = vmatmul.mubr.msk.bf16.gmra.mxu1 %vm5193_vm1, %v19548_v55 }
 0x3ef   : > { %17001 = vmatprep.mubr.msk.bf16.mxu1 %vm5193_vm1, %v19548_v55 }
 0x3f4   : > { %5922 = vmatmul.mubr.bf16.gmra.mxu0 %v5300_v36 }
 0x3f6   : > { %17002 = vmatmul.mubr.msk.bf16.gmra.mxu1 %vm5193_vm1, %v19561_v24 }
 0x3f7   : > { %17005 = vmatprep.mubr.msk.bf16.mxu1 %vm5193_vm1, %v19561_v24 }
 0x3fe   : > { %17006 = vmatmul.mubr.msk.bf16.gmra.mxu1 %vm5193_vm1, %v19568_v46 }
 0x3ff   : > { %17009 = vmatprep.mubr.msk.bf16.mxu1 %vm5193_vm1, %v19568_v46 }
 0x406   : > { %17010 = vmatmul.mubr.msk.bf16.gmra.mxu1 %vm5193_vm1, %v19574_v31 }
 0x407   : > { %17013 = vmatprep.mubr.msk.bf16.mxu1 %vm5193_vm1, %v19574_v31 }
 0x40e   : > { %17014 = vmatmul.mubr.msk.bf16.gmra.mxu1 %vm5193_vm1, %v19579_v30 }
 0x40f   : > { %17017 = vmatprep.mubr.msk.bf16.mxu1 %vm5193_vm1, %v19579_v30 }
 0x416   : > { %17018 = vmatmul.mubr.msk.bf16.gmra.mxu1 %vm5193_vm1, %v19590_v43 }
 0x41e   : > { %v16663_v19 = vpop.f32.mrf.mxu1 }
 0x420   : > { %v16664_v6 = vpop.f32.mrf.mxu1 }
 0x421   : > { %v19705_v61 = vadd.f32 %v16664_v6, %v16663_v19 }
 0x422   : > { %v19707_v60 = vpop.f32.mrf.mxu1 }
 0x424   : > { %v19709_v55 = vpop.f32.mrf.mxu1 }
 0x426   : > { %v16669_v9 = vpop.f32.mrf.mxu1 }
 0x428   : > { %v16670_v24 = vpop.f32.mrf.mxu1 }
 0x429   : > { %v19711_v46 = vadd.f32 %v16670_v24, %v16669_v9 }
 0x42a   : > { %v19713_v31 = vpop.f32.mrf.mxu1 }
 0x42c   : > { %v19715_v28 = vpop.f32.mrf.mxu1 }
 0x42e   : > { %v16675_v30 = vpop.f32.mrf.mxu1 }
 0x430   : > { %v16676_v34 = vpop.f32.mrf.mxu1 }
 0x431   : > { %v16677_v4 = vadd.f32 %v16676_v34, %v16675_v30 }
 0x432   : > { %v16678_v43 = vpop.f32.mrf.mxu1 }
 0x434   : > { %v16679_v7 = vpop.f32.mrf.mxu1 }
 0x435   : > { %v16680_v35 = vadd.f32 %v16679_v7, %v16678_v43 }
 0x436   : > { %v16681_v52 = vpop.f32.mrf.mxu1 }
 0x438   : > { %v16682_v21 = vpop.f32.mrf.mxu1 }
 0x439   : > { %v16683_v26 = vadd.f32 %v16682_v21, %v16681_v52 }
 0x43a   : > { %v16684_v15 = vpop.f32.mrf.mxu1 }
 0x43c   : > { %v19717_v8 = vpop.f32.mrf.mxu0  ;;  %v16685_v39 = vpop.f32.mrf.mxu1 }
 0x43d   : > { %v16686_v30 = vadd.f32 %v16685_v39, %v16684_v15 }
 0x43e   : > { %v19719_v1 = vpop.f32.mrf.mxu0  ;;  %v16687_v41 = vpop.f32.mrf.mxu1 }
 0x440   : > { %v19721_v16 = vpop.f32.mrf.mxu0  ;;  %v16688_v50 = vpop.f32.mrf.mxu1 }
 0x441   : > { %v16689_v62 = vadd.f32 %v16688_v50, %v16687_v41 }
 0x442   : > { %v19723_v32 = vpop.f32.mrf.mxu0  ;;  %v16690_v2 = vpop.f32.mrf.mxu1 }
 0x444   : > { %v19725_v17 = vpop.f32.mrf.mxu0  ;;  %v16691_v20 = vpop.f32.mrf.mxu1 }
 0x446   : > { %v19727_v57 = vpop.f32.mrf.mxu0  ;;  %v16693_v49 = vpop.f32.mrf.mxu1 }
 0x448   : > { %v19729_v0 = vpop.f32.mrf.mxu0  ;;  %v16694_v33 = vpop.f32.mrf.mxu1 }
 0x449   : > { %v16695_v54 = vadd.f32 %v16694_v33, %v16693_v49 }
 0x44a   : > { %v19731_v3 = vpop.f32.mrf.mxu0  ;;  %v16696_v48 = vpop.f32.mrf.mxu1 }
 0x44c   : > { %v16787_v27 = vpop.f32.mrf.mxu0  ;;  %v16697_v63 = vpop.f32.mrf.mxu1 }
 0x44e   : > { %v16788_v11 = vpop.f32.mrf.mxu0  ;;  %v16699_v13 = vpop.f32.mrf.mxu1 }
 0x44f   : > { %v16789_v38 = vadd.f32 %v16788_v11, %v16787_v27 }
 0x450   : > { %v16790_v53 = vpop.f32.mrf.mxu0  ;;  %v16700_v56 = vpop.f32.mrf.mxu1 }
 0x451   : > { %v19733_v22 = vadd.f32 %v16789_v38, %v16677_v4  ;;  %v16701_v45 = vadd.f32 %v16700_v56, %v16699_v13 }
 0x452   : > { %v16791_v37 = vpop.f32.mrf.mxu0  ;;  %v16702_v10 = vpop.f32.mrf.mxu1 }
 0x453   : > { %v16792_v29 = vadd.f32 %v16791_v37, %v16790_v53 }
 0x454   : > { %v16793_v42 = vpop.f32.mrf.mxu0  ;;  %v16703_v47 = vpop.f32.mrf.mxu1 }
 0x455   : > { %v19735_v58 = vadd.f32 %v16792_v29, %v16680_v35 }
 0x456   : > { %v16794_v12 = vpop.f32.mrf.mxu0  ;;  %v16705_v19 = vpop.f32.mrf.mxu1 }
 0x457   : > { %v16795_v40 = vadd.f32 %v16794_v12, %v16793_v42 }
 0x458   : > { %v16796_v36 = vpop.f32.mrf.mxu0  ;;  %v16706_v24 = vpop.f32.mrf.mxu1 }
 0x459   : > { %v19737_v6 = vadd.f32 %v16795_v40, %v16683_v26  ;;  %v16707_v4 = vadd.f32 %v16706_v24, %v16705_v19  ;;  %v16692_v26 = vadd.f32 %v16691_v20, %v16690_v2  ;;  %v16698_v19 = vadd.f32 %v16697_v63, %v16696_v48 }
 0x45a   : > { %v16797_v9 = vpop.f32.mrf.mxu0  ;;  %v16708_v43 = vpop.f32.mrf.mxu1 }
 0x45b   : > { %v16798_v34 = vadd.f32 %v16797_v9, %v16796_v36 }
 0x45c   : > { %v16799_v52 = vpop.f32.mrf.mxu0  ;;  %v16709_v41 = vpop.f32.mrf.mxu1 }
 0x45d   : > { %v19739_v7 = vadd.f32 %v16798_v34, %v16686_v30 }
 0x45e   : > { %v16800_v21 = vpop.f32.mrf.mxu0  ;;  %v16711_v33 = vpop.f32.mrf.mxu1 }
 0x45f   : > { %v16801_v50 = vadd.f32 %v16800_v21, %v16799_v52 }
 0x460   : > { %v16802_v49 = vpop.f32.mrf.mxu0  ;;  %v16712_v38 = vpop.f32.mrf.mxu1 }
 0x461   : > { %v19741_v27 = vadd.f32 %v16801_v50, %v16689_v62  ;;  %v19743_v13 = vadd.f32 %v16712_v38, %v16711_v33  ;;  %v16704_v38 = vadd.f32 %v16703_v47, %v16702_v10 }
 0x462   : > { %v16803_v11 = vpop.f32.mrf.mxu0  ;;  %v19745_v39 = vpop.f32.mrf.mxu1 }
 0x463   : > { %v16804_v53 = vadd.f32 %v16803_v11, %v16802_v49 }
 0x464   : > { %v16805_v15 = vpop.f32.mrf.mxu0  ;;  %v19749_v35 = vpop.f32.mrf.mxu1 }
 0x465   : > { %v19747_v37 = vadd.f32 %v16804_v53, %v16692_v26 }
 0x466   : > { %v16806_v56 = vpop.f32.mrf.mxu0  ;;  %v16717_v12 = vpop.f32.mrf.mxu1 }
 0x467   : > { %v16807_v29 = vadd.f32 %v16806_v56, %v16805_v15 }
 0x468   : > { %v16808_v42 = vpop.f32.mrf.mxu0  ;;  %v16718_v36 = vpop.f32.mrf.mxu1 }
 0x469   : > { %v19751_v40 = vadd.f32 %v16807_v29, %v16695_v54  ;;  %v19753_v20 = vadd.f32 %v16718_v36, %v16717_v12 }
 0x46a   : > { %v16809_v62 = vpop.f32.mrf.mxu0  ;;  %v19755_v24 = vpop.f32.mrf.mxu1 }
 0x46b   : > { %v16810_v2 = vadd.f32 %v16809_v62, %v16808_v42 }
 0x46c   : > { %v16811_v9 = vpop.f32.mrf.mxu0  ;;  %v19759_v52 = vpop.f32.mrf.mxu1 }
 0x46d   : > { %v19757_v30 = vadd.f32 %v16810_v2, %v16698_v19  ;;  %v16710_v2 = vadd.f32 %v16709_v41, %v16708_v43 }
 0x46e   : > { %v16812_v34 = vpop.f32.mrf.mxu0  ;;  %v16723_v49 = vpop.f32.mrf.mxu1 }
 0x46f   : > { %v16813_v21 = vadd.f32 %v16812_v34, %v16811_v9 }
 0x470   : > { %v16814_v50 = vpop.f32.mrf.mxu0  ;;  %v16724_v11 = vpop.f32.mrf.mxu1 }
 0x471   : > { %v19761_v33 = vadd.f32 %v16813_v21, %v16701_v45  ;;  %v19763_v63 = vadd.f32 %v16724_v11, %v16723_v49 }
 0x472   : > { %v16815_v54 = vpop.f32.mrf.mxu0  ;;  %v19765_v53 = vpop.f32.mrf.mxu1 }
 0x473   : > { %v16816_v48 = vadd.f32 %v16815_v54, %v16814_v50  ;;  %25858 = vst [vmem:[#allocation13_spill] sm:$0xff] %v19763_v63 }
 0x474   : > { %v16817_v26 = vpop.f32.mrf.mxu0  ;;  %v19769_v29 = vpop.f32.mrf.mxu1 }
 0x475   : > { %v19767_v15 = vadd.f32 %v16816_v48, %v16704_v38 }
 0x476   : > { %v16818_v56 = vpop.f32.mrf.mxu0  ;;  %v16729_v62 = vpop.f32.mrf.mxu1 }
 0x477   : > { %v16819_v42 = vadd.f32 %v16818_v56, %v16817_v26 }
 0x478   : > { %v16820_v12 = vpop.f32.mrf.mxu0  ;;  %v16730_v19 = vpop.f32.mrf.mxu1 }
 0x479   : > { %v19771_v36 = vadd.f32 %v16819_v42, %v16707_v4  ;;  %v19773_v47 = vadd.f32 %v16730_v19, %v16729_v62 }
 0x47a   : > { %v16821_v45 = vpop.f32.mrf.mxu0  ;;  %v19775_v34 = vpop.f32.mrf.mxu1 }
 0x47b   : > { %v16822_v10 = vadd.f32 %v16821_v45, %v16820_v12 }
 0x47c   : > { %v16823_v9 = vpop.f32.mrf.mxu0  ;;  %v19779_v49 = vpop.f32.mrf.mxu1 }
 0x47d   : > { %v19777_v21 = vadd.f32 %v16822_v10, %v16710_v2 }
 0x47e   : > { %v16824_v50 = vpop.f32.mrf.mxu0  ;;  %v16735_v38 = vpop.f32.mrf.mxu1 }
 0x47f   : > { %v16825_v54 = vadd.f32 %v16824_v50, %v16823_v9 }
 0x480   : > { %v19781_v11 = vpop.f32.mrf.mxu0  ;;  %v16736_v48 = vpop.f32.mrf.mxu1 }
 0x481   : > { %v19785_v26 = vadd.f32 %v16736_v48, %v16735_v38 }
 0x482   : > { %v19783_v4 = vpop.f32.mrf.mxu0  ;;  %v19787_v41 = vpop.f32.mrf.mxu1 }
 0x483   : > { %25859 = vst [vmem:[#allocation10_spill] sm:$0xff] %v19785_v26 }
 0x484   : > { %v16829_v43 = vpop.f32.mrf.mxu0  ;;  %v19789_v42 = vpop.f32.mrf.mxu1 }
 0x486   : > { %v16830_v56 = vpop.f32.mrf.mxu0  ;;  %v16741_v45 = vpop.f32.mrf.mxu1 }
 0x487   : > { %v16831_v12 = vadd.f32 %v16830_v56, %v16829_v43 }
 0x488   : > { %v16832_v62 = vpop.f32.mrf.mxu0  ;;  %v16742_v2 = vpop.f32.mrf.mxu1 }
 0x489   : > { %v19791_v10 = vadd.f32 %v16742_v2, %v16741_v45  ;;  %v19808_v45 = vadd.f32 %v16825_v54, %v19743_v13  ;;  %v16777_v13 = vadd.f32 %v19719_v1, %v19717_v8  ;;  %v16780_v8 = vadd.f32 %v19723_v32, %v19721_v16 }
 0x48a   : > { %v16833_v19 = vpop.f32.mrf.mxu0  ;;  %v19793_v50 = vpop.f32.mrf.mxu1 }
 0x48b   : > { %25860 = vst [vmem:[#allocation11_spill] sm:$0xff] %v19791_v10 }
 0x48c   : > { %v16835_v9 = vpop.f32.mrf.mxu0  ;;  %v19795_v18 = vpop.f32.mrf.mxu1 }
 0x48e   : > { %v16836_v59 = vpop.f32.mrf.mxu0  ;;  %v16747_v44 = vpop.f32.mrf.mxu1 }
 0x48f   : > { %v19797_v38 = vadd.f32 %v16836_v59, %v16835_v9 }
 0x490   : > { %v19799_v48 = vpop.f32.mrf.mxu0  ;;  %v16748_v43 = vpop.f32.mrf.mxu1 }
 0x491   : > { %25861 = vst [vmem:[#allocation12_spill] sm:$0xff] %v19797_v38  ;;  %v19803_v56 = vadd.f32 %v16748_v43, %v16747_v44  ;;  %v16783_v38 = vadd.f32 %v19727_v57, %v19725_v17  ;;  %v19821_v43 = vadd.f32 %v16831_v12, %v19753_v20  ;;  %v19833_v17 = vld [vmem:[%s25561_s8] ss:$0 sm:$0xff]  ;;  %v16674_v57 = vadd.f32 %v19715_v28, %v19713_v31 }
 0x492   : > { %v19801_v23 = vpop.f32.mrf.mxu0  ;;  %v19805_v14 = vpop.f32.mrf.mxu1  ;;  %v5804_v12 = vadd.f32 %v16777_v13, %v19705_v61 }
 0x493   : > { %25862 = vst [vmem:[#allocation3_spill] sm:$0xff] %v19803_v56 }
 0x494   : > { %v16841_v26 = vpop.f32.mrf.mxu0  ;;  %v19810_v10 = vpop.f32.mrf.mxu1 }
 0x496   : > { %v16842_v2 = vpop.f32.mrf.mxu0  ;;  %v16753_v59 = vpop.f32.mrf.mxu1 }
 0x497   : > { %v19812_v5 = vadd.f32 %v16842_v2, %v16841_v26  ;;  %v16786_v26 = vadd.f32 %v19731_v3, %v19729_v0  ;;  %v5812_v2 = vadd.f32 %v16783_v38, %v19711_v46  ;;  %v16668_v38 = vadd.f32 %v19709_v55, %v19707_v60 }
 0x498   : > { %v16754_v9 = vpop.f32.mrf.mxu1 }
 0x499   : > { %v19816_v63 = vadd.f32 %v16754_v9, %v16753_v59  ;;  %v5815_v46 = vadd.f32 %v16786_v26, %v16674_v57  ;;  %v19846_v59 = vld [vmem:[%s25562_s9] ss:$0 sm:$0xff]  ;;  %v5807_v9 = vadd.f32 %v16780_v8, %v16668_v38  ;;  %v16834_v26 = vadd.f32 %v16833_v19, %v16832_v62 }
 0x49a   : > { %v19818_v44 = vpop.f32.mrf.mxu1 }
 0x49b   : > { %25863 = vst [vmem:[#allocation9_spill] sm:$0xff] %v19816_v63 }
 0x49c   : > { %v19825_v54 = vpop.f32.mrf.mxu1 }
 0x49e   : > { %v16991_v56 = vpop.f32.mrf.mxu1 }
 0x49f   : > { %v5973_v20 = vadd.f32 %v16991_v56, %v5812_v2  ;;  %v16844_v56 = vpop.f32.mrf.mxu0 }
 0x4a0   : > { %v5964_v1 = vpop.f32.mrf.mxu1 }
 0x4a1   : > { %v6100_v0 = vmul.f32 %v19833_v17, %v5973_v20  ;;  %v5965_v3 = vadd.f32 %v5964_v1, %v5804_v12  ;;  %v16722_v20 = vadd.f32 %v19759_v52, %v19755_v24  ;;  %v16845_v12 = vpop.f32.mrf.mxu0 }
 0x4a2   : > { %v16992_v31 = vpop.f32.mrf.mxu1 }
 0x4a3   : > { %v5976_v28 = vadd.f32 %v16992_v31, %v5815_v46  ;;  %v6098_v61 = vmul.f32 %v19833_v17, %v5965_v3  ;;  %v6139_v32 = vadd.f32 %v19846_v59, %v6100_v0  ;;  %v19858_v19 = vadd.f32 %v16834_v26, %v16722_v20 }
 0x4a4   : > { %v5967_v16 = vpop.f32.mrf.mxu1 }
 0x4a5   : > { %v6101_v13 = vmul.f32 %v19833_v17, %v5976_v28  ;;  %v5968_v2 = vadd.f32 %v5967_v16, %v5807_v9  ;;  %v6137_v1 = vadd.f32 %v19846_v59, %v6098_v61  ;;  %v6171_v46 = vmax.f32 %v6139_v32, 0.0  ;;  %v16847_v28 = vpop.f32.mrf.mxu0 }
 0x4a6   : > { %v16995_v57 = vpop.f32.mrf.mxu1 }
 0x4a7   : > { %v6140_v60 = vadd.f32 %v19846_v59, %v6101_v13  ;;  %v5989_v55 = vadd.f32 %v16995_v57, %v19737_v6  ;;  %v6099_v8 = vmul.f32 %v19833_v17, %v5968_v2  ;;  %v6169_v9 = vmax.f32 %v6137_v1, 0.0  ;;  %v16848_v52 = vpop.f32.mrf.mxu0 }
 0x4a8   : > { %v5980_v3 = vpop.f32.mrf.mxu1 }
 0x4a9   : > { %v6172_v0 = vmax.f32 %v6140_v60, 0.0  ;;  %v6138_v38 = vadd.f32 %v19846_v59, %v6099_v8  ;;  %v16850_v13 = vpop.f32.mrf.mxu0 }
 0x4aa   : > { %v16996_v62 = vpop.f32.mrf.mxu1 }
 0x4ab   : > { %v6202_v31 = vpack.c.bf16 %v6172_v0, %v6171_v46  ;;  %v6170_v6 = vmax.f32 %v6138_v38, 0.0  ;;  %v5992_v16 = vadd.f32 %v16996_v62, %v19739_v7  ;;  %v16851_v61 = vpop.f32.mrf.mxu0  ;;  %v16237_v63 = vpack.c.bf16 %v6172_v0, %v6172_v0 }
 0x4ac   : > { %v5981_v46 = vadd.f32 %v5980_v3, %v19733_v22  ;;  %v19866_v7 = vadd.f32 %v19749_v35, %v19745_v39  ;;  %v19870_v38 = vadd.f32 %v19769_v29, %v19765_v53  ;;  %v19880_v22 = vadd.f32 %v19779_v49, %v19775_v34  ;;  %v19887_v53 = vpop.f32.mrf.mxu1 }
 0x4ad   : > { %v6201_v24 = vpack.c.bf16 %v6170_v6, %v6169_v9  ;;  %v16853_v57 = vpop.f32.mrf.mxu0  ;;  %v6289_v60 = vrot.slane %v6202_v31, %v25817_v25  ;;  %v6296_v8 = vrot.slane %v16237_v63, %v25817_v25  ;;  %v6104_v31 = vmul.f32 %v19833_v17, %v5989_v55 }
 0x4ae   : > { %v19876_v63 = vadd.f32 %v19783_v4, %v19781_v11  ;;  %v19884_v39 = vadd.f32 %v19789_v42, %v19787_v41  ;;  %v6105_v35 = vmul.f32 %v19833_v17, %v5992_v16  ;;  %v19891_v29 = vadd.f32 %v19801_v23, %v19799_v48  ;;  %v16999_v9 = vpop.f32.mrf.mxu1 }
 0x4af   : > { %v16854_v2 = vpop.f32.mrf.mxu0  ;;  %v6297_v20 = vcombine.high %v6289_v60, %v6289_v60  ;;  %v6298_v1 = vcombine.high %v6296_v8, %v6296_v8  ;;  %v6305_v0 = vrot.slane %v6289_v60, %v25817_v25  ;;  %v19895_v11 = vadd.f32 %v19795_v18, %v19793_v50 }
 0x4b0   : > { %25864 = vst [vmem:[#allocation14_spill] sm:$0xff] %v19884_v39  ;;  %v6102_v34 = vmul.f32 %v19833_v17, %v5981_v46  ;;  %v19899_v49 = vadd.f32 %v16845_v12, %v16844_v56  ;;  %v19903_v41 = vadd.f32 %v19810_v10, %v19805_v14  ;;  %v19906_v42 = vrot.slane %v6296_v8, %v25817_v25 }
 0x4b1   : > { %v16856_v32 = vpop.f32.mrf.mxu0  ;;  %25865 = vst [vmem:[#allocation2_spill] sm:$0xff] %v19895_v11  ;;  %v6319_v4 = vrot.slane %v6297_v20, %v25817_v25  ;;  %v19909_v23 = vrot.slane %v6298_v1, %v25817_v25  ;;  %v19911_v48 = vadd.f32 %v16848_v52, %v16847_v28  ;;  %v19915_v18 = vadd.f32 %v19825_v54, %v19818_v44  ;;  %v5996_v1 = vpop.f32.mrf.mxu1 }
 0x4b2   : > { %25866 = vst [vmem:[#allocation16_spill] sm:$0xff] %v19903_v41  ;;  %v6327_v50 = vcombine.high %v6305_v0, %v6305_v0  ;;  %v6143_v56 = vadd.f32 %v19846_v59, %v6104_v31  ;;  %v19918_v12 = vadd.f32 %v16851_v61, %v16850_v13  ;;  %v7034_v14 = vunpack.i.h.s16 %v6305_v0 }
 0x4b3   : > { %v16857_v26 = vpop.f32.mrf.mxu0  ;;  %25867 = vst [vmem:[#allocation17_spill] sm:$0xff] %v19915_v18  ;;  %v16236_v10 = vpack.c.bf16 %v6170_v6, %v6170_v6  ;;  %v6144_v3 = vadd.f32 %v19846_v59, %v6105_v35  ;;  %v19921_v16 = vadd.f32 %v16854_v2, %v16853_v57  ;;  %v6329_v28 = vcombine.high %v6319_v4, %v6319_v4 }
 0x4b4   : > { %25868 = vst [vmem:[#allocation18_spill] sm:$0xff] %v19918_v12  ;;  %v19923_v60 = vadd.f32 %v16857_v26, %v16856_v32  ;;  %v19926_v52 = vadd.f32 %v19846_v59, %v6102_v34  ;;  %v6328_v44 = vcombine.high %v19906_v42, %v19906_v42  ;;  %v6330_v54 = vcombine.high %v19909_v23, %v19909_v23  ;;  %v17000_v34 = vpop.f32.mrf.mxu1 }
 0x4b5   : > { %v16859_v62 = vpop.f32.mrf.mxu0  ;;  %v7036_v13 = vunpack.i.h.s16 %v6319_v4  ;;  %v7038_v6 = vunpack.i.h.s16 %v6327_v50  ;;  %v7042_v8 = vunpack.i.h.s16 %v19906_v42  ;;  %v19936_v57 = vrot.slane %v6201_v24, %v25817_v25 }
 0x4b6   : > { %25869 = vst [vmem:[#allocation19_spill] sm:$0xff] %v19923_v60  ;;  %v6175_v2 = vmax.f32 %v6143_v56, 0.0  ;;  %v16260_v32 = vpack.i.b16 %v6305_v0, %v6305_v0  ;;  %v7290_v26 = vpack.i.b16 %v7034_v14, %v7034_v14  ;;  %v19939_v20 = vrot.slane %v16236_v10, %v25817_v25 }
 0x4b7   : > { %v16860_v55 = vpop.f32.mrf.mxu0  ;;  %v19941_v46 = vmax.f32 %v6144_v3, 0.0  ;;  %v7040_v31 = vunpack.i.h.s16 %v6329_v28  ;;  %v7044_v35 = vunpack.i.h.s16 %v19909_v23  ;;  %v7048_v41 = vunpack.i.h.s16 %v6330_v54 }
 0x4b8   : > { %v19932_v61 = vadd.f32 %v16860_v55, %v16859_v62  ;;  %v16261_v62 = vpack.i.b16 %v6319_v4, %v6319_v4  ;;  %v7046_v55 = vunpack.i.h.s16 %v6328_v44  ;;  %v7292_v18 = vpack.i.b16 %v7036_v13, %v7036_v13 }
 0x4b9   : > { %v16264_v24 = vpack.i.b16 %v19906_v42, %v19906_v42  ;;  %v16262_v0 = vpack.i.b16 %v6327_v50, %v6327_v50  ;;  %v7294_v56 = vpack.i.b16 %v7038_v6, %v7038_v6  ;;  %v16263_v14 = vpack.i.b16 %v6329_v28, %v6329_v28 }
 0x4ba   : > { %25870 = vst [vmem:[#allocation20_spill] sm:$0xff] %v19932_v61  ;;  %v7298_v10 = vpack.i.b16 %v7042_v8, %v7042_v8  ;;  %v16265_v3 = vpack.i.b16 %v19909_v23, %v19909_v23  ;;  %v7596_v61 = vrot.slane %v16260_v32, %v25819_v51  ;;  %v7600_v12 = vrot.slane %v7290_v26, %v25819_v51 }
 0x4bb   : > { %v19952_v4 = vpack.c.bf16 %v19941_v46, %v6175_v2  ;;  %v7296_v39 = vpack.i.b16 %v7040_v31, %v7040_v31  ;;  %v7300_v13 = vpack.i.b16 %v7044_v35, %v7044_v35  ;;  %v16266_v60 = vpack.i.b16 %v6328_v44, %v6328_v44 }
 0x4bc   : > { %v7604_v42 = vrot.slane %v16261_v62, %v25819_v51  ;;  %v7302_v50 = vpack.i.b16 %v7046_v55, %v7046_v55  ;;  %v7608_v28 = vrot.slane %v7292_v18, %v25819_v51  ;;  %v19957_v6 = vadd.f32 %v16999_v9, %v19751_v40 }
 0x4bd   : > { %v19960_v23 = vadd.f32 %v5996_v1, %v19741_v27  ;;  %v16267_v8 = vpack.i.b16 %v6330_v54, %v6330_v54  ;;  %v7304_v32 = vpack.i.b16 %v7048_v41, %v7048_v41  ;;  %v7612_v2 = vrot.slane %v16262_v0, %v25819_v51 }
 0x4be   : > { %v19964_v26 = vadd.f32 %v17000_v34, %v19757_v30  ;;  %v7616_v44 = vrot.slane %v7294_v56, %v25819_v51  ;;  %v7620_v31 = vrot.slane %v16263_v14, %v25819_v51  ;;  %v8666_v35 = vpack.i.b16 %v7596_v61, %v7596_v61 }
 0x4bf   : > { %v8673_v62 = vpack.i.b16 %v7600_v12, %v7600_v12  ;;  %v19969_v18 = vrot.slane %v7296_v39, %v25819_v51  ;;  %v7628_v40 = vrot.slane %v16264_v24, %v25819_v51  ;;  %v7632_v27 = vrot.slane %v7298_v10, %v25819_v51 }
 0x4c0   : > { %v8680_v9 = vpack.i.b16 %v7604_v42, %v7604_v42  ;;  %v7636_v41 = vrot.slane %v16265_v3, %v25819_v51  ;;  %v7640_v54 = vrot.slane %v7300_v13, %v25819_v51  ;;  %v7644_v30 = vrot.slane %v16266_v60, %v25819_v51 }
 0x4c1   : > { %v8687_v1 = vpack.i.b16 %v7608_v28, %v7608_v28  ;;  %v7648_v34 = vrot.slane %v7302_v50, %v25819_v51  ;;  %v7652_v61 = vrot.slane %v16267_v8, %v25819_v51  ;;  %v7656_v12 = vrot.slane %v7304_v32, %v25819_v51 }
 0x4c2   : > { %v6248_v39 = vcombine.high %v19936_v57, %v19936_v57  ;;  %v19982_v55 = vrot.slane %v8666_v35, %v25819_v51  ;;  %v19985_v24 = vrot.slane %v8673_v62, %v25819_v51  ;;  %v8694_v0 = vpack.i.b16 %v7612_v2, %v7612_v2 }
 0x4c3   : > { %v8701_v56 = vpack.i.b16 %v7616_v44, %v7616_v44  ;;  %v19988_v60 = vrot.slane %v8680_v9, %v25819_v51  ;;  %v8708_v14 = vpack.i.b16 %v7620_v31, %v7620_v31  ;;  %v6249_v3 = vcombine.high %v19939_v20, %v19939_v20 }
 0x4c4   : > { %25871 = vst [vmem:[#allocation21_spill] sm:$0xff] %v19982_v55  ;;  %25872 = vst [vmem:[#allocation22_spill] sm:$0xff] %v19985_v24  ;;  %v19995_v13 = vrot.slane %v8687_v1, %v25819_v51  ;;  %v8729_v42 = vpack.i.b16 %v7632_v27, %v7632_v27  ;;  %v8743_v50 = vpack.i.b16 %v7640_v54, %v7640_v54  ;;  %v16862_v1 = vpop.f32.mrf.mxu0 }
 0x4c5   : > { %v6256_v28 = vrot.slane %v19936_v57, %v25817_v25  ;;  %v8722_v8 = vpack.i.b16 %v7628_v40, %v7628_v40  ;;  %v8736_v32 = vpack.i.b16 %v7636_v41, %v7636_v41  ;;  %v8757_v2 = vpack.i.b16 %v7648_v34, %v7648_v34 }
 0x4c6   : > { %v6270_v44 = vrot.slane %v6248_v39, %v25817_v25  ;;  %v20001_v31 = vrot.slane %v8694_v0, %v25819_v51  ;;  %v8750_v35 = vpack.i.b16 %v7644_v30, %v7644_v30  ;;  %v8764_v62 = vpack.i.b16 %v7652_v61, %v7652_v61 }
 0x4c7   : > { %v20005_v9 = vrot.slane %v19939_v20, %v25817_v25  ;;  %v20008_v27 = vrot.slane %v8701_v56, %v25819_v51  ;;  %v8771_v54 = vpack.i.b16 %v7656_v12, %v7656_v12  ;;  %v20011_v57 = vrot.slane %v6249_v3, %v25817_v25  ;;  %v16863_v3 = vpop.f32.mrf.mxu0 }
 0x4c8   : > { %25873 = vst [vmem:[#allocation23_spill] sm:$0xff] %v20001_v31  ;;  %v5984_v40 = vadd.f32 %v19887_v53, %v19735_v58  ;;  %v20016_v41 = vrot.slane %v8708_v14, %v25819_v51  ;;  %v20019_v30 = vrot.slane %v8729_v42, %v25819_v51  ;;  %v20022_v20 = vrot.slane %v8743_v50, %v25819_v51 }
 0x4c9   : > { %25874 = vst [vmem:[#allocation24_spill] sm:$0xff] %v20008_v27  ;;  %v6278_v34 = vcombine.high %v6256_v28, %v6256_v28  ;;  %v20025_v61 = vrot.slane %v8722_v8, %v25819_v51  ;;  %v20028_v12 = vrot.slane %v8736_v32, %v25819_v51  ;;  %v20031_v39 = vrot.slane %v8757_v2, %v25819_v51 }
 0x4ca   : > { %25875 = vst [vmem:[#allocation25_spill] sm:$0xff] %v20016_v41  ;;  %25876 = vst [vmem:[#allocation26_spill] sm:$0xff] %v20019_v30  ;;  %v6280_v58 = vcombine.high %v6270_v44, %v6270_v44  ;;  %v20034_v53 = vrot.slane %v8750_v35, %v25819_v51  ;;  %v20037_v0 = vrot.slane %v8764_v62, %v25819_v51  ;;  %v7018_v14 = vunpack.i.h.s16 %v6256_v28  ;;  %v20058_v41 = vpop.f32.mrf.mxu1 }
 0x4cb   : > { %25877 = vst [vmem:[#allocation27_spill] sm:$0xff] %v20022_v20  ;;  %25878 = vst [vmem:[#allocation28_spill] sm:$0xff] %v20025_v61  ;;  %v6279_v56 = vcombine.high %v20005_v9, %v20005_v9  ;;  %v20042_v42 = vrot.slane %v8771_v54, %v25819_v51  ;;  %v6281_v50 = vcombine.high %v20011_v57, %v20011_v57  ;;  %v7020_v8 = vunpack.i.h.s16 %v6270_v44 }
 0x4cc   : > { %25879 = vst [vmem:[#allocation29_spill] sm:$0xff] %v20028_v12  ;;  %25880 = vst [vmem:[#allocation30_spill] sm:$0xff] %v20031_v39  ;;  %v6103_v32 = vmul.f32 %v19833_v17, %v5984_v40  ;;  %v7022_v10 = vunpack.i.h.s16 %v6278_v34  ;;  %v20056_v11 = vadd.f32 %v16863_v3, %v16862_v1  ;;  %v7028_v40 = vunpack.i.h.s16 %v20011_v57 }
 0x4cd   : > { %25881 = vst [vmem:[#allocation31_spill] sm:$0xff] %v20034_v53  ;;  %25882 = vst [vmem:[#allocation32_spill] sm:$0xff] %v20037_v0  ;;  %v7024_v0 = vunpack.i.h.s16 %v6280_v58  ;;  %v7030_v2 = vunpack.i.h.s16 %v6279_v56  ;;  %v16252_v24 = vpack.i.b16 %v6256_v28, %v6256_v28  ;;  %v7274_v55 = vpack.i.b16 %v7018_v14, %v7018_v14  ;;  %v17003_v14 = vpop.f32.mrf.mxu1 }
 0x4ce   : > { %25883 = vst [vmem:[#allocation33_spill] sm:$0xff] %v20042_v42  ;;  %v7026_v42 = vunpack.i.h.s16 %v20005_v9  ;;  %25884 = vst [vmem:[#allocation34_spill] sm:$0xff] %v20056_v11  ;;  %v7032_v35 = vunpack.i.h.s16 %v6281_v50  ;;  %v16253_v30 = vpack.i.b16 %v6270_v44, %v6270_v44  ;;  %v7276_v61 = vpack.i.b16 %v7020_v8, %v7020_v8 }
 0x4cf   : > { %v6142_v62 = vadd.f32 %v19846_v59, %v6103_v32  ;;  %v16254_v20 = vpack.i.b16 %v6278_v34, %v6278_v34  ;;  %v7278_v12 = vpack.i.b16 %v7022_v10, %v7022_v10  ;;  %v16255_v54 = vpack.i.b16 %v6280_v58, %v6280_v58 }
 0x4d0   : > { %v16239_v39 = vpack.c.bf16 %v19941_v46, %v19941_v46  ;;  %v7280_v1 = vpack.i.b16 %v7024_v0, %v7024_v0  ;;  %v16256_v3 = vpack.i.b16 %v20005_v9, %v20005_v9  ;;  %v7282_v11 = vpack.i.b16 %v7026_v42, %v7026_v42 }
 0x4d1   : > { %v16257_v28 = vpack.i.b16 %v20011_v57, %v20011_v57  ;;  %v7284_v53 = vpack.i.b16 %v7028_v40, %v7028_v40  ;;  %v16258_v44 = vpack.i.b16 %v6279_v56, %v6279_v56  ;;  %v7286_v8 = vpack.i.b16 %v7030_v2, %v7030_v2  ;;  %v16865_v2 = vpop.f32.mrf.mxu0 }
 0x4d2   : > { %v16259_v31 = vpack.i.b16 %v6281_v50, %v6281_v50  ;;  %v7532_v34 = vrot.slane %v16252_v24, %v25819_v51  ;;  %v7536_v10 = vrot.slane %v7274_v55, %v25819_v51  ;;  %v7540_v58 = vrot.slane %v16253_v30, %v25819_v51  ;;  %v6012_v50 = vpop.f32.mrf.mxu1 }
 0x4d3   : > { %v20071_v46 = vmax.f32 %v6142_v62, 0.0  ;;  %v7288_v0 = vpack.i.b16 %v7032_v35, %v7032_v35  ;;  %v7544_v9 = vrot.slane %v7276_v61, %v25819_v51  ;;  %v7548_v42 = vrot.slane %v16254_v20, %v25819_v51  ;;  %v16866_v27 = vpop.f32.mrf.mxu0 }
 0x4d4   : > { %v6394_v57 = vrot.slane %v16239_v39, %v25817_v25  ;;  %v7552_v32 = vrot.slane %v7278_v12, %v25819_v51  ;;  %v20078_v56 = vrot.slane %v16255_v54, %v25819_v51  ;;  %v20081_v24 = vrot.slane %v7280_v1, %v25819_v51 }
 0x4d5   : > { %v25885_v55 = vmax.f32 %v19926_v52, 0.0  ;;  %v7564_v61 = vrot.slane %v16256_v3, %v25819_v51  ;;  %v7568_v20 = vrot.slane %v7282_v11, %v25819_v51  ;;  %v7572_v39 = vrot.slane %v16257_v28, %v25819_v51 }
 0x4d6   : > { %v7576_v12 = vrot.slane %v7284_v53, %v25819_v51  ;;  %v8554_v35 = vpack.i.b16 %v7532_v34, %v7532_v34  ;;  %v8561_v62 = vpack.i.b16 %v7536_v10, %v7536_v10  ;;  %v8568_v54 = vpack.i.b16 %v7540_v58, %v7540_v58 }
 0x4d7   : > { %v20086_v30 = vpack.c.bf16 %v20071_v46, %v25885_v55  ;;  %v6387_v40 = vrot.slane %v19952_v4, %v25817_v25  ;;  %v7580_v52 = vrot.slane %v16258_v44, %v25819_v51  ;;  %v6396_v1 = vcombine.high %v6394_v57, %v6394_v57 }
 0x4d8   : > { %v20096_v55 = vadd.f32 %v17003_v14, %v19771_v36  ;;  %v20099_v3 = vadd.f32 %v6012_v50, %v19761_v33  ;;  %v7584_v11 = vrot.slane %v7286_v8, %v25819_v51  ;;  %v7588_v53 = vrot.slane %v16259_v31, %v25819_v51 }
 0x4d9   : > { %v7592_v28 = vrot.slane %v7288_v0, %v25819_v51  ;;  %v8575_v34 = vpack.i.b16 %v7544_v9, %v7544_v9  ;;  %v8582_v10 = vpack.i.b16 %v7548_v42, %v7548_v42  ;;  %v8589_v58 = vpack.i.b16 %v7552_v32, %v7552_v32 }
 0x4da   : > { %v8617_v44 = vpack.i.b16 %v7568_v20, %v7568_v20  ;;  %v20107_v36 = vrot.slane %v8554_v35, %v25819_v51  ;;  %v20110_v33 = vrot.slane %v8561_v62, %v25819_v51  ;;  %v20113_v14 = vrot.slane %v8568_v54, %v25819_v51 }
 0x4db   : > { %v6395_v31 = vcombine.high %v6387_v40, %v6387_v40  ;;  %v8610_v8 = vpack.i.b16 %v7564_v61, %v7564_v61  ;;  %v8624_v0 = vpack.i.b16 %v7572_v39, %v7572_v39  ;;  %v8631_v9 = vpack.i.b16 %v7576_v12, %v7576_v12  ;;  %v16868_v39 = vpop.f32.mrf.mxu0 }
 0x4dc   : > { %25886 = vst [vmem:[#allocation35_spill] sm:$0xff] %v20107_v36  ;;  %25887 = vst [vmem:[#allocation36_spill] sm:$0xff] %v20110_v33  ;;  %v20116_v42 = vrot.slane %v6396_v1, %v25817_v25  ;;  %v8638_v32 = vpack.i.b16 %v7580_v52, %v7580_v52  ;;  %v8645_v50 = vpack.i.b16 %v7584_v11, %v7584_v11 }
 0x4dd   : > { %v8652_v20 = vpack.i.b16 %v7588_v53, %v7588_v53  ;;  %v20119_v4 = vrot.slane %v6394_v57, %v25817_v25  ;;  %v20122_v35 = vrot.slane %v8575_v34, %v25819_v51  ;;  %v20127_v54 = vrot.slane %v8617_v44, %v25819_v51 }
 0x4de   : > { %v8659_v61 = vpack.i.b16 %v7592_v28, %v7592_v28  ;;  %v20130_v12 = vrot.slane %v8582_v10, %v25819_v51  ;;  %v20133_v52 = vrot.slane %v8589_v58, %v25819_v51  ;;  %v6403_v57 = vrot.slane %v6387_v40, %v25817_v25 }
 0x4df   : > { %25888 = vst [vmem:[#allocation37_spill] sm:$0xff] %v20127_v54  ;;  %v20137_v1 = vrot.slane %v6395_v31, %v25817_v25  ;;  %v20140_v11 = vrot.slane %v8610_v8, %v25819_v51  ;;  %v20143_v53 = vrot.slane %v8624_v0, %v25819_v51  ;;  %v20146_v28 = vrot.slane %v8631_v9, %v25819_v51  ;;  %v16869_v0 = vpop.f32.mrf.mxu0 }
 0x4e0   : > { %25889 = vst [vmem:[#allocation38_spill] sm:$0xff] %v20130_v12  ;;  %25890 = vst [vmem:[#allocation39_spill] sm:$0xff] %v20133_v52  ;;  %v6428_v34 = vcombine.high %v20116_v42, %v20116_v42  ;;  %v20151_v10 = vrot.slane %v8638_v32, %v25819_v51  ;;  %v20154_v40 = vrot.slane %v8645_v50, %v25819_v51  ;;  %v7066_v62 = vunpack.i.h.s16 %v6403_v57 }
 0x4e1   : > { %25891 = vst [vmem:[#allocation40_spill] sm:$0xff] %v20140_v11  ;;  %25892 = vst [vmem:[#allocation41_spill] sm:$0xff] %v20143_v53  ;;  %v20157_v58 = vrot.slane %v8652_v20, %v25819_v51  ;;  %v6426_v44 = vcombine.high %v20119_v4, %v20119_v4  ;;  %v20162_v31 = vrot.slane %v8659_v61, %v25819_v51  ;;  %v7068_v61 = vunpack.i.h.s16 %v20137_v1 }
 0x4e2   : > { %25893 = vst [vmem:[#allocation42_spill] sm:$0xff] %v20146_v28  ;;  %25894 = vst [vmem:[#allocation43_spill] sm:$0xff] %v20151_v10  ;;  %v6109_v9 = vmul.f32 %v19833_v17, %v19964_v26  ;;  %v6000_v32 = vadd.f32 %v20058_v41, %v19747_v37  ;;  %v6425_v50 = vcombine.high %v6403_v57, %v6403_v57  ;;  %v7076_v10 = vunpack.i.h.s16 %v20116_v42 }
 0x4e3   : > { %25895 = vst [vmem:[#allocation44_spill] sm:$0xff] %v20154_v40  ;;  %25896 = vst [vmem:[#allocation45_spill] sm:$0xff] %v20157_v58  ;;  %v20172_v20 = vcombine.high %v20137_v1, %v20137_v1  ;;  %v7080_v40 = vunpack.i.h.s16 %v6428_v34  ;;  %v20176_v53 = vadd.f32 %v16866_v27, %v16865_v2  ;;  %v6108_v8 = vmul.f32 %v19833_v17, %v19957_v6 }
 0x4e4   : > { %25897 = vst [vmem:[#allocation46_spill] sm:$0xff] %v20162_v31  ;;  %v7074_v26 = vunpack.i.h.s16 %v20119_v4  ;;  %v7078_v54 = vunpack.i.h.s16 %v6426_v44  ;;  %v20181_v37 = vadd.f32 %v16869_v0, %v16868_v39  ;;  %v6106_v41 = vmul.f32 %v19833_v17, %v19960_v23 }
 0x4e5   : > { %25898 = vst [vmem:[#allocation47_spill] sm:$0xff] %v20176_v53  ;;  %v16276_v11 = vpack.i.b16 %v6403_v57, %v6403_v57  ;;  %v16280_v28 = vpack.i.b16 %v20119_v4, %v20119_v4  ;;  %v6148_v58 = vadd.f32 %v19846_v59, %v6109_v9  ;;  %v6107_v27 = vmul.f32 %v19833_v17, %v6000_v32 }
 0x4e6   : > { %25899 = vst [vmem:[#allocation48_spill] sm:$0xff] %v20181_v37  ;;  %v7070_v2 = vunpack.i.h.s16 %v6425_v50  ;;  %v7072_v31 = vunpack.i.h.s16 %v20172_v20  ;;  %v7322_v6 = vpack.i.b16 %v7066_v62, %v7066_v62  ;;  %v7332_v53 = vpack.i.b16 %v7076_v10, %v7076_v10 }
 0x4e7   : > { %v16277_v39 = vpack.i.b16 %v20137_v1, %v20137_v1  ;;  %v7324_v0 = vpack.i.b16 %v7068_v61, %v7068_v61  ;;  %v7336_v37 = vpack.i.b16 %v7080_v40, %v7080_v40  ;;  %v6147_v23 = vadd.f32 %v19846_v59, %v6108_v8 }
 0x4e8   : > { %v7330_v57 = vpack.i.b16 %v7074_v26, %v7074_v26  ;;  %v16281_v4 = vpack.i.b16 %v20116_v42, %v20116_v42  ;;  %v7334_v36 = vpack.i.b16 %v7078_v54, %v7078_v54  ;;  %v16283_v9 = vpack.i.b16 %v6428_v34, %v6428_v34 }
 0x4e9   : > { %v16278_v33 = vpack.i.b16 %v6425_v50, %v6425_v50  ;;  %v6145_v32 = vadd.f32 %v19846_v59, %v6106_v41  ;;  %v20196_v12 = vmax.f32 %v6148_v58, 0.0  ;;  %v6146_v62 = vadd.f32 %v19846_v59, %v6107_v27 }
 0x4ea   : > { %v7326_v10 = vpack.i.b16 %v7070_v2, %v7070_v2  ;;  %v16279_v1 = vpack.i.b16 %v20172_v20, %v20172_v20  ;;  %v7328_v40 = vpack.i.b16 %v7072_v31, %v7072_v31  ;;  %v7768_v8 = vrot.slane %v7332_v53, %v25819_v51 }
 0x4eb   : > { %v16282_v61 = vpack.i.b16 %v6426_v44, %v6426_v44  ;;  %v7724_v26 = vrot.slane %v16276_v11, %v25819_v51  ;;  %v7784_v42 = vrot.slane %v7336_v37, %v25819_v51  ;;  %v6179_v54 = vmax.f32 %v6147_v23, 0.0 }
 0x4ec   : > { %v7760_v34 = vrot.slane %v7330_v57, %v25819_v51  ;;  %v7764_v58 = vrot.slane %v16281_v4, %v25819_v51  ;;  %v7776_v50 = vrot.slane %v7334_v36, %v25819_v51  ;;  %v7780_v41 = vrot.slane %v16283_v9, %v25819_v51 }
 0x4ed   : > { %v16238_v20 = vpack.c.bf16 %v20071_v46, %v20071_v46  ;;  %v6177_v31 = vmax.f32 %v6145_v32, 0.0  ;;  %v20211_v53 = vpack.c.bf16 %v20196_v12, %v6179_v54  ;;  %v20213_v44 = vmax.f32 %v6146_v62, 0.0 }
 0x4ee   : > { %v7728_v11 = vrot.slane %v7322_v6, %v25819_v51  ;;  %v7756_v37 = vrot.slane %v16280_v28, %v25819_v51  ;;  %v8967_v27 = vpack.i.b16 %v7768_v8, %v7768_v8  ;;  %v6338_v2 = vrot.slane %v20086_v30, %v25817_v25 }
 0x4ef   : > { %v7732_v36 = vrot.slane %v16277_v39, %v25819_v51  ;;  %v7772_v23 = vrot.slane %v16282_v61, %v25819_v51  ;;  %v8995_v57 = vpack.i.b16 %v7784_v42, %v7784_v42  ;;  %v20222_v46 = vpack.c.bf16 %v20213_v44, %v6177_v31 }
 0x4f0   : > { %v7736_v4 = vrot.slane %v7324_v0, %v25819_v51  ;;  %v7740_v9 = vrot.slane %v16278_v33, %v25819_v51  ;;  %v8953_v32 = vpack.i.b16 %v7760_v34, %v7760_v34  ;;  %v8960_v6 = vpack.i.b16 %v7764_v58, %v7764_v58 }
 0x4f1   : > { %v7744_v28 = vrot.slane %v7326_v10, %v25819_v51  ;;  %v8981_v62 = vpack.i.b16 %v7776_v50, %v7776_v50  ;;  %v8988_v8 = vpack.i.b16 %v7780_v41, %v7780_v41  ;;  %v6345_v30 = vrot.slane %v16238_v20, %v25817_v25 }
 0x4f2   : > { %v7748_v39 = vrot.slane %v16279_v1, %v25819_v51  ;;  %v8946_v54 = vpack.i.b16 %v7756_v37, %v7756_v37  ;;  %v8972_v61 = vrot.slane %v8967_v27, %v25819_v51  ;;  %v6346_v42 = vcombine.high %v6338_v2, %v6338_v2 }
 0x4f3   : > { %v20231_v31 = vrot.slane %v7328_v40, %v25819_v51  ;;  %v8890_v0 = vpack.i.b16 %v7724_v26, %v7724_v26  ;;  %v8974_v52 = vpack.i.b16 %v7772_v23, %v7772_v23  ;;  %v9000_v33 = vrot.slane %v8995_v57, %v25819_v51 }
 0x4f4   : > { %v8897_v34 = vpack.i.b16 %v7728_v11, %v7728_v11  ;;  %v8904_v58 = vpack.i.b16 %v7732_v36, %v7732_v36  ;;  %v8958_v10 = vrot.slane %v8953_v32, %v25819_v51  ;;  %v8965_v50 = vrot.slane %v8960_v6, %v25819_v51 }
 0x4f5   : > { %25900 = vst [vmem:[#allocation49_spill] sm:$0xff] %v20231_v31  ;;  %v8911_v41 = vpack.i.b16 %v7736_v4, %v7736_v4  ;;  %v8986_v1 = vrot.slane %v8981_v62, %v25819_v51  ;;  %v8993_v20 = vrot.slane %v8988_v8, %v25819_v51  ;;  %v6347_v37 = vcombine.high %v6345_v30, %v6345_v30 }
 0x4f6   : > { %v8951_v27 = vrot.slane %v8946_v54, %v25819_v51  ;;  %v10945_v40 = vcombine.low %v8965_v50, %v8972_v61  ;;  %v6354_v26 = vrot.slane %v6338_v2, %v25817_v25  ;;  %v6368_v23 = vrot.slane %v6346_v42, %v25817_v25 }
 0x4f7   : > { %v8918_v57 = vpack.i.b16 %v7740_v9, %v7740_v9  ;;  %v8925_v11 = vpack.i.b16 %v7744_v28, %v7744_v28  ;;  %v8979_v36 = vrot.slane %v8974_v52, %v25819_v51  ;;  %v10947_v32 = vcombine.low %v8993_v20, %v9000_v33 }
 0x4f8   : > { %v20243_v6 = vrot.slane %v8890_v0, %v25819_v51  ;;  %v20246_v4 = vrot.slane %v8897_v34, %v25819_v51  ;;  %v10944_v62 = vcombine.low %v8951_v27, %v8958_v10  ;;  %v6361_v8 = vrot.slane %v6345_v30, %v25817_v25 }
 0x4f9   : > { %v8932_v54 = vpack.i.b16 %v7748_v39, %v7748_v39  ;;  %v10946_v61 = vcombine.low %v8979_v36, %v8986_v1  ;;  %v6375_v9 = vrot.slane %v6347_v37, %v25817_v25  ;;  %v20253_v28 = vrot.slane %v8904_v58, %v25819_v51 }
 0x4fa   : > { %25901 = vst [vmem:[#allocation50_spill] sm:$0xff] %v20243_v6  ;;  %25902 = vst [vmem:[#allocation51_spill] sm:$0xff] %v20246_v4  ;;  %v20256_v52 = vrot.slane %v10945_v40, %v25817_v25  ;;  %v6376_v42 = vcombine.high %v6354_v26, %v6354_v26  ;;  %v6378_v0 = vcombine.high %v6368_v23, %v6368_v23  ;;  %v7050_v34 = vunpack.i.h.s16 %v6354_v26 }
 0x4fb   : > { %25903 = vst [vmem:[#allocation52_spill] sm:$0xff] %v20253_v28  ;;  %v20259_v33 = vrot.slane %v8911_v41, %v25819_v51  ;;  %v20262_v30 = vrot.slane %v8918_v57, %v25819_v51  ;;  %v20265_v39 = vrot.slane %v10947_v32, %v25817_v25  ;;  %v20268_v10 = vrot.slane %v8925_v11, %v25819_v51 }
 0x4fc   : > { %25904 = vst [vmem:[#allocation53_spill] sm:$0xff] %v20256_v52  ;;  %v20271_v58 = vrot.slane %v10944_v62, %v25817_v25  ;;  %v6377_v50 = vcombine.high %v6361_v8, %v6361_v8  ;;  %v7052_v1 = vunpack.i.h.s16 %v6368_v23  ;;  %v20274_v20 = vrot.slane %v8932_v54, %v25819_v51 }
 0x4fd   : > { %25905 = vst [vmem:[#allocation54_spill] sm:$0xff] %v20259_v33  ;;  %25906 = vst [vmem:[#allocation55_spill] sm:$0xff] %v20262_v30  ;;  %v20279_v37 = vrot.slane %v10946_v61, %v25817_v25  ;;  %v6379_v27 = vcombine.high %v6375_v9, %v6375_v9  ;;  %v7054_v57 = vunpack.i.h.s16 %v6376_v42  ;;  %v7056_v11 = vunpack.i.h.s16 %v6378_v0 }
 0x4fe   : > { %25907 = vst [vmem:[#allocation56_spill] sm:$0xff] %v20265_v39  ;;  %25908 = vst [vmem:[#allocation57_spill] sm:$0xff] %v20268_v10  ;;  %v16268_v36 = vpack.i.b16 %v6354_v26, %v6354_v26  ;;  %v7058_v62 = vunpack.i.h.s16 %v6361_v8  ;;  %v7306_v2 = vpack.i.b16 %v7050_v34, %v7050_v34  ;;  %v16269_v54 = vpack.i.b16 %v6368_v23, %v6368_v23 }
 0x4ff   : > { %25909 = vst [vmem:[#allocation58_spill] sm:$0xff] %v20271_v58  ;;  %25910 = vst [vmem:[#allocation59_spill] sm:$0xff] %v20274_v20  ;;  %v7060_v20 = vunpack.i.h.s16 %v6375_v9  ;;  %v7062_v30 = vunpack.i.h.s16 %v6377_v50  ;;  %v7308_v10 = vpack.i.b16 %v7052_v1, %v7052_v1  ;;  %v20287_v61 = vmul.f32 %v19833_v17, %v20096_v55 }
 0x500   : > { %25911 = vst [vmem:[#allocation60_spill] sm:$0xff] %v20279_v37  ;;  %v7064_v41 = vunpack.i.h.s16 %v6379_v27  ;;  %v16270_v4 = vpack.i.b16 %v6376_v42, %v6376_v42  ;;  %v16272_v6 = vpack.i.b16 %v6361_v8, %v6361_v8  ;;  %v16241_v40 = vpack.c.bf16 %v20196_v12, %v20196_v12 }
 0x501   : > { %v7310_v26 = vpack.i.b16 %v7054_v57, %v7054_v57  ;;  %v16271_v52 = vpack.i.b16 %v6378_v0, %v6378_v0  ;;  %v7312_v58 = vpack.i.b16 %v7056_v11, %v7056_v11  ;;  %v7660_v32 = vrot.slane %v16268_v36, %v25819_v51 }
 0x502   : > { %v7314_v34 = vpack.i.b16 %v7058_v62, %v7058_v62  ;;  %v16273_v23 = vpack.i.b16 %v6375_v9, %v6375_v9  ;;  %v7664_v39 = vrot.slane %v7306_v2, %v25819_v51  ;;  %v7668_v1 = vrot.slane %v16269_v54, %v25819_v51 }
 0x503   : > { %v7316_v37 = vpack.i.b16 %v7060_v20, %v7060_v20  ;;  %v16274_v55 = vpack.i.b16 %v6377_v50, %v6377_v50  ;;  %v7318_v28 = vpack.i.b16 %v7062_v30, %v7062_v30  ;;  %v7672_v42 = vrot.slane %v7308_v10, %v25819_v51 }
 0x504   : > { %v16275_v8 = vpack.i.b16 %v6379_v27, %v6379_v27  ;;  %v7320_v33 = vpack.i.b16 %v7064_v41, %v7064_v41  ;;  %v7676_v12 = vrot.slane %v16270_v4, %v25819_v51  ;;  %v6492_v0 = vrot.slane %v16241_v40, %v25817_v25 }
 0x505   : > { %v7680_v57 = vrot.slane %v7310_v26, %v25819_v51  ;;  %v20299_v11 = vrot.slane %v16271_v52, %v25819_v51  ;;  %v20302_v2 = vrot.slane %v7312_v58, %v25819_v51  ;;  %v8778_v9 = vpack.i.b16 %v7660_v32, %v7660_v32 }
 0x506   : > { %v7692_v50 = vrot.slane %v16272_v6, %v25819_v51  ;;  %v7696_v30 = vrot.slane %v7314_v34, %v25819_v51  ;;  %v8785_v10 = vpack.i.b16 %v7664_v39, %v7664_v39  ;;  %v8792_v20 = vpack.i.b16 %v7668_v1, %v7668_v1  ;;  %v17004_v34 = vpop.f32.mrf.mxu1 }
 0x507   : > { %25912 = vst [vmem:[#allocation61_spill] sm:$0xff] %v20302_v2  ;;  %v7700_v41 = vrot.slane %v16273_v23, %v25819_v51  ;;  %v7704_v4 = vrot.slane %v7316_v37, %v25819_v51  ;;  %v8799_v27 = vpack.i.b16 %v7672_v42, %v7672_v42  ;;  %v6485_v40 = vrot.slane %v20211_v53, %v25817_v25 }
 0x508   : > { %v7708_v52 = vrot.slane %v16274_v55, %v25819_v51  ;;  %v7712_v58 = vrot.slane %v7318_v28, %v25819_v51  ;;  %v8806_v36 = vpack.i.b16 %v7676_v12, %v7676_v12  ;;  %v6494_v32 = vcombine.high %v6492_v0, %v6492_v0 }
 0x509   : > { %v7716_v6 = vrot.slane %v16275_v8, %v25819_v51  ;;  %v7720_v62 = vrot.slane %v7320_v33, %v25819_v51  ;;  %v20315_v39 = vrot.slane %v8778_v9, %v25819_v51  ;;  %v8813_v54 = vpack.i.b16 %v7680_v57, %v7680_v57 }
 0x50a   : > { %v20318_v37 = vrot.slane %v8785_v10, %v25819_v51  ;;  %v20321_v26 = vrot.slane %v8792_v20, %v25819_v51  ;;  %v20328_v23 = vrot.slane %v8799_v27, %v25819_v51  ;;  %v8834_v33 = vpack.i.b16 %v7692_v50, %v7692_v50 }
 0x50b   : > { %25913 = vst [vmem:[#allocation62_spill] sm:$0xff] %v20315_v39  ;;  %v8841_v1 = vpack.i.b16 %v7696_v30, %v7696_v30  ;;  %v6493_v55 = vcombine.high %v6485_v40, %v6485_v40  ;;  %v20331_v42 = vrot.slane %v8806_v36, %v25819_v51  ;;  %v8848_v8 = vpack.i.b16 %v7700_v41, %v7700_v41  ;;  %v6015_v41 = vpop.f32.mrf.mxu1 }
 0x50c   : > { %25914 = vst [vmem:[#allocation63_spill] sm:$0xff] %v20318_v37  ;;  %25915 = vst [vmem:[#allocation64_spill] sm:$0xff] %v20321_v26  ;;  %v8855_v12 = vpack.i.b16 %v7704_v4, %v7704_v4  ;;  %v20334_v57 = vrot.slane %v6494_v32, %v25817_v25  ;;  %v20337_v9 = vrot.slane %v8813_v54, %v25819_v51 }
 0x50d   : > { %25916 = vst [vmem:[#allocation65_spill] sm:$0xff] %v20328_v23  ;;  %25917 = vst [vmem:[#allocation66_spill] sm:$0xff] %v20331_v42  ;;  %v8862_v10 = vpack.i.b16 %v7708_v52, %v7708_v52  ;;  %v8869_v20 = vpack.i.b16 %v7712_v58, %v7712_v58  ;;  %v8876_v28 = vpack.i.b16 %v7716_v6, %v7716_v6 }
 0x50e   : > { %25918 = vst [vmem:[#allocation67_spill] sm:$0xff] %v20337_v9  ;;  %v8883_v53 = vpack.i.b16 %v7720_v62, %v7720_v62  ;;  %v6501_v27 = vrot.slane %v6485_v40, %v25817_v25  ;;  %v20341_v50 = vrot.slane %v6492_v0, %v25817_v25  ;;  %v6110_v30 = vmul.f32 %v19833_v17, %v20099_v3 }
 0x50f   : > { %v20346_v4 = vrot.slane %v8834_v33, %v25819_v51  ;;  %v20349_v36 = vrot.slane %v8841_v1, %v25819_v51  ;;  %v6515_v52 = vrot.slane %v6493_v55, %v25817_v25  ;;  %v6024_v58 = vadd.f32 %v17004_v34, %v19777_v21 }
 0x510   : > { %v20354_v32 = vrot.slane %v8848_v8, %v25819_v51  ;;  %v20357_v0 = vrot.slane %v8855_v12, %v25819_v51  ;;  %v6526_v3 = vcombine.high %v20334_v57, %v20334_v57  ;;  %v6151_v40 = vadd.f32 %v19846_v59, %v20287_v61 }
 0x511   : > { %25919 = vst [vmem:[#allocation68_spill] sm:$0xff] %v20346_v4  ;;  %25920 = vst [vmem:[#allocation69_spill] sm:$0xff] %v20349_v36  ;;  %v20364_v6 = vrot.slane %v8862_v10, %v25819_v51  ;;  %v20367_v62 = vrot.slane %v8869_v20, %v25819_v51  ;;  %v20370_v21 = vrot.slane %v8876_v28, %v25819_v51  ;;  %v7108_v12 = vunpack.i.h.s16 %v20334_v57 }
 0x512   : > { %25921 = vst [vmem:[#allocation70_spill] sm:$0xff] %v20354_v32  ;;  %25922 = vst [vmem:[#allocation71_spill] sm:$0xff] %v20357_v0  ;;  %v6016_v54 = vadd.f32 %v6015_v41, %v19767_v15  ;;  %v6523_v34 = vcombine.high %v6501_v27, %v6501_v27  ;;  %v6524_v33 = vcombine.high %v20341_v50, %v20341_v50  ;;  %v7098_v10 = vunpack.i.h.s16 %v6501_v27 }
 0x513   : > { %25923 = vst [vmem:[#allocation72_spill] sm:$0xff] %v20364_v6  ;;  %25924 = vst [vmem:[#allocation73_spill] sm:$0xff] %v20367_v62  ;;  %v16240_v1 = vpack.c.bf16 %v20213_v44, %v20213_v44  ;;  %v6149_v61 = vadd.f32 %v19846_v59, %v6110_v30  ;;  %v20379_v55 = vrot.slane %v8883_v53, %v25819_v51  ;;  %v7112_v20 = vunpack.i.h.s16 %v6526_v3 }
 0x514   : > { %25925 = vst [vmem:[#allocation74_spill] sm:$0xff] %v20370_v21  ;;  %v6525_v8 = vcombine.high %v6515_v52, %v6515_v52  ;;  %v6113_v28 = vmul.f32 %v19833_v17, %v6024_v58  ;;  %v6183_v41 = vmax.f32 %v6151_v40, 0.0  ;;  %v7100_v31 = vunpack.i.h.s16 %v6515_v52 }
 0x515   : > { %25926 = vst [vmem:[#allocation75_spill] sm:$0xff] %v20379_v55  ;;  %v7106_v21 = vunpack.i.h.s16 %v20341_v50  ;;  %v20388_v44 = vrot.slane %v20222_v46, %v25817_v25  ;;  %v6111_v53 = vmul.f32 %v19833_v17, %v6016_v54  ;;  %v7102_v30 = vunpack.i.h.s16 %v6523_v34 }
 0x516   : > { %v7110_v55 = vunpack.i.h.s16 %v6524_v33  ;;  %v6443_v6 = vrot.slane %v16240_v1, %v25817_v25  ;;  %v6181_v58 = vmax.f32 %v6149_v61, 0.0  ;;  %v7104_v62 = vunpack.i.h.s16 %v6525_v8 }
 0x517   : > { %v16292_v32 = vpack.i.b16 %v6501_v27, %v6501_v27  ;;  %v7364_v15 = vpack.i.b16 %v7108_v12, %v7108_v12  ;;  %v6152_v36 = vadd.f32 %v19846_v59, %v6113_v28  ;;  %v7354_v40 = vpack.i.b16 %v7098_v10, %v7098_v10 }
 0x518   : > { %v16293_v4 = vpack.i.b16 %v6515_v52, %v6515_v52  ;;  %v16296_v0 = vpack.i.b16 %v20341_v50, %v20341_v50  ;;  %v7368_v42 = vpack.i.b16 %v7112_v20, %v7112_v20  ;;  %v7356_v46 = vpack.i.b16 %v7100_v31, %v7100_v31 }
 0x519   : > { %v16294_v9 = vpack.i.b16 %v6523_v34, %v6523_v34  ;;  %v7362_v26 = vpack.i.b16 %v7106_v21, %v7106_v21  ;;  %v16297_v17 = vpack.i.b16 %v20334_v57, %v20334_v57  ;;  %v7358_v54 = vpack.i.b16 %v7102_v30, %v7102_v30  ;;  %v20406_v57 = vld [vmem:[%s25562_s9] ss:$0 sm:$0xff] }
 0x51a   : > { %v16295_v1 = vpack.i.b16 %v6525_v8, %v6525_v8  ;;  %v7366_v61 = vpack.i.b16 %v7110_v55, %v7110_v55  ;;  %v16299_v23 = vpack.i.b16 %v6526_v3, %v6526_v3  ;;  %v7360_v27 = vpack.i.b16 %v7104_v62, %v7104_v62 }
 0x51b   : > { %v16298_v12 = vpack.i.b16 %v6524_v33, %v6524_v33  ;;  %v7852_v59 = vrot.slane %v16292_v32, %v25819_v51  ;;  %v7896_v52 = vrot.slane %v7364_v15, %v25819_v51  ;;  %v7856_v28 = vrot.slane %v7354_v40, %v25819_v51 }
 0x51c   : > { %v7912_v50 = vrot.slane %v7368_v42, %v25819_v51  ;;  %v20401_v31 = vmax.f32 %v6152_v36, 0.0  ;;  %v6150_v21 = vadd.f32 %v20406_v57, %v6111_v53  ;;  %v7860_v3 = vrot.slane %v16293_v4, %v25819_v51 }
 0x51d   : > { %v7864_v62 = vrot.slane %v7356_v46, %v25819_v51  ;;  %v7888_v32 = vrot.slane %v7362_v26, %v25819_v51  ;;  %v7892_v34 = vrot.slane %v16297_v17, %v25819_v51  ;;  %v7904_v33 = vrot.slane %v7366_v61, %v25819_v51 }
 0x51e   : > { %v7908_v42 = vrot.slane %v16299_v23, %v25819_v51  ;;  %v6445_v36 = vcombine.high %v6443_v6, %v6443_v6  ;;  %v20416_v55 = vpack.c.bf16 %v20401_v31, %v6183_v41  ;;  %v7868_v8 = vrot.slane %v16294_v9, %v25819_v51 }
 0x51f   : > { %v7884_v15 = vrot.slane %v16296_v0, %v25819_v51  ;;  %v9191_v10 = vpack.i.b16 %v7896_v52, %v7896_v52  ;;  %v20420_v4 = vmax.f32 %v6150_v21, 0.0  ;;  %v7872_v20 = vrot.slane %v7358_v54, %v25819_v51 }
 0x520   : > { %v7876_v26 = vrot.slane %v16295_v1, %v25819_v51  ;;  %v7900_v53 = vrot.slane %v16298_v12, %v25819_v51  ;;  %v9219_v30 = vpack.i.b16 %v7912_v50, %v7912_v50  ;;  %v20426_v23 = vrot.slane %v7360_v27, %v25819_v51 }
 0x521   : > { %v9177_v40 = vpack.i.b16 %v7888_v32, %v7888_v32  ;;  %v9184_v41 = vpack.i.b16 %v7892_v34, %v7892_v34  ;;  %v20429_v46 = vpack.c.bf16 %v20420_v4, %v6181_v58  ;;  %v9114_v9 = vpack.i.b16 %v7852_v59, %v7852_v59 }
 0x522   : > { %25927 = vst [vmem:[#allocation76_spill] sm:$0xff] %v20426_v23  ;;  %v9205_v0 = vpack.i.b16 %v7904_v33, %v7904_v33  ;;  %v9212_v17 = vpack.i.b16 %v7908_v42, %v7908_v42  ;;  %v20432_v61 = vrot.slane %v6445_v36, %v25817_v25  ;;  %v9121_v54 = vpack.i.b16 %v7856_v28, %v7856_v28 }
 0x523   : > { %v9128_v52 = vpack.i.b16 %v7860_v3, %v7860_v3  ;;  %v9170_v1 = vpack.i.b16 %v7884_v15, %v7884_v15  ;;  %v9196_v12 = vrot.slane %v9191_v10, %v25819_v51  ;;  %v9135_v50 = vpack.i.b16 %v7864_v62, %v7864_v62 }
 0x524   : > { %v9198_v21 = vpack.i.b16 %v7900_v53, %v7900_v53  ;;  %v9224_v27 = vrot.slane %v9219_v30, %v25819_v51  ;;  %v20437_v32 = vrot.slane %v6443_v6, %v25817_v25  ;;  %v9142_v58 = vpack.i.b16 %v7868_v8, %v7868_v8 }
 0x525   : > { %v9182_v59 = vrot.slane %v9177_v40, %v25819_v51  ;;  %v9189_v34 = vrot.slane %v9184_v41, %v25819_v51  ;;  %v6444_v33 = vcombine.high %v20388_v44, %v20388_v44  ;;  %v9149_v28 = vpack.i.b16 %v7872_v20, %v7872_v20 }
 0x526   : > { %v9210_v3 = vrot.slane %v9205_v0, %v25819_v51  ;;  %v9217_v42 = vrot.slane %v9212_v17, %v25819_v51  ;;  %v6477_v62 = vcombine.high %v20432_v61, %v20432_v61  ;;  %v20448_v36 = vrot.slane %v9114_v9, %v25819_v51 }
 0x527   : > { %v20451_v6 = vrot.slane %v9121_v54, %v25819_v51  ;;  %v9175_v8 = vrot.slane %v9170_v1, %v25819_v51  ;;  %v11141_v15 = vcombine.low %v9189_v34, %v9196_v12  ;;  %v9203_v10 = vrot.slane %v9198_v21, %v25819_v51 }
 0x528   : > { %25928 = vst [vmem:[#allocation77_spill] sm:$0xff] %v20448_v36  ;;  %v11143_v53 = vcombine.low %v9217_v42, %v9224_v27  ;;  %v6452_v20 = vrot.slane %v20388_v44, %v25817_v25  ;;  %v6475_v30 = vcombine.high %v20437_v32, %v20437_v32  ;;  %v9156_v40 = vpack.i.b16 %v7876_v26, %v7876_v26 }
 0x529   : > { %25929 = vst [vmem:[#allocation78_spill] sm:$0xff] %v20451_v6  ;;  %v11140_v9 = vcombine.low %v9175_v8, %v9182_v59  ;;  %v6466_v0 = vrot.slane %v6444_v33, %v25817_v25  ;;  %v20463_v17 = vrot.slane %v9128_v52, %v25819_v51  ;;  %v11142_v54 = vcombine.low %v9203_v10, %v9210_v3 }
 0x52a   : > { %v7092_v1 = vunpack.i.h.s16 %v20432_v61  ;;  %v7096_v12 = vunpack.i.h.s16 %v6477_v62  ;;  %v20467_v21 = vrot.slane %v9135_v50, %v25819_v51  ;;  %v20470_v44 = vrot.slane %v9142_v58, %v25819_v51 }
 0x52b   : > { %25930 = vst [vmem:[#allocation79_spill] sm:$0xff] %v20463_v17  ;;  %v20473_v26 = vrot.slane %v11141_v15, %v25817_v25  ;;  %v7090_v27 = vunpack.i.h.s16 %v20437_v32  ;;  %v20477_v59 = vrot.slane %v9149_v28, %v25819_v51  ;;  %v20480_v52 = vrot.slane %v11143_v53, %v25817_v25 }
 0x52c   : > { %25931 = vst [vmem:[#allocation80_spill] sm:$0xff] %v20467_v21  ;;  %25932 = vst [vmem:[#allocation81_spill] sm:$0xff] %v20470_v44  ;;  %v6474_v34 = vcombine.high %v6452_v20, %v6452_v20  ;;  %v7094_v33 = vunpack.i.h.s16 %v6475_v30  ;;  %v20483_v3 = vrot.slane %v9156_v40, %v25819_v51  ;;  %v20486_v50 = vrot.slane %v11140_v9, %v25817_v25 }
 0x52d   : > { %25933 = vst [vmem:[#allocation82_spill] sm:$0xff] %v20473_v26  ;;  %25934 = vst [vmem:[#allocation83_spill] sm:$0xff] %v20477_v59  ;;  %v6476_v58 = vcombine.high %v6466_v0, %v6466_v0  ;;  %v7082_v42 = vunpack.i.h.s16 %v6452_v20  ;;  %v20491_v15 = vrot.slane %v11142_v54, %v25817_v25  ;;  %v7348_v28 = vpack.i.b16 %v7092_v1, %v7092_v1 }
 0x52e   : > { %25935 = vst [vmem:[#allocation84_spill] sm:$0xff] %v20480_v52  ;;  %25936 = vst [vmem:[#allocation85_spill] sm:$0xff] %v20483_v3  ;;  %v7352_v10 = vpack.i.b16 %v7096_v12, %v7096_v12  ;;  %v7084_v41 = vunpack.i.h.s16 %v6466_v0  ;;  %v7346_v44 = vpack.i.b16 %v7090_v27, %v7090_v27  ;;  %v16289_v40 = vpack.i.b16 %v20432_v61, %v20432_v61 }
 0x52f   : > { %25937 = vst [vmem:[#allocation86_spill] sm:$0xff] %v20486_v50  ;;  %25938 = vst [vmem:[#allocation87_spill] sm:$0xff] %v20491_v15  ;;  %v7086_v3 = vunpack.i.h.s16 %v6474_v34  ;;  %v7350_v59 = vpack.i.b16 %v7094_v33, %v7094_v33  ;;  %v16291_v17 = vpack.i.b16 %v6477_v62, %v6477_v62  ;;  %v7088_v8 = vunpack.i.h.s16 %v6476_v58 }
 0x530   : > { %v16284_v6 = vpack.i.b16 %v6452_v20, %v6452_v20  ;;  %v7338_v54 = vpack.i.b16 %v7082_v42, %v7082_v42  ;;  %v16288_v1 = vpack.i.b16 %v20437_v32, %v20437_v32  ;;  %v16285_v12 = vpack.i.b16 %v6466_v0, %v6466_v0 }
 0x531   : > { %v16290_v36 = vpack.i.b16 %v6475_v30, %v6475_v30  ;;  %v7832_v53 = vrot.slane %v7348_v28, %v25819_v51  ;;  %v7848_v27 = vrot.slane %v7352_v10, %v25819_v51  ;;  %v7340_v26 = vpack.i.b16 %v7084_v41, %v7084_v41 }
 0x532   : > { %v16286_v61 = vpack.i.b16 %v6474_v34, %v6474_v34  ;;  %v7824_v50 = vrot.slane %v7346_v44, %v25819_v51  ;;  %v7828_v9 = vrot.slane %v16289_v40, %v25819_v51  ;;  %v7342_v33 = vpack.i.b16 %v7086_v3, %v7086_v3 }
 0x533   : > { %v16287_v62 = vpack.i.b16 %v6476_v58, %v6476_v58  ;;  %v7840_v20 = vrot.slane %v7350_v59, %v25819_v51  ;;  %v7844_v42 = vrot.slane %v16291_v17, %v25819_v51  ;;  %v7344_v52 = vpack.i.b16 %v7088_v8, %v7088_v8 }
 0x534   : > { %v7788_v32 = vrot.slane %v16284_v6, %v25819_v51  ;;  %v7820_v30 = vrot.slane %v16288_v1, %v25819_v51  ;;  %v16243_v0 = vpack.c.bf16 %v20401_v31, %v20401_v31  ;;  %v7792_v41 = vrot.slane %v7338_v54, %v25819_v51  ;;  %v17007_v1 = vpop.f32.mrf.mxu1 }
 0x535   : > { %v7836_v44 = vrot.slane %v16290_v36, %v25819_v51  ;;  %v9079_v34 = vpack.i.b16 %v7832_v53, %v7832_v53  ;;  %v9107_v28 = vpack.i.b16 %v7848_v27, %v7848_v27  ;;  %v7796_v3 = vrot.slane %v16285_v12, %v25819_v51 }
 0x536   : > { %v7800_v59 = vrot.slane %v7340_v26, %v25819_v51  ;;  %v9065_v58 = vpack.i.b16 %v7824_v50, %v7824_v50  ;;  %v9072_v17 = vpack.i.b16 %v7828_v9, %v7828_v9  ;;  %v7804_v8 = vrot.slane %v16286_v61, %v25819_v51 }
 0x537   : > { %v9093_v6 = vpack.i.b16 %v7840_v20, %v7840_v20  ;;  %v9100_v10 = vpack.i.b16 %v7844_v42, %v7844_v42  ;;  %v6583_v40 = vrot.slane %v20416_v55, %v25817_v25  ;;  %v7808_v31 = vrot.slane %v7342_v33, %v25819_v51 }
 0x538   : > { %v20520_v54 = vrot.slane %v16287_v62, %v25819_v51  ;;  %v9058_v36 = vpack.i.b16 %v7820_v30, %v7820_v30  ;;  %v6590_v53 = vrot.slane %v16243_v0, %v25817_v25  ;;  %v20524_v26 = vrot.slane %v7344_v52, %v25819_v51 }
 0x539   : > { %v9084_v50 = vrot.slane %v9079_v34, %v25819_v51  ;;  %v9086_v9 = vpack.i.b16 %v7836_v44, %v7836_v44  ;;  %v9112_v12 = vrot.slane %v9107_v28, %v25819_v51  ;;  %v9002_v27 = vpack.i.b16 %v7788_v32, %v7788_v32 }
 0x53a   : > { %25939 = vst [vmem:[#allocation88_spill] sm:$0xff] %v20520_v54  ;;  %25940 = vst [vmem:[#allocation89_spill] sm:$0xff] %v20524_v26  ;;  %v9009_v61 = vpack.i.b16 %v7792_v41, %v7792_v41  ;;  %v9070_v55 = vrot.slane %v9065_v58, %v25819_v51  ;;  %v9077_v33 = vrot.slane %v9072_v17, %v25819_v51  ;;  %v6028_v58 = vpop.f32.mrf.mxu1 }
 0x53b   : > { %v9098_v62 = vrot.slane %v9093_v6, %v25819_v51  ;;  %v9105_v20 = vrot.slane %v9100_v10, %v25819_v51  ;;  %v6591_v42 = vcombine.high %v6583_v40, %v6583_v40  ;;  %v6037_v30 = vadd.f32 %v17007_v1, %v19821_v43 }
 0x53c   : > { %v9016_v52 = vpack.i.b16 %v7796_v3, %v7796_v3  ;;  %v9023_v0 = vpack.i.b16 %v7800_v59, %v7800_v59  ;;  %v9063_v34 = vrot.slane %v9058_v36, %v25819_v51  ;;  %v6592_v44 = vcombine.high %v6590_v53, %v6590_v53  ;;  %v20546_v59 = vld [vmem:[%s25561_s8] ss:$0 sm:$0xff] }
 0x53d   : > { %v9030_v15 = vpack.i.b16 %v7804_v8, %v7804_v8  ;;  %v9091_v32 = vrot.slane %v9086_v9, %v25819_v51  ;;  %v11043_v41 = vcombine.low %v9077_v33, %v9084_v50  ;;  %v11045_v28 = vcombine.low %v9105_v20, %v9112_v12 }
 0x53e   : > { %v20536_v17 = vrot.slane %v9002_v27, %v25819_v51  ;;  %v9037_v6 = vpack.i.b16 %v7808_v31, %v7808_v31  ;;  %v11042_v21 = vcombine.low %v9063_v34, %v9070_v55  ;;  %v6599_v10 = vrot.slane %v6583_v40, %v25817_v25 }
 0x53f   : > { %v11044_v23 = vcombine.low %v9091_v32, %v9098_v62  ;;  %v20540_v43 = vrot.slane %v6590_v53, %v25817_v25  ;;  %v6613_v3 = vrot.slane %v6591_v42, %v25817_v25  ;;  %v6116_v8 = vmul.f32 %v20546_v59, %v6037_v30  ;;  %v17008_v30 = vpop.f32.mrf.mxu1 }
 0x540   : > { %25941 = vst [vmem:[#allocation90_spill] sm:$0xff] %v20536_v17  ;;  %v20550_v36 = vrot.slane %v9009_v61, %v25819_v51  ;;  %v20555_v40 = vrot.slane %v6592_v44, %v25817_v25  ;;  %v6029_v53 = vadd.f32 %v6028_v58, %v19808_v45  ;;  %v20559_v1 = vrot.slane %v9016_v52, %v25819_v51 }
 0x541   : > { %v20564_v9 = vrot.slane %v11043_v41, %v25817_v25  ;;  %v20567_v12 = vrot.slane %v11045_v28, %v25817_v25  ;;  %v20570_v27 = vrot.slane %v9023_v0, %v25819_v51  ;;  %v20573_v61 = vrot.slane %v11042_v21, %v25817_v25  ;;  %v6031_v50 = vpop.f32.mrf.mxu1 }
 0x542   : > { %25942 = vst [vmem:[#allocation91_spill] sm:$0xff] %v20550_v36  ;;  %25943 = vst [vmem:[#allocation92_spill] sm:$0xff] %v20559_v1  ;;  %v6621_v55 = vcombine.high %v6599_v10, %v6599_v10  ;;  %v16242_v45 = vpack.c.bf16 %v20420_v4, %v20420_v4  ;;  %v20578_v33 = vrot.slane %v11044_v23, %v25817_v25  ;;  %v7130_v0 = vunpack.i.h.s16 %v6599_v10 }
 0x543   : > { %25944 = vst [vmem:[#allocation93_spill] sm:$0xff] %v20564_v9  ;;  %25945 = vst [vmem:[#allocation94_spill] sm:$0xff] %v20567_v12  ;;  %v6622_v62 = vcombine.high %v20540_v43, %v20540_v43  ;;  %v6623_v20 = vcombine.high %v6613_v3, %v6613_v3  ;;  %v20583_v42 = vadd.f32 %v20406_v57, %v6116_v8  ;;  %v7132_v32 = vunpack.i.h.s16 %v6613_v3 }
 0x544   : > { %25946 = vst [vmem:[#allocation95_spill] sm:$0xff] %v20570_v27  ;;  %25947 = vst [vmem:[#allocation96_spill] sm:$0xff] %v20573_v61  ;;  %v20586_v52 = vrot.slane %v9030_v15, %v25819_v51  ;;  %v20590_v21 = vcombine.high %v20555_v40, %v20555_v40  ;;  %v6114_v4 = vmul.f32 %v20546_v59, %v6029_v53  ;;  %v7134_v41 = vunpack.i.h.s16 %v6621_v55 }
 0x545   : > { %25948 = vst [vmem:[#allocation97_spill] sm:$0xff] %v20578_v33  ;;  %v20594_v23 = vrot.slane %v9037_v6, %v25819_v51  ;;  %v7138_v15 = vunpack.i.h.s16 %v20540_v43  ;;  %v20603_v28 = vrot.slane %v20429_v46, %v25817_v25  ;;  %v20606_v58 = vrot.slane %v16242_v45, %v25817_v25 }
 0x546   : > { %25949 = vst [vmem:[#allocation98_spill] sm:$0xff] %v20586_v52  ;;  %v7136_v8 = vunpack.i.h.s16 %v6623_v20  ;;  %v7140_v6 = vunpack.i.h.s16 %v20555_v40  ;;  %v7142_v53 = vunpack.i.h.s16 %v6622_v62  ;;  %v6187_v34 = vmax.f32 %v20583_v42, 0.0 }
 0x547   : > { %25950 = vst [vmem:[#allocation99_spill] sm:$0xff] %v20594_v23  ;;  %v7144_v44 = vunpack.i.h.s16 %v20590_v21  ;;  %v16308_v31 = vpack.i.b16 %v6599_v10, %v6599_v10  ;;  %v7386_v12 = vpack.i.b16 %v7130_v0, %v7130_v0  ;;  %v20612_v33 = vadd.f32 %v20406_v57, %v6114_v4  ;;  %v20618_v0 = vpop.f32.mrf.mxu1 }
 0x548   : > { %v16309_v9 = vpack.i.b16 %v6613_v3, %v6613_v3  ;;  %v7388_v46 = vpack.i.b16 %v7132_v32, %v7132_v32  ;;  %v16310_v61 = vpack.i.b16 %v6621_v55, %v6621_v55  ;;  %v16312_v45 = vpack.i.b16 %v20540_v43, %v20540_v43 }
 0x549   : > { %v7390_v52 = vpack.i.b16 %v7134_v41, %v7134_v41  ;;  %v16311_v23 = vpack.i.b16 %v6623_v20, %v6623_v20  ;;  %v7394_v1 = vpack.i.b16 %v7138_v15, %v7138_v15  ;;  %v16313_v42 = vpack.i.b16 %v20555_v40, %v20555_v40 }
 0x54a   : > { %v7392_v27 = vpack.i.b16 %v7136_v8, %v7136_v8  ;;  %v7396_v17 = vpack.i.b16 %v7140_v6, %v7140_v6  ;;  %v16314_v36 = vpack.i.b16 %v6622_v62, %v6622_v62  ;;  %v7398_v10 = vpack.i.b16 %v7142_v53, %v7142_v53  ;;  %v25952_v53 = vld [vmem:[#allocation13_spill] sm:$0xff] }
 0x54b   : > { %v16315_v3 = vpack.i.b16 %v20590_v21, %v20590_v21  ;;  %v7400_v4 = vpack.i.b16 %v7144_v44, %v7144_v44  ;;  %v20623_v55 = vrot.slane %v16308_v31, %v25819_v51  ;;  %v20626_v43 = vrot.slane %v7386_v12, %v25819_v51  ;;  %v25951_v44 = vld [vmem:[#allocation4_spill] sm:$0xff] }
 0x54c   : > { %v20629_v20 = vrot.slane %v16309_v9, %v25819_v51  ;;  %v20632_v40 = vrot.slane %v7388_v46, %v25819_v51  ;;  %v20635_v62 = vrot.slane %v16310_v61, %v25819_v51  ;;  %v6040_v32 = vadd.f32 %v17008_v30, %v19858_v19  ;;  %v20654_v30 = vpop.f32.mrf.mxu1  ;;  %v25953_v46 = vld [vmem:[#allocation12_spill] sm:$0xff] }
 0x54d   : > { %v20639_v21 = vrot.slane %v7390_v52, %v25819_v51  ;;  %v20642_v31 = vrot.slane %v16311_v23, %v25819_v51  ;;  %v5871_v12 = vadd.f32 %v19876_v63, %v19866_v7  ;;  %v12475_v9 = vshll.u32 %v25951_v44, 16 }
 0x54e   : > { %v8012_v41 = vrot.slane %v16312_v45, %v25819_v51  ;;  %v8016_v15 = vrot.slane %v7394_v1, %v25819_v51  ;;  %v6117_v61 = vmul.f32 %v20546_v59, %v6040_v32  ;;  %v20652_v19 = vadd.f32 %v19812_v5, %v19773_v47 }
 0x54f   : > { %v8020_v52 = vrot.slane %v16313_v42, %v25819_v51  ;;  %v8024_v23 = vrot.slane %v7396_v17, %v25819_v51  ;;  %v6032_v8 = vadd.f32 %v6031_v50, %v5871_v12  ;;  %v20658_v7 = vrot.slane %v12475_v9, 1  ;;  %v25954_v42 = vld [vmem:[#allocation7_spill] sm:$0xff]  ;;  %v17012_v12 = vpop.f32.mrf.mxu1 }
 0x550   : > { %v8028_v63 = vrot.slane %v16314_v36, %v25819_v51  ;;  %v8040_v6 = vrot.slane %v7400_v4, %v25819_v51  ;;  %v6156_v1 = vadd.f32 %v20406_v57, %v6117_v61  ;;  %v20665_v45 = vadd.f32 %v25953_v46, %v25952_v53  ;;  %v25956_v61 = vld [vmem:[#allocation6_spill] sm:$0xff]  ;;  %v25959_v46 = vld [vmem:[#allocation15_spill] sm:$0xff] }
 0x551   : > { %v8032_v5 = vrot.slane %v7398_v10, %v25819_v51  ;;  %v6115_v47 = vmul.f32 %v20546_v59, %v6032_v8  ;;  %v20672_v17 = vsel %vm4988_vm0, %v25954_v42, %v20658_v7  ;;  %v12835_v50 = vrot.slane %v25951_v44, 1 }
 0x552   : > { %25955 = vst [vmem:[#allocation13_spill] sm:$0xff] %v20672_v17  ;;  %v8036_v36 = vrot.slane %v16315_v3, %v25819_v51  ;;  %v9401_v4 = vpack.i.b16 %v8016_v15, %v8016_v15  ;;  %v20676_v32 = vmax.f32 %v6156_v1, 0.0  ;;  %12918 = vrot.lane.b32.xlu0 %v20672_v17, %s17606_s27  ;;  %v5895_v10 = vadd.f32 %v19899_v49, %v19880_v22 }
 0x553   : > { %v6154_v9 = vadd.f32 %v20406_v57, %v6115_v47  ;;  %v25957_v8 = vrot.slane %v25956_v61, 1  ;;  %v25960_v3 = vrot.slane %v25959_v46, 1  ;;  %v20695_v1 = vadd.f32 %v19891_v29, %v19870_v38 }
 0x554   : > { %v9415_v42 = vpack.i.b16 %v8024_v23, %v8024_v23  ;;  %v9443_v17 = vpack.i.b16 %v8040_v6, %v8040_v6  ;;  %v6543_v22 = vcombine.high %v20606_v58, %v20606_v58  ;;  %v20700_v49 = vpack.c.bf16 %v20676_v32, %v6187_v34 }
 0x555   : > { %v20686_v53 = vsel %vm1787_vm6, %v25957_v8, %v12835_v50  ;;  %v20691_v15 = vsel %vm1787_vm6, %v12835_v50, %v25960_v3  ;;  %v6185_v47 = vmax.f32 %v20612_v33, 0.0  ;;  %v20703_v8 = vmax.f32 %v6154_v9, 0.0 }
 0x556   : > { %25958 = vst [vmem:[#allocation12_spill] sm:$0xff] %v20686_v53  ;;  %25961 = vst [vmem:[#allocation7_spill] sm:$0xff] %v20691_v15  ;;  %v17198_v50 = vpack.i.bf16 %v20691_v15, %v20686_v53  ;;  %v20707_v46 = vadd.f32 %v17012_v12, %v5895_v10  ;;  %v20710_v38 = vrot.slane %v7392_v27, %v25819_v51 }
 0x557   : > { %v9408_v29 = vpack.i.b16 %v8020_v52, %v8020_v52  ;;  %v9429_v23 = vpack.i.b16 %v8032_v5, %v8032_v5  ;;  %v9436_v6 = vpack.i.b16 %v8036_v36, %v8036_v36  ;;  %v9338_v3 = vpack.i.b16 %v20623_v55, %v20623_v55 }
 0x558   : > { %25962 = vst [vmem:[#allocation15_spill] sm:$0xff] %v20710_v38  ;;  %v9394_v34 = vpack.i.b16 %v8012_v41, %v8012_v41  ;;  %v9422_v61 = vpack.i.b16 %v8028_v63, %v8028_v63  ;;  %v20715_v33 = vpack.c.bf16 %v20703_v8, %v6185_v47  ;;  %17199 = vrot.lane.b32.xlu0 %v17198_v50, %s17605_s29 }
 0x559   : > { %v9420_v9 = vrot.slane %v9415_v42, %v25819_v51  ;;  %v9448_v10 = vrot.slane %v9443_v17, %v25819_v51  ;;  %v6542_v27 = vcombine.high %v20603_v28, %v20603_v28  ;;  %v20723_v52 = vrot.slane %v6543_v22, %v25817_v25 }
 0x55a   : > { %v9345_v55 = vpack.i.b16 %v20626_v43, %v20626_v43  ;;  %v9352_v41 = vpack.i.b16 %v20629_v20, %v20629_v20  ;;  %v9359_v63 = vpack.i.b16 %v20632_v40, %v20632_v40  ;;  %v9406_v5 = vrot.slane %v9401_v4, %v25819_v51 }
 0x55b   : > { %v9413_v36 = vrot.slane %v9408_v29, %v25819_v51  ;;  %v9434_v17 = vrot.slane %v9429_v23, %v25819_v51  ;;  %v9441_v12 = vrot.slane %v9436_v6, %v25819_v51  ;;  %v20737_v42 = vrot.slane %v20606_v58, %v25817_v25 }
 0x55c   : > { %v9366_v43 = vpack.i.b16 %v20635_v62, %v20635_v62  ;;  %v9399_v20 = vrot.slane %v9394_v34, %v25819_v51  ;;  %v9427_v22 = vrot.slane %v9422_v61, %v25819_v51  ;;  %v6550_v40 = vrot.slane %v20603_v28, %v25817_v25 }
 0x55d   : > { %v11337_v4 = vcombine.low %v9413_v36, %v9420_v9  ;;  %v11339_v47 = vcombine.low %v9441_v12, %v9448_v10  ;;  %v6564_v50 = vrot.slane %v6542_v27, %v25817_v25  ;;  %v6575_v29 = vcombine.high %v20723_v52, %v20723_v52 }
 0x55e   : > { %v20749_v58 = vrot.slane %v9338_v3, %v25819_v51  ;;  %v20752_v23 = vrot.slane %v9345_v55, %v25819_v51  ;;  %v9373_v62 = vpack.i.b16 %v20639_v21, %v20639_v21  ;;  %v9380_v61 = vpack.i.b16 %v20642_v31, %v20642_v31 }
 0x55f   : > { %v11336_v6 = vcombine.low %v9399_v20, %v9406_v5  ;;  %v11338_v34 = vcombine.low %v9427_v22, %v9434_v17  ;;  %v6573_v9 = vcombine.high %v20737_v42, %v20737_v42  ;;  %v20763_v3 = vrot.slane %v9352_v41, %v25819_v51 }
 0x560   : > { %25963 = vst [vmem:[#allocation100_spill] sm:$0xff] %v20749_v58  ;;  %25964 = vst [vmem:[#allocation101_spill] sm:$0xff] %v20752_v23  ;;  %v20766_v10 = vrot.slane %v9359_v63, %v25819_v51  ;;  %v6572_v27 = vcombine.high %v6550_v40, %v6550_v40  ;;  %v7124_v21 = vunpack.i.h.s16 %v20723_v52  ;;  %v20770_v55 = vrot.slane %v11337_v4, %v25817_v25 }
 0x561   : > { %25965 = vst [vmem:[#allocation102_spill] sm:$0xff] %v20763_v3  ;;  %v20773_v31 = vrot.slane %v11339_v47, %v25817_v25  ;;  %v6574_v5 = vcombine.high %v6564_v50, %v6564_v50  ;;  %v7128_v36 = vunpack.i.h.s16 %v6575_v29  ;;  %v20776_v17 = vrot.slane %v9366_v43, %v25819_v51 }
 0x562   : > { %25966 = vst [vmem:[#allocation103_spill] sm:$0xff] %v20766_v10  ;;  %25967 = vst [vmem:[#allocation104_spill] sm:$0xff] %v20770_v55  ;;  %v20779_v41 = vrot.slane %v9373_v62, %v25819_v51  ;;  %v7114_v12 = vunpack.i.h.s16 %v6550_v40  ;;  %v7122_v63 = vunpack.i.h.s16 %v20737_v42  ;;  %v20783_v20 = vrot.slane %v11336_v6, %v25817_v25 }
 0x563   : > { %25968 = vst [vmem:[#allocation105_spill] sm:$0xff] %v20773_v31  ;;  %25969 = vst [vmem:[#allocation106_spill] sm:$0xff] %v20776_v17  ;;  %v20786_v22 = vrot.slane %v11338_v34, %v25817_v25  ;;  %v7116_v4 = vunpack.i.h.s16 %v6564_v50  ;;  %v7126_v47 = vunpack.i.h.s16 %v6573_v9  ;;  %v20789_v28 = vrot.slane %v9380_v61, %v25819_v51 }
 0x564   : > { %25970 = vst [vmem:[#allocation107_spill] sm:$0xff] %v20779_v41  ;;  %25971 = vst [vmem:[#allocation108_spill] sm:$0xff] %v20783_v20  ;;  %v7118_v15 = vunpack.i.h.s16 %v6572_v27  ;;  %v7380_v62 = vpack.i.b16 %v7124_v21, %v7124_v21  ;;  %v7120_v17 = vunpack.i.h.s16 %v6574_v5  ;;  %v7384_v41 = vpack.i.b16 %v7128_v36, %v7128_v36 }
 0x565   : > { %25972 = vst [vmem:[#allocation109_spill] sm:$0xff] %v20786_v22  ;;  %25973 = vst [vmem:[#allocation110_spill] sm:$0xff] %v20789_v28  ;;  %v16300_v34 = vpack.i.b16 %v6550_v40, %v6550_v40  ;;  %v7370_v3 = vpack.i.b16 %v7114_v12, %v7114_v12  ;;  %v7378_v10 = vpack.i.b16 %v7122_v63, %v7122_v63 }
 0x566   : > { %v16305_v61 = vpack.i.b16 %v20723_v52, %v20723_v52  ;;  %v16301_v28 = vpack.i.b16 %v6564_v50, %v6564_v50  ;;  %v7372_v38 = vpack.i.b16 %v7116_v4, %v7116_v4  ;;  %v7382_v26 = vpack.i.b16 %v7126_v47, %v7126_v47 }
 0x567   : > { %v16307_v43 = vpack.i.b16 %v6575_v29, %v6575_v29  ;;  %v16302_v23 = vpack.i.b16 %v6572_v27, %v6572_v27  ;;  %v7374_v21 = vpack.i.b16 %v7118_v15, %v7118_v15  ;;  %v16304_v53 = vpack.i.b16 %v20737_v42, %v20737_v42 }
 0x568   : > { %v7960_v55 = vrot.slane %v7380_v62, %v25819_v51  ;;  %v16303_v6 = vpack.i.b16 %v6574_v5, %v6574_v5  ;;  %v7376_v20 = vpack.i.b16 %v7120_v17, %v7120_v17  ;;  %v16306_v36 = vpack.i.b16 %v6573_v9, %v6573_v9 }
 0x569   : > { %v7976_v40 = vrot.slane %v7384_v41, %v25819_v51  ;;  %v7916_v12 = vrot.slane %v16300_v34, %v25819_v51  ;;  %v7952_v52 = vrot.slane %v7378_v10, %v25819_v51  ;;  %v7956_v50 = vrot.slane %v16305_v61, %v25819_v51 }
 0x56a   : > { %v16245_v29 = vpack.c.bf16 %v20676_v32, %v20676_v32  ;;  %v7920_v15 = vrot.slane %v7370_v3, %v25819_v51  ;;  %v7924_v42 = vrot.slane %v16301_v28, %v25819_v51  ;;  %v7968_v27 = vrot.slane %v7382_v26, %v25819_v51 }
 0x56b   : > { %v7972_v5 = vrot.slane %v16307_v43, %v25819_v51  ;;  %v7928_v9 = vrot.slane %v7372_v38, %v25819_v51  ;;  %v7932_v17 = vrot.slane %v16302_v23, %v25819_v51  ;;  %v7948_v41 = vrot.slane %v16304_v53, %v25819_v51 }
 0x56c   : > { %v9303_v10 = vpack.i.b16 %v7960_v55, %v7960_v55  ;;  %v7936_v63 = vrot.slane %v7374_v21, %v25819_v51  ;;  %v20817_v4 = vrot.slane %v16303_v6, %v25819_v51  ;;  %v7964_v32 = vrot.slane %v16306_v36, %v25819_v51 }
 0x56d   : > { %v9331_v3 = vpack.i.b16 %v7976_v40, %v7976_v40  ;;  %v20821_v28 = vrot.slane %v7376_v20, %v25819_v51  ;;  %v9289_v26 = vpack.i.b16 %v7952_v52, %v7952_v52  ;;  %v9296_v47 = vpack.i.b16 %v7956_v50, %v7956_v50 }
 0x56e   : > { %25974 = vst [vmem:[#allocation111_spill] sm:$0xff] %v20817_v4  ;;  %v6688_v38 = vrot.slane %v16245_v29, %v25817_v25  ;;  %v9226_v43 = vpack.i.b16 %v7916_v12, %v7916_v12  ;;  %v9317_v23 = vpack.i.b16 %v7968_v27, %v7968_v27  ;;  %v9324_v62 = vpack.i.b16 %v7972_v5, %v7972_v5 }
 0x56f   : > { %25975 = vst [vmem:[#allocation112_spill] sm:$0xff] %v20821_v28  ;;  %v6681_v53 = vrot.slane %v20700_v49, %v25817_v25  ;;  %v9233_v55 = vpack.i.b16 %v7920_v15, %v7920_v15  ;;  %v9240_v34 = vpack.i.b16 %v7924_v42, %v7924_v42  ;;  %v9282_v6 = vpack.i.b16 %v7948_v41, %v7948_v41 }
 0x570   : > { %v9308_v61 = vrot.slane %v9303_v10, %v25819_v51  ;;  %v9247_v21 = vpack.i.b16 %v7928_v9, %v7928_v9  ;;  %v9310_v36 = vpack.i.b16 %v7964_v32, %v7964_v32  ;;  %v9336_v20 = vrot.slane %v9331_v3, %v25819_v51 }
 0x571   : > { %v6053_v40 = vadd.f32 %v20618_v0, %v20652_v19  ;;  %v9254_v52 = vpack.i.b16 %v7932_v17, %v7932_v17  ;;  %v9294_v12 = vrot.slane %v9289_v26, %v25819_v51  ;;  %v9301_v50 = vrot.slane %v9296_v47, %v25819_v51 }
 0x572   : > { %v6690_v29 = vcombine.high %v6688_v38, %v6688_v38  ;;  %v9261_v27 = vpack.i.b16 %v7936_v63, %v7936_v63  ;;  %v9322_v49 = vrot.slane %v9317_v23, %v25819_v51  ;;  %v9329_v15 = vrot.slane %v9324_v62, %v25819_v51  ;;  %v6047_v62 = vpop.f32.mrf.mxu1 }
 0x573   : > { %v6689_v42 = vcombine.high %v6681_v53, %v6681_v53  ;;  %v20835_v5 = vrot.slane %v9226_v43, %v25819_v51  ;;  %v9287_v9 = vrot.slane %v9282_v6, %v25819_v51  ;;  %v11239_v41 = vcombine.low %v9301_v50, %v9308_v61 }
 0x574   : > { %v6045_v0 = vadd.f32 %v20654_v30, %v20665_v45  ;;  %v20841_v19 = vrot.slane %v9233_v55, %v25819_v51  ;;  %v9315_v17 = vrot.slane %v9310_v36, %v25819_v51  ;;  %v11241_v10 = vcombine.low %v9329_v15, %v9336_v20 }
 0x575   : > { %25976 = vst [vmem:[#allocation113_spill] sm:$0xff] %v20835_v5  ;;  %v6120_v63 = vmul.f32 %v20546_v59, %v6053_v40  ;;  %v11238_v3 = vcombine.low %v9287_v9, %v9294_v12  ;;  %v6697_v26 = vrot.slane %v6681_v53, %v25817_v25  ;;  %v20849_v47 = vrot.slane %v6690_v29, %v25817_v25 }
 0x576   : > { %25977 = vst [vmem:[#allocation114_spill] sm:$0xff] %v20841_v19  ;;  %v11240_v45 = vcombine.low %v9315_v17, %v9322_v49  ;;  %v20854_v43 = vrot.slane %v6688_v38, %v25817_v25  ;;  %v6711_v23 = vrot.slane %v6689_v42, %v25817_v25  ;;  %v20858_v55 = vrot.slane %v9240_v34, %v25819_v51 }
 0x577   : > { %v20861_v6 = vrot.slane %v9247_v21, %v25819_v51  ;;  %v20864_v53 = vrot.slane %v11239_v41, %v25817_v25  ;;  %v6118_v61 = vmul.f32 %v20546_v59, %v6045_v0  ;;  %v20868_v36 = vrot.slane %v9254_v52, %v25819_v51 }
 0x578   : > { %25978 = vst [vmem:[#allocation115_spill] sm:$0xff] %v20858_v55  ;;  %v20871_v38 = vrot.slane %v9261_v27, %v25819_v51  ;;  %v20874_v20 = vrot.slane %v11241_v10, %v25817_v25  ;;  %v6159_v34 = vadd.f32 %v20406_v57, %v6120_v63  ;;  %v20878_v40 = vrot.slane %v11238_v3, %v25817_v25 }
 0x579   : > { %25979 = vst [vmem:[#allocation116_spill] sm:$0xff] %v20861_v6  ;;  %25980 = vst [vmem:[#allocation117_spill] sm:$0xff] %v20864_v53  ;;  %v6719_v21 = vcombine.high %v6697_v26, %v6697_v26  ;;  %v6722_v12 = vcombine.high %v20849_v47, %v20849_v47  ;;  %v6048_v50 = vadd.f32 %v6047_v62, %v20695_v1  ;;  %v7162_v42 = vunpack.i.h.s16 %v6697_v26 }
 0x57a   : > { %25981 = vst [vmem:[#allocation118_spill] sm:$0xff] %v20868_v36  ;;  %25982 = vst [vmem:[#allocation119_spill] sm:$0xff] %v20871_v38  ;;  %v20884_v52 = vrot.slane %v11240_v45, %v25817_v25  ;;  %v6720_v29 = vcombine.high %v20854_v43, %v20854_v43  ;;  %v6721_v27 = vcombine.high %v6711_v23, %v6711_v23  ;;  %v7164_v0 = vunpack.i.h.s16 %v6711_v23 }
 0x57b   : > { %25983 = vst [vmem:[#allocation120_spill] sm:$0xff] %v20874_v20  ;;  %25984 = vst [vmem:[#allocation121_spill] sm:$0xff] %v20878_v40  ;;  %v16244_v49 = vpack.c.bf16 %v20703_v8, %v20703_v8  ;;  %v6157_v9 = vadd.f32 %v20406_v57, %v6118_v61  ;;  %v6121_v41 = vmul.f32 %v20546_v59, %v20707_v46  ;;  %v7172_v17 = vunpack.i.h.s16 %v20849_v47 }
 0x57c   : > { %25985 = vst [vmem:[#allocation122_spill] sm:$0xff] %v20884_v52  ;;  %v6191_v10 = vmax.f32 %v6159_v34, 0.0  ;;  %v7166_v63 = vunpack.i.h.s16 %v6719_v21  ;;  %v7176_v3 = vunpack.i.h.s16 %v6722_v12  ;;  %v20900_v8 = vrot.slane %v20715_v33, %v25817_v25 }
 0x57d   : > { %v6119_v45 = vmul.f32 %v20546_v59, %v6048_v50  ;;  %v7168_v62 = vunpack.i.h.s16 %v6721_v27  ;;  %v7170_v61 = vunpack.i.h.s16 %v20854_v43  ;;  %v7174_v15 = vunpack.i.h.s16 %v6720_v29 }
 0x57e   : > { %v6639_v46 = vrot.slane %v16244_v49, %v25817_v25  ;;  %v16324_v32 = vpack.i.b16 %v6697_v26, %v6697_v26  ;;  %v7418_v1 = vpack.i.b16 %v7162_v42, %v7162_v42  ;;  %v6189_v30 = vmax.f32 %v6157_v9, 0.0 }
 0x57f   : > { %v6160_v31 = vadd.f32 %v20406_v57, %v6121_v41  ;;  %v16325_v34 = vpack.i.b16 %v6711_v23, %v6711_v23  ;;  %v7420_v22 = vpack.i.b16 %v7164_v0, %v7164_v0  ;;  %v16328_v58 = vpack.i.b16 %v20854_v43, %v20854_v43 }
 0x580   : > { %v7428_v33 = vpack.i.b16 %v7172_v17, %v7172_v17  ;;  %v16326_v20 = vpack.i.b16 %v6719_v21, %v6719_v21  ;;  %v7422_v52 = vpack.i.b16 %v7166_v63, %v7166_v63  ;;  %v16327_v50 = vpack.i.b16 %v6721_v27, %v6721_v27 }
 0x581   : > { %v7432_v53 = vpack.i.b16 %v7176_v3, %v7176_v3  ;;  %v7424_v40 = vpack.i.b16 %v7168_v62, %v7168_v62  ;;  %v7426_v36 = vpack.i.b16 %v7170_v61, %v7170_v61  ;;  %v16329_v49 = vpack.i.b16 %v20849_v47, %v20849_v47 }
 0x582   : > { %v7430_v26 = vpack.i.b16 %v7174_v15, %v7174_v15  ;;  %v16330_v42 = vpack.i.b16 %v6720_v29, %v6720_v29  ;;  %v16331_v9 = vpack.i.b16 %v6722_v12, %v6722_v12  ;;  %v8108_v41 = vrot.slane %v16324_v32, %v25819_v51 }
 0x583   : > { %v8112_v23 = vrot.slane %v7418_v1, %v25819_v51  ;;  %v8116_v0 = vrot.slane %v16325_v34, %v25819_v51  ;;  %v8152_v43 = vrot.slane %v7428_v33, %v25819_v51  ;;  %v20914_v21 = vmax.f32 %v6160_v31, 0.0  ;;  %v25986_v34 = vld [vmem:[#allocation8_spill] sm:$0xff] }
 0x584   : > { %v6158_v27 = vadd.f32 %v20406_v57, %v6119_v45  ;;  %v8120_v17 = vrot.slane %v7420_v22, %v25819_v51  ;;  %v8124_v63 = vrot.slane %v16326_v20, %v25819_v51  ;;  %v8168_v47 = vrot.slane %v7432_v53, %v25819_v51 }
 0x585   : > { %v12479_v12 = vshrl.u32 %v25951_v44, 16  ;;  %v8144_v32 = vrot.slane %v7426_v36, %v25819_v51  ;;  %v8148_v29 = vrot.slane %v16329_v49, %v25819_v51  ;;  %v8160_v15 = vrot.slane %v7430_v26, %v25819_v51 }
 0x586   : > { %v20925_v1 = vpack.c.bf16 %v20914_v21, %v6191_v10  ;;  %v8164_v31 = vrot.slane %v16331_v9, %v25819_v51  ;;  %v6641_v57 = vcombine.high %v6639_v46, %v6639_v46  ;;  %v20928_v3 = vmax.f32 %v6158_v27, 0.0 }
 0x587   : > { %v12481_v22 = vor.u32 %v12479_v12, %v20658_v7  ;;  %v8128_v53 = vrot.slane %v7422_v52, %v25819_v51  ;;  %v8132_v20 = vrot.slane %v16327_v50, %v25819_v51  ;;  %v8140_v36 = vrot.slane %v16328_v58, %v25819_v51 }
 0x588   : > { %v9639_v45 = vpack.i.b16 %v8152_v43, %v8152_v43  ;;  %v8156_v62 = vrot.slane %v16330_v42, %v25819_v51  ;;  %v9667_v61 = vpack.i.b16 %v8168_v47, %v8168_v47  ;;  %v20936_v10 = vpack.c.bf16 %v20928_v3, %v6189_v30 }
 0x589   : > { %v20940_v33 = vsel %vm4988_vm0, %v12481_v22, %v25986_v34  ;;  %v20943_v49 = vrot.slane %v7424_v40, %v25819_v51  ;;  %v9562_v7 = vpack.i.b16 %v8108_v41, %v8108_v41  ;;  %v9625_v52 = vpack.i.b16 %v8144_v32, %v8144_v32 }
 0x58a   : > { %25987 = vst [vmem:[#allocation8_spill] sm:$0xff] %v20940_v33  ;;  %v9632_v26 = vpack.i.b16 %v8148_v29, %v8148_v29  ;;  %12920 = vrot.lane.b32.xlu0 %v20940_v33, %s17606_s27  ;;  %v9569_v58 = vpack.i.b16 %v8112_v23, %v8112_v23  ;;  %v9653_v50 = vpack.i.b16 %v8160_v15, %v8160_v15 }
 0x58b   : > { %25988 = vst [vmem:[#allocation123_spill] sm:$0xff] %v20943_v49  ;;  %v9660_v42 = vpack.i.b16 %v8164_v31, %v8164_v31  ;;  %v20948_v9 = vrot.slane %v6641_v57, %v25817_v25  ;;  %v9576_v30 = vpack.i.b16 %v8116_v0, %v8116_v0  ;;  %v9583_v43 = vpack.i.b16 %v8120_v17, %v8120_v17 }
 0x58c   : > { %v9618_v27 = vpack.i.b16 %v8140_v36, %v8140_v36  ;;  %v9644_v47 = vrot.slane %v9639_v45, %v25819_v51  ;;  %v9646_v12 = vpack.i.b16 %v8156_v62, %v8156_v62  ;;  %v9672_v40 = vrot.slane %v9667_v61, %v25819_v51 }
 0x58d   : > { %v6640_v41 = vcombine.high %v20900_v8, %v20900_v8  ;;  %v20955_v32 = vrot.slane %v6639_v46, %v25817_v25  ;;  %v9590_v23 = vpack.i.b16 %v8124_v63, %v8124_v63  ;;  %v9597_v29 = vpack.i.b16 %v8128_v53, %v8128_v53 }
 0x58e   : > { %v9630_v15 = vrot.slane %v9625_v52, %v25819_v51  ;;  %v9637_v31 = vrot.slane %v9632_v26, %v25819_v51  ;;  %v20960_v0 = vrot.slane %v9562_v7, %v25819_v51  ;;  %v9658_v17 = vrot.slane %v9653_v50, %v25819_v51 }
 0x58f   : > { %v9665_v57 = vrot.slane %v9660_v42, %v25819_v51  ;;  %v6673_v22 = vcombine.high %v20948_v9, %v20948_v9  ;;  %v20967_v36 = vrot.slane %v9569_v58, %v25819_v51  ;;  %v9623_v46 = vrot.slane %v9618_v27, %v25819_v51 }
 0x590   : > { %25989 = vst [vmem:[#allocation124_spill] sm:$0xff] %v20960_v0  ;;  %v11533_v63 = vcombine.low %v9637_v31, %v9644_v47  ;;  %v6648_v53 = vrot.slane %v20900_v8, %v25817_v25  ;;  %v9651_v45 = vrot.slane %v9646_v12, %v25819_v51  ;;  %v6662_v61 = vrot.slane %v6640_v41, %v25817_v25 }
 0x591   : > { %25990 = vst [vmem:[#allocation125_spill] sm:$0xff] %v20967_v36  ;;  %v11535_v62 = vcombine.low %v9665_v57, %v9672_v40  ;;  %v6671_v34 = vcombine.high %v20955_v32, %v20955_v32  ;;  %v9604_v7 = vpack.i.b16 %v8132_v20, %v8132_v20  ;;  %v11532_v26 = vcombine.low %v9623_v46, %v9630_v15 }
 0x592   : > { %v7156_v58 = vunpack.i.h.s16 %v20948_v9  ;;  %v20980_v50 = vrot.slane %v9576_v30, %v25819_v51  ;;  %v20983_v8 = vrot.slane %v9583_v43, %v25819_v51  ;;  %v11534_v42 = vcombine.low %v9651_v45, %v9658_v17 }
 0x593   : > { %v7160_v27 = vunpack.i.h.s16 %v6673_v22  ;;  %v20986_v47 = vrot.slane %v9590_v23, %v25819_v51  ;;  %v20989_v12 = vrot.slane %v11533_v63, %v25817_v25  ;;  %v6670_v20 = vcombine.high %v6648_v53, %v6648_v53 }
 0x594   : > { %25991 = vst [vmem:[#allocation126_spill] sm:$0xff] %v20980_v50  ;;  %25992 = vst [vmem:[#allocation127_spill] sm:$0xff] %v20983_v8  ;;  %v7154_v40 = vunpack.i.h.s16 %v20955_v32  ;;  %v20993_v41 = vrot.slane %v9597_v29, %v25819_v51  ;;  %v20996_v30 = vrot.slane %v11535_v62, %v25817_v25  ;;  %v6672_v15 = vcombine.high %v6662_v61, %v6662_v61 }
 0x595   : > { %25993 = vst [vmem:[#allocation128_spill] sm:$0xff] %v20986_v47  ;;  %25994 = vst [vmem:[#allocation129_spill] sm:$0xff] %v20989_v12  ;;  %v7158_v43 = vunpack.i.h.s16 %v6671_v34  ;;  %v20999_v31 = vrot.slane %v9604_v7, %v25819_v51  ;;  %v21002_v23 = vrot.slane %v11532_v26, %v25817_v25  ;;  %v7146_v17 = vunpack.i.h.s16 %v6648_v53 }
 0x596   : > { %25995 = vst [vmem:[#allocation130_spill] sm:$0xff] %v20993_v41  ;;  %25996 = vst [vmem:[#allocation131_spill] sm:$0xff] %v20996_v30  ;;  %v7412_v57 = vpack.i.b16 %v7156_v58, %v7156_v58  ;;  %v21007_v63 = vrot.slane %v11534_v42, %v25817_v25  ;;  %v7148_v29 = vunpack.i.h.s16 %v6662_v61  ;;  %v7416_v45 = vpack.i.b16 %v7160_v27, %v7160_v27 }
 0x597   : > { %25997 = vst [vmem:[#allocation132_spill] sm:$0xff] %v20999_v31  ;;  %25998 = vst [vmem:[#allocation133_spill] sm:$0xff] %v21002_v23  ;;  %v7150_v52 = vunpack.i.h.s16 %v6670_v20  ;;  %v7410_v33 = vpack.i.b16 %v7154_v40, %v7154_v40  ;;  %v16321_v7 = vpack.i.b16 %v20948_v9, %v20948_v9  ;;  %v7152_v58 = vunpack.i.h.s16 %v6672_v15  ;;  %v26013_v31 = vld [vmem:[#allocation10_spill] sm:$0xff] }
 0x598   : > { %25999 = vst [vmem:[#allocation134_spill] sm:$0xff] %v21007_v63  ;;  %v7414_v44 = vpack.i.b16 %v7158_v43, %v7158_v43  ;;  %v16323_v47 = vpack.i.b16 %v6673_v22, %v6673_v22  ;;  %v16316_v46 = vpack.i.b16 %v6648_v53, %v6648_v53  ;;  %v7402_v36 = vpack.i.b16 %v7146_v17, %v7146_v17 }
 0x599   : > { %v16320_v42 = vpack.i.b16 %v20955_v32, %v20955_v32  ;;  %v8088_v27 = vrot.slane %v7412_v57, %v25819_v51  ;;  %v16317_v0 = vpack.i.b16 %v6662_v61, %v6662_v61  ;;  %v7404_v62 = vpack.i.b16 %v7148_v29, %v7148_v29 }
 0x59a   : > { %v16322_v12 = vpack.i.b16 %v6671_v34, %v6671_v34  ;;  %v8104_v40 = vrot.slane %v7416_v45, %v25819_v51  ;;  %v16318_v23 = vpack.i.b16 %v6670_v20, %v6670_v20  ;;  %v7406_v9 = vpack.i.b16 %v7150_v52, %v7150_v52 }
 0x59b   : > { %v8080_v41 = vrot.slane %v7410_v33, %v25819_v51  ;;  %v8084_v26 = vrot.slane %v16321_v7, %v25819_v51  ;;  %v16319_v43 = vpack.i.b16 %v6672_v15, %v6672_v15  ;;  %v8096_v22 = vrot.slane %v7414_v44, %v25819_v51 }
 0x59c   : > { %v8100_v53 = vrot.slane %v16323_v47, %v25819_v51  ;;  %v16247_v32 = vpack.c.bf16 %v20914_v21, %v20914_v21  ;;  %v7408_v17 = vpack.i.b16 %v7152_v58, %v7152_v58  ;;  %v8044_v61 = vrot.slane %v16316_v46, %v25819_v51 }
 0x59d   : > { %v8076_v34 = vrot.slane %v16320_v42, %v25819_v51  ;;  %v9527_v57 = vpack.i.b16 %v8088_v27, %v8088_v27  ;;  %v8048_v52 = vrot.slane %v7402_v36, %v25819_v51  ;;  %v8092_v33 = vrot.slane %v16322_v12, %v25819_v51 }
 0x59e   : > { %v9555_v20 = vpack.i.b16 %v8104_v40, %v8104_v40  ;;  %v6779_v15 = vrot.slane %v20925_v1, %v25817_v25  ;;  %v8052_v44 = vrot.slane %v16317_v0, %v25819_v51  ;;  %v8056_v47 = vrot.slane %v7404_v62, %v25819_v51 }
 0x59f   : > { %v9513_v29 = vpack.i.b16 %v8080_v41, %v8080_v41  ;;  %v9520_v21 = vpack.i.b16 %v8084_v26, %v8084_v26  ;;  %v8060_v45 = vrot.slane %v16318_v23, %v25819_v51  ;;  %v9541_v46 = vpack.i.b16 %v8096_v22, %v8096_v22 }
 0x5a0   : > { %v9548_v7 = vpack.i.b16 %v8100_v53, %v8100_v53  ;;  %v6786_v58 = vrot.slane %v16247_v32, %v25817_v25  ;;  %v8064_v36 = vrot.slane %v7406_v9, %v25819_v51  ;;  %v21037_v12 = vrot.slane %v16319_v43, %v25819_v51 }
 0x5a1   : > { %v9506_v42 = vpack.i.b16 %v8076_v34, %v8076_v34  ;;  %v9532_v1 = vrot.slane %v9527_v57, %v25819_v51  ;;  %v21041_v0 = vrot.slane %v7408_v17, %v25819_v51  ;;  %v9534_v62 = vpack.i.b16 %v8092_v33, %v8092_v33 }
 0x5a2   : > { %26000 = vst [vmem:[#allocation135_spill] sm:$0xff] %v21037_v12  ;;  %v9560_v41 = vrot.slane %v9555_v20, %v25819_v51  ;;  %v6787_v26 = vcombine.high %v6779_v15, %v6779_v15  ;;  %v9450_v23 = vpack.i.b16 %v8044_v61, %v8044_v61  ;;  %v9457_v27 = vpack.i.b16 %v8048_v52, %v8048_v52 }
 0x5a3   : > { %26001 = vst [vmem:[#allocation136_spill] sm:$0xff] %v21041_v0  ;;  %v9518_v40 = vrot.slane %v9513_v29, %v25819_v51  ;;  %v9525_v22 = vrot.slane %v9520_v21, %v25819_v51  ;;  %v9464_v9 = vpack.i.b16 %v8052_v44, %v8052_v44  ;;  %v9546_v43 = vrot.slane %v9541_v46, %v25819_v51 }
 0x5a4   : > { %v9553_v53 = vrot.slane %v9548_v7, %v25819_v51  ;;  %v6788_v32 = vcombine.high %v6786_v58, %v6786_v58  ;;  %v9471_v34 = vpack.i.b16 %v8056_v47, %v8056_v47  ;;  %v9511_v17 = vrot.slane %v9506_v42, %v25819_v51 }
 0x5a5   : > { %v11435_v57 = vcombine.low %v9525_v22, %v9532_v1  ;;  %v6795_v33 = vrot.slane %v6779_v15, %v25817_v25  ;;  %v9478_v20 = vpack.i.b16 %v8060_v45, %v8060_v45  ;;  %v9539_v61 = vrot.slane %v9534_v62, %v25819_v51  ;;  %v17015_v1 = vpop.f32.mrf.mxu1 }
 0x5a6   : > { %v11437_v52 = vcombine.low %v9553_v53, %v9560_v41  ;;  %v6809_v29 = vrot.slane %v6787_v26, %v25817_v25  ;;  %v21053_v21 = vrot.slane %v9450_v23, %v25819_v51  ;;  %v9485_v44 = vpack.i.b16 %v8064_v36, %v8064_v36  ;;  %v26005_v26 = vld [vmem:[#allocation11_spill] sm:$0xff] }
 0x5a7   : > { %v11434_v46 = vcombine.low %v9511_v17, %v9518_v40  ;;  %v21056_v7 = vrot.slane %v6786_v58, %v25817_v25  ;;  %v21059_v47 = vrot.slane %v9457_v27, %v25819_v51  ;;  %v11436_v45 = vcombine.low %v9539_v61, %v9546_v43 }
 0x5a8   : > { %26002 = vst [vmem:[#allocation137_spill] sm:$0xff] %v21053_v21  ;;  %v6816_v42 = vrot.slane %v6788_v32, %v25817_v25  ;;  %v21067_v41 = vrot.slane %v11435_v57, %v25817_v25  ;;  %v6817_v36 = vcombine.high %v6795_v33, %v6795_v33  ;;  %v5908_v58 = vadd.f32 %v19921_v16, %v26005_v26 }
 0x5a9   : > { %26003 = vst [vmem:[#allocation138_spill] sm:$0xff] %v21059_v47  ;;  %v21072_v23 = vrot.slane %v9464_v9, %v25819_v51  ;;  %v21075_v27 = vrot.slane %v9471_v34, %v25819_v51  ;;  %v21078_v40 = vrot.slane %v11437_v52, %v25817_v25  ;;  %v6819_v22 = vcombine.high %v6809_v29, %v6809_v29 }
 0x5aa   : > { %26004 = vst [vmem:[#allocation139_spill] sm:$0xff] %v21067_v41  ;;  %v21081_v43 = vrot.slane %v11434_v46, %v25817_v25  ;;  %v6818_v53 = vcombine.high %v21056_v7, %v21056_v7  ;;  %v16246_v32 = vpack.c.bf16 %v20928_v3, %v20928_v3  ;;  %v6069_v16 = vadd.f32 %v17015_v1, %v5908_v58 }
 0x5ab   : > { %26006 = vst [vmem:[#allocation11_spill] sm:$0xff] %v21072_v23  ;;  %26007 = vst [vmem:[#allocation140_spill] sm:$0xff] %v21075_v27  ;;  %v21088_v9 = vrot.slane %v9478_v20, %v25819_v51  ;;  %v21091_v34 = vrot.slane %v11436_v45, %v25817_v25  ;;  %v6820_v17 = vcombine.high %v6816_v42, %v6816_v42  ;;  %v7194_v57 = vunpack.i.h.s16 %v6795_v33 }
 0x5ac   : > { %26008 = vst [vmem:[#allocation141_spill] sm:$0xff] %v21078_v40  ;;  %26009 = vst [vmem:[#allocation142_spill] sm:$0xff] %v21081_v43  ;;  %v21094_v61 = vrot.slane %v9485_v44, %v25819_v51  ;;  %v7196_v46 = vunpack.i.h.s16 %v6809_v29  ;;  %v7198_v26 = vunpack.i.h.s16 %v6817_v36  ;;  %v7200_v1 = vunpack.i.h.s16 %v6819_v22 }
 0x5ad   : > { %26010 = vst [vmem:[#allocation143_spill] sm:$0xff] %v21088_v9  ;;  %26011 = vst [vmem:[#allocation144_spill] sm:$0xff] %v21091_v34  ;;  %v7202_v20 = vunpack.i.h.s16 %v21056_v7  ;;  %v21103_v45 = vrot.slane %v20936_v10, %v25817_v25  ;;  %v7204_v58 = vunpack.i.h.s16 %v6816_v42  ;;  %v7206_v15 = vunpack.i.h.s16 %v6818_v53 }
 0x5ae   : > { %26012 = vst [vmem:[#allocation145_spill] sm:$0xff] %v21094_v61  ;;  %v21106_v44 = vrot.slane %v16246_v32, %v25817_v25  ;;  %v6124_v62 = vmul.f32 %v20546_v59, %v6069_v16  ;;  %v7208_v52 = vunpack.i.h.s16 %v6820_v17  ;;  %v16340_v30 = vpack.i.b16 %v6795_v33, %v6795_v33 }
 0x5af   : > { %v7450_v63 = vpack.i.b16 %v7194_v57, %v7194_v57  ;;  %v5900_v3 = vadd.f32 %v19911_v48, %v26013_v31  ;;  %v16341_v50 = vpack.i.b16 %v6809_v29, %v6809_v29  ;;  %v7452_v8 = vpack.i.b16 %v7196_v46, %v7196_v46  ;;  %v6060_v31 = vpop.f32.mrf.mxu1 }
 0x5b0   : > { %v16342_v49 = vpack.i.b16 %v6817_v36, %v6817_v36  ;;  %v7454_v40 = vpack.i.b16 %v7198_v26, %v7198_v26  ;;  %v16343_v34 = vpack.i.b16 %v6819_v22, %v6819_v22  ;;  %v7456_v10 = vpack.i.b16 %v7200_v1, %v7200_v1  ;;  %v26021_v1 = vld [vmem:[#allocation21_spill] sm:$0xff] }
 0x5b1   : > { %v16344_v41 = vpack.i.b16 %v21056_v7, %v21056_v7  ;;  %v7458_v43 = vpack.i.b16 %v7202_v20, %v7202_v20  ;;  %v16345_v32 = vpack.i.b16 %v6816_v42, %v6816_v42  ;;  %v7460_v9 = vpack.i.b16 %v7204_v58, %v7204_v58  ;;  %v17016_v46 = vpop.f32.mrf.mxu1 }
 0x5b2   : > { %v16346_v61 = vpack.i.b16 %v6818_v53, %v6818_v53  ;;  %v7462_v59 = vpack.i.b16 %v7206_v15, %v7206_v15  ;;  %v16347_v16 = vpack.i.b16 %v6820_v17, %v6820_v17  ;;  %v7464_v33 = vpack.i.b16 %v7208_v52, %v7208_v52  ;;  %v26017_v17 = vld [vmem:[#allocation24_spill] sm:$0xff] }
 0x5b3   : > { %v8236_v57 = vrot.slane %v16340_v30, %v25819_v51  ;;  %v8240_v48 = vrot.slane %v7450_v63, %v25819_v51  ;;  %v21116_v29 = vrot.slane %v16341_v50, %v25819_v51  ;;  %v21119_v36 = vrot.slane %v7452_v8, %v25819_v51 }
 0x5b4   : > { %v21122_v7 = vrot.slane %v16342_v49, %v25819_v51  ;;  %v21125_v42 = vrot.slane %v7454_v40, %v25819_v51  ;;  %v21128_v15 = vrot.slane %v16343_v34, %v25819_v51  ;;  %v21131_v30 = vrot.slane %v7456_v10, %v25819_v51 }
 0x5b5   : > { %v26015_v50 = vpack.i.b16 %v19969_v18, %v19969_v18  ;;  %v10700_v8 = vcombine.low %v19988_v60, %v19995_v13  ;;  %v21140_v49 = vrot.slane %v16344_v41, %v25819_v51  ;;  %v21143_v40 = vrot.slane %v7458_v43, %v25819_v51  ;;  %v26018_v60 = vld [vmem:[#allocation23_spill] sm:$0xff]  ;;  %v26019_v41 = vld [vmem:[#allocation25_spill] sm:$0xff] }
 0x5b6   : > { %26014 = vst [vmem:[#allocation10_spill] sm:$0xff] %v21131_v30  ;;  %v21146_v22 = vrot.slane %v16345_v32, %v25819_v51  ;;  %v21149_v53 = vrot.slane %v7460_v9, %v25819_v51  ;;  %v21152_v34 = vrot.slane %v16346_v61, %v25819_v51  ;;  %v21155_v18 = vrot.slane %v7462_v59, %v25819_v51  ;;  %v26022_v9 = vld [vmem:[#allocation22_spill] sm:$0xff] }
 0x5b7   : > { %v8720_v63 = vrot.slane %v26015_v50, %v25819_v51  ;;  %v10701_v13 = vcombine.low %v26018_v60, %v26017_v17  ;;  %v21161_v43 = vrot.slane %v16347_v16, %v25819_v51  ;;  %v6061_v26 = vadd.f32 %v6060_v31, %v5900_v3  ;;  %v26024_v50 = vld [vmem:[#allocation2_spill] sm:$0xff] }
 0x5b8   : > { %26016 = vst [vmem:[#allocation146_spill] sm:$0xff] %v21152_v34  ;;  %v26023_v20 = vcombine.low %v26021_v1, %v26022_v9  ;;  %v10716_v61 = vrot.slane %v10700_v8, %v25817_v25  ;;  %v21169_v10 = vrot.slane %v7464_v33, %v25819_v51  ;;  %v9786_v16 = vpack.i.b16 %v8236_v57, %v8236_v57  ;;  %v6063_v9 = vpop.f32.mrf.mxu1 }
 0x5b9   : > { %v10702_v52 = vcombine.low %v26019_v41, %v8720_v63  ;;  %26020 = vst [vmem:[#allocation24_spill] sm:$0xff] %v21161_v43  ;;  %v10723_v32 = vrot.slane %v10701_v13, %v25817_v25  ;;  %v26025_v63 = vld [vmem:[#allocation19_spill] sm:$0xff]  ;;  %v9793_v60 = vpack.i.b16 %v8240_v48, %v8240_v48  ;;  %v26026_v31 = vpack.i.b16 %v20081_v24, %v20081_v24  ;;  %v21190_v48 = vld [vmem:[%s25562_s9] ss:$0 sm:$0xff] }
 0x5ba   : > { %v10709_v58 = vrot.slane %v26023_v20, %v25817_v25  ;;  %v5911_v17 = vadd.f32 %v26025_v63, %v26024_v50  ;;  %v9800_v8 = vpack.i.b16 %v21116_v29, %v21116_v29  ;;  %v26027_v13 = vpack.i.b16 %v20078_v56, %v20078_v56  ;;  %v21196_v29 = vld [vmem:[%s25561_s8] ss:$0 sm:$0xff]  ;;  %v26030_v63 = vld [vmem:[#allocation39_spill] sm:$0xff] }
 0x5bb   : > { %v10730_v59 = vrot.slane %v10702_v52, %v25817_v25  ;;  %v8608_v41 = vrot.slane %v26026_v31, %v25819_v51  ;;  %v9807_v57 = vpack.i.b16 %v21119_v36, %v21119_v36  ;;  %v6163_v24 = vadd.f32 %v21190_v48, %v6124_v62  ;;  %v26028_v56 = vld [vmem:[#allocation14_spill] sm:$0xff] }
 0x5bc   : > { %v10731_v3 = vcombine.low %v10709_v58, %v10716_v61  ;;  %v6072_v1 = vadd.f32 %v17016_v46, %v5911_v17  ;;  %v8601_v52 = vrot.slane %v26027_v13, %v25819_v51  ;;  %v6122_v46 = vmul.f32 %v21196_v29, %v6061_v26  ;;  %v26029_v20 = vld [vmem:[#allocation18_spill] sm:$0xff] }
 0x5bd   : > { %v10732_v33 = vcombine.low %v10723_v32, %v10730_v59  ;;  %v5903_v58 = vadd.f32 %v26029_v20, %v26028_v56  ;;  %v9814_v62 = vpack.i.b16 %v21122_v7, %v21122_v7  ;;  %v10602_v50 = vcombine.low %v20113_v14, %v20122_v35  ;;  %v26031_v17 = vld [vmem:[#allocation38_spill] sm:$0xff]  ;;  %v26035_v20 = vld [vmem:[#allocation35_spill] sm:$0xff] }
 0x5be   : > { %v10739_v61 = vrot.slane %v10731_v3, %v25817_v25  ;;  %v6125_v32 = vmul.f32 %v21196_v29, %v6072_v1  ;;  %v10604_v59 = vcombine.low %v8601_v52, %v8608_v41  ;;  %v10603_v31 = vcombine.low %v26031_v17, %v26030_v63 }
 0x5bf   : > { %v10746_v36 = vrot.slane %v10732_v33, %v25817_v25  ;;  %v6064_v26 = vadd.f32 %v6063_v9, %v5903_v58  ;;  %v21211_v13 = vrot.slane %v9786_v16, %v25819_v51  ;;  %v9821_v3 = vpack.i.b16 %v21125_v42, %v21125_v42  ;;  %v26034_v9 = vld [vmem:[#allocation36_spill] sm:$0xff] }
 0x5c0   : > { %v6164_v1 = vadd.f32 %v21190_v48, %v6125_v32  ;;  %v21217_v41 = vrot.slane %v9793_v60, %v25819_v51  ;;  %v6195_v7 = vmax.f32 %v6163_v24, 0.0  ;;  %v6161_v52 = vadd.f32 %v21190_v48, %v6122_v46 }
 0x5c1   : > { %26032 = vst [vmem:[#allocation23_spill] sm:$0xff] %v21211_v13  ;;  %v10747_v33 = vcombine.low %v10739_v61, %v10746_v36  ;;  %v6123_v14 = vmul.f32 %v21196_v29, %v6064_v26  ;;  %v10601_v16 = vcombine.low %v26035_v20, %v26034_v9  ;;  %v10632_v58 = vrot.slane %v10604_v59, %v25817_v25 }
 0x5c2   : > { %26033 = vst [vmem:[#allocation25_spill] sm:$0xff] %v21217_v41  ;;  %v6196_v56 = vmax.f32 %v6164_v1, 0.0  ;;  %v9828_v42 = vpack.i.b16 %v21128_v15, %v21128_v15  ;;  %v10618_v61 = vrot.slane %v10602_v50, %v25817_v25  ;;  %v10625_v60 = vrot.slane %v10603_v31, %v25817_v25 }
 0x5c3   : > { %v12186_v35 = vshrl.u32 %v10747_v33, 16  ;;  %v6162_v24 = vadd.f32 %v21190_v48, %v6123_v14  ;;  %v12189_v46 = vshll.u32 %v10747_v33, 16  ;;  %v21232_v17 = vrot.slane %v9800_v8, %v25819_v51 }
 0x5c4   : > { %v6214_v32 = vpack.c.bf16 %v6196_v56, %v6195_v7  ;;  %v16249_v63 = vpack.c.bf16 %v6196_v56, %v6196_v56  ;;  %v6193_v26 = vmax.f32 %v6161_v52, 0.0  ;;  %v10611_v31 = vrot.slane %v10601_v16, %v25817_v25 }
 0x5c5   : > { %v21229_v36 = vrot.slane %v12186_v35, 7  ;;  %26036 = vst [vmem:[#allocation21_spill] sm:$0xff] %v21232_v17  ;;  %v21236_v1 = vmax.f32 %v6162_v24, 0.0  ;;  %v10634_v14 = vcombine.low %v10625_v60, %v10632_v58  ;;  %v21242_v33 = vrot.slane %v9807_v57, %v25819_v51  ;;  %v26065_v17 = vld [vmem:[#allocation9_spill] sm:$0xff] }
 0x5c6   : > { %v6877_v50 = vrot.slane %v6214_v32, %v25817_v25  ;;  %v9842_v8 = vpack.i.b16 %v21140_v49, %v21140_v49  ;;  %v6884_v7 = vrot.slane %v16249_v63, %v25817_v25  ;;  %v21251_v52 = vrot.slane %v9814_v62, %v25819_v51  ;;  %v26044_v63 = vld [vmem:[#allocation33_spill] sm:$0xff] }
 0x5c7   : > { %v12191_v15 = vor.u32 %v12189_v46, %v21229_v36  ;;  %26037 = vst [vmem:[#allocation22_spill] sm:$0xff] %v21242_v33  ;;  %v21248_v35 = vpack.c.bf16 %v21236_v1, %v6193_v26  ;;  %v21254_v56 = vrot.slane %v9821_v3, %v25819_v51  ;;  %v10633_v57 = vcombine.low %v10611_v31, %v10618_v61  ;;  %v26045_v26 = vld [vmem:[#allocation32_spill] sm:$0xff]  ;;  %v26047_v31 = vld [vmem:[#allocation27_spill] sm:$0xff] }
 0x5c8   : > { %26038 = vst [vmem:[#allocation2_spill] sm:$0xff] %v21251_v52  ;;  %v21261_v16 = vrot.slane %v9828_v42, %v25819_v51  ;;  %v9849_v49 = vpack.i.b16 %v21143_v40, %v21143_v40  ;;  %v9856_v58 = vpack.i.b16 %v21146_v22, %v21146_v22  ;;  %v6885_v62 = vcombine.high %v6877_v50, %v6877_v50  ;;  %v26066_v33 = vld [vmem:[#allocation47_spill] sm:$0xff] }
 0x5c9   : > { %26039 = vst [vmem:[#allocation19_spill] sm:$0xff] %v21254_v56  ;;  %v21258_v20 = vsel %vm18272_vm9, 0, %v12191_v15  ;;  %v9863_v3 = vpack.i.b16 %v21149_v53, %v21149_v53  ;;  %v9877_v42 = vpack.i.b16 %v21155_v18, %v21155_v18  ;;  %v10648_v61 = vrot.slane %v10634_v14, %v25817_v25  ;;  %v26046_v18 = vld [vmem:[#allocation29_spill] sm:$0xff] }
 0x5ca   : > { %26041 = vst [vmem:[#allocation14_spill] sm:$0xff] %v21258_v20  ;;  %26042 = vst [vmem:[#allocation18_spill] sm:$0xff] %v21261_v16  ;;  %13186 = vrot.lane.b32.xlu1 %v21258_v20, %s17605_s29  ;;  %v21277_v40 = vrot.slane %v9842_v8, %v25819_v51  ;;  %v9891_v24 = vpack.i.b16 %v21169_v10, %v21169_v10  ;;  %v6886_v46 = vcombine.high %v6884_v7, %v6884_v7 }
 0x5cb   : > { %v6893_v53 = vrot.slane %v6877_v50, %v25817_v25  ;;  %v10641_v32 = vrot.slane %v10633_v57, %v25817_v25  ;;  %v10751_v15 = vcombine.low %v26045_v26, %v26044_v63  ;;  %v26048_v14 = vcombine.low %v26046_v18, %v26047_v31  ;;  %v26053_v18 = vld [vmem:[#allocation26_spill] sm:$0xff] }
 0x5cc   : > { %26043 = vst [vmem:[#allocation39_spill] sm:$0xff] %v21277_v40  ;;  %v21292_v59 = vrot.slane %v9849_v49, %v25819_v51  ;;  %v6738_v60 = vcombine.high %v21103_v45, %v21103_v45  ;;  %v6739_v10 = vcombine.high %v21106_v44, %v21106_v44  ;;  %v6907_v50 = vrot.slane %v6885_v62, %v25817_v25  ;;  %v26052_v49 = vld [vmem:[#allocation28_spill] sm:$0xff] }
 0x5cd   : > { %v10765_v8 = vrot.slane %v26048_v14, %v25817_v25  ;;  %v21300_v57 = vrot.slane %v9856_v58, %v25819_v51  ;;  %v21304_v63 = vrot.slane %v21103_v45, %v25817_v25  ;;  %v21306_v26 = vcombine.low %v10641_v32, %v10648_v61 }
 0x5ce   : > { %26049 = vst [vmem:[#allocation38_spill] sm:$0xff] %v21292_v59  ;;  %v26054_v31 = vcombine.low %v26052_v49, %v26053_v18  ;;  %v21313_v22 = vrot.slane %v9863_v3, %v25819_v51  ;;  %v21316_v16 = vrot.slane %v9877_v42, %v25819_v51  ;;  %v6900_v58 = vrot.slane %v6884_v7, %v25817_v25  ;;  %v26063_v18 = vld [vmem:[#allocation30_spill] sm:$0xff] }
 0x5cf   : > { %26050 = vst [vmem:[#allocation36_spill] sm:$0xff] %v21300_v57  ;;  %26051 = vst [vmem:[#allocation35_spill] sm:$0xff] %v21304_v63  ;;  %v6914_v62 = vrot.slane %v6886_v46, %v25817_v25  ;;  %v21321_v45 = vrot.slane %v9891_v24, %v25819_v51  ;;  %v6915_v61 = vcombine.high %v6893_v53, %v6893_v53  ;;  %v7226_v46 = vunpack.i.h.s16 %v6893_v53 }
 0x5d0   : > { %v10758_v14 = vrot.slane %v26054_v31, %v25817_v25  ;;  %26055 = vst [vmem:[#allocation5_spill] sm:$0xff] %v21313_v22  ;;  %26056 = vst [vmem:[#allocation33_spill] sm:$0xff] %v21316_v16  ;;  %v21324_v32 = vrot.slane %v10751_v15, %v25817_v25  ;;  %v21328_v49 = vrot.slane %v21106_v44, %v25817_v25  ;;  %v12171_v15 = vshrl.u32 %v21306_v26, 16 }
 0x5d1   : > { %26057 = vst [vmem:[#allocation32_spill] sm:$0xff] %v21321_v45  ;;  %v21331_v3 = vrot.slane %v6738_v60, %v25817_v25  ;;  %v21334_v42 = vrot.slane %v6739_v10, %v25817_v25  ;;  %v6917_v7 = vcombine.high %v6907_v50, %v6907_v50  ;;  %v21338_v24 = vcombine.high %v21304_v63, %v21304_v63 }
 0x5d2   : > { %v10780_v52 = vcombine.low %v10758_v14, %v10765_v8  ;;  %26058 = vst [vmem:[#allocation29_spill] sm:$0xff] %v21328_v49  ;;  %v26062_v8 = vld [vmem:[#allocation31_spill] sm:$0xff]  ;;  %v17019_v14 = vpop.f32.mrf.mxu1  ;;  %v6916_v60 = vcombine.high %v6900_v58, %v6900_v58  ;;  %v6918_v56 = vcombine.high %v6914_v62, %v6914_v62  ;;  %v16248_v10 = vpack.c.bf16 %v21236_v1, %v21236_v1 }
 0x5d3   : > { %26059 = vst [vmem:[#allocation27_spill] sm:$0xff] %v21331_v3  ;;  %26060 = vst [vmem:[#allocation28_spill] sm:$0xff] %v21334_v42  ;;  %v26064_v31 = vcombine.low %v26062_v8, %v26063_v18  ;;  %v5924_v30 = vadd.f32 %v26066_v33, %v26065_v17  ;;  %v7228_v16 = vunpack.i.h.s16 %v6907_v50  ;;  %v7230_v45 = vunpack.i.h.s16 %v6915_v61  ;;  %v26075_v3 = vld [vmem:[#allocation16_spill] sm:$0xff] }
 0x5d4   : > { %26061 = vst [vmem:[#allocation26_spill] sm:$0xff] %v21338_v24  ;;  %v21354_v22 = vrot.slane %v10780_v52, %v25817_v25  ;;  %v7232_v8 = vunpack.i.h.s16 %v6917_v7  ;;  %v16356_v18 = vpack.i.b16 %v6893_v53, %v6893_v53  ;;  %v7234_v59 = vunpack.i.h.s16 %v6900_v58 }
 0x5d5   : > { %v21345_v44 = vrot.slane %v26064_v31, %v25817_v25  ;;  %v12174_v31 = vshll.u32 %v21306_v26, 16  ;;  %v21357_v40 = vadd.f32 %v17019_v14, %v5924_v30  ;;  %v7236_v13 = vunpack.i.h.s16 %v6914_v62 }
 0x5d6   : > { %v7482_v1 = vpack.i.b16 %v7226_v46, %v7226_v46  ;;  %v21359_v41 = vrot.slane %v12171_v15, 7  ;;  %v7238_v17 = vunpack.i.h.s16 %v6916_v60  ;;  %v7240_v33 = vunpack.i.h.s16 %v6918_v56 }
 0x5d7   : > { %v6828_v34 = vrot.slane %v21248_v35, %v25817_v25  ;;  %v21364_v57 = vrot.slane %v16248_v10, %v25817_v25  ;;  %v16357_v52 = vpack.i.b16 %v6907_v50, %v6907_v50  ;;  %v7484_v43 = vpack.i.b16 %v7228_v16, %v7228_v16 }
 0x5d8   : > { %v16358_v53 = vpack.i.b16 %v6915_v61, %v6915_v61  ;;  %v7486_v21 = vpack.i.b16 %v7230_v45, %v7230_v45  ;;  %v16359_v26 = vpack.i.b16 %v6917_v7, %v6917_v7  ;;  %v7488_v30 = vpack.i.b16 %v7232_v8, %v7232_v8 }
 0x5d9   : > { %v16360_v14 = vpack.i.b16 %v6900_v58, %v6900_v58  ;;  %v8364_v47 = vrot.slane %v16356_v18, %v25819_v51  ;;  %v7490_v46 = vpack.i.b16 %v7234_v59, %v7234_v59  ;;  %v16361_v15 = vpack.i.b16 %v6914_v62, %v6914_v62 }
 0x5da   : > { %v7492_v23 = vpack.i.b16 %v7236_v13, %v7236_v13  ;;  %v8368_v27 = vrot.slane %v7482_v1, %v25819_v51  ;;  %v16362_v12 = vpack.i.b16 %v6916_v60, %v6916_v60  ;;  %v7494_v0 = vpack.i.b16 %v7238_v17, %v7238_v17 }
 0x5db   : > { %v16363_v35 = vpack.i.b16 %v6918_v56, %v6918_v56  ;;  %v7496_v38 = vpack.i.b16 %v7240_v33, %v7240_v33  ;;  %v8372_v10 = vrot.slane %v16357_v52, %v25819_v51  ;;  %v8376_v16 = vrot.slane %v7484_v43, %v25819_v51 }
 0x5dc   : > { %v8380_v50 = vrot.slane %v16358_v53, %v25819_v51  ;;  %v8384_v45 = vrot.slane %v7486_v21, %v25819_v51  ;;  %v8388_v58 = vrot.slane %v16359_v26, %v25819_v51  ;;  %v21374_v59 = vrot.slane %v7488_v30, %v25819_v51 }
 0x5dd   : > { %v10010_v13 = vpack.i.b16 %v8364_v47, %v8364_v47  ;;  %v12176_v62 = vor.u32 %v12174_v31, %v21359_v41  ;;  %v8396_v61 = vrot.slane %v16360_v14, %v25819_v51  ;;  %v8400_v56 = vrot.slane %v7490_v46, %v25819_v51 }
 0x5de   : > { %v8404_v7 = vrot.slane %v16361_v15, %v25819_v51  ;;  %v10017_v60 = vpack.i.b16 %v8368_v27, %v8368_v27  ;;  %v8408_v43 = vrot.slane %v7492_v23, %v25819_v51  ;;  %v8412_v8 = vrot.slane %v16362_v12, %v25819_v51  ;;  %v17311_v12 = vld [vmem:[%s25563_s10 + $0x38] sm:$0xff]  }
 0x5df   : > { %v8416_v21 = vrot.slane %v7494_v0, %v25819_v51  ;;  %v21385_v18 = vsel %vm18272_vm9, 0, %v12176_v62  ;;  %v8420_v47 = vrot.slane %v16363_v35, %v25819_v51  ;;  %v8424_v31 = vrot.slane %v7496_v38, %v25819_v51  ;;  %14219 = vmatpush1.bf16.msra.mxu0 %v17311_v12  ;;  %17169 = vmatpush1.bf16.msra.mxu1 %v17311_v12 }
 0x5e0   : > { %26067 = vst [vmem:[#allocation31_spill] sm:$0xff] %v21385_v18  ;;  %v10024_v1 = vpack.i.b16 %v8372_v10, %v8372_v10  ;;  %13054 = vrot.lane.b32.xlu0 %v21385_v18, %s17607_s16  ;;  %v6836_v27 = vcombine.high %v6828_v34, %v6828_v34  ;;  %v21395_v0 = vrot.slane %v10010_v13, %v25819_v51  ;;  %v26068_v46 = vmov 0  }
 0x5e1   : > { %v10031_v23 = vpack.i.b16 %v8376_v16, %v8376_v16  ;;  %v10038_v17 = vpack.i.b16 %v8380_v50, %v8380_v50  ;;  %v10045_v33 = vpack.i.b16 %v8384_v45, %v8384_v45  ;;  %v21398_v52 = vrot.slane %v10017_v60, %v25819_v51  ;;  %14220 = vmatprep.subr.bf16.mxu0 %v26068_v46 }
 0x5e2   : > { %v10052_v38 = vpack.i.b16 %v8388_v58, %v8388_v58  ;;  %v6837_v53 = vcombine.high %v21364_v57, %v21364_v57  ;;  %v10073_v30 = vpack.i.b16 %v8400_v56, %v8400_v56  ;;  %v21405_v14 = vrot.slane %v6828_v34, %v25817_v25  ;;  %17154 = vmatprep.subr.bf16.mxu1 %v26068_v46 }
 0x5e3   : > { %v21410_v15 = vrot.slane %v10024_v1, %v25819_v51  ;;  %v10087_v35 = vpack.i.b16 %v8408_v43, %v8408_v43  ;;  %v10101_v10 = vpack.i.b16 %v8416_v21, %v8416_v21  ;;  %v21413_v16 = vrot.slane %v6836_v27, %v25817_v25  ;;  %v17312_v1 = vld [vmem:[%s25563_s10 + $0x30] sm:$0xff]  }
 0x5e4   : > { %v10066_v50 = vpack.i.b16 %v8396_v61, %v8396_v61  ;;  %v10080_v45 = vpack.i.b16 %v8404_v7, %v8404_v7  ;;  %v10094_v58 = vpack.i.b16 %v8412_v8, %v8412_v8  ;;  %v21417_v13 = vrot.slane %v21364_v57, %v25817_v25  ;;  %14221 = vmatpush1.bf16.msra.mxu0 %v17312_v1 }
 0x5e5   : > { %v21420_v34 = vrot.slane %v10031_v23, %v25819_v51  ;;  %v10108_v62 = vpack.i.b16 %v8420_v47, %v8420_v47  ;;  %v10115_v56 = vpack.i.b16 %v8424_v31, %v8424_v31  ;;  %v21423_v60 = vrot.slane %v6837_v53, %v25817_v25  ;;  %14222 = vmatprep.subr.bf16.mxu0 %v26068_v46 }
 0x5e6   : > { %v21426_v43 = vrot.slane %v10038_v17, %v25819_v51  ;;  %v21429_v21 = vrot.slane %v10045_v33, %v25819_v51  ;;  %v21432_v61 = vrot.slane %v10073_v30, %v25819_v51  ;;  %v6866_v57 = vcombine.high %v21405_v14, %v21405_v14  ;;  %17170 = vmatpush1.bf16.msra.mxu1 %v17312_v1 }
 0x5e7   : > { %v21437_v7 = vrot.slane %v10052_v38, %v25819_v51  ;;  %v21440_v8 = vrot.slane %v10087_v35, %v25819_v51  ;;  %v21443_v47 = vrot.slane %v10101_v10, %v25819_v51  ;;  %v6868_v31 = vcombine.high %v21413_v16, %v21413_v16  ;;  %17155 = vmatprep.subr.bf16.mxu1 %v26068_v46 }
 0x5e8   : > { %v21451_v27 = vrot.slane %v10066_v50, %v25819_v51  ;;  %v21454_v12 = vrot.slane %v10080_v45, %v25819_v51  ;;  %v21457_v23 = vrot.slane %v10094_v58, %v25819_v51  ;;  %v21461_v17 = vcombine.high %v21417_v13, %v21417_v13  ;;  %v6076_v58 = vpop.f32.mrf.mxu1 }
 0x5e9   : > { %v21464_v33 = vrot.slane %v10108_v62, %v25819_v51  ;;  %v21467_v38 = vrot.slane %v10115_v56, %v25819_v51  ;;  %v21471_v53 = vcombine.high %v21423_v60, %v21423_v60  ;;  %v7210_v30 = vunpack.i.h.s16 %v21405_v14 }
 0x5ea   : > { %v7212_v50 = vunpack.i.h.s16 %v21413_v16  ;;  %v7214_v45 = vunpack.i.h.s16 %v6866_v57  ;;  %v7216_v26 = vunpack.i.h.s16 %v6868_v31  ;;  %v7218_v5 = vunpack.i.h.s16 %v21417_v13 }
 0x5eb   : > { %v7220_v35 = vunpack.i.h.s16 %v21423_v60  ;;  %v7222_v10 = vunpack.i.h.s16 %v21461_v17  ;;  %v26069_v19 = vcombine.low %v21345_v44, %v21324_v32  ;;  %v6128_v6 = vmul.f32 %v21196_v29, %v21357_v40  ;;  %v17020_v32 = vpop.f32.mrf.mxu1 }
 0x5ec   : > { %v7224_v56 = vunpack.i.h.s16 %v21471_v53  ;;  %v16348_v62 = vpack.i.b16 %v21405_v14, %v21405_v14  ;;  %v7466_v1 = vpack.i.b16 %v7210_v30, %v7210_v30  ;;  %v16349_v4 = vpack.i.b16 %v21413_v16, %v21413_v16  ;;  %v17313_v14 = vld [vmem:[%s25563_s10 + $0x28] sm:$0xff]  }
 0x5ed   : > { %v10795_v55 = vrot.slane %v26069_v19, %v25817_v25  ;;  %v7468_v28 = vpack.i.b16 %v7212_v50, %v7212_v50  ;;  %v16350_v54 = vpack.i.b16 %v6866_v57, %v6866_v57  ;;  %v7470_v24 = vpack.i.b16 %v7214_v45, %v7214_v45  ;;  %14223 = vmatpush1.bf16.msra.mxu0 %v17313_v14 }
 0x5ee   : > { %v16351_v42 = vpack.i.b16 %v6868_v31, %v6868_v31  ;;  %v7472_v19 = vpack.i.b16 %v7216_v26, %v7216_v26  ;;  %v16352_v40 = vpack.i.b16 %v21417_v13, %v21417_v13  ;;  %v7474_v44 = vpack.i.b16 %v7218_v5, %v7218_v5  ;;  %14224 = vmatprep.subr.bf16.mxu0 %v26068_v46 }
 0x5ef   : > { %v16353_v63 = vpack.i.b16 %v21423_v60, %v21423_v60  ;;  %v7476_v30 = vpack.i.b16 %v7220_v35, %v7220_v35  ;;  %v16354_v16 = vpack.i.b16 %v21461_v17, %v21461_v17  ;;  %v7478_v57 = vpack.i.b16 %v7222_v10, %v7222_v10  ;;  %v6079_v10 = vpop.f32.mrf.mxu1  ;;  %17171 = vmatpush1.bf16.msra.mxu1 %v17313_v14 }
 0x5f0   : > { %v16355_v31 = vpack.i.b16 %v21471_v53, %v21471_v53  ;;  %v7480_v26 = vpack.i.b16 %v7224_v56, %v7224_v56  ;;  %v21511_v50 = vrot.slane %v16348_v62, %v25819_v51  ;;  %v21514_v5 = vrot.slane %v7466_v1, %v25819_v51  ;;  %v26072_v62 = vld [vmem:[#allocation20_spill] sm:$0xff]  ;;  %v26073_v1 = vld [vmem:[#allocation17_spill] sm:$0xff]  ;;  %17156 = vmatprep.subr.bf16.mxu1 %v26068_v46 }
 0x5f1   : > { %v21517_v13 = vrot.slane %v16349_v4, %v25819_v51  ;;  %v21520_v60 = vrot.slane %v7468_v28, %v25819_v51  ;;  %v21523_v17 = vrot.slane %v16350_v54, %v25819_v51  ;;  %v21526_v35 = vrot.slane %v7470_v24, %v25819_v51  ;;  %v26071_v4 = vld [vmem:[#allocation3_spill] sm:$0xff]  ;;  %v26074_v28 = vld [vmem:[#allocation48_spill] sm:$0xff]  ;;  %v26076_v54 = vld [vmem:[#allocation34_spill] sm:$0xff] }
 0x5f2   : > { %v10796_v53 = vcombine.low %v21354_v22, %v10795_v55  ;;  %v21531_v45 = vrot.slane %v16351_v42, %v25819_v51  ;;  %v5916_v56 = vadd.f32 %v26072_v62, %v26071_v4  ;;  %v5927_v49 = vadd.f32 %v26074_v28, %v26073_v1 }
 0x5f3   : > { %v5919_v39 = vadd.f32 %v26076_v54, %v26075_v3  ;;  %v21540_v24 = vrot.slane %v7472_v19, %v25819_v51  ;;  %v21543_v55 = vrot.slane %v16352_v40, %v25819_v51  ;;  %v21546_v22 = vrot.slane %v7474_v44, %v25819_v51 }
 0x5f4   : > { %26070 = vst [vmem:[#allocation30_spill] sm:$0xff] %v21531_v45  ;;  %v12193_v42 = vshrl.u32 %v10796_v53, 16  ;;  %v21550_v4 = vrot.slane %v16353_v63, %v25819_v51  ;;  %v6077_v62 = vadd.f32 %v6076_v58, %v5916_v56  ;;  %v6088_v1 = vadd.f32 %v17020_v32, %v5927_v49 }
 0x5f5   : > { %26077 = vst [vmem:[#allocation9_spill] sm:$0xff] %v21540_v24  ;;  %v6080_v28 = vadd.f32 %v6079_v10, %v5919_v39  ;;  %v21553_v3 = vrot.slane %v7476_v30, %v25819_v51  ;;  %v21556_v19 = vrot.slane %v16354_v16, %v25819_v51  ;;  %v12196_v14 = vshll.u32 %v10796_v53, 16  ;;  %v17314_v39 = vld [vmem:[%s25563_s10 + $0x20] sm:$0xff]  }
 0x5f6   : > { %v12195_v40 = vrot.slane %v12193_v42, 7  ;;  %v6167_v44 = vadd.f32 %v21190_v48, %v6128_v6  ;;  %v6126_v54 = vmul.f32 %v21196_v29, %v6077_v62  ;;  %v6129_v37 = vmul.f32 %v21196_v29, %v6088_v1  ;;  %14225 = vmatpush1.bf16.msra.mxu0 %v17314_v39  ;;  %17172 = vmatpush1.bf16.msra.mxu1 %v17314_v39 }
 0x5f7   : > { %v6127_v63 = vmul.f32 %v21196_v29, %v6080_v28  ;;  %v21566_v49 = vrot.slane %v7478_v57, %v25819_v51  ;;  %v21569_v58 = vrot.slane %v16355_v31, %v25819_v51  ;;  %v21572_v32 = vrot.slane %v7480_v26, %v25819_v51  ;;  %14226 = vmatprep.subr.bf16.mxu0 %v26068_v46 }
 0x5f8   : > { %v12198_v6 = vor.u32 %v12196_v14, %v12195_v40  ;;  %v12843_v30 = vrot.slane %v21258_v20, 1  ;;  %v6165_v16 = vadd.f32 %v21190_v48, %v6126_v54  ;;  %v6168_v29 = vadd.f32 %v21190_v48, %v6129_v37  ;;  %17157 = vmatprep.subr.bf16.mxu1 %v26068_v46  ;;  %v26081_v54 = vld [vmem:[#allocation45_spill] sm:$0xff] }
 0x5f9   : > { %v6166_v53 = vadd.f32 %v21190_v48, %v6127_v63  ;;  %v9898_v57 = vpack.i.b16 %v21511_v50, %v21511_v50  ;;  %v9905_v31 = vpack.i.b16 %v21514_v5, %v21514_v5  ;;  %v6199_v37 = vmax.f32 %v6167_v44, 0.0 }
 0x5fa   : > { %v21584_v26 = vsel %vm2259_vm7, %v21229_v36, %v12198_v6  ;;  %v6200_v10 = vmax.f32 %v6168_v29, 0.0  ;;  %v9912_v50 = vpack.i.b16 %v21517_v13, %v21517_v13  ;;  %v9919_v36 = vpack.i.b16 %v21520_v60, %v21520_v60  ;;  %v26082_v6 = vld [vmem:[#allocation42_spill] sm:$0xff]  ;;  %v17315_v29 = vld [vmem:[%s25563_s10 + $0x18] sm:$0xff]  }
 0x5fb   : > { %26078 = vst [vmem:[#allocation47_spill] sm:$0xff] %v21584_v26  ;;  %13188 = vrot.lane.b32.xlu1 %v21584_v26, %s17605_s29  ;;  %v12844_v48 = vrot.slane %v21584_v26, 1  ;;  %v21591_v56 = vmax.f32 %v6166_v53, 0.0  ;;  %v6197_v5 = vmax.f32 %v6165_v16, 0.0  ;;  %v21599_v42 = vsel %vm18272_vm9, %v12195_v40, 0  ;;  %v26080_v40 = vld [vmem:[#allocation46_spill] sm:$0xff]  ;;  %14227 = vmatpush1.bf16.msra.mxu0 %v17315_v29 }
 0x5fc   : > { %v9926_v62 = vpack.i.b16 %v21523_v17, %v21523_v17  ;;  %v6216_v28 = vpack.c.bf16 %v6200_v10, %v6199_v37  ;;  %v16251_v14 = vpack.c.bf16 %v6200_v10, %v6200_v10  ;;  %v9933_v44 = vpack.i.b16 %v21526_v35, %v21526_v35  ;;  %14228 = vmatprep.subr.bf16.mxu0 %v26068_v46 }
 0x5fd   : > { %v21604_v1 = vsel %vm1787_vm6, %v12843_v30, %v12844_v48  ;;  %v21613_v60 = vpack.c.bf16 %v21591_v56, %v6197_v5  ;;  %v10653_v17 = vcombine.low %v26081_v54, %v26080_v40  ;;  %v12846_v35 = vrot.slane %v21599_v42, 1  ;;  %v26083_v30 = vld [vmem:[#allocation41_spill] sm:$0xff]  ;;  %v26086_v5 = vld [vmem:[#allocation44_spill] sm:$0xff]  ;;  %17173 = vmatpush1.bf16.msra.mxu1 %v17315_v29 }
 0x5fe   : > { %26079 = vst [vmem:[#allocation3_spill] sm:$0xff] %v21604_v1  ;;  %13122 = vrot.lane.b32.xlu0 %v21604_v1, %s17606_s27  ;;  %v6975_v63 = vrot.slane %v6216_v28, %v25817_v25  ;;  %v6982_v39 = vrot.slane %v16251_v14, %v25817_v25  ;;  %v10651_v16 = vcombine.low %v26083_v30, %v26082_v6  ;;  %v26087_v28 = vld [vmem:[#allocation43_spill] sm:$0xff] }
 0x5ff   : > { %13058 = vrot.lane.b32.xlu1 %v21258_v20, %s17607_s16  ;;  %v21628_v53 = vrot.slane %v9898_v57, %v25819_v51  ;;  %v21631_v37 = vrot.slane %v9905_v31, %v25819_v51  ;;  %v10652_v14 = vcombine.low %v26087_v28, %v26086_v5  ;;  %v21638_v40 = vrot.slane %v9912_v50, %v25819_v51 }
 0x600   : > { %v21641_v54 = vrot.slane %v9919_v36, %v25819_v51  ;;  %v6984_v6 = vcombine.high %v6982_v39, %v6982_v39  ;;  %v21644_v30 = vsel %vm1787_vm6, %v12844_v48, %v12846_v35  ;;  %v21647_v57 = vrot.slane %v9926_v62, %v25819_v51  ;;  %17158 = vmatprep.subr.bf16.mxu1 %v26068_v46 }
 0x601   : > { %26084 = vst [vmem:[#allocation20_spill] sm:$0xff] %v21628_v53  ;;  %26085 = vst [vmem:[#allocation17_spill] sm:$0xff] %v21631_v37  ;;  %v9954_v31 = vpack.i.b16 %v21543_v55, %v21543_v55  ;;  %v9961_v5 = vpack.i.b16 %v21546_v22, %v21546_v22  ;;  %v10681_v50 = vrot.slane %v10653_v17, %v25817_v25 }
 0x602   : > { %26088 = vst [vmem:[#allocation48_spill] sm:$0xff] %v21638_v40  ;;  %26089 = vst [vmem:[#allocation16_spill] sm:$0xff] %v21641_v54  ;;  %13124 = vrot.lane.b32.xlu0 %v21644_v30, %s17606_s27  ;;  %v9968_v36 = vpack.i.b16 %v21550_v4, %v21550_v4  ;;  %v9975_v48 = vpack.i.b16 %v21553_v3, %v21553_v3  ;;  %v6983_v35 = vcombine.high %v6975_v63, %v6975_v63 }
 0x603   : > { %26090 = vst [vmem:[#allocation34_spill] sm:$0xff] %v21644_v30  ;;  %26091 = vst [vmem:[#allocation46_spill] sm:$0xff] %v21647_v57  ;;  %13060 = vrot.lane.b32.xlu1 %v21584_v26, %s17607_s16  ;;  %v10667_v55 = vrot.slane %v10651_v16, %v25817_v25  ;;  %v9982_v22 = vpack.i.b16 %v21556_v19, %v21556_v19  ;;  %v9989_v62 = vpack.i.b16 %v21566_v49, %v21566_v49  ;;  %v26092_v16 = vld [vmem:[#allocation40_spill] sm:$0xff]  ;;  %v26093_v19 = vld [vmem:[#allocation37_spill] sm:$0xff] }
 0x604   : > { %v10674_v17 = vrot.slane %v10652_v14, %v25817_v25  ;;  %v9996_v4 = vpack.i.b16 %v21569_v58, %v21569_v58  ;;  %v10003_v3 = vpack.i.b16 %v21572_v32, %v21572_v32  ;;  %v21674_v28 = vrot.slane %v6984_v6, %v25817_v25 }
 0x605   : > { %v26094_v10 = vcombine.low %v26092_v16, %v26093_v19  ;;  %v21682_v49 = vrot.slane %v9933_v44, %v25819_v51  ;;  %v21685_v29 = vrot.slane %v9961_v5, %v25819_v51  ;;  %v21688_v58 = vrot.slane %v6975_v63, %v25817_v25  ;;  %v17316_v63 = vld [vmem:[%s25563_s10 + $0x10] sm:$0xff]  }
 0x606   : > { %12994 = vrot.lane.b32.xlu0 %v21604_v1, %s17605_s29  ;;  %v10683_v32 = vcombine.low %v10674_v17, %v10681_v50  ;;  %v21693_v14 = vrot.slane %v9954_v31, %v25819_v51  ;;  %v21699_v6 = vrot.slane %v6983_v35, %v25817_v25  ;;  %v21707_v5 = vrot.slane %v9968_v36, %v25819_v51 }
 0x607   : > { %v10660_v13 = vrot.slane %v26094_v10, %v25817_v25  ;;  %26095 = vst [vmem:[#allocation45_spill] sm:$0xff] %v21682_v49  ;;  %26096 = vst [vmem:[#allocation42_spill] sm:$0xff] %v21685_v29  ;;  %v21696_v10 = vrot.slane %v6982_v39, %v25817_v25  ;;  %13182 = vrot.lane.b32.xlu1 %v21385_v18, %s17605_s29  ;;  %v21710_v31 = vrot.slane %v9975_v48, %v25819_v51 }
 0x608   : > { %26097 = vst [vmem:[#allocation41_spill] sm:$0xff] %v21693_v14  ;;  %26098 = vst [vmem:[#allocation44_spill] sm:$0xff] %v21707_v5  ;;  %v21713_v39 = vrot.slane %v9982_v22, %v25819_v51  ;;  %v16250_v50 = vpack.c.bf16 %v21591_v56, %v21591_v56  ;;  %v21718_v35 = vrot.slane %v9989_v62, %v25819_v51  ;;  %14229 = vmatpush1.bf16.msra.mxu0 %v17316_v63 }
 0x609   : > { %v10682_v44 = vcombine.low %v10660_v13, %v10667_v55  ;;  %26099 = vst [vmem:[#allocation43_spill] sm:$0xff] %v21710_v31  ;;  %v21721_v13 = vrot.slane %v9996_v4, %v25819_v51  ;;  %v21724_v55 = vrot.slane %v10003_v3, %v25819_v51  ;;  %v21728_v36 = vcombine.high %v21674_v28, %v21674_v28 }
 0x60a   : > { %26100 = vst [vmem:[#allocation40_spill] sm:$0xff] %v21713_v39  ;;  %26101 = vst [vmem:[#allocation37_spill] sm:$0xff] %v21718_v35  ;;  %v7013_v56 = vcombine.high %v21688_v58, %v21688_v58  ;;  %12996 = vrot.lane.b32.xlu0 %v21644_v30, %s17605_s29  ;;  %v10697_v22 = vrot.slane %v10683_v32, %v25817_v25  ;;  %v12486_v62 = vshll.u32 %v21385_v18, 16  ;;  %14230 = vmatprep.subr.bf16.mxu0 %v26068_v46 }
 0x60b   : > { %26102 = vst [vmem:[#allocation147_spill] sm:$0xff] %v21721_v13  ;;  %26103 = vst [vmem:[#allocation148_spill] sm:$0xff] %v21724_v55  ;;  %v21740_v17 = vcombine.high %v21696_v10, %v21696_v10  ;;  %v7015_v4 = vcombine.high %v21699_v6, %v21699_v6  ;;  %v21746_v3 = vrot.slane %v21613_v60, %v25817_v25  ;;  %v7260_v19 = vunpack.i.h.s16 %v21699_v6 }
 0x60c   : > { %v10690_v16 = vrot.slane %v10682_v44, %v25817_v25  ;;  %v7268_v32 = vunpack.i.h.s16 %v21674_v28  ;;  %v21753_v48 = vrot.slane %v16250_v50, %v25817_v25  ;;  %17174 = vmatpush1.bf16.msra.mxu1 %v17316_v63  ;;  %v7258_v1 = vunpack.i.h.s16 %v21688_v58  ;;  %v17317_v44 = vld [vmem:[%s25563_s10 + $0x8] sm:$0xff]  }
 0x60d   : > { %v7272_v29 = vunpack.i.h.s16 %v21728_v36  ;;  %17159 = vmatprep.subr.bf16.mxu1 %v26068_v46  ;;  %v7262_v14 = vunpack.i.h.s16 %v7013_v56  ;;  %v7266_v13 = vunpack.i.h.s16 %v21696_v10  ;;  %v21764_v50 = vrot.slane %v12486_v62, 1  ;;  %14231 = vmatpush1.bf16.msra.mxu0 %v17317_v44 }
 0x60e   : > { %v21762_v55 = vcombine.low %v10690_v16, %v10697_v22  ;;  %v7264_v39 = vunpack.i.h.s16 %v7015_v4  ;;  %v7270_v63 = vunpack.i.h.s16 %v21740_v17  ;;  %v16372_v30 = vpack.i.b16 %v21688_v58, %v21688_v58  ;;  %14232 = vmatprep.subr.bf16.mxu0 %v26068_v46 }
 0x60f   : > { %v7516_v35 = vpack.i.b16 %v7260_v19, %v7260_v19  ;;  %v7524_v5 = vpack.i.b16 %v7268_v32, %v7268_v32  ;;  %v21778_v62 = vrot.slane %v21746_v3, %v25817_v25  ;;  %v7514_v16 = vpack.i.b16 %v7258_v1, %v7258_v1 }
 0x610   : > { %v16373_v58 = vpack.i.b16 %v21699_v6, %v21699_v6  ;;  %v7528_v31 = vpack.i.b16 %v7272_v29, %v7272_v29  ;;  %v21784_v60 = vrot.slane %v21753_v48, %v25817_v25  ;;  %v16374_v57 = vpack.i.b16 %v7013_v56, %v7013_v56  ;;  %17175 = vmatpush1.bf16.msra.mxu1 %v17317_v44 }
 0x611   : > { %v7518_v19 = vpack.i.b16 %v7262_v14, %v7262_v14  ;;  %v7522_v32 = vpack.i.b16 %v7266_v13, %v7266_v13  ;;  %v16377_v22 = vpack.i.b16 %v21674_v28, %v21674_v28  ;;  %v7520_v49 = vpack.i.b16 %v7264_v39, %v7264_v39  ;;  %17160 = vmatprep.subr.bf16.mxu1 %v26068_v46 }
 0x612   : > { %v7526_v40 = vpack.i.b16 %v7270_v63, %v7270_v63  ;;  %v16379_v1 = vpack.i.b16 %v21728_v36, %v21728_v36  ;;  %v8492_v29 = vrot.slane %v16372_v30, %v25819_v51  ;;  %v16375_v6 = vpack.i.b16 %v7015_v4, %v7015_v4 }
 0x613   : > { %v16376_v54 = vpack.i.b16 %v21696_v10, %v21696_v10  ;;  %v8504_v14 = vrot.slane %v7516_v35, %v25819_v51  ;;  %v8536_v13 = vrot.slane %v7524_v5, %v25819_v51  ;;  %v16378_v28 = vpack.i.b16 %v21740_v17, %v21740_v17 }
 0x614   : > { %v8496_v39 = vrot.slane %v7514_v16, %v25819_v51  ;;  %v8500_v36 = vrot.slane %v16373_v58, %v25819_v51  ;;  %v8552_v30 = vrot.slane %v7528_v31, %v25819_v51  ;;  %v8508_v56 = vrot.slane %v16374_v57, %v25819_v51  ;;  %v17318_v16 = vld [vmem:[%s25563_s10] sm:$0xff]  }
 0x615   : > { %v8512_v4 = vrot.slane %v7518_v19, %v25819_v51  ;;  %v8528_v10 = vrot.slane %v7522_v32, %v25819_v51  ;;  %v8532_v35 = vrot.slane %v16377_v22, %v25819_v51  ;;  %v8520_v5 = vrot.slane %v7520_v49, %v25819_v51  ;;  %14233 = vmatpush1.bf16.msra.mxu0 %v17318_v16 }
 0x616   : > { %v8544_v44 = vrot.slane %v7526_v40, %v25819_v51  ;;  %v8548_v17 = vrot.slane %v16379_v1, %v25819_v51  ;;  %v10234_v63 = vpack.i.b16 %v8492_v29, %v8492_v29  ;;  %v8516_v31 = vrot.slane %v16375_v6, %v25819_v51  ;;  %14234 = vmatprep.subr.bf16.mxu0 %v26068_v46 }
 0x617   : > { %v8524_v57 = vrot.slane %v16376_v54, %v25819_v51  ;;  %v10255_v58 = vpack.i.b16 %v8504_v14, %v8504_v14  ;;  %v10311_v19 = vpack.i.b16 %v8536_v13, %v8536_v13  ;;  %v8540_v32 = vrot.slane %v16378_v28, %v25819_v51  ;;  %17176 = vmatpush1.bf16.msra.mxu1 %v17318_v16 }
 0x618   : > { %v10241_v22 = vpack.i.b16 %v8496_v39, %v8496_v39  ;;  %v10248_v53 = vpack.i.b16 %v8500_v36, %v8500_v36  ;;  %v10339_v49 = vpack.i.b16 %v8552_v30, %v8552_v30  ;;  %v10262_v40 = vpack.i.b16 %v8508_v56, %v8508_v56  ;;  %17161 = vmatprep.subr.bf16.mxu1 %v26068_v46 }
 0x619   : > { %v10269_v37 = vpack.i.b16 %v8512_v4, %v8512_v4  ;;  %v10297_v1 = vpack.i.b16 %v8528_v10, %v8528_v10  ;;  %v10304_v29 = vpack.i.b16 %v8532_v35, %v8532_v35  ;;  %v10239_v24 = vrot.slane %v10234_v63, %v25819_v51 }
 0x61a   : > { %v10283_v45 = vpack.i.b16 %v8520_v5, %v8520_v5  ;;  %v10325_v6 = vpack.i.b16 %v8544_v44, %v8544_v44  ;;  %v10332_v2 = vpack.i.b16 %v8548_v17, %v8548_v17  ;;  %v10260_v54 = vrot.slane %v10255_v58, %v25819_v51 }
 0x61b   : > { %v10276_v14 = vpack.i.b16 %v8516_v31, %v8516_v31  ;;  %v10290_v13 = vpack.i.b16 %v8524_v57, %v8524_v57  ;;  %v10316_v28 = vrot.slane %v10311_v19, %v25819_v51  ;;  %v10246_v39 = vrot.slane %v10241_v22, %v25819_v51 }
 0x61c   : > { %v10253_v36 = vrot.slane %v10248_v53, %v25819_v51  ;;  %v10318_v30 = vpack.i.b16 %v8540_v32, %v8540_v32  ;;  %v10344_v56 = vrot.slane %v10339_v49, %v25819_v51  ;;  %v10267_v4 = vrot.slane %v10262_v40, %v25819_v51 }
 0x61d   : > { %v10274_v10 = vrot.slane %v10269_v37, %v25819_v51  ;;  %v10302_v35 = vrot.slane %v10297_v1, %v25819_v51  ;;  %v10309_v5 = vrot.slane %v10304_v29, %v25819_v51  ;;  %v10288_v44 = vrot.slane %v10283_v45, %v25819_v51  ;;  %v17319_v37 = vld [vmem:[%s25563_s10 + $0x78] sm:$0xff]  }
 0x61e   : > { %v10330_v17 = vrot.slane %v10325_v6, %v25819_v51  ;;  %v10337_v63 = vrot.slane %v10332_v2, %v25819_v51  ;;  %v26104_v53 = vcombine.high %v21746_v3, %v21746_v3  ;;  %v10281_v31 = vrot.slane %v10276_v14, %v25819_v51  ;;  %14235 = vmatpush2.bf16.msra.mxu0 %v17319_v37 }
 0x61f   : > { %v10295_v57 = vrot.slane %v10290_v13, %v25819_v51  ;;  %v12072_v58 = vcombine.low %v10253_v36, %v10260_v54  ;;  %v12121_v45 = vcombine.low %v10309_v5, %v10316_v28  ;;  %v10323_v19 = vrot.slane %v10318_v30, %v25819_v51  ;;  %14236 = vmatprep.subr.bf16.mxu0 %v26068_v46 }
 0x620   : > { %v21834_v16 = vrot.slane %v26104_v53, %v25817_v25  ;;  %v12071_v32 = vcombine.low %v10239_v24, %v10246_v39  ;;  %v12123_v2 = vcombine.low %v10337_v63, %v10344_v56  ;;  %v26105_v3 = vcombine.high %v21753_v48, %v21753_v48  ;;  %17177 = vmatpush2.bf16.msra.mxu1 %v17319_v37 }
 0x621   : > { %v12073_v49 = vcombine.low %v10267_v4, %v10274_v10  ;;  %v12120_v40 = vcombine.low %v10295_v57, %v10302_v35  ;;  %v12506_v1 = vshll.u32 %v21258_v20, 16  ;;  %v12511_v29 = vshll.u32 %v21584_v26, 16  ;;  %17162 = vmatprep.subr.bf16.mxu1 %v26068_v46 }
 0x622   : > { %v21846_v22 = vrot.slane %v26105_v3, %v25817_v25  ;;  %v12074_v6 = vcombine.low %v10281_v31, %v10288_v44  ;;  %v12122_v54 = vcombine.low %v10323_v19, %v10330_v17  ;;  %v21853_v24 = vcombine.high %v21778_v62, %v21778_v62 }
 0x623   : > { %v21857_v48 = vcombine.high %v21834_v16, %v21834_v16  ;;  %v21860_v14 = vrot.slane %v12072_v58, %v25817_v25  ;;  %v21863_v13 = vrot.slane %v12121_v45, %v25817_v25  ;;  %v12178_v28 = vshrl.u32 %v21762_v55, 16  ;;  %v17320_v45 = vld [vmem:[%s25563_s10 + $0x70] sm:$0xff]  }
 0x624   : > { %v12181_v39 = vshll.u32 %v21762_v55, 16  ;;  %v21869_v36 = vrot.slane %v12071_v32, %v25817_v25  ;;  %v21872_v30 = vrot.slane %v12123_v2, %v25817_v25  ;;  %v21876_v56 = vcombine.high %v21784_v60, %v21784_v60  ;;  %14237 = vmatpush2.bf16.msra.mxu0 %v17320_v45  ;;  %17178 = vmatpush2.bf16.msra.mxu1 %v17320_v45 }
 0x625   : > { %26106 = vst [vmem:[#allocation149_spill] sm:$0xff] %v21860_v14  ;;  %v21880_v4 = vcombine.high %v21846_v22, %v21846_v22  ;;  %v21883_v10 = vrot.slane %v12073_v49, %v25817_v25  ;;  %v21886_v55 = vrot.slane %v12120_v40, %v25817_v25  ;;  %v7242_v35 = vunpack.i.h.s16 %v21778_v62  ;;  %14238 = vmatprep.subr.bf16.mxu0 %v26068_v46 }
 0x626   : > { %v7244_v5 = vunpack.i.h.s16 %v21834_v16  ;;  %v21891_v44 = vrot.slane %v12074_v6, %v25817_v25  ;;  %v21894_v17 = vrot.slane %v12122_v54, %v25817_v25  ;;  %v7246_v63 = vunpack.i.h.s16 %v21853_v24  ;;  %17163 = vmatprep.subr.bf16.mxu1 %v26068_v46 }
 0x627   : > { %v7248_v53 = vunpack.i.h.s16 %v21857_v48  ;;  %v7250_v57 = vunpack.i.h.s16 %v21784_v60  ;;  %v7252_v58 = vunpack.i.h.s16 %v21846_v22  ;;  %v7254_v32 = vunpack.i.h.s16 %v21876_v56 }
 0x628   : > { %v7256_v2 = vunpack.i.h.s16 %v21880_v4  ;;  %v16364_v3 = vpack.i.b16 %v21778_v62, %v21778_v62  ;;  %v7498_v49 = vpack.i.b16 %v7242_v35, %v7242_v35  ;;  %v16365_v40 = vpack.i.b16 %v21834_v16, %v21834_v16 }
 0x629   : > { %v7500_v6 = vpack.i.b16 %v7244_v5, %v7244_v5  ;;  %v21917_v37 = vpack.i.b16 %v7246_v63, %v7246_v63  ;;  %v21921_v19 = vpack.i.b16 %v7248_v53, %v7248_v53  ;;  %v21926_v62 = vpack.i.b16 %v7250_v57, %v7250_v57 }
 0x62a   : > { %v21930_v35 = vpack.i.b16 %v7252_v58, %v7252_v58  ;;  %v21934_v63 = vpack.i.b16 %v7254_v32, %v7254_v32  ;;  %v21938_v31 = vpack.i.b16 %v7256_v2, %v7256_v2  ;;  %v21941_v14 = vrot.slane %v16364_v3, %v25819_v51 }
 0x62b   : > { %v21945_v57 = vrot.slane %v7498_v49, %v25819_v51  ;;  %v21948_v58 = vrot.slane %v16365_v40, %v25819_v51  ;;  %v21951_v45 = vrot.slane %v7500_v6, %v25819_v51  ;;  %v12180_v32 = vrot.slane %v12178_v28, 7 }
 0x62c   : > { %v12508_v5 = vrot.slane %v12506_v1, 1  ;;  %v12513_v16 = vrot.slane %v12511_v29, 1  ;;  %v12515_v2 = vshrl.u32 %v21584_v26, 16  ;;  %v12519_v53 = vshll.u32 %v21599_v42, 16  ;;  %v17321_v1 = vld [vmem:[%s25563_s10 + $0x68] sm:$0xff]  }
 0x62d   : > { %v12183_v3 = vor.u32 %v12181_v39, %v12180_v32  ;;  %v12458_v54 = vsel %vm18272_vm9, %v12180_v32, 0  ;;  %v26107_v49 = vpack.i.b16 %v21374_v59, %v21374_v59  ;;  %v11876_v6 = vcombine.low %v21410_v15, %v21420_v34  ;;  %14239 = vmatpush2.bf16.msra.mxu0 %v17321_v1  ;;  %17179 = vmatpush2.bf16.msra.mxu1 %v17321_v1 }
 0x62e   : > { %v12499_v29 = vshll.u32 %v12458_v54, 16  ;;  %v26108_v28 = vshrl.u32 %v21385_v18, 16  ;;  %v26109_v39 = vshrl.u32 %v21258_v20, 16  ;;  %v21971_v26 = vor.u32 %v12515_v2, %v12513_v16  ;;  %14240 = vmatprep.subr.bf16.mxu0 %v26068_v46  ;;  %17164 = vmatprep.subr.bf16.mxu1 %v26068_v46 }
 0x62f   : > { %v10064_v40 = vrot.slane %v26107_v49, %v25819_v51  ;;  %v21975_v59 = vsel %vm2259_vm7, %v21359_v41, %v12183_v3  ;;  %v12841_v49 = vrot.slane %v12458_v54, 1  ;;  %v11877_v15 = vcombine.low %v21426_v43, %v21429_v21 }
 0x630   : > { %v12489_v42 = vor.u32 %v21764_v50, %v26108_v28  ;;  %v12509_v32 = vor.u32 %v12508_v5, %v26109_v39  ;;  %26110 = vst [vmem:[#allocation150_spill] sm:$0xff] %v21975_v59  ;;  %13184 = vrot.lane.b32.xlu1 %v21975_v59, %s17605_s29  ;;  %v12839_v50 = vrot.slane %v21975_v59, 1  ;;  %v12491_v5 = vshll.u32 %v21975_v59, 16 }
 0x631   : > { %v11878_v34 = vcombine.low %v21437_v7, %v10064_v40  ;;  %v12495_v2 = vshrl.u32 %v21975_v59, 16  ;;  %v21985_v28 = vrot.slane %v12519_v53, 1  ;;  %v12501_v41 = vrot.slane %v12499_v29, 1 }
 0x632   : > { %v21989_v43 = vsel %vm4988_vm0, %v12509_v32, %v12513_v16  ;;  %v26112_v21 = vcombine.low %v21395_v0, %v21398_v52  ;;  %v11892_v54 = vrot.slane %v11876_v6, %v25817_v25  ;;  %v26113_v3 = vrot.slane %v21385_v18, 1  ;;  %v17322_v32 = vld [vmem:[%s25563_s10 + $0x60] sm:$0xff]  }
 0x633   : > { %26111 = vst [vmem:[#allocation151_spill] sm:$0xff] %v21989_v43  ;;  %v22003_v40 = vsel %vm1787_vm6, %v12839_v50, %v12841_v49  ;;  %v12493_v1 = vrot.slane %v12491_v5, 1  ;;  %v11899_v16 = vrot.slane %v11877_v15, %v25817_v25  ;;  %v11906_v0 = vrot.slane %v11878_v34, %v25817_v25  ;;  %14241 = vmatpush2.bf16.msra.mxu0 %v17322_v32 }
 0x634   : > { %v11885_v7 = vrot.slane %v26112_v21, %v25817_v25  ;;  %v22000_v53 = vsel %vm1787_vm6, %v26113_v3, %v12839_v50  ;;  %26115 = vst [vmem:[#allocation153_spill] sm:$0xff] %v22003_v40  ;;  %v11927_v6 = vcombine.low %v21464_v33, %v21467_v38  ;;  %v26116_v29 = vcombine.low %v21451_v27, %v21432_v61 }
 0x635   : > { %26114 = vst [vmem:[#allocation152_spill] sm:$0xff] %v22000_v53  ;;  %12990 = vrot.lane.b32.xlu0 %v22000_v53, %s17605_s29  ;;  %13056 = vrot.lane.b32.xlu1 %v21975_v59, %s17607_s16  ;;  %v12497_v49 = vor.u32 %v12495_v2, %v12493_v1  ;;  %v22021_v15 = vsel %vm4988_vm0, %v12489_v42, %v12493_v1 }
 0x636   : > { %v11907_v52 = vcombine.low %v11885_v7, %v11892_v54  ;;  %v11934_v39 = vrot.slane %v26116_v29, %v25817_v25  ;;  %v26117_v33 = vcombine.low %v21454_v12, %v21440_v8  ;;  %v26118_v61 = vcombine.low %v21457_v23, %v21443_v47  ;;  %v26120_v12 = vld [vmem:[#allocation61_spill] sm:$0xff]  ;;  %v26122_v7 = vld [vmem:[#allocation63_spill] sm:$0xff]  ;;  %v26123_v54 = vld [vmem:[#allocation62_spill] sm:$0xff]  ;;  %14242 = vmatprep.subr.bf16.mxu0 %v26068_v46 }
 0x637   : > { %v11908_v34 = vcombine.low %v11899_v16, %v11906_v0  ;;  %v11955_v5 = vrot.slane %v11927_v6, %v25817_v25  ;;  %v26119_v42 = vpack.i.b16 %v20299_v11, %v20299_v11  ;;  %v22038_v21 = vsel %vm4988_vm0, %v12497_v49, %v12501_v41  ;;  %v26124_v16 = vld [vmem:[#allocation65_spill] sm:$0xff]  ;;  %v26125_v41 = vld [vmem:[#allocation64_spill] sm:$0xff]  ;;  %v26127_v6 = vld [vmem:[#allocation66_spill] sm:$0xff]  ;;  %17180 = vmatpush2.bf16.msra.mxu1 %v17322_v32 }
 0x638   : > { %v11941_v38 = vrot.slane %v26117_v33, %v25817_v25  ;;  %v11948_v27 = vrot.slane %v26118_v61, %v25817_v25  ;;  %v11915_v50 = vrot.slane %v11907_v52, %v25817_v25  ;;  %v26121_v47 = vpack.i.b16 %v26120_v12, %v26120_v12  ;;  %v26126_v52 = vld [vmem:[#allocation67_spill] sm:$0xff]  ;;  %17165 = vmatprep.subr.bf16.mxu1 %v26068_v46 }
 0x639   : > { %v8825_v2 = vrot.slane %v26119_v42, %v25819_v51  ;;  %v10797_v3 = vcombine.low %v26123_v54, %v26122_v7  ;;  %12992 = vrot.lane.b32.xlu0 %v22003_v40, %s17605_s29  ;;  %v11922_v11 = vrot.slane %v11908_v34, %v25817_v25  ;;  %v10798_v0 = vcombine.low %v26125_v41, %v26124_v16  ;;  %v26128_v61 = vld [vmem:[#allocation71_spill] sm:$0xff]  ;;  %v17324_v7 = vld [vmem:[%s25563_s10 + $0x50] sm:$0xff]   ;;  %v26133_v16 = vld [vmem:[#allocation74_spill] sm:$0xff] }
 0x63a   : > { %v11956_v8 = vcombine.low %v11934_v39, %v11941_v38  ;;  %v8832_v23 = vrot.slane %v26121_v47, %v25819_v51  ;;  %v11957_v1 = vcombine.low %v11948_v27, %v11955_v5  ;;  %v10799_v29 = vcombine.low %v26127_v6, %v26126_v52  ;;  %v17323_v39 = vld [vmem:[%s25563_s10 + $0x58] sm:$0xff]   ;;  %13118 = vrot.lane.b32.xlu1 %v22000_v53, %s17606_s27  ;;  %v26129_v27 = vld [vmem:[#allocation70_spill] sm:$0xff]  ;;  %v17325_v32 = vld [vmem:[%s25563_s10 + $0x48] sm:$0xff]  }
 0x63b   : > { %v10807_v38 = vrot.slane %v10797_v3, %v25817_v25  ;;  %v10847_v34 = vcombine.low %v26129_v27, %v26128_v61  ;;  %v11923_v5 = vcombine.low %v11915_v50, %v11922_v11  ;;  %v10814_v12 = vrot.slane %v10798_v0, %v25817_v25  ;;  %14243 = vmatpush2.bf16.msra.mxu0 %v17323_v39  ;;  %v26132_v3 = vld [vmem:[#allocation75_spill] sm:$0xff]  ;;  %v26134_v50 = vld [vmem:[#allocation68_spill] sm:$0xff]  ;;  %v26135_v11 = vld [vmem:[#allocation69_spill] sm:$0xff] }
 0x63c   : > { %v11964_v49 = vrot.slane %v11956_v8, %v25817_v25  ;;  %v10800_v33 = vcombine.low %v8825_v2, %v8832_v23  ;;  %v11971_v42 = vrot.slane %v11957_v1, %v25817_v25  ;;  %v10821_v47 = vrot.slane %v10799_v29, %v25817_v25  ;;  %v26130_v2 = vld [vmem:[#allocation73_spill] sm:$0xff]  ;;  %v26131_v23 = vld [vmem:[#allocation72_spill] sm:$0xff]  ;;  %14244 = vmatprep.subr.bf16.mxu0 %v26068_v46 }
 0x63d   : > { %v10848_v54 = vcombine.low %v26131_v23, %v26130_v2  ;;  %v10849_v41 = vcombine.low %v26133_v16, %v26132_v3  ;;  %v26136_v1 = vcombine.low %v26134_v50, %v26135_v11  ;;  %13252 = vrot.lane.b32.xlu0 %v22038_v21, %s17607_s16  ;;  %v12366_v52 = vshrl.u32 %v11923_v5, 16  ;;  %17181 = vmatpush2.bf16.msra.mxu1 %v17323_v39  ;;  %v17326_v39 = vld [vmem:[%s25563_s10 + $0x40] sm:$0xff]  }
 0x63e   : > { %v10828_v8 = vrot.slane %v10800_v33, %v25817_v25  ;;  %v12369_v6 = vshll.u32 %v11923_v5, 16  ;;  %v11972_v29 = vcombine.low %v11964_v49, %v11971_v42  ;;  %v10829_v33 = vcombine.low %v10807_v38, %v10814_v12  ;;  %13120 = vrot.lane.b32.xlu1 %v22003_v40, %s17606_s27  ;;  %v26137_v5 = vld [vmem:[#allocation30_spill] sm:$0xff]  ;;  %17166 = vmatprep.subr.bf16.mxu1 %v26068_v46 }
 0x63f   : > { %v10856_v0 = vrot.slane %v26136_v1, %v25817_v25  ;;  %v10863_v27 = vrot.slane %v10847_v34, %v25817_v25  ;;  %v10870_v2 = vrot.slane %v10848_v54, %v25817_v25  ;;  %v10877_v23 = vrot.slane %v10849_v41, %v25817_v25  ;;  %14245 = vmatpush2.bf16.msra.mxu0 %v17324_v7  ;;  %v26139_v54 = vld [vmem:[#allocation9_spill] sm:$0xff]  ;;  %v26158_v40 = vld [vmem:[#allocation42_spill] sm:$0xff] }
 0x640   : > { %v10830_v61 = vcombine.low %v10821_v47, %v10828_v8  ;;  %v12368_v3 = vrot.slane %v12366_v52, 7  ;;  %v12373_v16 = vshrl.u32 %v11972_v29, 16  ;;  %v12376_v50 = vshll.u32 %v11972_v29, 16  ;;  %14246 = vmatprep.subr.bf16.mxu0 %v26068_v46  ;;  %v26142_v52 = vld [vmem:[#allocation20_spill] sm:$0xff] }
 0x641   : > { %v10837_v11 = vrot.slane %v10829_v33, %v25817_v25  ;;  %v10878_v38 = vcombine.low %v10856_v0, %v10863_v27  ;;  %v10879_v34 = vcombine.low %v10870_v2, %v10877_v23  ;;  %v26138_v42 = vpack.i.b16 %v26137_v5, %v26137_v5  ;;  %12922 = vrot.lane.b32.xlu0 %v22021_v15, %s17606_s27  ;;  %v26141_v0 = vld [vmem:[#allocation17_spill] sm:$0xff]  ;;  %v26143_v27 = vld [vmem:[#allocation16_spill] sm:$0xff] }
 0x642   : > { %v10844_v49 = vrot.slane %v10830_v61, %v25817_v25  ;;  %v12371_v47 = vor.u32 %v12369_v6, %v12368_v3  ;;  %v22099_v8 = vrot.slane %v12373_v16, 7  ;;  %v26140_v41 = vpack.i.b16 %v26139_v54, %v26139_v54  ;;  %13254 = vrot.lane.b32.xlu1 %v21989_v43, %s17607_s16  ;;  %v26144_v2 = vld [vmem:[#allocation48_spill] sm:$0xff]  ;;  %v26145_v5 = vld [vmem:[#allocation45_spill] sm:$0xff]  ;;  %17182 = vmatpush2.bf16.msra.mxu1 %v17324_v7 }
 0x643   : > { %v9945_v12 = vrot.slane %v26138_v42, %v25819_v51  ;;  %v11777_v29 = vcombine.low %v26142_v52, %v26141_v0  ;;  %v10886_v61 = vrot.slane %v10878_v38, %v25817_v25  ;;  %v10893_v6 = vrot.slane %v10879_v34, %v25817_v25  ;;  %v26146_v42 = vld [vmem:[#allocation46_spill] sm:$0xff]  ;;  %14247 = vmatpush2.bf16.msra.mxu0 %v17325_v32 }
 0x644   : > { %v9952_v1 = vrot.slane %v26140_v41, %v25819_v51  ;;  %v22109_v33 = vcombine.low %v10837_v11, %v10844_v49  ;;  %v11778_v23 = vcombine.low %v26144_v2, %v26143_v27  ;;  %v12378_v16 = vor.u32 %v12376_v50, %v22099_v8  ;;  %14248 = vmatprep.subr.bf16.mxu0 %v26068_v46  ;;  %v26153_v2 = vld [vmem:[#allocation37_spill] sm:$0xff] }
 0x645   : > { %v11779_v54 = vcombine.low %v26146_v42, %v26145_v5  ;;  %v26147_v11 = vpack.i.b16 %v21853_v24, %v21853_v24  ;;  %v22131_v50 = vsel %vm4988_vm0, %v21971_v26, %v21985_v28  ;;  %v10894_v38 = vcombine.low %v10886_v61, %v10893_v6  ;;  %12924 = vrot.lane.b32.xlu0 %v22038_v21, %s17606_s27  ;;  %v26152_v61 = vld [vmem:[#allocation44_spill] sm:$0xff]  ;;  %v26156_v42 = vld [vmem:[#allocation147_spill] sm:$0xff] }
 0x646   : > { %v11780_v41 = vcombine.low %v9945_v12, %v9952_v1  ;;  %26148 = vst [vmem:[#allocation61_spill] sm:$0xff] %v22131_v50  ;;  %v11787_v34 = vrot.slane %v11777_v29, %v25817_v25  ;;  %v22138_v12 = vsel %vm2259_vm7, %v12368_v3, %v12378_v16  ;;  %v11794_v24 = vrot.slane %v11778_v23, %v25817_v25  ;;  %v26151_v29 = vld [vmem:[#allocation43_spill] sm:$0xff]  ;;  %v26154_v23 = vld [vmem:[#allocation40_spill] sm:$0xff] }
 0x647   : > { %v22126_v49 = vrot.slane %v26147_v11, %v25819_v51  ;;  %26149 = vst [vmem:[#allocation63_spill] sm:$0xff] %v22138_v12  ;;  %v11801_v1 = vrot.slane %v11779_v54, %v25817_v25  ;;  %13256 = vrot.lane.b32.xlu1 %v22131_v50, %s17607_s16  ;;  %v22147_v26 = vsel %vm18272_vm9, 0, %v12371_v47  ;;  %v12201_v28 = vshrl.u32 %v22109_v33, 16  ;;  %v26155_v5 = vld [vmem:[#allocation148_spill] sm:$0xff]  ;;  %14249 = vmatpush2.bf16.msra.mxu0 %v17326_v39  ;;  %v26157_v11 = vld [vmem:[#allocation41_spill] sm:$0xff] }
 0x648   : > { %v11808_v0 = vrot.slane %v11780_v41, %v25817_v25  ;;  %26150 = vst [vmem:[#allocation62_spill] sm:$0xff] %v22147_v26  ;;  %v12208_v52 = vshrl.u32 %v10894_v38, 16  ;;  %v11827_v3 = vcombine.low %v26152_v61, %v26151_v29  ;;  %v11809_v6 = vcombine.low %v11787_v34, %v11794_v24  ;;  %17167 = vmatprep.subr.bf16.mxu1 %v26068_v46 }
 0x649   : > { %v11828_v16 = vcombine.low %v26154_v23, %v26153_v2  ;;  %v11829_v54 = vcombine.low %v26156_v42, %v26155_v5  ;;  %v12211_v47 = vshll.u32 %v10894_v38, 16  ;;  %v26159_v53 = vcombine.low %v26157_v11, %v26158_v40  ;;  %13234 = vrot.lane.b32.xlu0 %v22147_v26, %s17605_s29  ;;  %17183 = vmatpush2.bf16.msra.mxu1 %v17325_v32 }
 0x64a   : > { %v11810_v27 = vcombine.low %v11801_v1, %v11808_v0  ;;  %v22156_v41 = vrot.slane %v12208_v52, 7  ;;  %v11843_v29 = vrot.slane %v11827_v3, %v25817_v25  ;;  %v11817_v7 = vrot.slane %v11809_v6, %v25817_v25  ;;  %17168 = vmatprep.subr.bf16.mxu1 %v26068_v46 }
 0x64b   : > { %v11836_v20 = vrot.slane %v26159_v53, %v25817_v25  ;;  %v11850_v24 = vrot.slane %v11828_v16, %v25817_v25  ;;  %v11857_v38 = vrot.slane %v11829_v54, %v25817_v25  ;;  %v22172_v1 = vrot.slane %v21917_v37, %v25819_v51  ;;  %12926 = vrot.lane.b32.xlu1 %v21989_v43, %s17606_s27  ;;  %v26255_v43 = vld [vmem:[#allocation114_spill] sm:$0xff] }
 0x64c   : > { %v11824_v34 = vrot.slane %v11810_v27, %v25817_v25  ;;  %v12203_v53 = vrot.slane %v12201_v28, 7  ;;  %v12213_v40 = vor.u32 %v12211_v47, %v22156_v41  ;;  %v26160_v52 = vpack.i.b16 %v21857_v48, %v21857_v48 }
 0x64d   : > { %v11858_v0 = vcombine.low %v11836_v20, %v11843_v29  ;;  %v22185_v3 = vrot.slane %v21921_v19, %v25819_v51  ;;  %v11859_v6 = vcombine.low %v11850_v24, %v11857_v38  ;;  %v26161_v28 = vpack.i.b16 %v21784_v60, %v21784_v60  ;;  %13236 = vrot.lane.b32.xlu0 %v22138_v12, %s17605_s29 }
 0x64e   : > { %v22181_v61 = vrot.slane %v26160_v52, %v25819_v51  ;;  %v11825_v37 = vcombine.low %v11817_v7, %v11824_v34  ;;  %v8464_v32 = vrot.slane %v21926_v62, %v25819_v51  ;;  %v26162_v48 = vpack.i.b16 %v21846_v22, %v21846_v22  ;;  %17184 = vmatpush2.bf16.msra.mxu1 %v17326_v39 }
 0x64f   : > { %v8460_v20 = vrot.slane %v26161_v28, %v25819_v51  ;;  %v22199_v19 = vsel %vm2259_vm7, %v12203_v53, %v12213_v40  ;;  %v10122_v2 = vpack.i.b16 %v21941_v14, %v21941_v14  ;;  %v11866_v60 = vrot.slane %v11858_v0, %v25817_v25  ;;  %12928 = vrot.lane.b32.xlu1 %v22131_v50, %s17606_s27 }
 0x650   : > { %v8468_v27 = vrot.slane %v26162_v48, %v25819_v51  ;;  %26163 = vst [vmem:[#allocation65_spill] sm:$0xff] %v22199_v19  ;;  %v12351_v46 = vshrl.u32 %v11825_v37, 16  ;;  %v11873_v23 = vrot.slane %v11859_v6, %v25817_v25  ;;  %v8472_v62 = vrot.slane %v21930_v35, %v25819_v51 }
 0x651   : > { %v26164_v22 = vpack.i.b16 %v21876_v56, %v21876_v56  ;;  %v8480_v5 = vrot.slane %v21934_v63, %v25819_v51  ;;  %v26165_v14 = vpack.i.b16 %v21880_v4, %v21880_v4  ;;  %v10129_v35 = vpack.i.b16 %v21945_v57, %v21945_v57  ;;  %13106 = vrot.lane.b32.xlu0 %v22147_v26, %s17607_s16 }
 0x652   : > { %v12204_v54 = vshll.u32 %v22109_v33, 16  ;;  %v11874_v47 = vcombine.low %v11866_v60, %v11873_v23  ;;  %v8488_v56 = vrot.slane %v21938_v31, %v25819_v51  ;;  %v10136_v63 = vpack.i.b16 %v21948_v58, %v21948_v58 }
 0x653   : > { %v8476_v16 = vrot.slane %v26164_v22, %v25819_v51  ;;  %v8484_v42 = vrot.slane %v26165_v14, %v25819_v51  ;;  %v10143_v39 = vpack.i.b16 %v21951_v45, %v21951_v45  ;;  %v12353_v11 = vrot.slane %v12351_v46, 7  ;;  %13250 = vrot.lane.b32.xlu1 %v22021_v15, %s17607_s16 }
 0x654   : > { %v22231_v29 = vrot.slane %v10122_v2, %v25819_v51  ;;  %v10150_v4 = vpack.i.b16 %v22126_v49, %v22126_v49  ;;  %v12206_v57 = vor.u32 %v12204_v54, %v12203_v53  ;;  %v12358_v33 = vshrl.u32 %v11874_v47, 16 }
 0x655   : > { %v10157_v31 = vpack.i.b16 %v22172_v1, %v22172_v1  ;;  %v10164_v58 = vpack.i.b16 %v22181_v61, %v22181_v61  ;;  %v10171_v45 = vpack.i.b16 %v22185_v3, %v22185_v3  ;;  %v12354_v7 = vshll.u32 %v11825_v37, 16  ;;  %13108 = vrot.lane.b32.xlu0 %v22138_v12, %s17607_s16 }
 0x656   : > { %v10134_v49 = vrot.slane %v10129_v35, %v25819_v51  ;;  %v10185_v34 = vpack.i.b16 %v8464_v32, %v8464_v32  ;;  %v22246_v24 = vrot.slane %v12358_v33, 7  ;;  %v12361_v38 = vshll.u32 %v11874_v47, 16 }
 0x657   : > { %v10178_v53 = vpack.i.b16 %v8460_v20, %v8460_v20  ;;  %v10192_v40 = vpack.i.b16 %v8468_v27, %v8468_v27  ;;  %v10199_v0 = vpack.i.b16 %v8472_v62, %v8472_v62  ;;  %v12356_v1 = vor.u32 %v12354_v7, %v12353_v11 }
 0x658   : > { %v10206_v52 = vpack.i.b16 %v8476_v16, %v8476_v16  ;;  %v10213_v6 = vpack.i.b16 %v8480_v5, %v8480_v5  ;;  %v22250_v61 = vsel %vm18272_vm9, 0, %v12206_v57  ;;  %v12363_v3 = vor.u32 %v12361_v38, %v22246_v24 }
 0x659   : > { %26166 = vst [vmem:[#allocation64_spill] sm:$0xff] %v22250_v61  ;;  %v10141_v37 = vrot.slane %v10136_v63, %v25819_v51  ;;  %v10148_v28 = vrot.slane %v10143_v39, %v25819_v51  ;;  %v10220_v32 = vpack.i.b16 %v8484_v42, %v8484_v42  ;;  %v10227_v20 = vpack.i.b16 %v8488_v56, %v8488_v56 }
 0x65a   : > { %13190 = vrot.lane.b32.xlu1 %v22250_v61, %s17605_s29  ;;  %v10155_v48 = vrot.slane %v10150_v4, %v25819_v51  ;;  %v10162_v27 = vrot.slane %v10157_v31, %v25819_v51  ;;  %v10190_v2 = vrot.slane %v10185_v34, %v25819_v51  ;;  %v22263_v46 = vsel %vm2259_vm7, %v12353_v11, %v12363_v3 }
 0x65b   : > { %26167 = vst [vmem:[#allocation67_spill] sm:$0xff] %v22263_v46  ;;  %v10183_v60 = vrot.slane %v10178_v53, %v25819_v51  ;;  %v10197_v23 = vrot.slane %v10192_v40, %v25819_v51  ;;  %v10204_v62 = vrot.slane %v10199_v0, %v25819_v51  ;;  %v22270_v22 = vsel %vm18272_vm9, 0, %v12356_v1 }
 0x65c   : > { %26168 = vst [vmem:[#allocation66_spill] sm:$0xff] %v22270_v22  ;;  %v10211_v16 = vrot.slane %v10206_v52, %v25819_v51  ;;  %v10218_v5 = vrot.slane %v10213_v6, %v25819_v51  ;;  %13102 = vrot.lane.b32.xlu0 %v22270_v22, %s17607_s16  ;;  %v12903_v14 = vrot.slane %v22147_v26, 1  ;;  %v12904_v42 = vrot.slane %v22138_v12, 1 }
 0x65d   : > { %v10225_v35 = vrot.slane %v10220_v32, %v25819_v51  ;;  %v10232_v54 = vrot.slane %v10227_v20, %v25819_v51  ;;  %v22285_v47 = vsel %vm18272_vm9, %v22099_v8, 0  ;;  %v12526_v56 = vshll.u32 %v22250_v61, 16 }
 0x65e   : > { %13192 = vrot.lane.b32.xlu1 %v22199_v19, %s17605_s29  ;;  %v12022_v63 = vcombine.low %v10183_v60, %v10190_v2  ;;  %v12848_v39 = vrot.slane %v22250_v61, 1  ;;  %v12849_v11 = vrot.slane %v22199_v19, 1  ;;  %v22293_v4 = vsel %vm18272_vm9, %v22156_v41, 0 }
 0x65f   : > { %v10169_v57 = vrot.slane %v10164_v58, %v25819_v51  ;;  %v10176_v33 = vrot.slane %v10171_v45, %v25819_v51  ;;  %v11973_v31 = vcombine.low %v22231_v29, %v10134_v49  ;;  %v11974_v8 = vcombine.low %v10141_v37, %v10148_v28 }
 0x660   : > { %13104 = vrot.lane.b32.xlu0 %v22263_v46, %s17607_s16  ;;  %v22301_v7 = vsel %vm1787_vm6, %v12903_v14, %v12904_v42  ;;  %v12906_v34 = vrot.slane %v22285_v47, 1  ;;  %v12531_v38 = vshll.u32 %v22199_v19, 16  ;;  %v11975_v53 = vcombine.low %v10155_v48, %v10162_v27 }
 0x661   : > { %26169 = vst [vmem:[#allocation71_spill] sm:$0xff] %v22301_v7  ;;  %v12528_v41 = vrot.slane %v12526_v56, 1  ;;  %v11976_v58 = vcombine.low %v10169_v57, %v10176_v33  ;;  %v11983_v45 = vrot.slane %v11973_v31, %v25817_v25  ;;  %v11990_v29 = vrot.slane %v11974_v8, %v25817_v25  ;;  %v26177_v31 = vld [vmem:[#allocation55_spill] sm:$0xff] }
 0x662   : > { %13062 = vrot.lane.b32.xlu1 %v22250_v61, %s17607_s16  ;;  %v22310_v49 = vsel %vm1787_vm6, %v12848_v39, %v12849_v11  ;;  %v22313_v40 = vsel %vm1787_vm6, %v12904_v42, %v12906_v34  ;;  %v12851_v0 = vrot.slane %v22293_v4, 1  ;;  %v12524_v1 = vshrl.u32 %v22250_v61, 16 }
 0x663   : > { %26170 = vst [vmem:[#allocation70_spill] sm:$0xff] %v22310_v49  ;;  %26171 = vst [vmem:[#allocation73_spill] sm:$0xff] %v22313_v40  ;;  %v11997_v52 = vrot.slane %v11975_v53, %v25817_v25  ;;  %v12004_v6 = vrot.slane %v11976_v58, %v25817_v25  ;;  %v12005_v3 = vcombine.low %v11983_v45, %v11990_v29  ;;  %v12533_v28 = vrot.slane %v12531_v38, 1  ;;  %v26178_v38 = vld [vmem:[#allocation59_spill] sm:$0xff] }
 0x664   : > { %v12023_v37 = vcombine.low %v10197_v23, %v10204_v62  ;;  %13170 = vrot.lane.b32.xlu0 %v22301_v7, %s17606_s27  ;;  %v12535_v32 = vshrl.u32 %v22199_v19, 16  ;;  %v12024_v20 = vcombine.low %v10211_v16, %v10218_v5  ;;  %v12025_v48 = vcombine.low %v10225_v35, %v10232_v54  ;;  %v26172_v62 = vld [vmem:[#allocation49_spill] sm:$0xff]  ;;  %v26174_v16 = vld [vmem:[#allocation54_spill] sm:$0xff]  ;;  %v26175_v5 = vld [vmem:[#allocation52_spill] sm:$0xff] }
 0x665   : > { %v12529_v27 = vor.u32 %v12528_v41, %v12524_v1  ;;  %v12006_v2 = vcombine.low %v11997_v52, %v12004_v6  ;;  %v12032_v60 = vrot.slane %v12022_v63, %v25817_v25  ;;  %v26173_v56 = vpack.i.b16 %v26172_v62, %v26172_v62  ;;  %v26176_v63 = vld [vmem:[#allocation57_spill] sm:$0xff]  ;;  %v26179_v41 = vld [vmem:[#allocation50_spill] sm:$0xff]  ;;  %v26180_v58 = vld [vmem:[#allocation51_spill] sm:$0xff] }
 0x666   : > { %13064 = vrot.lane.b32.xlu1 %v22199_v19, %s17607_s16  ;;  %v12039_v14 = vrot.slane %v12023_v37, %v25817_v25  ;;  %v12046_v42 = vrot.slane %v12024_v20, %v25817_v25  ;;  %v12053_v23 = vrot.slane %v12025_v48, %v25817_v25  ;;  %v10896_v35 = vcombine.low %v26175_v5, %v26174_v16  ;;  %v26183_v37 = vld [vmem:[#allocation53_spill] sm:$0xff] }
 0x667   : > { %v8944_v39 = vrot.slane %v26173_v56, %v25819_v51  ;;  %v12013_v54 = vrot.slane %v12005_v3, %v25817_v25  ;;  %v12020_v57 = vrot.slane %v12006_v2, %v25817_v25  ;;  %v10897_v8 = vcombine.low %v26177_v31, %v26176_v63  ;;  %v26182_v3 = vld [vmem:[#allocation58_spill] sm:$0xff]  ;;  %v26185_v2 = vld [vmem:[#allocation60_spill] sm:$0xff] }
 0x668   : > { %v12054_v33 = vcombine.low %v12032_v60, %v12039_v14  ;;  %13172 = vrot.lane.b32.xlu0 %v22313_v40, %s17606_s27  ;;  %v12055_v34 = vcombine.low %v12046_v42, %v12053_v23  ;;  %v26181_v45 = vcombine.low %v26179_v41, %v26180_v58  ;;  %v10912_v1 = vrot.slane %v10896_v35, %v25817_v25  ;;  %v26186_v60 = vld [vmem:[#allocation56_spill] sm:$0xff] }
 0x669   : > { %v10898_v53 = vcombine.low %v26178_v38, %v8944_v39  ;;  %v22348_v52 = vcombine.low %v12013_v54, %v12020_v57  ;;  %v26184_v20 = vcombine.low %v26182_v3, %v26183_v37  ;;  %v26187_v14 = vcombine.low %v26185_v2, %v26186_v60  ;;  %v26192_v37 = vld [vmem:[#allocation149_spill] sm:$0xff] }
 0x66a   : > { %v10905_v29 = vrot.slane %v26181_v45, %v25817_v25  ;;  %13126 = vrot.lane.b32.xlu1 %v22310_v49, %s17606_s27  ;;  %v12062_v6 = vrot.slane %v12054_v33, %v25817_v25  ;;  %v12069_v23 = vrot.slane %v12055_v34, %v25817_v25  ;;  %v10919_v62 = vrot.slane %v10897_v8, %v25817_v25 }
 0x66b   : > { %v10984_v48 = vrot.slane %v26184_v20, %v25817_v25  ;;  %v10991_v42 = vrot.slane %v26187_v14, %v25817_v25  ;;  %v10926_v56 = vrot.slane %v10898_v53, %v25817_v25  ;;  %v22363_v16 = vsel %vm1787_vm6, %v12849_v11, %v12851_v0  ;;  %v26194_v14 = vld [vmem:[#allocation27_spill] sm:$0xff] }
 0x66c   : > { %v10927_v39 = vcombine.low %v10905_v29, %v10912_v1  ;;  %26188 = vst [vmem:[#allocation72_spill] sm:$0xff] %v22363_v16  ;;  %v12539_v5 = vshll.u32 %v22293_v4, 16  ;;  %v12104_v54 = vcombine.low %v21883_v10, %v21891_v44  ;;  %13042 = vrot.lane.b32.xlu0 %v22301_v7, %s17605_s29  ;;  %v12537_v57 = vor.u32 %v12535_v32, %v12533_v28 }
 0x66d   : > { %v10992_v35 = vcombine.low %v10984_v48, %v10991_v42  ;;  %v12746_v33 = vshll.u32 %v22147_v26, 16  ;;  %v12070_v63 = vcombine.low %v12062_v6, %v12069_v23  ;;  %v10928_v31 = vcombine.low %v10919_v62, %v10926_v56 }
 0x66e   : > { %13128 = vrot.lane.b32.xlu1 %v22363_v16, %s17606_s27  ;;  %v22374_v11 = vsel %vm4988_vm0, %v12529_v27, %v12533_v28  ;;  %v12898_v4 = vrot.slane %v22270_v22, 1  ;;  %v12381_v0 = vshrl.u32 %v22348_v52, 16  ;;  %v12899_v10 = vrot.slane %v22263_v46, 1 }
 0x66f   : > { %26189 = vst [vmem:[#allocation75_spill] sm:$0xff] %v22374_v11  ;;  %v12223_v8 = vshrl.u32 %v10992_v35, 16  ;;  %v12388_v44 = vshrl.u32 %v12070_v63, 16  ;;  %v10935_v32 = vrot.slane %v10927_v39, %v25817_v25  ;;  %v10942_v34 = vrot.slane %v10928_v31, %v25817_v25 }
 0x670   : > { %v12226_v53 = vshll.u32 %v10992_v35, 16  ;;  %v12118_v41 = vrot.slane %v12104_v54, %v25817_v25  ;;  %v26190_v28 = vcombine.low %v21894_v17, %v21872_v30  ;;  %13044 = vrot.lane.b32.xlu0 %v22313_v40, %s17605_s29  ;;  %v12391_v45 = vshll.u32 %v12070_v63, 16  ;;  %v26198_v35 = vld [vmem:[#allocation29_spill] sm:$0xff] }
 0x671   : > { %v22381_v38 = vrot.slane %v12223_v8, 7  ;;  %v22390_v58 = vrot.slane %v12388_v44, 7  ;;  %v22392_v29 = vcombine.low %v10935_v32, %v10942_v34  ;;  %v26191_v1 = vcombine.low %v21886_v55, %v21863_v13 }
 0x672   : > { %v12167_v27 = vrot.slane %v26190_v28, %v25817_v25  ;;  %13258 = vrot.lane.b32.xlu1 %v22374_v11, %s17607_s16  ;;  %v12541_v3 = vrot.slane %v12539_v5, 1  ;;  %v22403_v30 = vsel %vm18272_vm9, %v22246_v24, 0  ;;  %v22405_v17 = vrot.slane %v12381_v0, 7 }
 0x673   : > { %v12160_v6 = vrot.slane %v26191_v1, %v25817_v25  ;;  %v26193_v20 = vcombine.low %v21869_v36, %v26192_v37  ;;  %v12393_v2 = vor.u32 %v12391_v45, %v22390_v58  ;;  %v12216_v13 = vshrl.u32 %v22392_v29, 16 }
 0x674   : > { %v12228_v55 = vor.u32 %v12226_v53, %v22381_v38  ;;  %v22416_v42 = vcombine.high %v26194_v14, %v26194_v14  ;;  %v22419_v24 = vsel %vm1787_vm6, %v12898_v4, %v12899_v10  ;;  %v12748_v23 = vrot.slane %v12746_v33, 1  ;;  %v26199_v33 = vld [vmem:[#allocation35_spill] sm:$0xff]  ;;  %v26200_v4 = vld [vmem:[#allocation28_spill] sm:$0xff] }
 0x675   : > { %v12111_v48 = vrot.slane %v26193_v20, %v25817_v25  ;;  %v12168_v60 = vcombine.low %v12160_v6, %v12167_v27  ;;  %26195 = vst [vmem:[#allocation74_spill] sm:$0xff] %v22419_v24  ;;  %v12751_v62 = vshll.u32 %v22138_v12, 16  ;;  %v22423_v36 = vsel %vm4988_vm0, %v12537_v57, %v12541_v3  ;;  %13166 = vrot.lane.b32.xlu0 %v22419_v24, %s17606_s27  ;;  %v26203_v27 = vld [vmem:[#allocation26_spill] sm:$0xff] }
 0x676   : > { %26196 = vst [vmem:[#allocation68_spill] sm:$0xff] %v22423_v36  ;;  %v22429_v56 = vsel %vm2259_vm7, %v22405_v17, %v12393_v2  ;;  %v12218_v39 = vrot.slane %v12216_v13, 7  ;;  %v22435_v54 = vcombine.high %v26198_v35, %v26198_v35  ;;  %v7178_v63 = vunpack.i.h.s16 %v26199_v33  ;;  %13260 = vrot.lane.b32.xlu1 %v22423_v36, %s17607_s16 }
 0x677   : > { %26197 = vst [vmem:[#allocation69_spill] sm:$0xff] %v22429_v56  ;;  %v22431_v5 = vcombine.low %v12111_v48, %v12118_v41  ;;  %v12901_v57 = vrot.slane %v22403_v30, 1  ;;  %v12744_v31 = vshrl.u32 %v22147_v26, 16  ;;  %v22444_v0 = vcombine.high %v26200_v4, %v26200_v4 }
 0x678   : > { %v7180_v8 = vunpack.i.h.s16 %v26194_v14  ;;  %v22448_v44 = vsel %vm2259_vm7, %v12218_v39, %v12228_v55  ;;  %v12403_v32 = vshrl.u32 %v12168_v60, 16  ;;  %v12753_v41 = vrot.slane %v12751_v62, 1  ;;  %v22469_v55 = vpop.permute.xlu0 %12918 }
 0x679   : > { %26201 = vst [vmem:[#allocation30_spill] sm:$0xff] %v22448_v44  ;;  %v22451_v34 = vsel %vm1787_vm6, %v12899_v10, %v12901_v57  ;;  %v12749_v53 = vor.u32 %v12748_v23, %v12744_v31  ;;  %v12726_v28 = vshll.u32 %v22270_v22, 16  ;;  %v7182_v45 = vunpack.i.h.s16 %v26203_v27 }
 0x67a   : > { %26202 = vst [vmem:[#allocation9_spill] sm:$0xff] %v22451_v34  ;;  %v7184_v1 = vunpack.i.h.s16 %v22416_v42  ;;  %v7186_v6 = vunpack.i.h.s16 %v26198_v35  ;;  %13168 = vrot.lane.b32.xlu0 %v22451_v34, %s17606_s27  ;;  %v12396_v3 = vshrl.u32 %v22431_v5, 16  ;;  %v7188_v37 = vunpack.i.h.s16 %v26200_v4  ;;  %13038 = vrot.lane.b32.xlu1 %v22419_v24, %s17605_s29 }
 0x67b   : > { %v12755_v10 = vshrl.u32 %v22138_v12, 16  ;;  %v12759_v20 = vshll.u32 %v22285_v47, 16  ;;  %v12731_v48 = vshll.u32 %v22263_v46, 16  ;;  %v22471_v23 = vrot.slane %v12403_v32, 7  ;;  %v26214_v12 = vld [vmem:[#allocation92_spill] sm:$0xff] }
 0x67c   : > { %v12406_v62 = vshll.u32 %v12168_v60, 16  ;;  %v22473_v57 = vpack.i.b16 %v7178_v63, %v7178_v63  ;;  %v22476_v31 = vsel %vm4988_vm0, %v12749_v53, %v12753_v41  ;;  %v12728_v7 = vrot.slane %v12726_v28, 1 }
 0x67d   : > { %26204 = vst [vmem:[#allocation17_spill] sm:$0xff] %v22476_v31  ;;  %v12757_v40 = vor.u32 %v12755_v10, %v12753_v41  ;;  %v22480_v24 = vpack.i.b16 %v7180_v8, %v7180_v8  ;;  %v22484_v13 = vrot.slane %v12396_v3, 7  ;;  %v12761_v63 = vrot.slane %v12759_v20, 1  ;;  %v26209_v8 = vld [vmem:[#allocation89_spill] sm:$0xff] }
 0x67e   : > { %12974 = vrot.lane.b32.xlu0 %v22476_v31, %s17606_s27  ;;  %v12408_v32 = vor.u32 %v12406_v62, %v22471_v23  ;;  %13040 = vrot.lane.b32.xlu1 %v22451_v34, %s17605_s29  ;;  %v12724_v53 = vshrl.u32 %v22270_v22, 16  ;;  %v12733_v41 = vrot.slane %v12731_v48, 1  ;;  %v22492_v28 = vpack.i.b16 %v7182_v45, %v7182_v45  ;;  %v17327_v62 = vld [vmem:[%s25563_s10 + $0x88] sm:$0xff]   ;;  %v26243_v22 = vld [vmem:[#allocation84_spill] sm:$0xff] }
 0x67f   : > { %v12219_v3 = vshll.u32 %v22392_v29, 16  ;;  %v22505_v20 = vsel %vm4988_vm0, %v12757_v40, %v12761_v63  ;;  %v12735_v45 = vshrl.u32 %v22263_v46, 16  ;;  %v12739_v48 = vshll.u32 %v22403_v30, 16  ;;  %17021 = vmatprep.subr.bf16.mxu1 %v17327_v62  ;;  %v26207_v63 = vld [vmem:[#allocation88_spill] sm:$0xff]  ;;  %v26212_v62 = vld [vmem:[#allocation90_spill] sm:$0xff] }
 0x680   : > { %v22499_v10 = vsel %vm2259_vm7, %v22484_v13, %v12408_v32  ;;  %26206 = vst [vmem:[#allocation16_spill] sm:$0xff] %v22505_v20  ;;  %v12729_v60 = vor.u32 %v12728_v7, %v12724_v53  ;;  %v22510_v47 = vpack.i.b16 %v7184_v1, %v7184_v1  ;;  %v22516_v32 = vpop.permute.xlu0 %17199  ;;  %v22518_v40 = vpack.i.b16 %v7186_v6, %v7186_v6  ;;  %v26213_v7 = vld [vmem:[#allocation95_spill] sm:$0xff] }
 0x681   : > { %26205 = vst [vmem:[#allocation20_spill] sm:$0xff] %v22499_v10  ;;  %v12221_v2 = vor.u32 %v12219_v3, %v12218_v39  ;;  %v12384_v30 = vshll.u32 %v22348_v52, 16  ;;  %v12737_v1 = vor.u32 %v12735_v45, %v12733_v41  ;;  %v26208_v53 = vpack.i.b16 %v26207_v63, %v26207_v63  ;;  %v26211_v3 = vld [vmem:[#allocation91_spill] sm:$0xff] }
 0x682   : > { %12976 = vrot.lane.b32.xlu0 %v22505_v20, %s17606_s27  ;;  %13302 = vrot.lane.b32.xlu1 %v22476_v31, %s17607_s16  ;;  %v26210_v39 = vpack.i.b16 %v26209_v8, %v26209_v8  ;;  %v10993_v34 = vcombine.low %v26212_v62, %v26211_v3  ;;  %v10994_v19 = vcombine.low %v26214_v12, %v26213_v7  ;;  %v12741_v63 = vrot.slane %v12739_v48, 1  ;;  %v26218_v12 = vld [vmem:[#allocation98_spill] sm:$0xff]  ;;  %v26219_v48 = vld [vmem:[#allocation96_spill] sm:$0xff]  ;;  %v26220_v3 = vld [vmem:[#allocation93_spill] sm:$0xff] }
 0x683   : > { %v9049_v29 = vrot.slane %v26208_v53, %v25819_v51  ;;  %v22537_v26 = vpack.i.b16 %v7188_v37, %v7188_v37  ;;  %v22542_v45 = vsel %vm4988_vm0, %v12729_v60, %v12733_v41  ;;  %v12386_v8 = vor.u32 %v12384_v30, %v22405_v17  ;;  %v26222_v30 = vld [vmem:[#allocation97_spill] sm:$0xff]  ;;  %v26242_v31 = vld [vmem:[#allocation87_spill] sm:$0xff] }
 0x684   : > { %v9056_v6 = vrot.slane %v26210_v39, %v25819_v51  ;;  %26215 = vst [vmem:[#allocation48_spill] sm:$0xff] %v22542_v45  ;;  %v22549_v53 = vsel %vm18272_vm9, 0, %v12221_v2  ;;  %v26217_v39 = vld [vmem:[#allocation99_spill] sm:$0xff]  ;;  %v11003_v60 = vrot.slane %v10993_v34, %v25817_v25  ;;  %v11010_v41 = vrot.slane %v10994_v19, %v25817_v25  ;;  %v26223_v2 = vld [vmem:[#allocation94_spill] sm:$0xff]  ;;  %v22565_v61 = vpop.permute.xlu0 %12920 }
 0x685   : > { %26216 = vst [vmem:[#allocation45_spill] sm:$0xff] %v22549_v53  ;;  %v10995_v37 = vcombine.low %v26218_v12, %v26217_v39  ;;  %v26221_v62 = vcombine.low %v26219_v48, %v26220_v3  ;;  %v26224_v52 = vcombine.low %v26222_v30, %v26223_v2  ;;  %26225 = vst [vmem:[#allocation46_spill] sm:$0xff] %v22565_v61  ;;  %v26227_v48 = vld [vmem:[#allocation76_spill] sm:$0xff] }
 0x686   : > { %12998 = vrot.lane.b32.xlu0 %v22310_v49, %s17605_s29  ;;  %v10996_v7 = vcombine.low %v9049_v29, %v9056_v6  ;;  %13304 = vrot.lane.b32.xlu1 %v22505_v20, %s17607_s16  ;;  %v22568_v29 = vsel %vm4988_vm0, %v12737_v1, %v12741_v63  ;;  %v12399_v6 = vshll.u32 %v22431_v5, 16  ;;  %v11025_v39 = vcombine.low %v11003_v60, %v11010_v41  ;;  %v26229_v30 = vld [vmem:[#allocation80_spill] sm:$0xff]  ;;  %v22590_v60 = vpop.permute.xlu1 %13186  ;;  %v26240_v20 = vld [vmem:[#allocation82_spill] sm:$0xff] }
 0x687   : > { %v11082_v17 = vrot.slane %v26221_v62, %v25817_v25  ;;  %v11089_v49 = vrot.slane %v26224_v52, %v25817_v25  ;;  %26226 = vst [vmem:[#allocation43_spill] sm:$0xff] %v22568_v29  ;;  %v11017_v34 = vrot.slane %v10995_v37, %v25817_v25  ;;  %v26228_v3 = vpack.i.b16 %v26227_v48, %v26227_v48  ;;  %v26230_v52 = vld [vmem:[#allocation79_spill] sm:$0xff] }
 0x688   : > { %v11024_v19 = vrot.slane %v10996_v7, %v25817_v25  ;;  %v11092_v2 = vcombine.low %v26230_v52, %v26229_v30  ;;  %v22583_v5 = vsel %vm18272_vm9, 0, %v12386_v8  ;;  %v12546_v1 = vshll.u32 %v22549_v53, 16  ;;  %v26232_v37 = vld [vmem:[#allocation83_spill] sm:$0xff]  ;;  %26234 = vst [vmem:[#allocation37_spill] sm:$0xff] %v22590_v60  ;;  %v26237_v30 = vld [vmem:[#allocation78_spill] sm:$0xff] }
 0x689   : > { %v11090_v12 = vcombine.low %v11082_v17, %v11089_v49  ;;  %v9168_v62 = vrot.slane %v26228_v3, %v25819_v51  ;;  %26231 = vst [vmem:[#allocation44_spill] sm:$0xff] %v22583_v5  ;;  %v26233_v49 = vld [vmem:[#allocation81_spill] sm:$0xff]  ;;  %v26289_v60 = vld [vmem:[#allocation106_spill] sm:$0xff] }
 0x68a   : > { %13000 = vrot.lane.b32.xlu0 %v22363_v16, %s17605_s29  ;;  %v11026_v63 = vcombine.low %v11017_v34, %v11024_v19  ;;  %v11093_v7 = vcombine.low %v26233_v49, %v26232_v37  ;;  %12970 = vrot.lane.b32.xlu1 %v22542_v45, %s17606_s27  ;;  %v26235_v17 = vld [vmem:[#allocation85_spill] sm:$0xff]  ;;  %v26239_v16 = vld [vmem:[#allocation86_spill] sm:$0xff]  ;;  %v11033_v37 = vrot.slane %v11025_v39, %v25817_v25 }
 0x68b   : > { %v12238_v41 = vshrl.u32 %v11090_v12, 16  ;;  %v11094_v48 = vcombine.low %v26235_v17, %v9168_v62  ;;  %v26236_v3 = vld [vmem:[#allocation77_spill] sm:$0xff]  ;;  %v26241_v34 = vcombine.low %v26239_v16, %v26240_v20  ;;  %v11108_v46 = vrot.slane %v11092_v2, %v25817_v25  ;;  %v22614_v16 = vpop.permute.xlu0 %13054 }
 0x68c   : > { %v26238_v52 = vcombine.low %v26236_v3, %v26237_v30  ;;  %v11040_v49 = vrot.slane %v11026_v63, %v25817_v25  ;;  %v26244_v62 = vcombine.low %v26242_v31, %v26243_v22  ;;  %v12241_v3 = vshll.u32 %v11090_v12, 16  ;;  %v26246_v63 = vld [vmem:[#allocation112_spill] sm:$0xff] }
 0x68d   : > { %v11180_v19 = vrot.slane %v26241_v34, %v25817_v25  ;;  %v22608_v45 = vrot.slane %v12238_v41, 7  ;;  %v11115_v30 = vrot.slane %v11093_v7, %v25817_v25  ;;  %v26247_v22 = vpack.i.b16 %v26246_v63, %v26246_v63 }
 0x68e   : > { %v11101_v8 = vrot.slane %v26238_v52, %v25817_v25  ;;  %v11187_v17 = vrot.slane %v26244_v62, %v25817_v25  ;;  %v11122_v52 = vrot.slane %v11094_v48, %v25817_v25  ;;  %13110 = vrot.lane.b32.xlu0 %v22583_v5, %s17607_s16  ;;  %v22616_v20 = vcombine.low %v11033_v37, %v11040_v49  ;;  %v22638_v62 = vpop.permute.xlu1 %13188 }
 0x68f   : > { %26245 = vst [vmem:[#allocation40_spill] sm:$0xff] %v22608_v45  ;;  %v9280_v31 = vrot.slane %v26247_v22, %v25819_v51  ;;  %12930 = vrot.lane.b32.xlu1 %v22374_v11, %s17606_s27  ;;  %v12908_v12 = vrot.slane %v22583_v5, 1  ;;  %v22628_v7 = vsel %vm18272_vm9, %v22390_v58, 0  ;;  %v12766_v41 = vshll.u32 %v22583_v5, 16  ;;  %26250 = vst [vmem:[#allocation148_spill] sm:$0xff] %v22638_v62  ;;  %v26251_v22 = vld [vmem:[#allocation116_spill] sm:$0xff]  ;;  %v22658_v59 = vpop.permute.xlu0 %13122 }
 0x690   : > { %v11123_v39 = vcombine.low %v11101_v8, %v11108_v46  ;;  %v11188_v2 = vcombine.low %v11180_v19, %v11187_v17  ;;  %v11124_v48 = vcombine.low %v11115_v30, %v11122_v52  ;;  %v12909_v46 = vrot.slane %v22429_v56, 1  ;;  %v26248_v19 = vld [vmem:[#allocation111_spill] sm:$0xff]  ;;  %26257 = vst [vmem:[#allocation42_spill] sm:$0xff] %v22658_v59 }
 0x691   : > { %v12231_v8 = vshrl.u32 %v22616_v20, 16  ;;  %v12243_v34 = vor.u32 %v12241_v3, %v22608_v45  ;;  %v26249_v37 = vpack.i.b16 %v26248_v19, %v26248_v19  ;;  %v26252_v30 = vld [vmem:[#allocation115_spill] sm:$0xff]  ;;  %v12548_v11 = vrot.slane %v12546_v1, 1 }
 0x692   : > { %v11131_v17 = vrot.slane %v11123_v39, %v25817_v25  ;;  %v11138_v58 = vrot.slane %v11124_v48, %v25817_v25  ;;  %v12253_v63 = vshrl.u32 %v11188_v2, 16  ;;  %v11190_v52 = vcombine.low %v26252_v30, %v26251_v22  ;;  %13112 = vrot.lane.b32.xlu0 %v22429_v56, %s17607_s16  ;;  %v26256_v22 = vld [vmem:[#allocation113_spill] sm:$0xff] }
 0x693   : > { %v9273_v49 = vrot.slane %v26249_v37, %v25819_v51  ;;  %v12401_v3 = vor.u32 %v12399_v6, %v22484_v13  ;;  %v22647_v50 = vrot.slane %v12231_v8, 7  ;;  %12972 = vrot.lane.b32.xlu1 %v22568_v29, %s17606_s27  ;;  %v12551_v39 = vshll.u32 %v22448_v44, 16  ;;  %v26260_v8 = vld [vmem:[#allocation118_spill] sm:$0xff] }
 0x694   : > { %v22652_v37 = vcombine.low %v11131_v17, %v11138_v58  ;;  %v22654_v48 = vrot.slane %v12253_v63, 7  ;;  %v11189_v30 = vcombine.low %v26256_v22, %v26255_v43  ;;  %v12544_v1 = vshrl.u32 %v22549_v53, 16 }
 0x695   : > { %v11192_v19 = vcombine.low %v9273_v49, %v9280_v31  ;;  %v22663_v13 = vsel %vm2259_vm7, %v22647_v50, %v12243_v34  ;;  %v12256_v6 = vshll.u32 %v11188_v2, 16  ;;  %v26259_v31 = vld [vmem:[#allocation119_spill] sm:$0xff]  ;;  %v26261_v17 = vunpack.i.h.s16 %v22435_v54 }
 0x696   : > { %26253 = vst [vmem:[#allocation147_spill] sm:$0xff] %v22652_v37  ;;  %26254 = vst [vmem:[#allocation41_spill] sm:$0xff] %v22654_v48  ;;  %v11191_v49 = vcombine.low %v26260_v8, %v26259_v31  ;;  %v22673_v63 = vsel %vm1787_vm6, %v12908_v12, %v12909_v46  ;;  %v12246_v43 = vshrl.u32 %v22652_v37, 16  ;;  %v11206_v22 = vrot.slane %v11190_v52, %v25817_v25 }
 0x697   : > { %26258 = vst [vmem:[#allocation49_spill] sm:$0xff] %v22663_v13  ;;  %v22670_v58 = vpack.i.b16 %v26261_v17, %v26261_v17  ;;  %26262 = vst [vmem:[#allocation54_spill] sm:$0xff] %v22673_v63  ;;  %13174 = vrot.lane.b32.xlu0 %v22673_v63, %s17606_s27  ;;  %v12549_v34 = vor.u32 %v12548_v11, %v12544_v1  ;;  %v22681_v2 = vsel %vm18272_vm9, 0, %v12401_v3  ;;  %13194 = vrot.lane.b32.xlu1 %v22549_v53, %s17605_s29  ;;  %v22689_v17 = vpop.permute.xlu1 %13058  ;;  %v26292_v13 = vld [vmem:[#allocation101_spill] sm:$0xff] }
 0x698   : > { %26263 = vst [vmem:[#allocation52_spill] sm:$0xff] %v22681_v2  ;;  %v12258_v31 = vor.u32 %v12256_v6, %v22654_v48  ;;  %v11220_v8 = vrot.slane %v11192_v19, %v25817_v25  ;;  %26264 = vst [vmem:[#allocation57_spill] sm:$0xff] %v22689_v17  ;;  %v12911_v52 = vrot.slane %v22628_v7, 1  ;;  %v22695_v11 = vsel %vm18272_vm9, %v22381_v38, 0  ;;  %v22709_v38 = vpop.permute.xlu0 %13124 }
 0x699   : > { %v11199_v3 = vrot.slane %v11189_v30, %v25817_v25  ;;  %v12553_v1 = vrot.slane %v12551_v39, 1  ;;  %v12768_v6 = vrot.slane %v12766_v41, 1  ;;  %v22698_v19 = vrot.slane %v12246_v43, 7  ;;  %26268 = vst [vmem:[#allocation51_spill] sm:$0xff] %v22709_v38 }
 0x69a   : > { %v11213_v12 = vrot.slane %v11191_v49, %v25817_v25  ;;  %v22702_v29 = vsel %vm1787_vm6, %v12909_v46, %v12911_v52  ;;  %v12764_v48 = vshrl.u32 %v22583_v5, 16  ;;  %v12786_v17 = vshll.u32 %v22681_v2, 16 }
 0x69b   : > { %26265 = vst [vmem:[#allocation55_spill] sm:$0xff] %v22698_v19  ;;  %26266 = vst [vmem:[#allocation59_spill] sm:$0xff] %v22702_v29  ;;  %v11221_v37 = vcombine.low %v11199_v3, %v11206_v22  ;;  %v22707_v59 = vsel %vm4988_vm0, %v12549_v34, %v12553_v1  ;;  %13176 = vrot.lane.b32.xlu0 %v22702_v29, %s17606_s27  ;;  %v12771_v41 = vshll.u32 %v22429_v56, 16  ;;  %v26270_v30 = vunpack.i.h.s16 %v22444_v0 }
 0x69c   : > { %26267 = vst [vmem:[#allocation50_spill] sm:$0xff] %v22707_v59  ;;  %v22716_v39 = vsel %vm2259_vm7, %v22698_v19, %v12258_v31  ;;  %v11222_v46 = vcombine.low %v11213_v12, %v11220_v8  ;;  %v26271_v43 = vpack.i.b16 %v26199_v33, %v26199_v33  ;;  %v22731_v34 = vrot.slane %v22473_v57, %v25819_v51  ;;  %v22786_v18 = vpop.permute.xlu0 %12994 }
 0x69d   : > { %26269 = vst [vmem:[#allocation58_spill] sm:$0xff] %v22716_v39  ;;  %v22721_v49 = vpack.i.b16 %v26270_v30, %v26270_v30  ;;  %v26272_v31 = vpack.i.b16 %v26194_v14, %v26194_v14  ;;  %13262 = vrot.lane.b32.xlu1 %v22707_v59, %s17607_s16  ;;  %v22743_v12 = vrot.slane %v22480_v24, %v25819_v51  ;;  %v12559_v52 = vshll.u32 %v22695_v11, 16 }
 0x69e   : > { %v22727_v22 = vrot.slane %v26271_v43, %v25819_v51  ;;  %v12769_v33 = vor.u32 %v12768_v6, %v12764_v48  ;;  %v11236_v3 = vrot.slane %v11222_v46, %v25817_v25  ;;  %v26273_v57 = vpack.i.b16 %v26203_v27, %v26203_v27  ;;  %v22757_v43 = vpop.permute.xlu1 %13060  ;;  %26285 = vst [vmem:[#allocation56_spill] sm:$0xff] %v22786_v18  ;;  %v26291_v18 = vld [vmem:[#allocation100_spill] sm:$0xff] }
 0x69f   : > { %v22737_v8 = vrot.slane %v26272_v31, %v25819_v51  ;;  %v22755_v14 = vrot.slane %v22492_v28, %v25819_v51  ;;  %26274 = vst [vmem:[#allocation53_spill] sm:$0xff] %v22757_v43  ;;  %v12788_v31 = vrot.slane %v12786_v17, 1  ;;  %v11229_v24 = vrot.slane %v11221_v37, %v25817_v25  ;;  %13046 = vrot.lane.b32.xlu0 %v22673_v63, %s17605_s29  ;;  %v26277_v37 = vld [vmem:[#allocation121_spill] sm:$0xff]  ;;  %v26281_v43 = vld [vmem:[#allocation120_spill] sm:$0xff] }
 0x6a0   : > { %v22751_v30 = vrot.slane %v26273_v57, %v25819_v51  ;;  %v26275_v48 = vpack.i.b16 %v22416_v42, %v22416_v42  ;;  %v12773_v27 = vrot.slane %v12771_v41, 1  ;;  %v12784_v46 = vshrl.u32 %v22681_v2, 16  ;;  %v26278_v57 = vld [vmem:[#allocation117_spill] sm:$0xff]  ;;  %v26283_v41 = vld [vmem:[#allocation15_spill] sm:$0xff] }
 0x6a1   : > { %v12791_v28 = vshll.u32 %v22499_v10, 16  ;;  %12932 = vrot.lane.b32.xlu1 %v22423_v36, %s17606_s27  ;;  %v22772_v17 = vcombine.low %v11229_v24, %v11236_v3  ;;  %v26279_v39 = vcombine.low %v26277_v37, %v26278_v57  ;;  %v26284_v38 = vpack.i.b16 %v26283_v41, %v26283_v41  ;;  %v26286_v37 = vld [vmem:[#allocation103_spill] sm:$0xff]  ;;  %v26290_v41 = vld [vmem:[#allocation110_spill] sm:$0xff] }
 0x6a2   : > { %v22764_v6 = vrot.slane %v26275_v48, %v25819_v51  ;;  %v26280_v48 = vld [vmem:[#allocation122_spill] sm:$0xff]  ;;  %v22789_v3 = vsel %vm4988_vm0, %v12769_v33, %v12773_v27  ;;  %v12555_v24 = vshrl.u32 %v22448_v44, 16  ;;  %v12561_v36 = vrot.slane %v12559_v52, 1 }
 0x6a3   : > { %26276 = vst [vmem:[#allocation60_spill] sm:$0xff] %v22772_v17  ;;  %v11278_v42 = vrot.slane %v26279_v39, %v25817_v25  ;;  %v26282_v19 = vcombine.low %v26280_v48, %v26281_v43  ;;  %v9392_v62 = vrot.slane %v26284_v38, %v25819_v51  ;;  %v26287_v39 = vld [vmem:[#allocation102_spill] sm:$0xff]  ;;  %v12789_v45 = vor.u32 %v12788_v31, %v12784_v46  ;;  %v26288_v48 = vld [vmem:[#allocation107_spill] sm:$0xff] }
 0x6a4   : > { %v11288_v57 = vcombine.low %v26287_v39, %v26286_v37  ;;  %v12775_v43 = vshrl.u32 %v22429_v56, 16  ;;  %v11289_v61 = vcombine.low %v26289_v60, %v26288_v48  ;;  %13306 = vrot.lane.b32.xlu0 %v22789_v3, %s17607_s16  ;;  %v12557_v38 = vor.u32 %v12555_v24, %v12553_v1  ;;  %v26295_v48 = vld [vmem:[#allocation109_spill] sm:$0xff] }
 0x6a5   : > { %v11285_v63 = vrot.slane %v26282_v19, %v25817_v25  ;;  %v11290_v33 = vcombine.low %v26290_v41, %v9392_v62  ;;  %v26293_v52 = vcombine.low %v26291_v18, %v26292_v13  ;;  %13196 = vrot.lane.b32.xlu1 %v22448_v44, %s17605_s29  ;;  %v12793_v31 = vrot.slane %v12791_v28, 1  ;;  %v26296_v28 = vld [vmem:[#allocation105_spill] sm:$0xff] }
 0x6a6   : > { %v11304_v37 = vrot.slane %v11288_v57, %v25817_v25  ;;  %v12779_v60 = vshll.u32 %v22628_v7, 16  ;;  %v12261_v46 = vshrl.u32 %v22772_v17, 16  ;;  %v11311_v62 = vrot.slane %v11289_v61, %v25817_v25 }
 0x6a7   : > { %v11286_v19 = vcombine.low %v11278_v42, %v11285_v63  ;;  %v11297_v59 = vrot.slane %v26293_v52, %v25817_v25  ;;  %v22807_v63 = vpop.permute.xlu1 %13182  ;;  %v12777_v42 = vor.u32 %v12775_v43, %v12773_v27  ;;  %v11318_v24 = vrot.slane %v11290_v33, %v25817_v25  ;;  %v22826_v27 = vpop.permute.xlu0 %12996  ;;  %v26300_v43 = vld [vmem:[#allocation104_spill] sm:$0xff] }
 0x6a8   : > { %v22814_v13 = vsel %vm4988_vm0, %v12789_v45, %v12793_v31  ;;  %v26297_v41 = vcombine.low %v26295_v48, %v26296_v28  ;;  %v22824_v52 = vrot.slane %v22510_v47, %v25819_v51  ;;  %26298 = vst [vmem:[#allocation27_spill] sm:$0xff] %v22826_v27  ;;  %v22829_v61 = vsel %vm4988_vm0, %v12557_v38, %v12561_v36  ;;  %v26299_v45 = vld [vmem:[#allocation108_spill] sm:$0xff] }
 0x6a9   : > { %v12268_v1 = vshrl.u32 %v11286_v19, 16  ;;  %v11319_v18 = vcombine.low %v11297_v59, %v11304_v37  ;;  %v12271_v57 = vshll.u32 %v11286_v19, 16  ;;  %13310 = vrot.lane.b32.xlu0 %v22814_v13, %s17607_s16  ;;  %v11320_v59 = vcombine.low %v11311_v62, %v11318_v24  ;;  %13264 = vrot.lane.b32.xlu1 %v22829_v61, %s17607_s16 }
 0x6aa   : > { %v11383_v7 = vrot.slane %v26297_v41, %v25817_v25  ;;  %v26301_v19 = vcombine.low %v26299_v45, %v26300_v43  ;;  %v12781_v37 = vrot.slane %v12779_v60, 1  ;;  %v22842_v47 = vsel %vm18272_vm9, %v22471_v23, 0 }
 0x6ab   : > { %v22816_v39 = vrot.slane %v12268_v1, 7  ;;  %v22844_v36 = vrot.slane %v12261_v46, 7  ;;  %v26303_v1 = vpack.i.b16 %v26198_v35, %v26198_v35  ;;  %v11327_v24 = vrot.slane %v11319_v18, %v25817_v25  ;;  %v22859_v23 = vpop.permute.xlu1 %13184  ;;  %v26305_v35 = vld [vmem:[#allocation136_spill] sm:$0xff] }
 0x6ac   : > { %v11376_v33 = vrot.slane %v26301_v19, %v25817_v25  ;;  %v11334_v48 = vrot.slane %v11320_v59, %v25817_v25  ;;  %v22857_v28 = vrot.slane %v22518_v40, %v25819_v51  ;;  %v22862_v46 = vsel %vm4988_vm0, %v12777_v42, %v12781_v37 }
 0x6ad   : > { %26294 = vst [vmem:[#allocation149_spill] sm:$0xff] %v22816_v39  ;;  %26302 = vst [vmem:[#allocation29_spill] sm:$0xff] %v22844_v36  ;;  %v12273_v38 = vor.u32 %v12271_v57, %v22816_v39  ;;  %v22851_v62 = vrot.slane %v26303_v1, %v25819_v51  ;;  %v26306_v18 = vpack.i.b16 %v26305_v35, %v26305_v35  ;;  %13308 = vrot.lane.b32.xlu0 %v22862_v46, %s17607_s16  ;;  %v26312_v1 = vld [vmem:[#allocation11_spill] sm:$0xff]  ;;  %v26316_v39 = vld [vmem:[#allocation137_spill] sm:$0xff] }
 0x6ae   : > { %v11384_v60 = vcombine.low %v11376_v33, %v11383_v7  ;;  %v26307_v7 = vpack.i.b16 %v26200_v4, %v26200_v4  ;;  %v12795_v42 = vshrl.u32 %v22499_v10, 16  ;;  %v12799_v59 = vshll.u32 %v22842_v47, 16  ;;  %13238 = vrot.lane.b32.xlu1 %v22583_v5, %s17605_s29  ;;  %v26309_v4 = vld [vmem:[#allocation135_spill] sm:$0xff] }
 0x6af   : > { %v22866_v57 = vsel %vm2259_vm7, %v22844_v36, %v12273_v38  ;;  %v9504_v41 = vrot.slane %v26306_v18, %v25819_v51  ;;  %v22882_v45 = vcombine.low %v11327_v24, %v11334_v48  ;;  %v8216_v43 = vrot.slane %v22537_v26, %v25819_v51  ;;  %v26311_v38 = vld [vmem:[#allocation140_spill] sm:$0xff]  ;;  %v22904_v18 = vpop.permute.xlu0 %12990 }
 0x6b0   : > { %26304 = vst [vmem:[#allocation35_spill] sm:$0xff] %v22866_v57  ;;  %v22876_v40 = vrot.slane %v26307_v7, %v25819_v51  ;;  %v12283_v19 = vshrl.u32 %v11384_v60, 16  ;;  %v26310_v33 = vpack.i.b16 %v26309_v4, %v26309_v4  ;;  %v11386_v35 = vcombine.low %v26312_v1, %v26311_v38  ;;  %v22907_v4 = vpop.permute.xlu1 %13056  ;;  %v26315_v1 = vld [vmem:[#allocation138_spill] sm:$0xff] }
 0x6b1   : > { %26308 = vst [vmem:[#allocation28_spill] sm:$0xff] %v22882_v45  ;;  %v26313_v24 = vpack.i.b16 %v22435_v54, %v22435_v54  ;;  %v22902_v26 = vrot.slane %v22670_v58, %v25819_v51  ;;  %v12797_v7 = vor.u32 %v12795_v42, %v12793_v31  ;;  %v12276_v5 = vshrl.u32 %v22882_v45, 16  ;;  %13048 = vrot.lane.b32.xlu0 %v22702_v29, %s17605_s29 }
 0x6b2   : > { %v9497_v37 = vrot.slane %v26310_v33, %v25819_v51  ;;  %v22909_v33 = vrot.slane %v12283_v19, 7  ;;  %v12286_v38 = vshll.u32 %v11384_v60, 16  ;;  %v11385_v57 = vcombine.low %v26316_v39, %v26315_v1  ;;  %13242 = vrot.lane.b32.xlu1 %v22681_v2, %s17605_s29 }
 0x6b3   : > { %v22898_v48 = vrot.slane %v26313_v24, %v25819_v51  ;;  %v26317_v24 = vpack.i.b16 %v22444_v0, %v22444_v0  ;;  %v8232_v36 = vrot.slane %v22721_v49, %v25819_v51  ;;  %v9674_v31 = vpack.i.b16 %v22727_v22, %v22727_v22  ;;  %v26320_v0 = vld [vmem:[#allocation143_spill] sm:$0xff]  ;;  %v22935_v1 = vpop.permute.xlu0 %12992 }
 0x6b4   : > { %26314 = vst [vmem:[#allocation26_spill] sm:$0xff] %v22909_v33  ;;  %v11388_v54 = vcombine.low %v9497_v37, %v9504_v41  ;;  %v12801_v42 = vrot.slane %v12799_v59, 1  ;;  %v22925_v39 = vrot.slane %v12276_v5, 7  ;;  %v12288_v60 = vor.u32 %v12286_v38, %v22909_v33  ;;  %v26319_v41 = vld [vmem:[#allocation145_spill] sm:$0xff] }
 0x6b5   : > { %v8228_v58 = vrot.slane %v26317_v24, %v25819_v51  ;;  %v11387_v19 = vcombine.low %v26320_v0, %v26319_v41  ;;  %v11402_v37 = vrot.slane %v11386_v35, %v25817_v25  ;;  %v9681_v49 = vpack.i.b16 %v22731_v34, %v22731_v34  ;;  %v22939_v24 = vpop.permute.xlu1 %13118 }
 0x6b6   : > { %26318 = vst [vmem:[#allocation88_spill] sm:$0xff] %v22925_v39  ;;  %v9688_v22 = vpack.i.b16 %v22737_v8, %v22737_v8  ;;  %v12913_v59 = vrot.slane %v22681_v2, 1  ;;  %v22942_v38 = vsel %vm4988_vm0, %v12797_v7, %v12801_v42  ;;  %v22946_v35 = vsel %vm2259_vm7, %v22925_v39, %v12288_v60  ;;  %13240 = vrot.lane.b32.xlu1 %v22429_v56, %s17605_s29 }
 0x6b7   : > { %26321 = vst [vmem:[#allocation89_spill] sm:$0xff] %v22942_v38  ;;  %26322 = vst [vmem:[#allocation91_spill] sm:$0xff] %v22946_v35  ;;  %v11395_v34 = vrot.slane %v11385_v57, %v25817_v25  ;;  %v11416_v41 = vrot.slane %v11388_v54, %v25817_v25  ;;  %v9695_v8 = vpack.i.b16 %v22743_v12, %v22743_v12  ;;  %13312 = vrot.lane.b32.xlu0 %v22942_v38, %s17607_s16  ;;  %v22970_v42 = vpop.permute.xlu0 %13252  ;;  %v26331_v35 = vld [vmem:[#allocation141_spill] sm:$0xff] }
 0x6b8   : > { %v9751_v0 = vpack.i.b16 %v8216_v43, %v8216_v43  ;;  %v12853_v5 = vrot.slane %v22549_v53, 1  ;;  %v9779_v60 = vpack.i.b16 %v8232_v36, %v8232_v36  ;;  %v11409_v57 = vrot.slane %v11387_v19, %v25817_v25 }
 0x6b9   : > { %v11417_v54 = vcombine.low %v11395_v34, %v11402_v37  ;;  %v22962_v12 = vrot.slane %v9674_v31, %v25819_v51  ;;  %v9737_v29 = vpack.i.b16 %v22857_v28, %v22857_v28  ;;  %v9744_v7 = vpack.i.b16 %v22876_v40, %v22876_v40  ;;  %v22974_v19 = vpop.permute.xlu1 %13120 }
 0x6ba   : > { %v9765_v36 = vpack.i.b16 %v22902_v26, %v22902_v26  ;;  %v9772_v56 = vpack.i.b16 %v8228_v58, %v8228_v58  ;;  %v26323_v31 = vrot.slane %v22499_v10, 1  ;;  %v11418_v34 = vcombine.low %v11409_v57, %v11416_v41  ;;  %v26328_v57 = vld [vmem:[#allocation139_spill] sm:$0xff] }
 0x6bb   : > { %v22982_v43 = vrot.slane %v9681_v49, %v25819_v51  ;;  %v9730_v28 = vpack.i.b16 %v22851_v62, %v22851_v62  ;;  %v9756_v40 = vrot.slane %v9751_v0, %v25819_v51  ;;  %v26325_v33 = vrot.slane %v22448_v44, 1  ;;  %v26327_v0 = vld [vmem:[#allocation142_spill] sm:$0xff] }
 0x6bc   : > { %v22979_v37 = vsel %vm1787_vm6, %v12913_v59, %v26323_v31  ;;  %v9758_v58 = vpack.i.b16 %v22898_v48, %v22898_v48  ;;  %v9784_v59 = vrot.slane %v9779_v60, %v25819_v51  ;;  %v11425_v62 = vrot.slane %v11417_v54, %v25817_v25  ;;  %v26330_v60 = vld [vmem:[#allocation144_spill] sm:$0xff] }
 0x6bd   : > { %26324 = vst [vmem:[#allocation90_spill] sm:$0xff] %v22979_v37  ;;  %v22990_v26 = vsel %vm1787_vm6, %v12853_v5, %v26325_v33  ;;  %13178 = vrot.lane.b32.xlu0 %v22979_v37, %s17606_s27  ;;  %v11432_v49 = vrot.slane %v11418_v34, %v25817_v25  ;;  %v9742_v41 = vrot.slane %v9737_v29, %v25819_v51  ;;  %v23003_v5 = vpop.permute.xlu0 %12922  ;;  %v23015_v17 = vpop.permute.xlu1 %13254 }
 0x6be   : > { %26326 = vst [vmem:[#allocation95_spill] sm:$0xff] %v22990_v26  ;;  %13130 = vrot.lane.b32.xlu1 %v22990_v26, %s17606_s27  ;;  %v9749_v33 = vrot.slane %v9744_v7, %v25819_v51  ;;  %v26329_v31 = vcombine.low %v26327_v0, %v26328_v57  ;;  %v26332_v39 = vcombine.low %v26330_v60, %v26331_v35  ;;  %v26333_v7 = vld [vmem:[#allocation123_spill] sm:$0xff]  ;;  %v26336_v57 = vld [vmem:[#allocation126_spill] sm:$0xff] }
 0x6bf   : > { %v9770_v54 = vrot.slane %v9765_v36, %v25819_v51  ;;  %v9777_v34 = vrot.slane %v9772_v56, %v25819_v51  ;;  %v23017_v29 = vcombine.low %v11425_v62, %v11432_v49  ;;  %v26334_v27 = vpack.i.b16 %v26333_v7, %v26333_v7  ;;  %v26337_v7 = vld [vmem:[#allocation132_spill] sm:$0xff] }
 0x6c0   : > { %v11474_v48 = vrot.slane %v26329_v31, %v25817_v25  ;;  %v11481_v45 = vrot.slane %v26332_v39, %v25817_v25  ;;  %v11631_v39 = vcombine.low %v9749_v33, %v9756_v40  ;;  %v9735_v36 = vrot.slane %v9730_v28, %v25819_v51 }
 0x6c1   : > { %v9616_v38 = vrot.slane %v26334_v27, %v25819_v51  ;;  %13114 = vrot.lane.b32.xlu0 %v22681_v2, %s17607_s16  ;;  %v9763_v62 = vrot.slane %v9758_v58, %v25819_v51  ;;  %v11633_v49 = vcombine.low %v9777_v34, %v9784_v59  ;;  %v26335_v27 = vld [vmem:[#allocation127_spill] sm:$0xff]  ;;  %v23036_v60 = vrot.slane %v9688_v22, %v25819_v51  ;;  %v23041_v33 = vpop.permute.xlu0 %12924  ;;  %v23044_v59 = vpop.permute.xlu1 %13256 }
 0x6c2   : > { %v11482_v56 = vcombine.low %v11474_v48, %v11481_v45  ;;  %13066 = vrot.lane.b32.xlu1 %v22549_v53, %s17607_s16  ;;  %v11484_v31 = vcombine.low %v26336_v57, %v26335_v27  ;;  %v23039_v40 = vrot.slane %v9695_v8, %v25819_v51  ;;  %v12291_v45 = vshrl.u32 %v23017_v29, 16 }
 0x6c3   : > { %v11630_v48 = vcombine.low %v9735_v36, %v9742_v41  ;;  %v11632_v58 = vcombine.low %v9763_v62, %v9770_v54  ;;  %v12234_v34 = vshll.u32 %v22616_v20, 16  ;;  %v11486_v0 = vcombine.low %v26337_v7, %v9616_v38  ;;  %v26339_v41 = vld [vmem:[#allocation130_spill] sm:$0xff]  ;;  %v26340_v38 = vld [vmem:[#allocation128_spill] sm:$0xff] }
 0x6c4   : > { %v12298_v28 = vshrl.u32 %v11482_v56, 16  ;;  %v23049_v27 = vrot.slane %v11631_v39, %v25817_v25  ;;  %v12301_v8 = vshll.u32 %v11482_v56, 16  ;;  %v23056_v57 = vrot.slane %v11633_v49, %v25817_v25 }
 0x6c5   : > { %12978 = vrot.lane.b32.xlu0 %v22789_v3, %s17606_s27  ;;  %v12236_v20 = vor.u32 %v12234_v34, %v22647_v50  ;;  %v11485_v54 = vcombine.low %v26340_v38, %v26339_v41  ;;  %v11500_v39 = vrot.slane %v11484_v31, %v25817_v25  ;;  %v17201_v36 = vunpack.i.l.bf16 %v22516_v32  ;;  %v26342_v34 = vld [vmem:[#allocation6_spill] sm:$0xff]  ;;  %v23080_v41 = vpop.permute.xlu1 %12926  ;;  %v26344_v38 = vld [vmem:[#allocation125_spill] sm:$0xff] }
 0x6c6   : > { %v23053_v22 = vrot.slane %v12298_v28, 7  ;;  %13244 = vrot.lane.b32.xlu1 %v22499_v10, %s17605_s29  ;;  %v12856_v62 = vrot.slane %v22695_v11, 1  ;;  %v23066_v28 = vpop.permute.xlu0 %13234  ;;  %v23068_v56 = vrot.slane %v12291_v45, 7  ;;  %v26341_v7 = vpack.i.b16 %v22751_v30, %v22751_v30  ;;  %v26343_v11 = vld [vmem:[#allocation124_spill] sm:$0xff] }
 0x6c7   : > { %v13320_v31 = vsel %vm13318_vm2, %v26342_v34, %v22469_v55  ;;  %v26345_v35 = vcombine.low %v26343_v11, %v26344_v38  ;;  %v11514_v2 = vrot.slane %v11486_v0, %v25817_v25  ;;  %v11654_v30 = vrot.slane %v11632_v58, %v25817_v25 }
 0x6c8   : > { %26338 = vst [vmem:[#allocation92_spill] sm:$0xff] %v23053_v22  ;;  %v12303_v49 = vor.u32 %v12301_v8, %v23053_v22  ;;  %v23075_v50 = vrot.slane %v26341_v7, %v25819_v51  ;;  %v23088_v8 = vrot.slane %v11630_v48, %v25817_v25  ;;  %v26346_v7 = vrot.slane %v22448_v44, 1 }
 0x6c9   : > { %v11493_v45 = vrot.slane %v26345_v35, %v25817_v25  ;;  %13002 = vrot.lane.b32.xlu0 %v22990_v26, %s17605_s29  ;;  %v26349_v0 = vpack.i.b16 %v22755_v14, %v22755_v14  ;;  %v23110_v48 = vsel %vm18272_vm9, 0, %v12236_v20  ;;  %v11507_v58 = vrot.slane %v11485_v54, %v25817_v25  ;;  %v23129_v54 = vpop.permute.xlu1 %12928  ;;  %v26371_v26 = vld [vmem:[#allocation25_spill] sm:$0xff] }
 0x6ca   : > { %v23094_v22 = vsel %vm1787_vm6, %v26346_v7, %v12856_v62  ;;  %v23100_v55 = vsel %vm2259_vm7, %v23068_v56, %v12303_v49  ;;  %v11662_v11 = vcombine.low %v23088_v8, %v23049_v27  ;;  %v11663_v49 = vcombine.low %v11654_v30, %v23056_v57  ;;  %v23117_v14 = vpop.permute.xlu0 %13236 }
 0x6cb   : > { %26347 = vst [vmem:[#allocation99_spill] sm:$0xff] %v23094_v22  ;;  %26348 = vst [vmem:[#allocation98_spill] sm:$0xff] %v23100_v55  ;;  %v9714_v35 = vrot.slane %v26349_v0, %v25819_v51  ;;  %13132 = vrot.lane.b32.xlu1 %v23094_v22, %s17606_s27  ;;  %v11515_v62 = vcombine.low %v11493_v45, %v11500_v39  ;;  %v13388_v38 = vsel %vm5193_vm1, %v13320_v31, %v17201_v36 }
 0x6cc   : > { %v23122_v7 = vsel %vm13318_vm2, %v22021_v15, %v22939_v24  ;;  %v23127_v20 = vsel %vm13318_vm2, %v22038_v21, %v22974_v19  ;;  %v12916_v27 = vrot.slane %v22842_v47, 1  ;;  %v11516_v57 = vcombine.low %v11507_v58, %v11514_v2  ;;  %v26350_v15 = vld [vmem:[#allocation133_spill] sm:$0xff]  ;;  %v26353_v21 = vld [vmem:[#allocation134_spill] sm:$0xff]  ;;  %v26354_v19 = vld [vmem:[#allocation131_spill] sm:$0xff] }
 0x6cd   : > { %12980 = vrot.lane.b32.xlu0 %v22862_v46, %s17606_s27  ;;  %v12566_v36 = vshll.u32 %v23110_v48, 16  ;;  %v26351_v24 = vld [vmem:[#allocation129_spill] sm:$0xff]  ;;  %v26355_v8 = vcombine.low %v26353_v21, %v26354_v19  ;;  %v13457_v2 = vsel %vm13455_vm3, %v13388_v38, %v22614_v16  ;;  %v26356_v47 = vrot.slane %v22499_v10, 1 }
 0x6ce   : > { %v26352_v31 = vcombine.low %v26350_v15, %v26351_v24  ;;  %v11523_v58 = vrot.slane %v11515_v62, %v25817_v25  ;;  %v11530_v15 = vrot.slane %v11516_v57, %v25817_v25  ;;  %v13713_v24 = vsel %vm5193_vm1, %v23122_v7, %v22807_v63 }
 0x6cf   : > { %v11579_v30 = vrot.slane %v26355_v8, %v25817_v25  ;;  %13068 = vrot.lane.b32.xlu1 %v22448_v44, %s17607_s16  ;;  %v23151_v0 = vsel %vm1787_vm6, %v26356_v47, %v12916_v27  ;;  %v13715_v38 = vsel %vm5193_vm1, %v23127_v20, %v22859_v23  ;;  %v26358_v27 = vpack.i.b16 %v22824_v52, %v22824_v52  ;;  %v13251_v8 = vpop.permute.xlu1 %13250  ;;  %v26374_v44 = vld [vmem:[#allocation39_spill] sm:$0xff] }
 0x6d0   : > { %v11572_v45 = vrot.slane %v26352_v31, %v25817_v25  ;;  %26357 = vst [vmem:[#allocation96_spill] sm:$0xff] %v23151_v0  ;;  %v23158_v31 = vpop.permute.xlu0 %13106  ;;  %v23167_v62 = vcombine.low %v11523_v58, %v11530_v15  ;;  %v26360_v57 = vpack.i.b16 %v22764_v6, %v22764_v6  ;;  %v11581_v47 = vcombine.low %v22962_v12, %v22982_v43  ;;  %v26361_v15 = vld [vmem:[#allocation50_spill] sm:$0xff] }
 0x6d1   : > { %v9728_v19 = vrot.slane %v26358_v27, %v25819_v51  ;;  %v11582_v23 = vcombine.low %v23036_v60, %v23039_v40  ;;  %13180 = vrot.lane.b32.xlu0 %v23151_v0, %s17606_s27  ;;  %v12568_v52 = vrot.slane %v12566_v36, 1  ;;  %v11583_v58 = vcombine.low %v23075_v50, %v9714_v35  ;;  %v26362_v27 = vld [vmem:[#allocation49_spill] sm:$0xff] }
 0x6d2   : > { %v11580_v21 = vcombine.low %v11572_v45, %v11579_v30  ;;  %26359 = vst [vmem:[#allocation93_spill] sm:$0xff] %v23167_v62  ;;  %v9721_v63 = vrot.slane %v26360_v57, %v25819_v51  ;;  %v13811_v45 = vsel %vm13455_vm3, %v13713_v24, %v13251_v8  ;;  %v12564_v6 = vshrl.u32 %v23110_v48, 16 }
 0x6d3   : > { %12934 = vrot.lane.b32.xlu1 %v26361_v15, %s17606_s27  ;;  %14250 = vmatprep.mubr.bf16.mxu0 %v13811_v45  ;;  %v12571_v12 = vshll.u32 %v26362_v27, 16  ;;  %v12306_v43 = vshrl.u32 %v23167_v62, 16  ;;  %v13814_v40 = vsel %vm13455_vm3, %v13715_v38, %v22970_v42  ;;  %v11598_v35 = vrot.slane %v11582_v23, %v25817_v25  ;;  %v23193_v8 = vpop.permute.xlu1 %13190  ;;  %v26364_v23 = vld [vmem:[#allocation24_spill] sm:$0xff] }
 0x6d4   : > { %v12313_v30 = vshrl.u32 %v11580_v21, 16  ;;  %v11584_v60 = vcombine.low %v9721_v63, %v9728_v19  ;;  %14251 = vmatmul.mubr.bf16.vlgmr.msra.gmra.mxu0 %v13457_v2  ;;  %v23188_v24 = vpop.permute.xlu0 %13108  ;;  %v12316_v50 = vshll.u32 %v11580_v21, 16  ;;  %v11591_v57 = vrot.slane %v11581_v47, %v25817_v25  ;;  %v26377_v62 = vld [vmem:[#allocation32_spill] sm:$0xff] }
 0x6d5   : > { %14258 = vmatprep.mubr.bf16.mxu0 %v13814_v40  ;;  %v11605_v45 = vrot.slane %v11583_v58, %v25817_v25  ;;  %v11677_v2 = vrot.slane %v11663_v49, %v25817_v25  ;;  %13116 = vrot.lane.b32.xlu0 %v22499_v10, %s17607_s16  ;;  %v12569_v42 = vor.u32 %v12568_v52, %v12564_v6  ;;  %v23201_v38 = vrot.slane %v12306_v43, 7  ;;  %v26366_v58 = vld [vmem:[#allocation46_spill] sm:$0xff]  ;;  %v26367_v40 = vld [vmem:[#allocation4_spill] sm:$0xff] }
 0x6d6   : > { %v23190_v36 = vrot.slane %v12313_v30, 7  ;;  %v11612_v19 = vrot.slane %v11584_v60, %v25817_v25  ;;  %v11670_v63 = vrot.slane %v11662_v11, %v25817_v25  ;;  %v26365_v47 = vpack.i.b16 %v26364_v23, %v26364_v23  ;;  %v26368_v6 = vld [vmem:[#allocation146_spill] sm:$0xff] }
 0x6d7   : > { %v13322_v60 = vsel %vm13318_vm2, %v26367_v40, %v26366_v58  ;;  %13198 = vrot.lane.b32.xlu1 %v23110_v48, %s17605_s29  ;;  %v11613_v49 = vcombine.low %v11591_v57, %v11598_v35  ;;  %v26369_v43 = vpack.i.b16 %v26368_v6, %v26368_v6  ;;  %v12573_v11 = vrot.slane %v12571_v12, 1  ;;  %v26372_v58 = vld [vmem:[#allocation23_spill] sm:$0xff]  ;;  %v26375_v57 = vld [vmem:[#allocation5_spill] sm:$0xff] }
 0x6d8   : > { %26363 = vst [vmem:[#allocation97_spill] sm:$0xff] %v23190_v36  ;;  %v12318_v21 = vor.u32 %v12316_v50, %v23190_v36  ;;  %v9889_v30 = vrot.slane %v26365_v47, %v25819_v51  ;;  %v11614_v52 = vcombine.low %v11605_v45, %v11612_v19  ;;  %v23218_v39 = vpop.permute.xlu0 %13102  ;;  %v11678_v47 = vcombine.low %v11670_v63, %v11677_v2  ;;  %v26373_v36 = vld [vmem:[#allocation38_spill] sm:$0xff]  ;;  %v26376_v45 = vld [vmem:[#allocation36_spill] sm:$0xff]  ;;  %v26378_v12 = vld [vmem:[#allocation33_spill] sm:$0xff] }
 0x6d9   : > { %v9875_v50 = vrot.slane %v26369_v43, %v25819_v51  ;;  %26370 = vst [vmem:[#allocation94_spill] sm:$0xff] %v23218_v39  ;;  %v11679_v10 = vcombine.low %v26372_v58, %v26371_v26  ;;  %v11728_v35 = vcombine.low %v26374_v44, %v26373_v36  ;;  %v11729_v19 = vcombine.low %v26376_v45, %v26375_v57  ;;  %v23231_v43 = vpop.permute.xlu1 %13192  ;;  %v26380_v44 = vld [vmem:[#allocation10_spill] sm:$0xff]  ;;  %v26386_v45 = vld [vmem:[#allocation21_spill] sm:$0xff] }
 0x6da   : > { %v23222_v23 = vsel %vm2259_vm7, %v23201_v38, %v12318_v21  ;;  %v11731_v6 = vcombine.low %v9889_v30, %v26377_v62  ;;  %v26379_v55 = vunpack.i.h.bf16 %v22516_v32  ;;  %v23238_v2 = vsel %vm4988_vm0, %v12569_v42, %v12573_v11  ;;  %13004 = vrot.lane.b32.xlu0 %v23094_v22, %s17605_s29  ;;  %v26382_v32 = vld [vmem:[#allocation37_spill] sm:$0xff]  ;;  %v26385_v57 = vld [vmem:[#allocation22_spill] sm:$0xff] }
 0x6db   : > { %v11730_v53 = vcombine.low %v9875_v50, %v26378_v12  ;;  %v26381_v26 = vpack.i.b16 %v26380_v44, %v26380_v44  ;;  %13266 = vrot.lane.b32.xlu1 %v23238_v2, %s17607_s16  ;;  %v11621_v42 = vrot.slane %v11613_v49, %v25817_v25  ;;  %v11628_v63 = vrot.slane %v11614_v52, %v25817_v25  ;;  %v26387_v52 = vld [vmem:[#allocation31_spill] sm:$0xff] }
 0x6dc   : > { %v13390_v21 = vsel %vm5193_vm1, %v13322_v60, %v26379_v55  ;;  %v13717_v55 = vsel %vm5193_vm1, %v23122_v7, %v26382_v32  ;;  %v23257_v60 = vpop.permute.xlu0 %13104  ;;  %v12328_v58 = vshrl.u32 %v11678_v47, 16  ;;  %v11680_v12 = vcombine.low %v26386_v45, %v26385_v57  ;;  %v26391_v57 = vld [vmem:[#allocation2_spill] sm:$0xff] }
 0x6dd   : > { %v9840_v36 = vrot.slane %v26381_v26, %v25819_v51  ;;  %v13460_v62 = vsel %vm13455_vm3, %v13390_v21, %v22907_v4  ;;  %v13817_v30 = vsel %vm13455_vm3, %v13717_v55, %v23015_v17  ;;  %26383 = vst [vmem:[#allocation76_spill] sm:$0xff] %v23257_v60  ;;  %v26384_v51 = vld [vmem:[#allocation40_spill] sm:$0xff]  ;;  %v11745_v7 = vrot.slane %v11729_v19, %v25817_v25  ;;  %v23271_v44 = vpop.permute.xlu1 %13062  ;;  %v26392_v45 = vld [vmem:[#allocation18_spill] sm:$0xff] }
 0x6de   : > { %14259 = vmatmul.mubr.bf16.gmra.mxu0 %v13460_v62  ;;  %v23262_v50 = vsel %vm18272_vm9, %v26384_v51, 0  ;;  %v11759_v49 = vrot.slane %v11731_v6, %v25817_v25  ;;  %v13324_v21 = vsel %vm13318_vm2, %v26387_v52, %v23003_v5  ;;  %v23273_v26 = vcombine.low %v11621_v42, %v11628_v63  ;;  %12982 = vrot.lane.b32.xlu0 %v22814_v13, %s17606_s27  ;;  %v26390_v51 = vld [vmem:[#allocation19_spill] sm:$0xff] }
 0x6df   : > { %14266 = vmatprep.mubr.bf16.mxu0 %v13817_v30  ;;  %v23277_v62 = vrot.slane %v12328_v58, 7  ;;  %v12331_v55 = vshll.u32 %v11678_v47, 16  ;;  %v11681_v19 = vcombine.low %v26391_v57, %v26390_v51  ;;  %v11682_v6 = vcombine.low %v26392_v45, %v9840_v36  ;;  %12936 = vrot.lane.b32.xlu1 %v22829_v61, %s17606_s27 }
 0x6e0   : > { %26388 = vst [vmem:[#allocation80_spill] sm:$0xff] %v23273_v26  ;;  %v11738_v22 = vrot.slane %v11728_v35, %v25817_v25  ;;  %v11752_v5 = vrot.slane %v11730_v53, %v25817_v25  ;;  %v12579_v42 = vshll.u32 %v23262_v50, 16  ;;  %v12321_v63 = vshrl.u32 %v23273_v26, 16  ;;  %v23292_v47 = vpop.permute.xlu0 %13170 }
 0x6e1   : > { %26389 = vst [vmem:[#allocation79_spill] sm:$0xff] %v23277_v62  ;;  %v23290_v30 = vsel %vm5193_vm1, %v13324_v21, %v22904_v18  ;;  %v12575_v58 = vshrl.u32 %v26362_v27, 16  ;;  %v12333_v36 = vor.u32 %v12331_v55, %v23277_v62  ;;  %v11696_v35 = vrot.slane %v11680_v12, %v25817_v25  ;;  %v23297_v51 = vpop.permute.xlu1 %13064  ;;  %v26393_v12 = vld [vmem:[#allocation148_spill] sm:$0xff] }
 0x6e2   : > { %v11760_v53 = vcombine.low %v11738_v22, %v11745_v7  ;;  %v11761_v52 = vcombine.low %v11752_v5, %v11759_v49  ;;  %v23299_v57 = vrot.slane %v12321_v63, 7  ;;  %13050 = vrot.lane.b32.xlu0 %v22979_v37, %s17605_s29  ;;  %v11689_v18 = vrot.slane %v11679_v10, %v25817_v25  ;;  %v26395_v5 = vld [vmem:[#allocation150_spill] sm:$0xff] }
 0x6e3   : > { %v12577_v45 = vor.u32 %v12575_v58, %v12573_v11  ;;  %v11703_v21 = vrot.slane %v11681_v19, %v25817_v25  ;;  %v11710_v26 = vrot.slane %v11682_v6, %v25817_v25  ;;  %13200 = vrot.lane.b32.xlu1 %v26362_v27, %s17605_s29  ;;  %v13462_v22 = vsel %vm13455_vm3, %v23290_v30, %v22614_v16 }
 0x6e4   : > { %v13719_v7 = vsel %vm5193_vm1, %v23127_v20, %v26393_v12  ;;  %v23316_v11 = vsel %vm2259_vm7, %v23299_v57, %v12333_v36  ;;  %v12581_v49 = vrot.slane %v12579_v42, 1  ;;  %v23320_v55 = vpop.permute.xlu0 %13172  ;;  %v11711_v19 = vcombine.low %v11689_v18, %v11696_v35  ;;  %v26396_v36 = vld [vmem:[#allocation13_spill] sm:$0xff]  ;;  %v26398_v35 = vld [vmem:[#allocation151_spill] sm:$0xff] }
 0x6e5   : > { %26394 = vst [vmem:[#allocation83_spill] sm:$0xff] %v23316_v11  ;;  %v13820_v10 = vsel %vm13455_vm3, %v13719_v7, %v23044_v59  ;;  %v11712_v6 = vcombine.low %v11703_v21, %v11710_v26  ;;  %v13326_v16 = vsel %vm13318_vm2, %v26395_v5, %v23041_v33  ;;  %v23325_v63 = vpop.permute.xlu1 %13126  ;;  %v11775_v20 = vrot.slane %v11761_v52, %v25817_v25 }
 0x6e6   : > { %14267 = vmatmul.mubr.bf16.gmra.mxu0 %v13462_v22  ;;  %v23329_v58 = vsel %vm4988_vm0, %v12577_v45, %v12581_v49  ;;  %13314 = vrot.lane.b32.xlu0 %v26396_v36, %s17607_s16  ;;  %v11768_v42 = vrot.slane %v11760_v53, %v25817_v25  ;;  %v26397_v22 = vld [vmem:[#allocation42_spill] sm:$0xff]  ;;  %v13394_v33 = vsel %vm5193_vm1, %v13326_v16, %v22935_v1  ;;  %v26399_v53 = vld [vmem:[#allocation89_spill] sm:$0xff]  ;;  %v12859_v49 = vrot.slane %v26362_v27, 1 }
 0x6e7   : > { %14274 = vmatprep.mubr.bf16.mxu0 %v13820_v10  ;;  %v13624_v26 = vsel %vm13318_vm2, %v26398_v35, %v26397_v22  ;;  %13268 = vrot.lane.b32.xlu1 %v23329_v58, %s17607_s16  ;;  %v11719_v52 = vrot.slane %v11711_v19, %v25817_v25  ;;  %v11726_v45 = vrot.slane %v11712_v6, %v25817_v25  ;;  %v12858_v10 = vrot.slane %v23110_v48, 1  ;;  %v26405_v35 = vld [vmem:[#allocation61_spill] sm:$0xff] }
 0x6e8   : > { %v23341_v18 = vpop.permute.xlu0 %13042  ;;  %v11776_v21 = vcombine.low %v11768_v42, %v11775_v20  ;;  %v13464_v1 = vsel %vm13455_vm3, %v13394_v33, %v22907_v4  ;;  %v13720_v25 = vsel %vm5193_vm1, %v13624_v26, %v26382_v32  ;;  %v26404_v32 = vld [vmem:[#allocation51_spill] sm:$0xff] }
 0x6e9   : > { %v23345_v7 = vpop.permute.xlu1 %13128  ;;  %v23351_v5 = vcombine.low %v11719_v52, %v11726_v45  ;;  %v13822_v19 = vsel %vm13455_vm3, %v13720_v25, %v23015_v17  ;;  %v13627_v52 = vsel %vm13318_vm2, %v26405_v35, %v26404_v32  ;;  %v26408_v25 = vld [vmem:[#allocation8_spill] sm:$0xff]  ;;  %v26410_v32 = vld [vmem:[#allocation55_spill] sm:$0xff] }
 0x6ea   : > { %12984 = vrot.lane.b32.xlu0 %v26399_v53, %s17606_s27  ;;  %v12343_v36 = vshrl.u32 %v11776_v21, 16  ;;  %v12346_v42 = vshll.u32 %v11776_v21, 16 }
 0x6eb   : > { %26400 = vst [vmem:[#allocation81_spill] sm:$0xff] %v23351_v5  ;;  %13246 = vrot.lane.b32.xlu1 %v26342_v34, %s17605_s29  ;;  %v12336_v16 = vshrl.u32 %v23351_v5, 16  ;;  %v23369_v34 = vsel %vm1787_vm6, %v12858_v10, %v12859_v49  ;;  %v26418_v5 = vld [vmem:[#allocation41_spill] sm:$0xff] }
 0x6ec   : > { %v23361_v6 = vpop.permute.xlu0 %13044  ;;  %v23364_v20 = vrot.slane %v12343_v36, 7  ;;  %26402 = vst [vmem:[#allocation77_spill] sm:$0xff] %v23369_v34  ;;  %v26407_v36 = vld [vmem:[#allocation147_spill] sm:$0xff] }
 0x6ed   : > { %v23366_v22 = vpop.permute.xlu1 %13258  ;;  %v23373_v4 = vrot.slane %v12336_v16, 7 }
 0x6ee   : > { %14275 = vmatmul.mubr.bf16.gmra.mxu0 %v13464_v1  ;;  %26401 = vst [vmem:[#allocation85_spill] sm:$0xff] %v23364_v20  ;;  %13052 = vrot.lane.b32.xlu0 %v23151_v0, %s17605_s29  ;;  %v12348_v17 = vor.u32 %v12346_v42, %v23364_v20  ;;  %v12249_v1 = vshll.u32 %v26407_v36, 16  ;;  %v13721_v42 = vsel %vm5193_vm1, %v13627_v52, %v26393_v12  ;;  %v12861_v12 = vrot.slane %v23262_v50, 1  ;;  %v26414_v50 = vld [vmem:[#allocation53_spill] sm:$0xff] }
 0x6ef   : > { %14282 = vmatprep.mubr.bf16.mxu0 %v13822_v19  ;;  %26403 = vst [vmem:[#allocation78_spill] sm:$0xff] %v23373_v4  ;;  %13134 = vrot.lane.b32.xlu1 %v23369_v34, %s17606_s27  ;;  %v26409_v19 = vld [vmem:[#allocation57_spill] sm:$0xff]  ;;  %v13824_v35 = vsel %vm13455_vm3, %v13721_v42, %v23044_v59  ;;  %v26411_v59 = vld [vmem:[#allocation48_spill] sm:$0xff] }
 0x6f0   : > { %v13167_v45 = vpop.permute.xlu0 %13166  ;;  %v23383_v21 = vsel %vm2259_vm7, %v23373_v4, %v12348_v17  ;;  %v13467_v16 = vsel %vm13455_vm3, %v23290_v30, %v26409_v19  ;;  %v12251_v17 = vor.u32 %v12249_v1, %v26410_v32  ;;  %v23418_v42 = vsel %vm1787_vm6, %v12859_v49, %v12861_v12 }
 0x6f1   : > { %26406 = vst [vmem:[#allocation86_spill] sm:$0xff] %v23383_v21  ;;  %v23385_v10 = vpop.permute.xlu1 %13260  ;;  %26413 = vst [vmem:[#allocation87_spill] sm:$0xff] %v23418_v42  ;;  %v13723_v32 = vsel %vm5193_vm1, %v13624_v26, %v23193_v8 }
 0x6f2   : > { %13316 = vrot.lane.b32.xlu0 %v26408_v25, %s17607_s16  ;;  %v23406_v30 = vsel %vm18272_vm9, 0, %v12251_v17  ;;  %v13470_v17 = vsel %vm13455_vm3, %v13394_v33, %v26414_v50 }
 0x6f3   : > { %13070 = vrot.lane.b32.xlu1 %v23110_v48, %s17607_s16 }
 0x6f4   : > { %v13169_v36 = vpop.permute.xlu0 %13168 }
 0x6f5   : > { %v13039_v0 = vpop.permute.xlu1 %13038 }
 0x6f6   : > { %14283 = vmatmul.mubr.bf16.gmra.mxu0 %v13467_v16  ;;  %12938 = vrot.lane.b32.xlu0 %v23238_v2, %s17606_s27  ;;  %v23415_v16 = vsel %vm13318_vm2, %v26411_v59, %v13167_v45  ;;  %v13827_v45 = vsel %vm13455_vm3, %v13723_v32, %v23366_v22 }
 0x6f7   : > { %14290 = vmatprep.mubr.bf16.mxu0 %v13824_v35  ;;  %13248 = vrot.lane.b32.xlu1 %v26367_v40, %s17605_s29  ;;  %26412 = vst [vmem:[#allocation82_spill] sm:$0xff] %v23415_v16  ;;  %v12586_v40 = vshll.u32 %v23406_v30, 16  ;;  %v26415_v35 = vld [vmem:[#allocation14_spill] sm:$0xff]  ;;  %v13789_v26 = vsel %vm5193_vm1, %v23415_v16, %v23066_v28 }
 0x6f8   : > { %v23409_v1 = vpop.permute.xlu0 %12974  ;;  %v13328_v12 = vsel %vm13318_vm2, %v26415_v35, %v23080_v41  ;;  %v12584_v35 = vshrl.u32 %v23406_v30, 16  ;;  %v26417_v16 = vld [vmem:[#allocation58_spill] sm:$0xff] }
 0x6f9   : > { %v23411_v25 = vpop.permute.xlu1 %13040  ;;  %v12588_v32 = vrot.slane %v12586_v40, 1  ;;  %v12591_v59 = vshll.u32 %v26417_v16, 16  ;;  %v12864_v40 = vrot.slane %v26417_v16, 1 }
 0x6fa   : > { %13006 = vrot.lane.b32.xlu0 %v23369_v34, %s17605_s29 }
 0x6fb   : > { %13136 = vrot.lane.b32.xlu1 %v23418_v42, %s17606_s27  ;;  %v12593_v21 = vrot.slane %v12591_v59, 1  ;;  %v26422_v59 = vld [vmem:[#allocation66_spill] sm:$0xff] }
 0x6fc   : > { %v23431_v49 = vpop.permute.xlu0 %12976 }
 0x6fd   : > { %v23436_v37 = vpop.permute.xlu1 %13302 }
 0x6fe   : > { %14291 = vmatmul.mubr.bf16.gmra.mxu0 %v13470_v17  ;;  %v13937_v33 = vsel %vm13455_vm3, %v13789_v26, %v23436_v37  ;;  %12940 = vrot.lane.b32.xlu0 %v23329_v58, %s17606_s27  ;;  %v26416_v17 = vld [vmem:[#allocation56_spill] sm:$0xff]  ;;  %v12863_v26 = vrot.slane %v23406_v30, 1 }
 0x6ff   : > { %14298 = vmatprep.mubr.bf16.mxu0 %v13827_v45  ;;  %13072 = vrot.lane.b32.xlu1 %v26362_v27, %s17607_s16  ;;  %v23449_v41 = vsel %vm5193_vm1, %v13328_v12, %v26416_v17  ;;  %v13725_v12 = vsel %vm5193_vm1, %v13627_v52, %v23231_v43  ;;  %v26419_v52 = vld [vmem:[#allocation47_spill] sm:$0xff] }
 0x700   : > { %14650 = vmatprep.mubr.bf16.mxu1 %v13937_v33  ;;  %v23451_v45 = vpop.permute.xlu0 %12998  ;;  %v12589_v33 = vor.u32 %v12588_v32, %v12584_v35  ;;  %v13472_v17 = vsel %vm13455_vm3, %v23449_v41, %v26409_v19  ;;  %v13830_v20 = vsel %vm13455_vm3, %v13725_v12, %v23385_v10  ;;  %v12463_v32 = vsel %vm18272_vm9, %v26418_v5, 0 }
 0x701   : > { %v23455_v34 = vpop.permute.xlu1 %13304  ;;  %v13330_v35 = vsel %vm13318_vm2, %v26419_v52, %v23129_v54  ;;  %v12866_v5 = vrot.slane %v12463_v32, 1 }
 0x702   : > { %13008 = vrot.lane.b32.xlu0 %v23418_v42, %s17605_s29  ;;  %v26420_v42 = vld [vmem:[#allocation43_spill] sm:$0xff]  ;;  %v23488_v62 = vsel %vm4988_vm0, %v12589_v33, %v12593_v21 }
 0x703   : > { %13202 = vrot.lane.b32.xlu1 %v23406_v30, %s17605_s29  ;;  %v23480_v27 = vsel %vm13318_vm2, %v26420_v42, %v13169_v36  ;;  %v12599_v36 = vshll.u32 %v12463_v32, 16  ;;  %v26424_v33 = vld [vmem:[#allocation75_spill] sm:$0xff]  ;;  %v17328_v32 = vld [vmem:[%s25563_s10 + $0x80] sm:$0xff]  }
 0x704   : > { %v23470_v4 = vpop.permute.xlu0 %13000  ;;  %26421 = vst [vmem:[#allocation84_spill] sm:$0xff] %v23480_v27 }
 0x705   : > { %v12971_v19 = vpop.permute.xlu1 %12970 }
 0x706   : > { %14299 = vmatmul.mubr.bf16.gmra.mxu0 %v13472_v17  ;;  %v23483_v17 = vsel %vm1787_vm6, %v12863_v26, %v12864_v40  ;;  %v13372_v12 = vsel %vm13318_vm2, %v26422_v59, %v12971_v19  ;;  %v26423_v26 = vld [vmem:[#allocation27_spill] sm:$0xff]  ;;  %v23505_v19 = vsel %vm13318_vm2, %v26424_v33, %v23325_v63 }
 0x707   : > { %14306 = vmatprep.mubr.bf16.mxu0 %v13830_v20  ;;  %13138 = vrot.lane.b32.xlu0 %v23483_v17, %s17606_s27  ;;  %v23493_v54 = vsel %vm5193_vm1, %v13372_v12, %v13039_v0  ;;  %v12595_v20 = vshrl.u32 %v26417_v16, 16  ;;  %v23500_v52 = vsel %vm5193_vm1, %v13330_v35, %v26423_v26  ;;  %v13791_v12 = vsel %vm5193_vm1, %v23480_v27, %v23117_v14  ;;  %v26425_v26 = vld [vmem:[#allocation60_spill] sm:$0xff] }
 0x708   : > { %13270 = vrot.lane.b32.xlu1 %v23488_v62, %s17607_s16  ;;  %v13582_v0 = vsel %vm13455_vm3, %v23493_v54, %v23218_v39  ;;  %v23513_v42 = vpop.permute.xlu0 %13110  ;;  %v13940_v63 = vsel %vm13455_vm3, %v13791_v12, %v23455_v34  ;;  %v12264_v33 = vshll.u32 %v26425_v26, 16  ;;  %v17590_v39 = vld [vmem:[%s25563_s10 + $0x88] sm:$0xff]   ;;  %v23527_v27 = vsel %vm1787_vm6, %v12864_v40, %v12866_v5 }
 0x709   : > { %14651 = vmatmul.mubr.bf16.vlgmr.msra.gmra.mxu1 %v13582_v0  ;;  %v23518_v35 = vpop.permute.xlu1 %12930  ;;  %26426 = vst [vmem:[#allocation112_spill] sm:$0xff] %v23527_v27  ;;  %v12597_v59 = vor.u32 %v12595_v20, %v12593_v21  ;;  %v13474_v0 = vsel %vm13455_vm3, %v23500_v52, %v26414_v50  ;;  %v13726_v12 = vsel %vm5193_vm1, %v23505_v19, %v23193_v8  ;;  %v12601_v40 = vrot.slane %v12599_v36, 1  ;;  %v26428_v20 = vld [vmem:[#allocation17_spill] sm:$0xff]  ;;  %v26429_v8 = vld [vmem:[#allocation67_spill] sm:$0xff]  ;;  %v26430_v36 = vld [vmem:[#allocation68_spill] sm:$0xff] }
 0x70a   : > { %14658 = vmatprep.mubr.bf16.mxu1 %v13940_v63  ;;  %17022 = vmatpush3.bf16.msra.mxu1 %v17590_v39  ;;  %v26427_v63 = vld [vmem:[#allocation29_spill] sm:$0xff]  ;;  %v13832_v21 = vsel %vm13455_vm3, %v13726_v12, %v23366_v22  ;;  %v23547_v50 = vsel %vm13318_vm2, %v26428_v20, %v23292_v47 }
 0x70b   : > { %13140 = vrot.lane.b32.xlu0 %v23527_v27, %s17606_s27  ;;  %v12266_v39 = vor.u32 %v12264_v33, %v26427_v63  ;;  %17023 = vmatprep.subr.bf16.mxu1 %v17328_v32  ;;  %v23552_v33 = vsel %vm4988_vm0, %v12597_v59, %v12601_v40 }
 0x70c   : > { %13204 = vrot.lane.b32.xlu1 %v26417_v16, %s17605_s29  ;;  %v23542_v5 = vpop.permute.xlu0 %13112 }
 0x70d   : > { %v12973_v26 = vpop.permute.xlu1 %12972  ;;  %v23562_v47 = vsel %vm18272_vm9, 0, %v12266_v39 }
 0x70e   : > { %14307 = vmatmul.mubr.bf16.gmra.mxu0 %v13474_v0  ;;  %v13374_v11 = vsel %vm13318_vm2, %v26429_v8, %v12973_v26  ;;  %17024 = vmatpush3.bf16.msra.mxu1 %v17328_v32  ;;  %v23567_v0 = vsel %vm13318_vm2, %v26430_v36, %v23345_v7  ;;  %v12606_v63 = vshll.u32 %v23562_v47, 16  ;;  %v13477_v7 = vsel %vm13455_vm3, %v23449_v41, %v23271_v44  ;;  %v26432_v36 = vld [vmem:[#allocation35_spill] sm:$0xff] }
 0x70f   : > { %14314 = vmatprep.mubr.bf16.mxu0 %v13832_v21  ;;  %v13442_v22 = vsel %vm5193_vm1, %v13374_v11, %v23411_v25  ;;  %12942 = vrot.lane.b32.xlu0 %v23488_v62, %s17606_s27  ;;  %v13792_v11 = vsel %vm5193_vm1, %v23547_v50, %v23066_v28  ;;  %v13727_v28 = vsel %vm5193_vm1, %v23567_v0, %v23231_v43  ;;  %v26431_v21 = vld [vmem:[#allocation16_spill] sm:$0xff]  ;;  %v12604_v26 = vshrl.u32 %v23562_v47, 16 }
 0x710   : > { %13272 = vrot.lane.b32.xlu1 %v23552_v33, %s17607_s16  ;;  %v13584_v59 = vsel %vm13455_vm3, %v13442_v22, %v23257_v60  ;;  %v23574_v25 = vpop.permute.xlu0 %13174  ;;  %v13942_v12 = vsel %vm13455_vm3, %v13792_v11, %v23436_v37  ;;  %v13834_v37 = vsel %vm13455_vm3, %v13727_v28, %v23385_v10  ;;  %v23598_v40 = vsel %vm13318_vm2, %v26431_v21, %v23320_v55  ;;  %v26436_v60 = vld [vmem:[#allocation62_spill] sm:$0xff] }
 0x711   : > { %14659 = vmatmul.mubr.bf16.gmra.mxu1 %v13584_v59  ;;  %v23576_v32 = vpop.permute.xlu1 %13194  ;;  %v12608_v41 = vrot.slane %v12606_v63, 1  ;;  %v13587_v43 = vsel %vm13455_vm3, %v23493_v54, %v23158_v31  ;;  %v13793_v10 = vsel %vm5193_vm1, %v23598_v40, %v23117_v14  ;;  %v12611_v59 = vshll.u32 %v26432_v36, 16 }
 0x712   : > { %14666 = vmatprep.mubr.bf16.mxu1 %v13942_v12  ;;  %v13944_v12 = vsel %vm13455_vm3, %v13793_v10, %v23455_v34  ;;  %v12869_v54 = vrot.slane %v26432_v36, 1  ;;  %v13729_v14 = vsel %vm5193_vm1, %v23505_v19, %v23576_v32  ;;  %v13480_v28 = vsel %vm13455_vm3, %v23500_v52, %v23297_v51 }
 0x713   : > { %13010 = vrot.lane.b32.xlu0 %v23483_v17, %s17605_s29  ;;  %v12609_v63 = vor.u32 %v12608_v41, %v12604_v26  ;;  %v26433_v41 = vld [vmem:[#allocation149_spill] sm:$0xff] }
 0x714   : > { %13074 = vrot.lane.b32.xlu1 %v23406_v30, %s17607_s16  ;;  %v23593_v39 = vpop.permute.xlu0 %13176  ;;  %v12464_v19 = vsel %vm18272_vm9, %v26433_v41, 0  ;;  %v26435_v41 = vld [vmem:[#allocation28_spill] sm:$0xff] }
 0x715   : > { %v23600_v20 = vpop.permute.xlu1 %13262 }
 0x716   : > { %14315 = vmatmul.mubr.bf16.gmra.mxu0 %v13477_v7  ;;  %v12868_v7 = vrot.slane %v23562_v47, 1  ;;  %v13837_v34 = vsel %vm13455_vm3, %v13729_v14, %v23600_v20 }
 0x717   : > { %14322 = vmatprep.mubr.bf16.mxu0 %v13834_v37  ;;  %12944 = vrot.lane.b32.xlu0 %v23552_v33, %s17606_s27  ;;  %v12613_v37 = vrot.slane %v12611_v59, 1  ;;  %v12871_v59 = vrot.slane %v12464_v19, 1 }
 0x718   : > { %13076 = vrot.lane.b32.xlu1 %v26417_v16, %s17607_s16  ;;  %v23612_v55 = vpop.permute.xlu0 %13046 }
 0x719   : > { %14667 = vmatmul.mubr.bf16.gmra.mxu1 %v13587_v43  ;;  %v12933_v11 = vpop.permute.xlu1 %12932  ;;  %v26434_v43 = vld [vmem:[#allocation64_spill] sm:$0xff]  ;;  %v23643_v52 = vsel %vm4988_vm0, %v12609_v63, %v12613_v37  ;;  %v12615_v63 = vshrl.u32 %v26432_v36, 16 }
 0x71a   : > { %14674 = vmatprep.mubr.bf16.mxu1 %v13944_v12  ;;  %v13332_v10 = vsel %vm13318_vm2, %v26434_v43, %v23518_v35  ;;  %v23646_v12 = vsel %vm1787_vm6, %v12868_v7, %v12869_v54  ;;  %v13590_v35 = vsel %vm13455_vm3, %v13442_v22, %v23188_v24  ;;  %v12619_v7 = vshll.u32 %v12464_v19, 16 }
 0x71b   : > { %13012 = vrot.lane.b32.xlu0 %v23527_v27, %s17605_s29  ;;  %v23654_v14 = vsel %vm5193_vm1, %v13332_v10, %v23451_v45  ;;  %v12279_v43 = vshll.u32 %v26435_v41, 16  ;;  %v13376_v27 = vsel %vm13318_vm2, %v26436_v60, %v23409_v1  ;;  %v23668_v45 = vsel %vm1787_vm6, %v12869_v54, %v12871_v59  ;;  %v26438_v59 = vld [vmem:[#allocation65_spill] sm:$0xff] }
 0x71c   : > { %13206 = vrot.lane.b32.xlu1 %v23562_v47, %s17605_s29  ;;  %v23632_v21 = vpop.permute.xlu0 %13306  ;;  %v12617_v10 = vor.u32 %v12615_v63, %v12613_v37  ;;  %v13482_v19 = vsel %vm13455_vm3, %v23654_v14, %v23271_v44  ;;  %v12621_v54 = vrot.slane %v12619_v7, 1  ;;  %v13334_v63 = vsel %vm13318_vm2, %v26438_v59, %v12933_v11 }
 0x71d   : > { %v23640_v26 = vpop.permute.xlu1 %13196 }
 0x71e   : > { %14323 = vmatmul.mubr.bf16.gmra.mxu0 %v13480_v28  ;;  %v13731_v22 = vsel %vm5193_vm1, %v23567_v0, %v23640_v26  ;;  %v13444_v0 = vsel %vm5193_vm1, %v13376_v27, %v23341_v18  ;;  %v23706_v18 = vsel %vm5193_vm1, %v13334_v63, %v23470_v4 }
 0x71f   : > { %14330 = vmatprep.mubr.bf16.mxu0 %v13837_v34  ;;  %13142 = vrot.lane.b32.xlu0 %v23646_v12, %s17606_s27  ;;  %v13484_v4 = vsel %vm13455_vm3, %v23706_v18, %v23297_v51 }
 0x720   : > { %13274 = vrot.lane.b32.xlu1 %v23643_v52, %s17607_s16  ;;  %v23658_v28 = vpop.permute.xlu0 %13310 }
 0x721   : > { %14675 = vmatmul.mubr.bf16.gmra.mxu1 %v13590_v35  ;;  %v23661_v34 = vpop.permute.xlu1 %13264  ;;  %v26437_v35 = vld [vmem:[#allocation88_spill] sm:$0xff] }
 0x722   : > { %v12281_v60 = vor.u32 %v12279_v43, %v26437_v35  ;;  %v13840_v1 = vsel %vm13455_vm3, %v13731_v22, %v23661_v34  ;;  %v23692_v43 = vsel %vm4988_vm0, %v12617_v10, %v12621_v54  ;;  %v26439_v22 = vld [vmem:[#allocation63_spill] sm:$0xff] }
 0x723   : > { %13144 = vrot.lane.b32.xlu0 %v23668_v45, %s17606_s27 }
 0x724   : > { %13208 = vrot.lane.b32.xlu1 %v26432_v36, %s17605_s29  ;;  %v23683_v37 = vpop.permute.xlu0 %13308  ;;  %v23702_v27 = vsel %vm18272_vm9, 0, %v12281_v60 }
 0x725   : > { %v13239_v41 = vpop.permute.xlu1 %13238  ;;  %v12626_v35 = vshll.u32 %v23702_v27, 16 }
 0x726   : > { %14331 = vmatmul.mubr.bf16.gmra.mxu0 %v13482_v19  ;;  %v13795_v44 = vsel %vm5193_vm1, %v23547_v50, %v13239_v41  ;;  %v13592_v50 = vsel %vm13455_vm3, %v13444_v0, %v23158_v31  ;;  %v13378_v19 = vsel %vm13318_vm2, %v26439_v22, %v23431_v49  ;;  %v13702_v49 = vsel %vm13318_vm2, %v22789_v3, %v23574_v25 }
 0x727   : > { %14338 = vmatprep.mubr.bf16.mxu0 %v13840_v1  ;;  %v13947_v7 = vsel %vm13455_vm3, %v13795_v44, %v23632_v21  ;;  %12946 = vrot.lane.b32.xlu0 %v23643_v52, %s17606_s27  ;;  %v23729_v60 = vsel %vm5193_vm1, %v13378_v19, %v23361_v6  ;;  %v13798_v54 = vsel %vm5193_vm1, %v13702_v49, %v13239_v41  ;;  %v12628_v59 = vrot.slane %v12626_v35, 1 }
 0x728   : > { %13276 = vrot.lane.b32.xlu1 %v23692_v43, %s17607_s16  ;;  %14682 = vmatprep.mubr.bf16.mxu1 %v13947_v7  ;;  %v23710_v11 = vpop.permute.xlu0 %13048  ;;  %v13594_v3 = vsel %vm13455_vm3, %v23729_v60, %v23188_v24  ;;  %v12624_v25 = vshrl.u32 %v23702_v27, 16  ;;  %v13952_v7 = vsel %vm13455_vm3, %v13798_v54, %v23632_v21  ;;  %v12873_v19 = vrot.slane %v23702_v27, 1 }
 0x729   : > { %14683 = vmatmul.mubr.bf16.gmra.mxu1 %v13592_v50  ;;  %v23712_v10 = vpop.permute.xlu1 %13242  ;;  %v13705_v54 = vsel %vm13318_vm2, %v22862_v46, %v23593_v39  ;;  %v13597_v39 = vsel %vm13455_vm3, %v13444_v0, %v23513_v42 }
 0x72a   : > { %v12629_v22 = vor.u32 %v12628_v59, %v12624_v25 }
 0x72b   : > { %13014 = vrot.lane.b32.xlu0 %v23646_v12, %s17605_s29 }
 0x72c   : > { %13078 = vrot.lane.b32.xlu1 %v23562_v47, %s17607_s16  ;;  %v23725_v31 = vpop.permute.xlu0 %13312 }
 0x72d   : > { %v13241_v1 = vpop.permute.xlu1 %13240 }
 0x72e   : > { %14339 = vmatmul.mubr.bf16.gmra.mxu0 %v13484_v4  ;;  %v13797_v51 = vsel %vm5193_vm1, %v23598_v40, %v13241_v1  ;;  %v26440_v40 = vld [vmem:[#allocation91_spill] sm:$0xff] }
 0x72f   : > { %v13950_v63 = vsel %vm13455_vm3, %v13797_v51, %v23683_v37  ;;  %12948 = vrot.lane.b32.xlu0 %v23692_v43, %s17606_s27  ;;  %v12631_v41 = vshll.u32 %v26440_v40, 16  ;;  %v12874_v21 = vrot.slane %v26440_v40, 1  ;;  %v12635_v25 = vshrl.u32 %v26440_v40, 16 }
 0x730   : > { %13080 = vrot.lane.b32.xlu1 %v26432_v36, %s17607_s16  ;;  %14690 = vmatprep.mubr.bf16.mxu1 %v13950_v63  ;;  %v23746_v6 = vpop.permute.xlu0 %13178  ;;  %v13799_v63 = vsel %vm5193_vm1, %v13705_v54, %v13241_v1 }
 0x731   : > { %14691 = vmatmul.mubr.bf16.gmra.mxu1 %v13594_v3  ;;  %v13131_v44 = vpop.permute.xlu1 %13130  ;;  %v12633_v35 = vrot.slane %v12631_v41, 1  ;;  %v23787_v46 = vsel %vm1787_vm6, %v12873_v19, %v12874_v21 }
 0x732   : > { %v23754_v50 = vsel %vm13318_vm2, %v26361_v15, %v13131_v44  ;;  %14698 = vmatprep.mubr.bf16.mxu1 %v13952_v7 }
 0x733   : > { %v13732_v24 = vsel %vm5193_vm1, %v23754_v50, %v23576_v32  ;;  %13016 = vrot.lane.b32.xlu0 %v23668_v45, %s17605_s29  ;;  %v26441_v32 = vld [vmem:[#allocation26_spill] sm:$0xff]  ;;  %v23779_v3 = vsel %vm4988_vm0, %v12629_v22, %v12633_v35  ;;  %v12294_v22 = vshll.u32 %v23017_v29, 16 }
 0x734   : > { %13210 = vrot.lane.b32.xlu1 %v23702_v27, %s17605_s29  ;;  %v13842_v15 = vsel %vm13455_vm3, %v13732_v24, %v23600_v20  ;;  %v23767_v4 = vpop.permute.xlu0 %13114  ;;  %v12465_v59 = vsel %vm18272_vm9, %v26441_v32, 0  ;;  %v12637_v24 = vor.u32 %v12635_v25, %v12633_v35 }
 0x735   : > { %v23772_v51 = vpop.permute.xlu1 %13066  ;;  %14346 = vmatprep.mubr.bf16.mxu0 %v13842_v15  ;;  %v12639_v41 = vshll.u32 %v12465_v59, 16  ;;  %v12876_v7 = vrot.slane %v12465_v59, 1  ;;  %v12296_v19 = vor.u32 %v12294_v22, %v23068_v56 }
 0x736   : > { %v13487_v20 = vsel %vm13455_vm3, %v23654_v14, %v23772_v51  ;;  %v13954_v14 = vsel %vm13455_vm3, %v13799_v63, %v23683_v37  ;;  %v13801_v37 = vsel %vm5193_vm1, %v13702_v49, %v23712_v10  ;;  %v13600_v49 = vsel %vm13455_vm3, %v23729_v60, %v23542_v5 }
 0x737   : > { %14347 = vmatmul.mubr.bf16.gmra.mxu0 %v13487_v20  ;;  %13146 = vrot.lane.b32.xlu0 %v23787_v46, %s17606_s27  ;;  %v23802_v0 = vsel %vm1787_vm6, %v12874_v21, %v12876_v7  ;;  %v12641_v15 = vrot.slane %v12639_v41, 1  ;;  %v23823_v21 = vsel %vm18272_vm9, 0, %v12296_v19  ;;  %v26443_v19 = vld [vmem:[#allocation98_spill] sm:$0xff] }
 0x738   : > { %13278 = vrot.lane.b32.xlu1 %v23779_v3, %s17607_s16  ;;  %v12979_v1 = vpop.permute.xlu0 %12978 }
 0x739   : > { %14699 = vmatmul.mubr.bf16.gmra.mxu1 %v13597_v39  ;;  %v23794_v44 = vpop.permute.xlu1 %13244  ;;  %v23814_v35 = vsel %vm4988_vm0, %v12637_v24, %v12641_v15  ;;  %v26442_v39 = vld [vmem:[#allocation44_spill] sm:$0xff]  ;;  %v12651_v15 = vshll.u32 %v26443_v19, 16 }
 0x73a   : > { %14706 = vmatprep.mubr.bf16.mxu1 %v13954_v14  ;;  %v13380_v25 = vsel %vm13318_vm2, %v26442_v39, %v12979_v1  ;;  %v13803_v7 = vsel %vm5193_vm1, %v13705_v54, %v23794_v44  ;;  %v12878_v39 = vrot.slane %v23823_v21, 1 }
 0x73b   : > { %13148 = vrot.lane.b32.xlu0 %v23802_v0, %s17606_s27  ;;  %v23848_v14 = vsel %vm5193_vm1, %v13380_v25, %v23612_v55  ;;  %v12644_v55 = vshrl.u32 %v23823_v21, 16  ;;  %v12879_v25 = vrot.slane %v26443_v19, 1 }
 0x73c   : > { %13212 = vrot.lane.b32.xlu1 %v26440_v40, %s17605_s29  ;;  %v13003_v32 = vpop.permute.xlu0 %13002 }
 0x73d   : > { %v13133_v20 = vpop.permute.xlu1 %13132 }
 0x73e   : > { %v23811_v29 = vsel %vm13318_vm2, %v22829_v61, %v13133_v20  ;;  %v26444_v20 = vld [vmem:[#allocation45_spill] sm:$0xff] }
 0x73f   : > { %v13733_v56 = vsel %vm5193_vm1, %v23811_v29, %v23640_v26  ;;  %12950 = vrot.lane.b32.xlu0 %v23779_v3, %s17606_s27  ;;  %v13957_v26 = vsel %vm13455_vm3, %v13801_v37, %v23658_v28 }
 0x740   : > { %13280 = vrot.lane.b32.xlu1 %v23814_v35, %s17607_s16  ;;  %v13844_v61 = vsel %vm13455_vm3, %v13733_v56, %v23661_v34  ;;  %v12981_v59 = vpop.permute.xlu0 %12980  ;;  %v12646_v34 = vshll.u32 %v23823_v21, 16  ;;  %v13960_v56 = vsel %vm13455_vm3, %v13803_v7, %v23725_v31  ;;  %v26446_v7 = vld [vmem:[#allocation92_spill] sm:$0xff] }
 0x741   : > { %14707 = vmatmul.mubr.bf16.gmra.mxu1 %v13600_v49  ;;  %v23832_v63 = vpop.permute.xlu1 %13068  ;;  %14354 = vmatprep.mubr.bf16.mxu0 %v13844_v61  ;;  %v26445_v49 = vld [vmem:[#allocation69_spill] sm:$0xff] }
 0x742   : > { %14714 = vmatprep.mubr.bf16.mxu1 %v13957_v26  ;;  %v13490_v60 = vsel %vm13455_vm3, %v23706_v18, %v23832_v63  ;;  %v12648_v22 = vrot.slane %v12646_v34, 1  ;;  %v13602_v18 = vsel %vm13455_vm3, %v23848_v14, %v23513_v42  ;;  %v13382_v42 = vsel %vm13318_vm2, %v26445_v49, %v12981_v59 }
 0x743   : > { %14355 = vmatmul.mubr.bf16.gmra.mxu0 %v13490_v60  ;;  %13018 = vrot.lane.b32.xlu0 %v23787_v46, %s17605_s29  ;;  %v23874_v26 = vsel %vm13318_vm2, %v22814_v13, %v23746_v6  ;;  %v12653_v59 = vrot.slane %v12651_v15, 1 }
 0x744   : > { %13082 = vrot.lane.b32.xlu1 %v23702_v27, %s17607_s16  ;;  %v13181_v41 = vpop.permute.xlu0 %13180  ;;  %v12649_v61 = vor.u32 %v12648_v22, %v12644_v55  ;;  %v12466_v22 = vsel %vm18272_vm9, %v26446_v7, 0  ;;  %v23909_v55 = vsel %vm1787_vm6, %v12878_v39, %v12879_v25 }
 0x745   : > { %v12935_v1 = vpop.permute.xlu1 %12934 }
 0x746   : > { %v13336_v54 = vsel %vm13318_vm2, %v26444_v20, %v12935_v1  ;;  %v13450_v1 = vsel %vm5193_vm1, %v13382_v42, %v23710_v11  ;;  %v13804_v11 = vsel %vm5193_vm1, %v23874_v26, %v23712_v10  ;;  %v12655_v10 = vshrl.u32 %v26443_v19, 16  ;;  %v26447_v42 = vld [vmem:[#allocation93_spill] sm:$0xff] }
 0x747   : > { %12952 = vrot.lane.b32.xlu0 %v23814_v35, %s17606_s27  ;;  %v23881_v60 = vsel %vm5193_vm1, %v13336_v54, %v13003_v32  ;;  %v23896_v32 = vsel %vm4988_vm0, %v12649_v61, %v12653_v59  ;;  %v13604_v15 = vsel %vm13455_vm3, %v13450_v1, %v23542_v5  ;;  %v12659_v54 = vshll.u32 %v12466_v22, 16 }
 0x748   : > { %13084 = vrot.lane.b32.xlu1 %v26440_v40, %s17607_s16  ;;  %v23859_v24 = vpop.permute.xlu0 %13116  ;;  %v13962_v49 = vsel %vm13455_vm3, %v13804_v11, %v23658_v28  ;;  %v12309_v61 = vshll.u32 %v26447_v42, 16  ;;  %v12657_v39 = vor.u32 %v12655_v10, %v12653_v59  ;;  %v23921_v5 = vsel %vm13318_vm2, %v26399_v53, %v13181_v41 }
 0x749   : > { %14715 = vmatmul.mubr.bf16.gmra.mxu1 %v13602_v18  ;;  %v23865_v37 = vpop.permute.xlu1 %13198  ;;  %v12661_v28 = vrot.slane %v12659_v54, 1  ;;  %v13805_v41 = vsel %vm5193_vm1, %v23921_v5, %v23794_v44  ;;  %v13610_v42 = vsel %vm13455_vm3, %v13450_v1, %v23859_v24 }
 0x74a   : > { %14722 = vmatprep.mubr.bf16.mxu1 %v13960_v56  ;;  %v13735_v13 = vsel %vm5193_vm1, %v23754_v50, %v23865_v37  ;;  %v13492_v50 = vsel %vm13455_vm3, %v23881_v60, %v23772_v51  ;;  %v12881_v51 = vrot.slane %v12466_v22, 1  ;;  %v12311_v7 = vor.u32 %v12309_v61, %v23201_v38 }
 0x74b   : > { %13020 = vrot.lane.b32.xlu0 %v23802_v0, %s17605_s29  ;;  %v23936_v53 = vsel %vm4988_vm0, %v12657_v39, %v12661_v28  ;;  %v13964_v54 = vsel %vm13455_vm3, %v13805_v41, %v23725_v31  ;;  %v12671_v39 = vshll.u32 %v23222_v23, 16  ;;  %v12884_v41 = vrot.slane %v23222_v23, 1 }
 0x74c   : > { %13214 = vrot.lane.b32.xlu1 %v23823_v21, %s17605_s29  ;;  %v13005_v34 = vpop.permute.xlu0 %13004  ;;  %v23945_v38 = vsel %vm18272_vm9, 0, %v12311_v7 }
 0x74d   : > { %v23890_v6 = vpop.permute.xlu1 %13266  ;;  %v12664_v61 = vshrl.u32 %v23945_v38, 16 }
 0x74e   : > { %v13847_v18 = vsel %vm13455_vm3, %v13735_v13, %v23890_v6  ;;  %v23926_v13 = vsel %vm1787_vm6, %v12879_v25, %v12881_v51 }
 0x74f   : > { %14362 = vmatprep.mubr.bf16.mxu0 %v13847_v18  ;;  %13150 = vrot.lane.b32.xlu0 %v23909_v55, %s17606_s27  ;;  %v26448_v18 = vld [vmem:[#allocation30_spill] sm:$0xff] }
 0x750   : > { %13282 = vrot.lane.b32.xlu1 %v23896_v32, %s17607_s16  ;;  %14363 = vmatmul.mubr.bf16.gmra.mxu0 %v13492_v50  ;;  %v12983_v20 = vpop.permute.xlu0 %12982  ;;  %v13607_v50 = vsel %vm13455_vm3, %v23848_v14, %v23767_v4  ;;  %v12666_v14 = vshll.u32 %v23945_v38, 16 }
 0x751   : > { %14723 = vmatmul.mubr.bf16.gmra.mxu1 %v13604_v15  ;;  %v12937_v56 = vpop.permute.xlu1 %12936 }
 0x752   : > { %14730 = vmatprep.mubr.bf16.mxu1 %v13962_v49  ;;  %v13338_v59 = vsel %vm13318_vm2, %v26448_v18, %v12937_v56  ;;  %v12668_v51 = vrot.slane %v12666_v14, 1 }
 0x753   : > { %13152 = vrot.lane.b32.xlu0 %v23926_v13, %s17606_s27  ;;  %v23948_v25 = vsel %vm5193_vm1, %v13338_v59, %v13005_v34  ;;  %v12883_v59 = vrot.slane %v23945_v38, 1 }
 0x754   : > { %13216 = vrot.lane.b32.xlu1 %v26443_v19, %s17605_s29  ;;  %v13051_v22 = vpop.permute.xlu0 %13050  ;;  %v12669_v18 = vor.u32 %v12668_v51, %v12664_v61  ;;  %v12675_v51 = vshrl.u32 %v23222_v23, 16 }
 0x755   : > { %v23933_v11 = vpop.permute.xlu1 %13200 }
 0x756   : > { %v13737_v44 = vsel %vm5193_vm1, %v23811_v29, %v23933_v11  ;;  %v13494_v29 = vsel %vm13455_vm3, %v23948_v25, %v23832_v63 }
 0x757   : > { %12954 = vrot.lane.b32.xlu0 %v23896_v32, %s17606_s27 }
 0x758   : > { %13284 = vrot.lane.b32.xlu1 %v23936_v53, %s17607_s16  ;;  %v13315_v15 = vpop.permute.xlu0 %13314 }
 0x759   : > { %14731 = vmatmul.mubr.bf16.gmra.mxu1 %v13607_v50  ;;  %v23958_v10 = vpop.permute.xlu1 %13268  ;;  %v26449_v50 = vld [vmem:[#allocation52_spill] sm:$0xff] }
 0x75a   : > { %14738 = vmatprep.mubr.bf16.mxu1 %v13964_v54  ;;  %v13850_v34 = vsel %vm13455_vm3, %v13737_v44, %v23958_v10  ;;  %v12673_v44 = vrot.slane %v12671_v39, 1  ;;  %v26451_v39 = vld [vmem:[#allocation80_spill] sm:$0xff] }
 0x75b   : > { %14370 = vmatprep.mubr.bf16.mxu0 %v13850_v34  ;;  %13022 = vrot.lane.b32.xlu0 %v23909_v55, %s17605_s29 }
 0x75c   : > { %13086 = vrot.lane.b32.xlu1 %v23823_v21, %s17607_s16  ;;  %14371 = vmatmul.mubr.bf16.gmra.mxu0 %v13494_v29  ;;  %v12985_v56 = vpop.permute.xlu0 %12984 }
 0x75d   : > { %v13247_v31 = vpop.permute.xlu1 %13246 }
 0x75e   : > { %v13807_v49 = vsel %vm5193_vm1, %v23874_v26, %v13247_v31  ;;  %v24007_v31 = vsel %vm4988_vm0, %v12669_v18, %v12673_v44  ;;  %v12677_v18 = vor.u32 %v12675_v51, %v12673_v44 }
 0x75f   : > { %12956 = vrot.lane.b32.xlu0 %v23936_v53, %s17606_s27  ;;  %v13967_v28 = vsel %vm13455_vm3, %v13807_v49, %v13315_v15  ;;  %v13384_v15 = vsel %vm13318_vm2, %v26449_v50, %v12983_v20  ;;  %v24015_v20 = vsel %vm1787_vm6, %v12883_v59, %v12884_v41  ;;  %v26452_v50 = vld [vmem:[#allocation20_spill] sm:$0xff] }
 0x760   : > { %13088 = vrot.lane.b32.xlu1 %v26443_v19, %s17607_s16  ;;  %v13053_v63 = vpop.permute.xlu0 %13052  ;;  %v13452_v34 = vsel %vm5193_vm1, %v13384_v15, %v13051_v22  ;;  %v13386_v15 = vsel %vm13318_vm2, %v26452_v50, %v12985_v56 }
 0x761   : > { %14739 = vmatmul.mubr.bf16.gmra.mxu1 %v13610_v42  ;;  %v13135_v7 = vpop.permute.xlu1 %13134  ;;  %v13612_v22 = vsel %vm13455_vm3, %v13452_v34, %v23767_v4  ;;  %v13454_v44 = vsel %vm5193_vm1, %v13386_v15, %v13053_v63 }
 0x762   : > { %v23985_v26 = vsel %vm13318_vm2, %v23238_v2, %v13135_v7  ;;  %14746 = vmatprep.mubr.bf16.mxu1 %v13967_v28  ;;  %v12324_v7 = vshll.u32 %v26451_v39, 16  ;;  %v13614_v63 = vsel %vm13455_vm3, %v13454_v44, %v23859_v24  ;;  %v26454_v39 = vld [vmem:[#allocation83_spill] sm:$0xff] }
 0x763   : > { %v13738_v1 = vsel %vm5193_vm1, %v23985_v26, %v23865_v37  ;;  %13024 = vrot.lane.b32.xlu0 %v23926_v13, %s17605_s29  ;;  %v26450_v37 = vld [vmem:[#allocation97_spill] sm:$0xff]  ;;  %v12889_v15 = vrot.slane %v26454_v39, 1 }
 0x764   : > { %13218 = vrot.lane.b32.xlu1 %v23945_v38, %s17605_s29  ;;  %v13852_v2 = vsel %vm13455_vm3, %v13738_v1, %v23890_v6  ;;  %v13317_v54 = vpop.permute.xlu0 %13316  ;;  %v12467_v29 = vsel %vm18272_vm9, %v26450_v37, 0  ;;  %v12326_v59 = vor.u32 %v12324_v7, %v23299_v57  ;;  %v12691_v7 = vshll.u32 %v26454_v39, 16 }
 0x765   : > { %v24001_v14 = vpop.permute.xlu1 %13070  ;;  %14378 = vmatprep.mubr.bf16.mxu0 %v13852_v2  ;;  %v12679_v42 = vshll.u32 %v12467_v29, 16 }
 0x766   : > { %v13497_v6 = vsel %vm13455_vm3, %v23881_v60, %v24001_v14  ;;  %v12886_v60 = vrot.slane %v12467_v29, 1  ;;  %v24048_v56 = vsel %vm18272_vm9, 0, %v12326_v59 }
 0x767   : > { %14379 = vmatmul.mubr.bf16.gmra.mxu0 %v13497_v6  ;;  %13154 = vrot.lane.b32.xlu0 %v24015_v20, %s17606_s27  ;;  %v12681_v2 = vrot.slane %v12679_v42, 1  ;;  %v26453_v6 = vld [vmem:[#allocation152_spill] sm:$0xff] }
 0x768   : > { %13286 = vrot.lane.b32.xlu1 %v24007_v31, %s17607_s16  ;;  %v12939_v49 = vpop.permute.xlu0 %12938  ;;  %v24029_v1 = vsel %vm1787_vm6, %v12884_v41, %v12886_v60  ;;  %v12684_v60 = vshrl.u32 %v24048_v56, 16 }
 0x769   : > { %14747 = vmatmul.mubr.bf16.gmra.mxu1 %v13612_v22  ;;  %v13249_v61 = vpop.permute.xlu1 %13248  ;;  %v24040_v41 = vsel %vm4988_vm0, %v12677_v18, %v12681_v2  ;;  %v12686_v22 = vshll.u32 %v24048_v56, 16  ;;  %v13340_v42 = vsel %vm13318_vm2, %v23110_v48, %v12939_v49  ;;  %v26455_v18 = vld [vmem:[#allocation153_spill] sm:$0xff]  ;;  %v26456_v49 = vld [vmem:[#allocation3_spill] sm:$0xff]  ;;  %v12693_v2 = vrot.slane %v12691_v7, 1 }
 0x76a   : > { %v13809_v28 = vsel %vm5193_vm1, %v23921_v5, %v13249_v61 }
 0x76b   : > { %v13970_v4 = vsel %vm13455_vm3, %v13809_v28, %v13317_v54  ;;  %13156 = vrot.lane.b32.xlu0 %v24029_v1, %s17606_s27  ;;  %v12688_v51 = vrot.slane %v12686_v22, 1 }
 0x76c   : > { %13220 = vrot.lane.b32.xlu1 %v23222_v23, %s17605_s29  ;;  %14754 = vmatprep.mubr.bf16.mxu1 %v13970_v4  ;;  %v13007_v5 = vpop.permute.xlu0 %13006 }
 0x76d   : > { %v13137_v34 = vpop.permute.xlu1 %13136  ;;  %v12689_v59 = vor.u32 %v12688_v51, %v12684_v60  ;;  %v12695_v51 = vshrl.u32 %v26454_v39, 16 }
 0x76e   : > { %v13645_v54 = vsel %vm13318_vm2, %v23329_v58, %v13137_v34  ;;  %v26457_v34 = vld [vmem:[#allocation79_spill] sm:$0xff] }
 0x76f   : > { %v13739_v57 = vsel %vm5193_vm1, %v13645_v54, %v23933_v11  ;;  %12958 = vrot.lane.b32.xlu0 %v24007_v31, %s17606_s27 }
 0x770   : > { %13288 = vrot.lane.b32.xlu1 %v24040_v41, %s17607_s16  ;;  %v13854_v37 = vsel %vm13455_vm3, %v13739_v57, %v23958_v10  ;;  %v12941_v58 = vpop.permute.xlu0 %12940  ;;  %v12468_v57 = vsel %vm18272_vm9, %v26457_v34, 0 }
 0x771   : > { %14755 = vmatmul.mubr.bf16.gmra.mxu1 %v13614_v63  ;;  %v13073_v29 = vpop.permute.xlu1 %13072  ;;  %14386 = vmatprep.mubr.bf16.mxu0 %v13854_v37  ;;  %v26458_v37 = vld [vmem:[#allocation49_spill] sm:$0xff] }
 0x772   : > { %v13500_v11 = vsel %vm13455_vm3, %v23948_v25, %v13073_v29  ;;  %17025 = vmatprep.mubr.msk.bf16.mxu1 %vm13318_vm2, %v26453_v6  ;;  %v24070_v25 = vsel %vm5193_vm1, %v13340_v42, %v13007_v5 }
 0x773   : > { %14387 = vmatmul.mubr.bf16.gmra.mxu0 %v13500_v11  ;;  %13026 = vrot.lane.b32.xlu0 %v24015_v20, %s17605_s29  ;;  %v13502_v50 = vsel %vm13455_vm3, %v24070_v25, %v24001_v14  ;;  %v24098_v14 = vsel %vm4988_vm0, %v12689_v59, %v12693_v2  ;;  %v13342_v11 = vsel %vm13318_vm2, %v26458_v37, %v12941_v58 }
 0x774   : > { %13090 = vrot.lane.b32.xlu1 %v23945_v38, %s17607_s16  ;;  %v13009_v24 = vpop.permute.xlu0 %13008  ;;  %v12697_v59 = vor.u32 %v12695_v51, %v12693_v2 }
 0x775   : > { %v13203_v10 = vpop.permute.xlu1 %13202  ;;  %v13410_v22 = vsel %vm5193_vm1, %v13342_v11, %v13009_v24 }
 0x776   : > { %v13741_v28 = vsel %vm5193_vm1, %v23985_v26, %v13203_v10  ;;  %v12888_v26 = vrot.slane %v24048_v56, 1 }
 0x777   : > { %12960 = vrot.lane.b32.xlu0 %v24040_v41, %s17606_s27 }
 0x778   : > { %13092 = vrot.lane.b32.xlu1 %v23222_v23, %s17607_s16  ;;  %v24105_v6 = vsel %vm1787_vm6, %v12888_v26, %v12889_v15  ;;  %v26461_v26 = vld [vmem:[#allocation78_spill] sm:$0xff] }
 0x779   : > { %v13139_v61 = vpop.permute.xlu0 %13138  ;;  %17026 = vmatmul.mubr.msk.bf16.vlgmr.msra.gmra.mxu1 %vm13318_vm2, %v26455_v18  ;;  %v26460_v18 = vld [vmem:[#allocation81_spill] sm:$0xff] }
 0x77a   : > { %v13271_v48 = vpop.permute.xlu1 %13270  ;;  %17029 = vmatprep.mubr.msk.bf16.mxu1 %vm13318_vm2, %v26456_v49  ;;  %v13648_v63 = vsel %vm13318_vm2, %v23488_v62, %v13139_v61  ;;  %v12699_v62 = vshll.u32 %v12468_v57, 16  ;;  %v26459_v61 = vld [vmem:[#allocation34_spill] sm:$0xff] }
 0x77b   : > { %v13857_v4 = vsel %vm13455_vm3, %v13741_v28, %v13271_v48  ;;  %13028 = vrot.lane.b32.xlu0 %v24029_v1, %s17605_s29  ;;  %v13744_v7 = vsel %vm5193_vm1, %v13648_v63, %v13203_v10  ;;  %v12891_v28 = vrot.slane %v12468_v57, 1 }
 0x77c   : > { %13222 = vrot.lane.b32.xlu1 %v24048_v56, %s17605_s29  ;;  %14394 = vmatprep.mubr.bf16.mxu0 %v13857_v4  ;;  %v12339_v4 = vshll.u32 %v26460_v18, 16  ;;  %v13862_v34 = vsel %vm13455_vm3, %v13744_v7, %v13271_v48 }
 0x77d   : > { %14395 = vmatmul.mubr.bf16.gmra.mxu0 %v13502_v50  ;;  %v13141_v44 = vpop.permute.xlu0 %13140  ;;  %v24125_v50 = vsel %vm1787_vm6, %v12889_v15, %v12891_v28  ;;  %v26464_v28 = vld [vmem:[#allocation86_spill] sm:$0xff] }
 0x77e   : > { %v13205_v5 = vpop.permute.xlu1 %13204  ;;  %v12341_v10 = vor.u32 %v12339_v4, %v26461_v26  ;;  %v13651_v37 = vsel %vm13318_vm2, %v23552_v33, %v13141_v44  ;;  %v26463_v44 = vld [vmem:[#allocation70_spill] sm:$0xff]  ;;  %v12711_v18 = vshll.u32 %v26464_v28, 16  ;;  %v26465_v4 = vld [vmem:[#allocation72_spill] sm:$0xff]  ;;  %v12715_v9 = vshrl.u32 %v26464_v28, 16 }
 0x77f   : > { %13158 = vrot.lane.b32.xlu0 %v24105_v6, %s17606_s27  ;;  %v13743_v42 = vsel %vm5193_vm1, %v13645_v54, %v13205_v5  ;;  %v13504_v54 = vsel %vm13455_vm3, %v13410_v22, %v13073_v29  ;;  %v13745_v33 = vsel %vm5193_vm1, %v13651_v37, %v13205_v5 }
 0x780   : > { %13290 = vrot.lane.b32.xlu1 %v24098_v14, %s17607_s16  ;;  %v24142_v48 = vsel %vm18272_vm9, 0, %v12341_v10 }
 0x781   : > { %17030 = vmatmul.mubr.msk.bf16.gmra.mxu1 %vm13318_vm2, %v26459_v61  ;;  %v24114_v60 = vpop.permute.xlu0 %12942  ;;  %26462 = vst [vmem:[#allocation111_spill] sm:$0xff] %v24142_v48  ;;  %v12706_v51 = vshll.u32 %v24142_v48, 16  ;;  %v12893_v10 = vrot.slane %v24142_v48, 1 }
 0x782   : > { %v13273_v58 = vpop.permute.xlu1 %13272  ;;  %17033 = vmatprep.mubr.msk.bf16.mxu1 %vm13318_vm2, %v26456_v49  ;;  %v12701_v49 = vrot.slane %v12699_v62, 1 }
 0x783   : > { %v13860_v24 = vsel %vm13455_vm3, %v13743_v42, %v13273_v58  ;;  %13160 = vrot.lane.b32.xlu0 %v24125_v50, %s17606_s27  ;;  %v13864_v42 = vsel %vm13455_vm3, %v13745_v33, %v13273_v58  ;;  %v12708_v7 = vrot.slane %v12706_v51, 1  ;;  %v26466_v51 = vld [vmem:[#allocation85_spill] sm:$0xff] }
 0x784   : > { %13224 = vrot.lane.b32.xlu1 %v26454_v39, %s17605_s29  ;;  %14402 = vmatprep.mubr.bf16.mxu0 %v13860_v24  ;;  %v24136_v29 = vsel %vm4988_vm0, %v12697_v59, %v12701_v49 }
 0x785   : > { %14403 = vmatmul.mubr.bf16.gmra.mxu0 %v13504_v54  ;;  %v13011_v2 = vpop.permute.xlu0 %13010 }
 0x786   : > { %v24131_v57 = vpop.permute.xlu1 %13074  ;;  %14410 = vmatprep.mubr.bf16.mxu0 %v13862_v34  ;;  %v12894_v34 = vrot.slane %v26464_v28, 1 }
 0x787   : > { %12962 = vrot.lane.b32.xlu0 %v24098_v14, %s17606_s27  ;;  %v13507_v62 = vsel %vm13455_vm3, %v24070_v25, %v24131_v57  ;;  %v12704_v25 = vshrl.u32 %v24142_v48, 16 }
 0x788   : > { %13292 = vrot.lane.b32.xlu1 %v24136_v29, %s17607_s16 }
 0x789   : > { %17034 = vmatmul.mubr.msk.bf16.gmra.mxu1 %vm13318_vm2, %v26459_v61  ;;  %v24150_v11 = vpop.permute.xlu0 %12944  ;;  %v12709_v59 = vor.u32 %v12708_v7, %v12704_v25  ;;  %v13344_v25 = vsel %vm13318_vm2, %v23406_v30, %v24114_v60 }
 0x78a   : > { %v24148_v15 = vpop.permute.xlu1 %13076  ;;  %17037 = vmatprep.mubr.msk.bf16.mxu1 %vm13318_vm2, %v26463_v44 }
 0x78b   : > { %13030 = vrot.lane.b32.xlu0 %v24105_v6, %s17605_s29  ;;  %v13510_v54 = vsel %vm13455_vm3, %v13410_v22, %v24148_v15  ;;  %v12713_v22 = vrot.slane %v12711_v18, 1  ;;  %v24206_v18 = vsel %vm1787_vm6, %v12893_v10, %v12894_v34  ;;  %v26468_v10 = vld [vmem:[#allocation95_spill] sm:$0xff] }
 0x78c   : > { %13094 = vrot.lane.b32.xlu1 %v24048_v56, %s17607_s16 }
 0x78d   : > { %14411 = vmatmul.mubr.bf16.gmra.mxu0 %v13507_v62  ;;  %v13013_v5 = vpop.permute.xlu0 %13012  ;;  %v12469_v62 = vsel %vm18272_vm9, %v26466_v51, 0  ;;  %v24198_v7 = vsel %vm4988_vm0, %v12709_v59, %v12713_v22 }
 0x78e   : > { %v24164_v61 = vpop.permute.xlu1 %13206  ;;  %14418 = vmatprep.mubr.bf16.mxu0 %v13864_v42  ;;  %v12719_v59 = vshll.u32 %v12469_v62, 16 }
 0x78f   : > { %12964 = vrot.lane.b32.xlu0 %v24136_v29, %s17606_s27  ;;  %v13747_v26 = vsel %vm5193_vm1, %v13648_v63, %v24164_v61 }
 0x790   : > { %13096 = vrot.lane.b32.xlu1 %v26454_v39, %s17607_s16 }
 0x791   : > { %17038 = vmatmul.mubr.msk.bf16.gmra.mxu1 %vm13318_vm2, %v26465_v4  ;;  %v13143_v24 = vpop.permute.xlu0 %13142 }
 0x792   : > { %v24174_v58 = vpop.permute.xlu1 %13274  ;;  %17041 = vmatprep.mubr.msk.bf16.mxu1 %vm13318_vm2, %v26463_v44 }
 0x793   : > { %v13867_v33 = vsel %vm13455_vm3, %v13747_v26, %v24174_v58  ;;  %13032 = vrot.lane.b32.xlu0 %v24125_v50, %s17605_s29 }
 0x794   : > { %13226 = vrot.lane.b32.xlu1 %v24142_v48, %s17605_s29  ;;  %v24186_v49 = vpop.f32.mrf.mxu0 }
 0x795   : > { %14419 = vmatmul.mubr.bf16.gmra.mxu0 %v13510_v54  ;;  %v13145_v63 = vpop.permute.xlu0 %13144  ;;  %v13412_v54 = vsel %vm5193_vm1, %v13344_v25, %v13011_v2  ;;  %v12717_v2 = vor.u32 %v12715_v9, %v12713_v22  ;;  %v12721_v22 = vrot.slane %v12719_v59, 1 }
 0x796   : > { %v24192_v44 = vpop.permute.xlu1 %13208  ;;  %14426 = vmatprep.mubr.bf16.mxu0 %v13867_v33  ;;  %v14254_v42 = vpop.f32.mrf.mxu0  ;;  %v12896_v33 = vrot.slane %v12469_v62, 1  ;;  %v13512_v25 = vsel %vm13455_vm3, %v13412_v54, %v24131_v57  ;;  %v13654_v57 = vsel %vm13318_vm2, %v23643_v52, %v13143_v24 }
 0x797   : > { %13162 = vrot.lane.b32.xlu0 %v24206_v18, %s17606_s27  ;;  %v13749_v42 = vsel %vm5193_vm1, %v13651_v37, %v24192_v44 }
 0x798   : > { %13294 = vrot.lane.b32.xlu1 %v24198_v7, %s17607_s16  ;;  %v24209_v26 = vpop.f32.mrf.mxu0 }
 0x799   : > { %26467 = vst [vmem:[#allocation116_spill] sm:$0xff] %v24209_v26  ;;  %17042 = vmatmul.mubr.msk.bf16.gmra.mxu1 %vm13318_vm2, %v26465_v4  ;;  %v24216_v60 = vpop.permute.xlu0 %12946  ;;  %v24227_v4 = vsel %vm1787_vm6, %v12894_v34, %v12896_v33  ;;  %v24241_v34 = vsel %vm4988_vm0, %v12717_v2, %v12721_v22  ;;  %v13346_v33 = vsel %vm13318_vm2, %v26417_v16, %v24150_v11 }
 0x79a   : > { %v13277_v30 = vpop.permute.xlu1 %13276  ;;  %v14257_v51 = vpop.f32.mrf.mxu0  ;;  %17045 = vmatprep.mubr.msk.bf16.mxu1 %vm13318_vm2, %v26468_v10  ;;  %v13414_v59 = vsel %vm5193_vm1, %v13346_v33, %v13013_v5  ;;  %v13750_v16 = vsel %vm5193_vm1, %v13654_v57, %v24164_v61 }
 0x79b   : > { %v13870_v62 = vsel %vm13455_vm3, %v13749_v42, %v13277_v30  ;;  %13164 = vrot.lane.b32.xlu0 %v24227_v4, %s17606_s27  ;;  %v13514_v5 = vsel %vm13455_vm3, %v13414_v59, %v24148_v15 }
 0x79c   : > { %13228 = vrot.lane.b32.xlu1 %v26464_v28, %s17605_s29 }
 0x79d   : > { %14427 = vmatmul.mubr.bf16.gmra.mxu0 %v13512_v25  ;;  %v24236_v37 = vpop.permute.xlu0 %13014  ;;  %v26469_v25 = vld [vmem:[#allocation99_spill] sm:$0xff] }
 0x79e   : > { %v24229_v26 = vpop.f32.mrf.mxu0  ;;  %v24234_v9 = vpop.permute.xlu1 %13078  ;;  %14434 = vmatprep.mubr.bf16.mxu0 %v13870_v62  ;;  %v13872_v62 = vsel %vm13455_vm3, %v13750_v16, %v24174_v58 }
 0x79f   : > { %12966 = vrot.lane.b32.xlu0 %v24198_v7, %s17606_s27 }
 0x7a0   : > { %v14262_v51 = vpop.f32.mrf.mxu0  ;;  %13296 = vrot.lane.b32.xlu1 %v24241_v34, %s17607_s16 }
 0x7a1   : > { %17046 = vmatmul.mubr.msk.bf16.gmra.mxu1 %vm13318_vm2, %v26469_v25  ;;  %v24257_v24 = vpop.permute.xlu0 %12948 }
 0x7a2   : > { %v24249_v42 = vpop.f32.mrf.mxu0  ;;  %v24255_v52 = vpop.permute.xlu1 %13080  ;;  %17049 = vmatprep.mubr.msk.bf16.mxu1 %vm13318_vm2, %v26468_v10  ;;  %v13657_v10 = vsel %vm13318_vm2, %v23692_v43, %v13145_v63  ;;  %v13517_v63 = vsel %vm13455_vm3, %v13412_v54, %v24234_v9  ;;  %v26474_v54 = vld [vmem:[#allocation87_spill] sm:$0xff] }
 0x7a3   : > { %13034 = vrot.lane.b32.xlu0 %v24206_v18, %s17605_s29  ;;  %v13751_v33 = vsel %vm5193_vm1, %v13657_v10, %v24192_v44 }
 0x7a4   : > { %v14265_v11 = vpop.f32.mrf.mxu0  ;;  %13098 = vrot.lane.b32.xlu1 %v24142_v48, %s17607_s16 }
 0x7a5   : > { %14435 = vmatmul.mubr.bf16.gmra.mxu0 %v13514_v5  ;;  %v13017_v22 = vpop.permute.xlu0 %13016  ;;  %v26471_v11 = vld [vmem:[#allocation77_spill] sm:$0xff]  ;;  %v26472_v5 = vld [vmem:[#allocation66_spill] sm:$0xff] }
 0x7a6   : > { %v24267_v2 = vpop.f32.mrf.mxu0  ;;  %v24273_v61 = vpop.permute.xlu1 %13210  ;;  %14442 = vmatprep.mubr.bf16.mxu0 %v13872_v62 }
 0x7a7   : > { %12968 = vrot.lane.b32.xlu0 %v24241_v34, %s17606_s27 }
 0x7a8   : > { %v14270_v51 = vpop.f32.mrf.mxu0  ;;  %13100 = vrot.lane.b32.xlu1 %v26464_v28, %s17607_s16  ;;  %v26473_v28 = vld [vmem:[#allocation48_spill] sm:$0xff] }
 0x7a9   : > { %17050 = vmatmul.mubr.msk.bf16.gmra.mxu1 %vm13318_vm2, %v26469_v25  ;;  %v13147_v43 = vpop.permute.xlu0 %13146  ;;  %v13874_v25 = vsel %vm13455_vm3, %v13751_v33, %v13277_v30  ;;  %v13520_v30 = vsel %vm13455_vm3, %v13414_v59, %v24255_v52  ;;  %v13753_v33 = vsel %vm5193_vm1, %v13654_v57, %v24273_v61  ;;  %v13348_v59 = vsel %vm13318_vm2, %v23562_v47, %v24216_v60  ;;  %v26475_v57 = vld [vmem:[#allocation43_spill] sm:$0xff] }
 0x7aa   : > { %v24279_v15 = vpop.f32.mrf.mxu0  ;;  %v13279_v58 = vpop.permute.xlu1 %13278  ;;  %17053 = vmatprep.mubr.msk.bf16.mxu1 %vm13318_vm2, %v26471_v11 }
 0x7ab   : > { %26470 = vst [vmem:[#allocation115_spill] sm:$0xff] %v24279_v15  ;;  %13036 = vrot.lane.b32.xlu0 %v24227_v4, %s17605_s29 }
 0x7ac   : > { %v14273_v16 = vpop.f32.mrf.mxu0  ;;  %13230 = vrot.lane.b32.xlu1 %v26472_v5, %s17605_s29 }
 0x7ad   : > { %14443 = vmatmul.mubr.bf16.gmra.mxu0 %v13517_v63  ;;  %v13149_v16 = vpop.permute.xlu0 %13148 }
 0x7ae   : > { %v24293_v62 = vpop.f32.mrf.mxu0  ;;  %v13213_v44 = vpop.permute.xlu1 %13212  ;;  %14450 = vmatprep.mubr.bf16.mxu0 %v13874_v25  ;;  %v13877_v25 = vsel %vm13455_vm3, %v13753_v33, %v13279_v58 }
 0x7af   : > { %v13755_v47 = vsel %vm5193_vm1, %v13657_v10, %v13213_v44 }
 0x7b0   : > { %v14278_v51 = vpop.f32.mrf.mxu0  ;;  %13298 = vrot.lane.b32.xlu1 %v26473_v28, %s17607_s16 }
 0x7b1   : > { %17054 = vmatmul.mubr.msk.bf16.gmra.mxu1 %vm13318_vm2, %v26474_v54  ;;  %v24314_v63 = vpop.permute.xlu0 %12950 }
 0x7b2   : > { %v24300_v48 = vpop.f32.mrf.mxu0  ;;  %v13281_v5 = vpop.permute.xlu1 %13280  ;;  %17057 = vmatprep.mubr.msk.bf16.mxu1 %vm13318_vm2, %v26471_v11 }
 0x7b4   : > { %v14281_v15 = vpop.f32.mrf.mxu0  ;;  %13232 = vrot.lane.b32.xlu1 %v26429_v8, %s17605_s29  ;;  %v13416_v8 = vsel %vm5193_vm1, %v13348_v59, %v24236_v37  ;;  %v13880_v37 = vsel %vm13455_vm3, %v13755_v47, %v13281_v5 }
 0x7b5   : > { %14451 = vmatmul.mubr.bf16.gmra.mxu0 %v13520_v30  ;;  %v24332_v33 = vpop.permute.xlu0 %13018  ;;  %v13522_v60 = vsel %vm13455_vm3, %v13416_v8, %v24234_v9 }
 0x7b6   : > { %v24312_v28 = vpop.f32.mrf.mxu0  ;;  %v24317_v15 = vpop.permute.xlu1 %13082  ;;  %14458 = vmatprep.mubr.bf16.mxu0 %v13877_v25 }
 0x7b8   : > { %v14286_v11 = vpop.f32.mrf.mxu0  ;;  %13300 = vrot.lane.b32.xlu1 %v26475_v57, %s17607_s16 }
 0x7b9   : > { %17058 = vmatmul.mubr.msk.bf16.gmra.mxu1 %vm13318_vm2, %v26474_v54  ;;  %v13660_v54 = vsel %vm13318_vm2, %v23779_v3, %v13147_v43 }
 0x7ba   : > { %v24326_v51 = vpop.f32.mrf.mxu0  ;;  %v24330_v30 = vpop.permute.xlu1 %13084  ;;  %17061 = vmatprep.mubr.msk.bf16.mxu1 %vm13318_vm2, %v23483_v17 }
 0x7bb   : > { %26476 = vst [vmem:[#allocation114_spill] sm:$0xff] %v24326_v51  ;;  %v24350_v51 = vpop.permute.xlu0 %12952 }
 0x7bc   : > { %v14289_v25 = vpop.f32.mrf.mxu0 }
 0x7bd   : > { %14459 = vmatmul.mubr.bf16.gmra.mxu0 %v13522_v60  ;;  %v13350_v25 = vsel %vm13318_vm2, %v26432_v36, %v24257_v24  ;;  %v26478_v60 = vld [vmem:[#allocation112_spill] sm:$0xff] }
 0x7be   : > { %v24339_v11 = vpop.f32.mrf.mxu0  ;;  %v24342_v59 = vpop.permute.xlu1 %13214  ;;  %14466 = vmatprep.mubr.bf16.mxu0 %v13880_v37  ;;  %v13418_v10 = vsel %vm5193_vm1, %v13350_v25, %v13017_v22  ;;  %v13756_v37 = vsel %vm5193_vm1, %v13660_v54, %v24273_v61 }
 0x7bf   : > { %v13524_v36 = vsel %vm13455_vm3, %v13418_v10, %v24255_v52  ;;  %v13882_v22 = vsel %vm13455_vm3, %v13756_v37, %v13279_v58  ;;  %v13021_v25 = vpop.permute.xlu0 %13020 }
 0x7c0   : > { %v14294_v57 = vpop.f32.mrf.mxu0 }
 0x7c1   : > { %17062 = vmatmul.mubr.msk.bf16.gmra.mxu1 %vm13318_vm2, %v26478_v60  ;;  %v13663_v57 = vsel %vm13318_vm2, %v23814_v35, %v13149_v16  ;;  %v13527_v35 = vsel %vm13455_vm3, %v13416_v8, %v24317_v15 }
 0x7c2   : > { %v24352_v9 = vpop.f32.mrf.mxu0  ;;  %v24356_v47 = vpop.permute.xlu1 %13282  ;;  %17065 = vmatprep.mubr.msk.bf16.mxu1 %vm13318_vm2, %v23483_v17  ;;  %v13757_v52 = vsel %vm5193_vm1, %v13663_v57, %v13213_v44 }
 0x7c3   : > { %26477 = vst [vmem:[#allocation113_spill] sm:$0xff] %v24352_v9  ;;  %v13151_v37 = vpop.permute.xlu0 %13150 }
 0x7c4   : > { %v14297_v3 = vpop.f32.mrf.mxu0 }
 0x7c5   : > { %14467 = vmatmul.mubr.bf16.gmra.mxu0 %v13524_v36 }
 0x7c6   : > { %v24364_v24 = vpop.f32.mrf.mxu0  ;;  %v24367_v43 = vpop.permute.xlu1 %13216  ;;  %14474 = vmatprep.mubr.bf16.mxu0 %v13882_v22  ;;  %v13884_v22 = vsel %vm13455_vm3, %v13757_v52, %v13281_v5  ;;  %v13530_v5 = vsel %vm13455_vm3, %v13418_v10, %v24330_v30  ;;  %v13759_v52 = vsel %vm5193_vm1, %v13660_v54, %v24342_v59 }
 0x7c7   : > { %v13153_v8 = vpop.permute.xlu0 %13152 }
 0x7c8   : > { %v14302_v61 = vpop.f32.mrf.mxu0 }
 0x7c9   : > { %v24373_v9 = vpop.f32.mrf.mxu1  ;;  %17066 = vmatmul.mubr.msk.bf16.gmra.mxu1 %vm13318_vm2, %v26478_v60 }
 0x7ca   : > { %v24371_v3 = vpop.f32.mrf.mxu0  ;;  %26480 = vst [vmem:[#allocation118_spill] sm:$0xff] %v24373_v9  ;;  %v24377_v17 = vpop.permute.xlu1 %13284  ;;  %17069 = vmatprep.mubr.msk.bf16.mxu1 %vm13318_vm2, %v23646_v12 }
 0x7cb   : > { %26479 = vst [vmem:[#allocation119_spill] sm:$0xff] %v24371_v3  ;;  %v14654_v16 = vpop.f32.mrf.mxu1 }
 0x7cc   : > { %v14305_v58 = vpop.f32.mrf.mxu0 }
 0x7cd   : > { %14475 = vmatmul.mubr.bf16.gmra.mxu0 %v13527_v35  ;;  %v24387_v61 = vpop.f32.mrf.mxu1 }
 0x7ce   : > { %v24384_v36 = vpop.f32.mrf.mxu0  ;;  %26481 = vst [vmem:[#allocation121_spill] sm:$0xff] %v24387_v61  ;;  %14482 = vmatprep.mubr.bf16.mxu0 %v13884_v22  ;;  %v24389_v60 = vpop.permute.xlu1 %13086 }
 0x7cf   : > { %v14657_v58 = vpop.f32.mrf.mxu1 }
 0x7d0   : > { %v14310_v44 = vpop.f32.mrf.mxu0  ;;  %v13887_v58 = vsel %vm13455_vm3, %v13759_v52, %v24356_v47 }
 0x7d1   : > { %v24393_v3 = vpop.f32.mrf.mxu1  ;;  %17070 = vmatmul.mubr.msk.bf16.gmra.mxu1 %vm13318_vm2, %v23668_v45 }
 0x7d2   : > { %v24391_v9 = vpop.f32.mrf.mxu0  ;;  %26482 = vst [vmem:[#allocation117_spill] sm:$0xff] %v24393_v3  ;;  %17073 = vmatprep.mubr.msk.bf16.mxu1 %vm13318_vm2, %v23646_v12  ;;  %v24403_v22 = vpop.permute.xlu1 %13088  ;;  %v13352_v12 = vsel %vm13318_vm2, %v23702_v27, %v24314_v63  ;;  %v13761_v27 = vsel %vm5193_vm1, %v13663_v57, %v24367_v43  ;;  %v13354_v57 = vsel %vm13318_vm2, %v26440_v40, %v24350_v51 }
 0x7d3   : > { %v14662_v35 = vpop.f32.mrf.mxu1  ;;  %v13420_v54 = vsel %vm5193_vm1, %v13352_v12, %v24332_v33  ;;  %v13890_v12 = vsel %vm13455_vm3, %v13761_v27, %v24377_v17 }
 0x7d4   : > { %v14313_v16 = vpop.f32.mrf.mxu0  ;;  %v24416_v35 = vpop.permute.xlu0 %12954  ;;  %v13532_v33 = vsel %vm13455_vm3, %v13420_v54, %v24317_v15  ;;  %v13422_v15 = vsel %vm5193_vm1, %v13354_v57, %v13021_v25 }
 0x7d5   : > { %14483 = vmatmul.mubr.bf16.gmra.mxu0 %v13530_v5  ;;  %v24409_v61 = vpop.f32.mrf.mxu1  ;;  %v13534_v51 = vsel %vm13455_vm3, %v13422_v15, %v24330_v30 }
 0x7d6   : > { %v24405_v44 = vpop.f32.mrf.mxu0  ;;  %26483 = vst [vmem:[#allocation122_spill] sm:$0xff] %v24409_v61  ;;  %14490 = vmatprep.mubr.bf16.mxu0 %v13887_v58  ;;  %v24424_v52 = vpop.permute.xlu1 %13218 }
 0x7d7   : > { %v14665_v10 = vpop.f32.mrf.mxu1 }
 0x7d8   : > { %v14318_v16 = vpop.f32.mrf.mxu0  ;;  %v13666_v10 = vsel %vm13318_vm2, %v23896_v32, %v13151_v37 }
 0x7d9   : > { %v24420_v5 = vpop.f32.mrf.mxu1  ;;  %17074 = vmatmul.mubr.msk.bf16.gmra.mxu1 %vm13318_vm2, %v23668_v45  ;;  %v13762_v32 = vsel %vm5193_vm1, %v13666_v10, %v24342_v59  ;;  %v13669_v59 = vsel %vm13318_vm2, %v23936_v53, %v13153_v8  ;;  %v13537_v53 = vsel %vm13455_vm3, %v13420_v54, %v24389_v60 }
 0x7da   : > { %v24418_v3 = vpop.f32.mrf.mxu0  ;;  %26484 = vst [vmem:[#allocation120_spill] sm:$0xff] %v24420_v5  ;;  %17077 = vmatprep.mubr.msk.bf16.mxu1 %vm13318_vm2, %v23787_v46  ;;  %v24444_v61 = vpop.permute.xlu1 %13286 }
 0x7db   : > { %v14670_v63 = vpop.f32.mrf.mxu1 }
 0x7dc   : > { %v14321_v58 = vpop.f32.mrf.mxu0 }
 0x7dd   : > { %14491 = vmatmul.mubr.bf16.gmra.mxu0 %v13532_v33  ;;  %v24436_v45 = vpop.f32.mrf.mxu1  ;;  %v13023_v58 = vpop.permute.xlu0 %13022 }
 0x7de   : > { %v24432_v16 = vpop.f32.mrf.mxu0  ;;  %26485 = vst [vmem:[#allocation15_spill] sm:$0xff] %v24436_v45  ;;  %14498 = vmatprep.mubr.bf16.mxu0 %v13890_v12  ;;  %v13892_v12 = vsel %vm13455_vm3, %v13762_v32, %v24356_v47  ;;  %v13763_v47 = vsel %vm5193_vm1, %v13669_v59, %v24367_v43 }
 0x7df   : > { %v14673_v63 = vpop.f32.mrf.mxu1 }
 0x7e0   : > { %v14326_v5 = vpop.f32.mrf.mxu0  ;;  %v24468_v63 = vpop.permute.xlu1 %13220 }
 0x7e1   : > { %v24448_v27 = vpop.f32.mrf.mxu1  ;;  %17078 = vmatmul.mubr.msk.bf16.gmra.mxu1 %vm13318_vm2, %v23802_v0  ;;  %v24458_v25 = vpop.permute.xlu0 %12956 }
 0x7e2   : > { %v24446_v33 = vpop.f32.mrf.mxu0  ;;  %17081 = vmatprep.mubr.msk.bf16.mxu1 %vm13318_vm2, %v23787_v46 }
 0x7e3   : > { %v14678_v40 = vpop.f32.mrf.mxu1 }
 0x7e4   : > { %v14329_v37 = vpop.f32.mrf.mxu0 }
 0x7e5   : > { %14499 = vmatmul.mubr.bf16.gmra.mxu0 %v13534_v51  ;;  %v24464_v57 = vpop.f32.mrf.mxu1  ;;  %v13025_v32 = vpop.permute.xlu0 %13024 }
 0x7e6   : > { %v24460_v5 = vpop.f32.mrf.mxu0  ;;  %26486 = vst [vmem:[#allocation103_spill] sm:$0xff] %v24464_v57  ;;  %14506 = vmatprep.mubr.bf16.mxu0 %v13892_v12  ;;  %v24482_v12 = vpop.permute.xlu1 %13288 }
 0x7e7   : > { %v14681_v37 = vpop.f32.mrf.mxu1 }
 0x7e8   : > { %v14334_v46 = vpop.f32.mrf.mxu0 }
 0x7e9   : > { %v24472_v30 = vpop.f32.mrf.mxu1  ;;  %17082 = vmatmul.mubr.msk.bf16.gmra.mxu1 %vm13318_vm2, %v23802_v0  ;;  %v13894_v0 = vsel %vm13455_vm3, %v13763_v47, %v24377_v17  ;;  %v13540_v17 = vsel %vm13455_vm3, %v13422_v15, %v24403_v22  ;;  %v13765_v47 = vsel %vm5193_vm1, %v13666_v10, %v24424_v52 }
 0x7ea   : > { %v24470_v40 = vpop.f32.mrf.mxu0  ;;  %26487 = vst [vmem:[#allocation102_spill] sm:$0xff] %v24472_v30  ;;  %17085 = vmatprep.mubr.msk.bf16.mxu1 %vm13318_vm2, %v23909_v55  ;;  %v13155_v30 = vpop.permute.xlu0 %13154 }
 0x7eb   : > { %v14686_v8 = vpop.f32.mrf.mxu1  ;;  %v24496_v54 = vpop.permute.xlu1 %13090 }
 0x7ec   : > { %v14337_v51 = vpop.f32.mrf.mxu0 }
 0x7ed   : > { %14507 = vmatmul.mubr.bf16.gmra.mxu0 %v13537_v53  ;;  %v24488_v37 = vpop.f32.mrf.mxu1 }
 0x7ee   : > { %v24484_v46 = vpop.f32.mrf.mxu0  ;;  %26488 = vst [vmem:[#allocation107_spill] sm:$0xff] %v24488_v37  ;;  %14514 = vmatprep.mubr.bf16.mxu0 %v13894_v0  ;;  %v13897_v0 = vsel %vm13455_vm3, %v13765_v47, %v24444_v61  ;;  %v13767_v47 = vsel %vm5193_vm1, %v13669_v59, %v24468_v63 }
 0x7ef   : > { %v14689_v51 = vpop.f32.mrf.mxu1 }
 0x7f0   : > { %v14342_v43 = vpop.f32.mrf.mxu0  ;;  %v13157_v51 = vpop.permute.xlu0 %13156 }
 0x7f1   : > { %v24492_v57 = vpop.f32.mrf.mxu1  ;;  %17086 = vmatmul.mubr.msk.bf16.gmra.mxu1 %vm13318_vm2, %v23926_v13 }
 0x7f2   : > { %v24490_v45 = vpop.f32.mrf.mxu0  ;;  %26489 = vst [vmem:[#allocation106_spill] sm:$0xff] %v24492_v57  ;;  %17089 = vmatprep.mubr.msk.bf16.mxu1 %vm13318_vm2, %v23909_v55  ;;  %v24514_v57 = vpop.permute.xlu1 %13092 }
 0x7f3   : > { %v14694_v53 = vpop.f32.mrf.mxu1 }
 0x7f4   : > { %v14345_v8 = vpop.f32.mrf.mxu0  ;;  %v13900_v53 = vsel %vm13455_vm3, %v13767_v47, %v24482_v12 }
 0x7f5   : > { %14515 = vmatmul.mubr.bf16.gmra.mxu0 %v13540_v17  ;;  %v24506_v43 = vpop.f32.mrf.mxu1  ;;  %v13356_v8 = vsel %vm13318_vm2, %v23823_v21, %v24416_v35 }
 0x7f6   : > { %14522 = vmatprep.mubr.bf16.mxu0 %v13897_v0  ;;  %v13424_v15 = vsel %vm5193_vm1, %v13356_v8, %v13023_v58  ;;  %v24534_v8 = vpop.permute.xlu1 %13222 }
 0x7f7   : > { %v24511_v55 = vpop.f32.mrf.mxu0  ;;  %v14697_v37 = vpop.f32.mrf.mxu1  ;;  %v13542_v35 = vsel %vm13455_vm3, %v13424_v15, %v24389_v60  ;;  %v13358_v60 = vsel %vm13318_vm2, %v26443_v19, %v24458_v25 }
 0x7f8   : > { %v12959_v37 = vpop.permute.xlu0 %12958 }
 0x7f9   : > { %v24516_v10 = vpop.f32.mrf.mxu1  ;;  %17090 = vmatmul.mubr.msk.bf16.gmra.mxu1 %vm13318_vm2, %v23926_v13  ;;  %v14350_v17 = vpop.f32.mrf.mxu0  ;;  %v13672_v13 = vsel %vm13318_vm2, %v24007_v31, %v13155_v30 }
 0x7fa   : > { %17093 = vmatprep.mubr.msk.bf16.mxu1 %vm13318_vm2, %v24015_v20  ;;  %v13768_v47 = vsel %vm5193_vm1, %v13672_v13, %v24424_v52  ;;  %v24552_v25 = vpop.permute.xlu1 %13290  ;;  %v13675_v52 = vsel %vm13318_vm2, %v24040_v41, %v13157_v51  ;;  %v13547_v41 = vsel %vm13455_vm3, %v13424_v15, %v24496_v54 }
 0x7fb   : > { %v14702_v21 = vpop.f32.mrf.mxu1  ;;  %v24526_v58 = vpop.f32.mrf.mxu0 }
 0x7fc   : > { %v13426_v21 = vsel %vm5193_vm1, %v13358_v60, %v13025_v32  ;;  %v13902_v32 = vsel %vm13455_vm3, %v13768_v47, %v24444_v61 }
 0x7fd   : > { %14523 = vmatmul.mubr.bf16.gmra.mxu0 %v13542_v35  ;;  %v24530_v0 = vpop.f32.mrf.mxu1  ;;  %v14353_v59 = vpop.f32.mrf.mxu0  ;;  %v13544_v19 = vsel %vm13455_vm3, %v13426_v21, %v24403_v22  ;;  %v13769_v22 = vsel %vm5193_vm1, %v13675_v52, %v24468_v63 }
 0x7fe   : > { %26490 = vst [vmem:[#allocation110_spill] sm:$0xff] %v24530_v0  ;;  %14530 = vmatprep.mubr.bf16.mxu0 %v13900_v53  ;;  %v13027_v53 = vpop.permute.xlu0 %13026  ;;  %v24568_v61 = vpop.permute.xlu1 %13224 }
 0x7ff   : > { %v14705_v17 = vpop.f32.mrf.mxu1 }
 0x801   : > { %v24540_v35 = vpop.f32.mrf.mxu1  ;;  %17094 = vmatmul.mubr.msk.bf16.gmra.mxu1 %vm13318_vm2, %v24029_v1 }
 0x802   : > { %17097 = vmatprep.mubr.msk.bf16.mxu1 %vm13318_vm2, %v24015_v20  ;;  %v12961_v17 = vpop.permute.xlu0 %12960  ;;  %v24578_v63 = vpop.permute.xlu1 %13292 }
 0x803   : > { %v24548_v31 = vpop.f32.mrf.mxu0  ;;  %v14710_v30 = vpop.f32.mrf.mxu1 }
 0x805   : > { %14531 = vmatmul.mubr.bf16.gmra.mxu0 %v13544_v19  ;;  %v24556_v59 = vpop.f32.mrf.mxu1  ;;  %v14358_v60 = vpop.f32.mrf.mxu0  ;;  %v13904_v19 = vsel %vm13455_vm3, %v13769_v22, %v24482_v12  ;;  %v13550_v12 = vsel %vm13455_vm3, %v13426_v21, %v24514_v57  ;;  %v13771_v22 = vsel %vm5193_vm1, %v13672_v13, %v24534_v8  ;;  %v13360_v21 = vsel %vm13318_vm2, %v23945_v38, %v12959_v37 }
 0x806   : > { %14538 = vmatprep.mubr.bf16.mxu0 %v13902_v32  ;;  %v13428_v13 = vsel %vm5193_vm1, %v13360_v21, %v13027_v53 }
 0x807   : > { %v14713_v20 = vpop.f32.mrf.mxu1  ;;  %v24560_v0 = vpop.f32.mrf.mxu0 }
 0x809   : > { %v24562_v30 = vpop.f32.mrf.mxu1  ;;  %17098 = vmatmul.mubr.msk.bf16.gmra.mxu1 %vm13318_vm2, %v24029_v1  ;;  %v14361_v47 = vpop.f32.mrf.mxu0 }
 0x80a   : > { %26491 = vst [vmem:[#allocation100_spill] sm:$0xff] %v24562_v30  ;;  %17101 = vmatprep.mubr.msk.bf16.mxu1 %vm13318_vm2, %v24105_v6  ;;  %v13029_v1 = vpop.permute.xlu0 %13028 }
 0x80b   : > { %v14718_v51 = vpop.f32.mrf.mxu1 }
 0x80d   : > { %14539 = vmatmul.mubr.bf16.gmra.mxu0 %v13547_v41  ;;  %v24576_v32 = vpop.f32.mrf.mxu1 }
 0x80e   : > { %26492 = vst [vmem:[#allocation101_spill] sm:$0xff] %v24576_v32  ;;  %14546 = vmatprep.mubr.bf16.mxu0 %v13904_v19  ;;  %v13159_v51 = vpop.permute.xlu0 %13158 }
 0x80f   : > { %v14721_v60 = vpop.f32.mrf.mxu1 }
 0x810   : > { %v24580_v20 = vpop.f32.mrf.mxu0  ;;  %v13907_v60 = vsel %vm13455_vm3, %v13771_v22, %v24552_v25  ;;  %v13773_v22 = vsel %vm5193_vm1, %v13675_v52, %v24568_v61  ;;  %v13362_v52 = vsel %vm13318_vm2, %v23222_v23, %v12961_v17 }
 0x811   : > { %v24582_v47 = vpop.f32.mrf.mxu1  ;;  %17102 = vmatmul.mubr.msk.bf16.gmra.mxu1 %vm13318_vm2, %v24125_v50  ;;  %v13910_v53 = vsel %vm13455_vm3, %v13773_v22, %v24578_v63 }
 0x812   : > { %v14366_v15 = vpop.f32.mrf.mxu0  ;;  %17105 = vmatprep.mubr.msk.bf16.mxu1 %vm13318_vm2, %v24105_v6 }
 0x813   : > { %v14726_v41 = vpop.f32.mrf.mxu1  ;;  %v24598_v15 = vpop.permute.xlu1 %13094 }
 0x814   : > { %v24592_v19 = vpop.f32.mrf.mxu0 }
 0x815   : > { %14547 = vmatmul.mubr.bf16.gmra.mxu0 %v13550_v12  ;;  %v24596_v32 = vpop.f32.mrf.mxu1  ;;  %v13161_v12 = vpop.permute.xlu0 %13160 }
 0x816   : > { %26493 = vst [vmem:[#allocation109_spill] sm:$0xff] %v24596_v32  ;;  %14554 = vmatprep.mubr.bf16.mxu0 %v13907_v60  ;;  %v14369_v6 = vpop.f32.mrf.mxu0 }
 0x817   : > { %v14729_v30 = vpop.f32.mrf.mxu1  ;;  %v13552_v6 = vsel %vm13455_vm3, %v13428_v13, %v24496_v54  ;;  %v24613_v38 = vpop.permute.xlu1 %13096  ;;  %v13430_v54 = vsel %vm5193_vm1, %v13362_v52, %v13029_v1 }
 0x818   : > { %v13678_v30 = vsel %vm13318_vm2, %v24098_v14, %v13159_v51  ;;  %v13554_v17 = vsel %vm13455_vm3, %v13430_v54, %v24514_v57 }
 0x819   : > { %v24603_v41 = vpop.f32.mrf.mxu1  ;;  %17106 = vmatmul.mubr.msk.bf16.gmra.mxu1 %vm13318_vm2, %v24125_v50  ;;  %v13774_v22 = vsel %vm5193_vm1, %v13678_v30, %v24534_v8  ;;  %v13681_v8 = vsel %vm13318_vm2, %v24136_v29, %v13161_v12  ;;  %v13557_v29 = vsel %vm13455_vm3, %v13428_v13, %v24598_v15 }
 0x81a   : > { %26494 = vst [vmem:[#allocation105_spill] sm:$0xff] %v24603_v41  ;;  %17109 = vmatprep.mubr.msk.bf16.mxu1 %vm13318_vm2, %v24206_v18  ;;  %v12963_v41 = vpop.permute.xlu0 %12962  ;;  %v13912_v1 = vsel %vm13455_vm3, %v13774_v22, %v24552_v25  ;;  %v13775_v57 = vsel %vm5193_vm1, %v13681_v8, %v24568_v61  ;;  %v26499_v22 = vld [vmem:[#allocation74_spill] sm:$0xff] }
 0x81b   : > { %v14734_v60 = vpop.f32.mrf.mxu1 }
 0x81c   : > { %v24615_v37 = vpop.f32.mrf.mxu0 }
 0x81d   : > { %14555 = vmatmul.mubr.bf16.gmra.mxu0 %v13552_v6  ;;  %v24619_v50 = vpop.f32.mrf.mxu1 }
 0x81e   : > { %26495 = vst [vmem:[#allocation108_spill] sm:$0xff] %v24619_v50  ;;  %14562 = vmatprep.mubr.bf16.mxu0 %v13910_v53  ;;  %v14374_v21 = vpop.f32.mrf.mxu0  ;;  %v24634_v53 = vpop.permute.xlu1 %13226  ;;  %v26502_v50 = vld [vmem:[#allocation9_spill] sm:$0xff] }
 0x81f   : > { %v14737_v60 = vpop.f32.mrf.mxu1  ;;  %v13031_v21 = vpop.permute.xlu0 %13030 }
 0x820   : > { %v24626_v32 = vpop.f32.mrf.mxu0 }
 0x821   : > { %v24628_v6 = vpop.f32.mrf.mxu1  ;;  %17110 = vmatmul.mubr.msk.bf16.gmra.mxu1 %vm13318_vm2, %v24227_v4 }
 0x822   : > { %26496 = vst [vmem:[#allocation104_spill] sm:$0xff] %v24628_v6  ;;  %v14377_v14 = vpop.f32.mrf.mxu0  ;;  %17113 = vmatprep.mubr.msk.bf16.mxu1 %vm13318_vm2, %v24206_v18 }
 0x823   : > { %v14742_v23 = vpop.f32.mrf.mxu1  ;;  %v24648_v14 = vpop.permute.xlu1 %13294 }
 0x824   : > { %v12965_v23 = vpop.permute.xlu0 %12964 }
 0x825   : > { %14563 = vmatmul.mubr.bf16.gmra.mxu0 %v13554_v17  ;;  %v24642_v51 = vpop.f32.mrf.mxu1 }
 0x826   : > { %26497 = vst [vmem:[#allocation136_spill] sm:$0xff] %v24642_v51  ;;  %14570 = vmatprep.mubr.bf16.mxu0 %v13912_v1  ;;  %v13914_v1 = vsel %vm13455_vm3, %v13775_v57, %v24578_v63  ;;  %v13777_v63 = vsel %vm5193_vm1, %v13678_v30, %v24634_v53 }
 0x827   : > { %v24646_v52 = vpop.f32.mrf.mxu0  ;;  %v14745_v60 = vpop.f32.mrf.mxu1 }
 0x828   : > { %v24666_v60 = vpop.permute.xlu1 %13228  ;;  %v13033_v13 = vpop.permute.xlu0 %13032 }
 0x829   : > { %v24650_v18 = vpop.f32.mrf.mxu1  ;;  %17114 = vmatmul.mubr.msk.bf16.gmra.mxu1 %vm13318_vm2, %v24227_v4  ;;  %v14382_v25 = vpop.f32.mrf.mxu0 }
 0x82a   : > { %26498 = vst [vmem:[#allocation135_spill] sm:$0xff] %v24650_v18  ;;  %17117 = vmatprep.mubr.msk.bf16.mxu1 %vm13318_vm2, %v26499_v22 }
 0x82b   : > { %v14750_v12 = vpop.f32.mrf.mxu1  ;;  %v24660_v17 = vpop.f32.mrf.mxu0 }
 0x82d   : > { %14571 = vmatmul.mubr.bf16.gmra.mxu0 %v13557_v29  ;;  %v24664_v4 = vpop.f32.mrf.mxu1  ;;  %v14385_v61 = vpop.f32.mrf.mxu0  ;;  %v13560_v29 = vsel %vm13455_vm3, %v13430_v54, %v24613_v38 }
 0x82e   : > { %14578 = vmatprep.mubr.bf16.mxu0 %v13914_v1  ;;  %26500 = vst [vmem:[#allocation140_spill] sm:$0xff] %v24664_v4  ;;  %v24680_v1 = vpop.permute.xlu1 %13296  ;;  %v13917_v61 = vsel %vm13455_vm3, %v13777_v63, %v24648_v14 }
 0x82f   : > { %v14753_v25 = vpop.f32.mrf.mxu1 }
 0x831   : > { %v24668_v18 = vpop.f32.mrf.mxu1  ;;  %17118 = vmatmul.mubr.msk.bf16.gmra.mxu1 %vm13318_vm2, %v26502_v50 }
 0x832   : > { %26501 = vst [vmem:[#allocation11_spill] sm:$0xff] %v24668_v18  ;;  %17121 = vmatprep.mubr.msk.bf16.mxu1 %vm13318_vm2, %v26499_v22  ;;  %v13364_v22 = vsel %vm13318_vm2, %v24048_v56, %v12963_v41  ;;  %v24700_v63 = vpop.permute.xlu1 %13098  ;;  %v26504_v41 = vld [vmem:[#allocation71_spill] sm:$0xff] }
 0x833   : > { %v24678_v57 = vpop.f32.mrf.mxu0  ;;  %v14758_v12 = vpop.f32.mrf.mxu1  ;;  %v24691_v30 = vsel %vm5193_vm1, %v13364_v22, %v13031_v21  ;;  %v13779_v21 = vsel %vm5193_vm1, %v13681_v8, %v24666_v60 }
 0x834   : > { %v13163_v12 = vpop.permute.xlu0 %13162  ;;  %v13920_v8 = vsel %vm13455_vm3, %v13779_v21, %v24680_v1 }
 0x835   : > { %14579 = vmatmul.mubr.bf16.gmra.mxu0 %v13560_v29  ;;  %v14390_v25 = vpop.f32.mrf.mxu0  ;;  %v24684_v4 = vpop.f32.mrf.mxu1  ;;  %v24696_v29 = vld [vmem:[%s25564_s11] ss:$0 sm:$0xff] }
 0x836   : > { %14586 = vmatprep.mubr.bf16.mxu0 %v13917_v61  ;;  %26503 = vst [vmem:[#allocation138_spill] sm:$0xff] %v24684_v4  ;;  %v24717_v61 = vsel %vm13318_vm2, %v24198_v7, %v13163_v12  ;;  %v13366_v4 = vsel %vm13318_vm2, %v26454_v39, %v12965_v23 }
 0x837   : > { %v24688_v54 = vpop.f32.mrf.mxu0  ;;  %v14761_v18 = vpop.f32.mrf.mxu1  ;;  %v13780_v21 = vsel %vm5193_vm1, %v24717_v61, %v24634_v53 }
 0x839   : > { %v14393_v51 = vpop.f32.mrf.mxu0  ;;  %v17027_v6 = vpop.f32.mrf.mxu1  ;;  %17122 = vmatmul.mubr.msk.bf16.gmra.mxu1 %vm13318_vm2, %v26502_v50  ;;  %v13562_v50 = vsel %vm13455_vm3, %v24691_v30, %v24598_v15 }
 0x83a   : > { %v14806_v56 = vadd.f32 %v17027_v6, %v24229_v26  ;;  %17125 = vmatprep.mubr.msk.bf16.mxu1 %vm13318_vm2, %v26504_v41  ;;  %v24710_v51 = vld [vmem:[%s25565_s12] ss:$0 sm:$0xff] }
 0x83b   : > { %v14797_v18 = vpop.f32.mrf.mxu1 }
 0x83c   : > { %v15317_v26 = vmul.f32 %v24696_v29, %v14806_v56  ;;  %v14798_v6 = vadd.f32 %v14797_v18, %v24186_v49  ;;  %v24731_v49 = vsel %vm5193_vm1, %v13366_v4, %v13033_v13  ;;  %v13165_v18 = vpop.permute.xlu0 %13164  ;;  %v26506_v4 = vld [vmem:[#allocation73_spill] sm:$0xff] }
 0x83d   : > { %v24721_v25 = vpop.f32.mrf.mxu0  ;;  %14587 = vmatmul.mubr.bf16.gmra.mxu0 %v13562_v50  ;;  %v17028_v22 = vpop.f32.mrf.mxu1 }
 0x83e   : > { %14594 = vmatprep.mubr.bf16.mxu0 %v13920_v8  ;;  %v15452_v15 = vadd.f32 %v24710_v51, %v15317_v26  ;;  %v15315_v7 = vmul.f32 %v24696_v29, %v14798_v6  ;;  %v14809_v12 = vadd.f32 %v17028_v22, %v24249_v42  ;;  %v24736_v8 = vpop.permute.xlu1 %13100  ;;  %v26505_v26 = vld [vmem:[#allocation116_spill] sm:$0xff] }
 0x83f   : > { %v14398_v56 = vpop.f32.mrf.mxu0  ;;  %v14800_v50 = vpop.f32.mrf.mxu1 }
 0x840   : > { %17329 = vtanh.f32 %v15452_v15  ;;  %v15450_v39 = vadd.f32 %v24710_v51, %v15315_v7  ;;  %v15318_v23 = vmul.f32 %v24696_v29, %v14809_v12  ;;  %v14801_v6 = vadd.f32 %v14800_v50, %v26505_v26 }
 0x841   : > { %v24741_v42 = vpop.f32.mrf.mxu0  ;;  %v17031_v22 = vpop.f32.mrf.mxu1  ;;  %17126 = vmatmul.mubr.msk.bf16.gmra.mxu1 %vm13318_vm2, %v26506_v4  ;;  %v24752_v7 = vsel %vm13318_vm2, %v24241_v34, %v13165_v18  ;;  %v13564_v50 = vsel %vm13455_vm3, %v24731_v49, %v24613_v38 }
 0x842   : > { %17331 = vtanh.f32 %v15450_v39  ;;  %v15453_v13 = vadd.f32 %v24710_v51, %v15318_v23  ;;  %v15316_v53 = vmul.f32 %v24696_v29, %v14801_v6  ;;  %v14822_v56 = vadd.f32 %v17031_v22, %v24293_v62  ;;  %17129 = vmatprep.mubr.msk.bf16.mxu1 %vm13318_vm2, %v26504_v41  ;;  %v24764_v18 = vpop.permute.xlu1 %13230 }
 0x843   : > { %v14401_v15 = vpop.f32.mrf.mxu0  ;;  %v14813_v12 = vpop.f32.mrf.mxu1  ;;  %v13922_v39 = vsel %vm13455_vm3, %v13780_v21, %v24648_v14 }
 0x844   : > { %17333 = vtanh.f32 %v15453_v13  ;;  %v15451_v62 = vadd.f32 %v24710_v51, %v15316_v53  ;;  %v15321_v23 = vmul.f32 %v24696_v29, %v14822_v56  ;;  %v14814_v41 = vadd.f32 %v14813_v12, %v24267_v2  ;;  %v26507_v56 = vld [vmem:[#allocation115_spill] sm:$0xff] }
 0x845   : > { %v24762_v26 = vpop.f32.mrf.mxu0  ;;  %14595 = vmatmul.mubr.bf16.gmra.mxu0 %v13564_v50  ;;  %v17032_v34 = vpop.f32.mrf.mxu1  ;;  %v13781_v2 = vsel %vm5193_vm1, %v24752_v7, %v24666_v60 }
 0x846   : > { %14602 = vmatprep.mubr.bf16.mxu0 %v13922_v39  ;;  %17335 = vtanh.f32 %v15451_v62  ;;  %v15456_v38 = vadd.f32 %v24710_v51, %v15321_v23  ;;  %v15319_v14 = vmul.f32 %v24696_v29, %v14814_v41  ;;  %v14825_v21 = vadd.f32 %v17032_v34, %v24300_v48  ;;  %v12967_v48 = vpop.permute.xlu0 %12966  ;;  %v26508_v41 = vld [vmem:[#allocation54_spill] sm:$0xff] }
 0x847   : > { %v14406_v6 = vpop.f32.mrf.mxu0  ;;  %v14816_v22 = vpop.f32.mrf.mxu1 }
 0x848   : > { %17337 = vtanh.f32 %v15456_v38  ;;  %v15454_v13 = vadd.f32 %v24710_v51, %v15319_v14  ;;  %v15322_v53 = vmul.f32 %v24696_v29, %v14825_v21  ;;  %v14817_v15 = vadd.f32 %v14816_v22, %v26507_v56 }
 0x849   : > { %v24776_v12 = vpop.f32.mrf.mxu0  ;;  %v17035_v50 = vpop.f32.mrf.mxu1  ;;  %17130 = vmatmul.mubr.msk.bf16.gmra.mxu1 %vm13318_vm2, %v26506_v4  ;;  %v13567_v4 = vsel %vm13455_vm3, %v24691_v30, %v24700_v63  ;;  %v13924_v38 = vsel %vm13455_vm3, %v13781_v2, %v24680_v1 }
 0x84a   : > { %17339 = vtanh.f32 %v15454_v13  ;;  %v15457_v39 = vadd.f32 %v24710_v51, %v15322_v53  ;;  %v15320_v60 = vmul.f32 %v24696_v29, %v14817_v15  ;;  %v14838_v62 = vadd.f32 %v17035_v50, %v24339_v11  ;;  %17133 = vmatprep.mubr.msk.bf16.mxu1 %vm13318_vm2, %v26508_v41  ;;  %v24795_v11 = vpop.permute.xlu1 %13298  ;;  %v26509_v53 = vld [vmem:[#allocation113_spill] sm:$0xff] }
 0x84b   : > { %v14409_v23 = vpop.f32.mrf.mxu0  ;;  %v14829_v34 = vpop.f32.mrf.mxu1 }
 0x84c   : > { %17341 = vtanh.f32 %v15457_v39  ;;  %v15455_v14 = vadd.f32 %v24710_v51, %v15320_v60  ;;  %v15325_v21 = vmul.f32 %v24696_v29, %v14838_v62  ;;  %v14830_v6 = vadd.f32 %v14829_v34, %v24312_v28  ;;  %v13035_v28 = vpop.permute.xlu0 %13034  ;;  %v26510_v23 = vld [vmem:[#allocation114_spill] sm:$0xff] }
 0x84d   : > { %v24800_v22 = vpop.f32.mrf.mxu0  ;;  %14603 = vmatmul.mubr.bf16.gmra.mxu0 %v13567_v4  ;;  %v17330_v13 = vpop.eup %17329 }
 0x84e   : > { %14610 = vmatprep.mubr.bf16.mxu0 %v13924_v38  ;;  %v17036_v30 = vpop.f32.mrf.mxu1  ;;  %15709 = vst.msk [vmem:[%s24788_s21 + $0x10] sm:$0xff] %vm15706_vm4, %v17330_v13  ;;  %17343 = vtanh.f32 %v15455_v14  ;;  %v15460_v1 = vadd.f32 %v24710_v51, %v15325_v21  ;;  %v15323_v2 = vmul.f32 %v24696_v29, %v14830_v6  ;;  %v13783_v14 = vsel %vm5193_vm1, %v24717_v61, %v24764_v18  ;;  %v26511_v6 = vld [vmem:[#allocation59_spill] sm:$0xff]  ;;  %v24819_v13 = vpop.permute.xlu1 %13232 }
 0x84f   : > { %v14841_v56 = vadd.f32 %v17036_v30, %v26509_v53  ;;  %v14414_v15 = vpop.f32.mrf.mxu0  ;;  %v17332_v50 = vpop.eup %17331 }
 0x850   : > { %v14832_v39 = vpop.f32.mrf.mxu1  ;;  %15707 = vst.msk [vmem:[%s24788_s21] sm:$0xff] %vm15706_vm4, %v17332_v50  ;;  %17345 = vtanh.f32 %v15460_v1  ;;  %v15458_v60 = vadd.f32 %v24710_v51, %v15323_v2  ;;  %v13927_v50 = vsel %vm13455_vm3, %v13783_v14, %v24795_v11 }
 0x851   : > { %v15326_v62 = vmul.f32 %v24696_v29, %v14841_v56  ;;  %v14833_v4 = vadd.f32 %v14832_v39, %v26510_v23  ;;  %v24812_v34 = vpop.f32.mrf.mxu0  ;;  %v17334_v38 = vpop.eup %17333  ;;  %17134 = vmatmul.mubr.msk.bf16.gmra.mxu1 %vm13318_vm2, %v26511_v6  ;;  %v13570_v56 = vsel %vm13455_vm3, %v24731_v49, %v24736_v8  ;;  %v26512_v23 = vld [vmem:[#allocation111_spill] sm:$0xff] }
 0x852   : > { %v17039_v21 = vpop.f32.mrf.mxu1  ;;  %15710 = vst.msk [vmem:[%s24788_s21 + $0x18] sm:$0xff] %vm15706_vm4, %v17334_v38  ;;  %17347 = vtanh.f32 %v15458_v60  ;;  %17137 = vmatprep.mubr.msk.bf16.mxu1 %vm13318_vm2, %v26508_v41  ;;  %v13368_v49 = vsel %vm13318_vm2, %v26512_v23, %v12967_v48  ;;  %v12969_v38 = vpop.permute.xlu0 %12968 }
 0x853   : > { %v15461_v30 = vadd.f32 %v24710_v51, %v15326_v62  ;;  %v15324_v1 = vmul.f32 %v24696_v29, %v14833_v4  ;;  %v14854_v2 = vadd.f32 %v17039_v21, %v24384_v36  ;;  %v14417_v53 = vpop.f32.mrf.mxu0  ;;  %v17336_v61 = vpop.eup %17335 }
 0x854   : > { %v14845_v15 = vpop.f32.mrf.mxu1  ;;  %15708 = vst.msk [vmem:[%s24788_s21 + $0x8] sm:$0xff] %vm15706_vm4, %v17336_v61  ;;  %v24850_v48 = vpop.permute.xlu1 %13300 }
 0x855   : > { %17349 = vtanh.f32 %v15461_v30  ;;  %v15459_v39 = vadd.f32 %v24710_v51, %v15324_v1  ;;  %v15329_v36 = vmul.f32 %v24696_v29, %v14854_v2  ;;  %v14846_v60 = vadd.f32 %v14845_v15, %v24364_v24  ;;  %v24838_v41 = vpop.f32.mrf.mxu0  ;;  %14611 = vmatmul.mubr.bf16.gmra.mxu0 %v13570_v56  ;;  %v17338_v62 = vpop.eup %17337  ;;  %v26513_v15 = vld [vmem:[#allocation119_spill] sm:$0xff] }
 0x856   : > { %14618 = vmatprep.mubr.bf16.mxu0 %v13927_v50  ;;  %v17040_v4 = vpop.f32.mrf.mxu1  ;;  %15713 = vst.msk [vmem:[%s24788_s21 + $0x30] sm:$0xff] %vm15706_vm4, %v17338_v62  ;;  %v24848_v2 = vsel %vm5193_vm1, %v13368_v49, %v13035_v28  ;;  %v13785_v28 = vsel %vm5193_vm1, %v24752_v7, %v24819_v13 }
 0x857   : > { %17351 = vtanh.f32 %v15459_v39  ;;  %v15464_v14 = vadd.f32 %v24710_v51, %v15329_v36  ;;  %v15327_v21 = vmul.f32 %v24696_v29, %v14846_v60  ;;  %v14857_v24 = vadd.f32 %v17040_v4, %v24391_v9  ;;  %v14422_v30 = vpop.f32.mrf.mxu0  ;;  %v17340_v1 = vpop.eup %17339  ;;  %v26514_v4 = vld [vmem:[#allocation90_spill] sm:$0xff] }
 0x858   : > { %v14848_v53 = vpop.f32.mrf.mxu1  ;;  %15711 = vst.msk [vmem:[%s24788_s21 + $0x20] sm:$0xff] %vm15706_vm4, %v17340_v1 }
 0x859   : > { %17353 = vtanh.f32 %v15464_v14  ;;  %v15462_v61 = vadd.f32 %v24710_v51, %v15327_v21  ;;  %v15330_v56 = vmul.f32 %v24696_v29, %v14857_v24  ;;  %v14849_v50 = vadd.f32 %v14848_v53, %v26513_v15  ;;  %v24857_v39 = vpop.f32.mrf.mxu0  ;;  %v17342_v9 = vpop.eup %17341  ;;  %17138 = vmatmul.mubr.msk.bf16.gmra.mxu1 %vm13318_vm2, %v26511_v6 }
 0x85a   : > { %v17043_v36 = vpop.f32.mrf.mxu1  ;;  %15714 = vst.msk [vmem:[%s24788_s21 + $0x38] sm:$0xff] %vm15706_vm4, %v17342_v9  ;;  %17141 = vmatprep.mubr.msk.bf16.mxu1 %vm13318_vm2, %v26514_v4  ;;  %v13572_v6 = vsel %vm13455_vm3, %v24848_v2, %v24700_v63  ;;  %v13930_v21 = vsel %vm13455_vm3, %v13785_v28, %v24850_v48  ;;  %v13037_v24 = vpop.permute.xlu0 %13036 }
 0x85b   : > { %17355 = vtanh.f32 %v15462_v61  ;;  %v15465_v60 = vadd.f32 %v24710_v51, %v15330_v56  ;;  %v15328_v62 = vmul.f32 %v24696_v29, %v14849_v50  ;;  %v14870_v23 = vadd.f32 %v17043_v36, %v24432_v16  ;;  %v14425_v49 = vpop.f32.mrf.mxu0  ;;  %v17344_v14 = vpop.eup %17343  ;;  %v26515_v56 = vld [vmem:[#allocation86_spill] sm:$0xff] }
 0x85c   : > { %v14861_v7 = vpop.f32.mrf.mxu1  ;;  %15712 = vst.msk [vmem:[%s24788_s21 + $0x28] sm:$0xff] %vm15706_vm4, %v17344_v14  ;;  %v13370_v63 = vsel %vm13318_vm2, %v26515_v56, %v12969_v38 }
 0x85d   : > { %17357 = vtanh.f32 %v15465_v60  ;;  %v15463_v16 = vadd.f32 %v24710_v51, %v15328_v62  ;;  %v15333_v30 = vmul.f32 %v24696_v29, %v14870_v23  ;;  %v14862_v1 = vadd.f32 %v14861_v7, %v24405_v44  ;;  %v24881_v53 = vpop.f32.mrf.mxu0  ;;  %14619 = vmatmul.mubr.bf16.gmra.mxu0 %v13572_v6  ;;  %v17346_v61 = vpop.eup %17345 }
 0x85e   : > { %14626 = vmatprep.mubr.bf16.mxu0 %v13930_v21  ;;  %v17044_v15 = vpop.f32.mrf.mxu1  ;;  %15717 = vst.msk [vmem:[%s24788_s21 + $0x50] sm:$0xff] %vm15706_vm4, %v17346_v61  ;;  %v24891_v60 = vsel %vm5193_vm1, %v13370_v63, %v13037_v24  ;;  %v26517_v24 = vld [vmem:[#allocation96_spill] sm:$0xff] }
 0x85f   : > { %17359 = vtanh.f32 %v15463_v16  ;;  %v15468_v50 = vadd.f32 %v24710_v51, %v15333_v30  ;;  %v15331_v9 = vmul.f32 %v24696_v29, %v14862_v1  ;;  %v14873_v44 = vadd.f32 %v17044_v15, %v24446_v33  ;;  %v14430_v28 = vpop.f32.mrf.mxu0  ;;  %v17348_v36 = vpop.eup %17347  ;;  %v26516_v33 = vld [vmem:[#allocation82_spill] sm:$0xff] }
 0x860   : > { %v14864_v62 = vpop.f32.mrf.mxu1  ;;  %15715 = vst.msk [vmem:[%s24788_s21 + $0x40] sm:$0xff] %vm15706_vm4, %v17348_v36  ;;  %v13786_v6 = vsel %vm5193_vm1, %v26516_v33, %v24764_v18  ;;  %v13574_v56 = vsel %vm13455_vm3, %v24891_v60, %v24736_v8 }
 0x861   : > { %17361 = vtanh.f32 %v15468_v50  ;;  %v15466_v38 = vadd.f32 %v24710_v51, %v15331_v9  ;;  %v15334_v23 = vmul.f32 %v24696_v29, %v14873_v44  ;;  %v14865_v49 = vadd.f32 %v14864_v62, %v24418_v3  ;;  %v24898_v14 = vpop.f32.mrf.mxu0  ;;  %17142 = vmatmul.mubr.msk.bf16.gmra.mxu1 %vm13318_vm2, %v26517_v24 }
 0x862   : > { %v17350_v7 = vpop.eup %17349  ;;  %v17047_v21 = vpop.f32.mrf.mxu1  ;;  %17145 = vmatprep.mubr.msk.bf16.mxu1 %vm13318_vm2, %v26514_v4  ;;  %v13932_v63 = vsel %vm13455_vm3, %v13786_v6, %v24795_v11  ;;  %v26518_v6 = vld [vmem:[#allocation84_spill] sm:$0xff] }
 0x863   : > { %15718 = vst.msk [vmem:[%s24788_s21 + $0x58] sm:$0xff] %vm15706_vm4, %v17350_v7  ;;  %17363 = vtanh.f32 %v15466_v38  ;;  %v15469_v16 = vadd.f32 %v24710_v51, %v15334_v23  ;;  %v15332_v30 = vmul.f32 %v24696_v29, %v14865_v49  ;;  %v14886_v3 = vadd.f32 %v17047_v21, %v24484_v46  ;;  %v14433_v1 = vpop.f32.mrf.mxu0 }
 0x864   : > { %v17352_v61 = vpop.eup %17351  ;;  %v14877_v18 = vpop.f32.mrf.mxu1  ;;  %v26519_v1 = vld [vmem:[#allocation12_spill] sm:$0xff] }
 0x865   : > { %15716 = vst.msk [vmem:[%s24788_s21 + $0x48] sm:$0xff] %vm15706_vm4, %v17352_v61  ;;  %17365 = vtanh.f32 %v15469_v16  ;;  %v15467_v15 = vadd.f32 %v24710_v51, %v15332_v30  ;;  %v15337_v46 = vmul.f32 %v24696_v29, %v14886_v3  ;;  %v14878_v50 = vadd.f32 %v14877_v18, %v24460_v5  ;;  %v24922_v4 = vpop.f32.mrf.mxu0  ;;  %14627 = vmatmul.mubr.bf16.gmra.mxu0 %v13574_v56  ;;  %v26520_v18 = vld [vmem:[#allocation94_spill] sm:$0xff] }
 0x866   : > { %v17354_v9 = vpop.eup %17353  ;;  %14634 = vmatprep.mubr.bf16.mxu0 %v13932_v63  ;;  %v17048_v44 = vpop.f32.mrf.mxu1 }
 0x867   : > { %15721 = vst.msk [vmem:[%s24788_s21 + $0x70] sm:$0xff] %vm15706_vm4, %v17354_v9  ;;  %17367 = vtanh.f32 %v15467_v15  ;;  %v15472_v8 = vadd.f32 %v24710_v51, %v15337_v46  ;;  %v15335_v11 = vmul.f32 %v24696_v29, %v14878_v50  ;;  %v14889_v28 = vadd.f32 %v17048_v44, %v24490_v45  ;;  %v14438_v36 = vpop.f32.mrf.mxu0 }
 0x868   : > { %v17356_v62 = vpop.eup %17355  ;;  %v14880_v38 = vpop.f32.mrf.mxu1  ;;  %v13787_v45 = vsel %vm5193_vm1, %v26518_v6, %v24819_v13 }
 0x869   : > { %15719 = vst.msk [vmem:[%s24788_s21 + $0x60] sm:$0xff] %vm15706_vm4, %v17356_v62  ;;  %17369 = vtanh.f32 %v15472_v8  ;;  %v15470_v5 = vadd.f32 %v24710_v51, %v15335_v11  ;;  %v15338_v23 = vmul.f32 %v24696_v29, %v14889_v28  ;;  %v14881_v49 = vadd.f32 %v14880_v38, %v24470_v40  ;;  %v24934_v7 = vpop.f32.mrf.mxu0  ;;  %17146 = vmatmul.mubr.msk.bf16.gmra.mxu1 %vm13318_vm2, %v26517_v24 }
 0x86a   : > { %v17358_v33 = vpop.eup %17357  ;;  %v17051_v21 = vpop.f32.mrf.mxu1  ;;  %17149 = vmatprep.mubr.msk.bf16.mxu1 %vm13318_vm2, %v26519_v1  ;;  %v13577_v24 = vsel %vm13455_vm3, %v24848_v2, %v26520_v18  ;;  %v13934_v56 = vsel %vm13455_vm3, %v13787_v45, %v24850_v48 }
 0x86b   : > { %15722 = vst.msk [vmem:[%s24788_s21 + $0x78] sm:$0xff] %vm15706_vm4, %v17358_v33  ;;  %17371 = vtanh.f32 %v15470_v5  ;;  %v15473_v16 = vadd.f32 %v24710_v51, %v15338_v23  ;;  %v15336_v30 = vmul.f32 %v24696_v29, %v14881_v49  ;;  %v14902_v40 = vadd.f32 %v17051_v21, %v24548_v31  ;;  %v14441_v3 = vpop.f32.mrf.mxu0  ;;  %v26521_v49 = vld [vmem:[#allocation7_spill] sm:$0xff] }
 0x86c   : > { %v17360_v61 = vpop.eup %17359  ;;  %v14893_v13 = vpop.f32.mrf.mxu1 }
 0x86d   : > { %15720 = vst.msk [vmem:[%s24788_s21 + $0x68] sm:$0xff] %vm15706_vm4, %v17360_v61  ;;  %17373 = vtanh.f32 %v15473_v16  ;;  %v15471_v63 = vadd.f32 %v24710_v51, %v15336_v30  ;;  %v15341_v31 = vmul.f32 %v24696_v29, %v14902_v40  ;;  %v14894_v15 = vadd.f32 %v14893_v13, %v24511_v55  ;;  %v24958_v46 = vpop.f32.mrf.mxu0  ;;  %14635 = vmatmul.mubr.bf16.gmra.mxu0 %v13577_v24  ;;  %v26522_v16 = vld [vmem:[#allocation76_spill] sm:$0xff] }
 0x86e   : > { %v17362_v50 = vpop.eup %17361  ;;  %14642 = vmatprep.mubr.bf16.mxu0 %v13934_v56  ;;  %v17052_v9 = vpop.f32.mrf.mxu1  ;;  %v13580_v30 = vsel %vm13455_vm3, %v24891_v60, %v26522_v16 }
 0x86f   : > { %15725 = vst.msk [vmem:[%s24788_s21 + $0x90] sm:$0xff] %vm15706_vm4, %v17362_v50  ;;  %17375 = vtanh.f32 %v15471_v63  ;;  %v15476_v2 = vadd.f32 %v24710_v51, %v15341_v31  ;;  %v15339_v48 = vmul.f32 %v24696_v29, %v14894_v15  ;;  %v14905_v44 = vadd.f32 %v17052_v9, %v24560_v0  ;;  %v14446_v8 = vpop.f32.mrf.mxu0 }
 0x870   : > { %v17364_v11 = vpop.eup %17363  ;;  %v14896_v28 = vpop.f32.mrf.mxu1 }
 0x871   : > { %15723 = vst.msk [vmem:[%s24788_s21 + $0x80] sm:$0xff] %vm15706_vm4, %v17364_v11  ;;  %17377 = vtanh.f32 %v15476_v2  ;;  %v15474_v55 = vadd.f32 %v24710_v51, %v15339_v48  ;;  %v15342_v36 = vmul.f32 %v24696_v29, %v14905_v44  ;;  %v14897_v62 = vadd.f32 %v14896_v28, %v24526_v58  ;;  %v24970_v38 = vpop.f32.mrf.mxu0  ;;  %17150 = vmatmul.mubr.msk.bf16.gmra.mxu1 %vm13318_vm2, %v26521_v49 }
 0x872   : > { %v17366_v5 = vpop.eup %17365  ;;  %v17055_v23 = vpop.f32.mrf.mxu1 }
 0x873   : > { %15726 = vst.msk [vmem:[%s24788_s21 + $0x98] sm:$0xff] %vm15706_vm4, %v17366_v5  ;;  %17379 = vtanh.f32 %v15474_v55  ;;  %v15477_v0 = vadd.f32 %v24710_v51, %v15342_v36  ;;  %v15340_v33 = vmul.f32 %v24696_v29, %v14897_v62  ;;  %v14918_v6 = vadd.f32 %v17055_v23, %v24615_v37  ;;  %v14449_v45 = vpop.f32.mrf.mxu0 }
 0x874   : > { %v17368_v21 = vpop.eup %17367  ;;  %v14909_v58 = vpop.f32.mrf.mxu1 }
 0x875   : > { %15724 = vst.msk [vmem:[%s24788_s21 + $0x88] sm:$0xff] %vm15706_vm4, %v17368_v21  ;;  %17381 = vtanh.f32 %v15477_v0  ;;  %v15475_v40 = vadd.f32 %v24710_v51, %v15340_v33  ;;  %v15345_v3 = vmul.f32 %v24696_v29, %v14918_v6  ;;  %v14910_v1 = vadd.f32 %v14909_v58, %v24580_v20  ;;  %v24987_v61 = vpop.f32.mrf.mxu0  ;;  %14643 = vmatmul.mubr.bf16.gmra.mxu0 %v13580_v30 }
 0x876   : > { %v17370_v37 = vpop.eup %17369  ;;  %v17056_v13 = vpop.f32.mrf.mxu1 }
 0x877   : > { %15729 = vst.msk [vmem:[%s24788_s21 + $0xb0] sm:$0xff] %vm15706_vm4, %v17370_v37  ;;  %17383 = vtanh.f32 %v15475_v40  ;;  %v15480_v60 = vadd.f32 %v24710_v51, %v15345_v3  ;;  %v15343_v18 = vmul.f32 %v24696_v29, %v14910_v1  ;;  %v14921_v24 = vadd.f32 %v17056_v13, %v24626_v32  ;;  %v14454_v56 = vpop.f32.mrf.mxu0 }
 0x878   : > { %v17372_v63 = vpop.eup %17371  ;;  %v14912_v31 = vpop.f32.mrf.mxu1 }
 0x879   : > { %15727 = vst.msk [vmem:[%s24788_s21 + $0xa0] sm:$0xff] %vm15706_vm4, %v17372_v63  ;;  %17385 = vtanh.f32 %v15480_v60  ;;  %v15478_v20 = vadd.f32 %v24710_v51, %v15343_v18  ;;  %v15346_v15 = vmul.f32 %v24696_v29, %v14921_v24  ;;  %v14913_v50 = vadd.f32 %v14912_v31, %v24592_v19  ;;  %v24999_v9 = vpop.f32.mrf.mxu0 }
 0x87a   : > { %v17374_v2 = vpop.eup %17373  ;;  %v17059_v48 = vpop.f32.mrf.mxu1 }
 0x87b   : > { %15730 = vst.msk [vmem:[%s24788_s21 + $0xb8] sm:$0xff] %vm15706_vm4, %v17374_v2  ;;  %17387 = vtanh.f32 %v15478_v20  ;;  %v15481_v32 = vadd.f32 %v24710_v51, %v15346_v15  ;;  %v15344_v44 = vmul.f32 %v24696_v29, %v14913_v50  ;;  %v14934_v8 = vadd.f32 %v17059_v48, %v24678_v57  ;;  %v14457_v11 = vpop.f32.mrf.mxu0 }
 0x87c   : > { %v17376_v28 = vpop.eup %17375  ;;  %v14925_v55 = vpop.f32.mrf.mxu1 }
 0x87d   : > { %15728 = vst.msk [vmem:[%s24788_s21 + $0xa8] sm:$0xff] %vm15706_vm4, %v17376_v28  ;;  %17389 = vtanh.f32 %v15481_v32  ;;  %v15479_v19 = vadd.f32 %v24710_v51, %v15344_v44  ;;  %v15349_v36 = vmul.f32 %v24696_v29, %v14934_v8  ;;  %v14926_v62 = vadd.f32 %v14925_v55, %v24646_v52  ;;  %v25011_v5 = vpop.f32.mrf.mxu0 }
 0x87e   : > { %v17378_v23 = vpop.eup %17377  ;;  %v17060_v49 = vpop.f32.mrf.mxu1 }
 0x87f   : > { %15733 = vst.msk [vmem:[%s24788_s21 + $0xd0] sm:$0xff] %vm15706_vm4, %v17378_v23  ;;  %17391 = vtanh.f32 %v15479_v19  ;;  %v15484_v57 = vadd.f32 %v24710_v51, %v15349_v36  ;;  %v15347_v0 = vmul.f32 %v24696_v29, %v14926_v62  ;;  %v14937_v33 = vadd.f32 %v17060_v49, %v24688_v54  ;;  %v14462_v6 = vpop.f32.mrf.mxu0 }
 0x880   : > { %v17380_v45 = vpop.eup %17379  ;;  %v14928_v21 = vpop.f32.mrf.mxu1 }
 0x881   : > { %15731 = vst.msk [vmem:[%s24788_s21 + $0xc0] sm:$0xff] %vm15706_vm4, %v17380_v45  ;;  %17393 = vtanh.f32 %v15484_v57  ;;  %v15482_v52 = vadd.f32 %v24710_v51, %v15347_v0  ;;  %v15350_v58 = vmul.f32 %v24696_v29, %v14937_v33  ;;  %v14929_v16 = vadd.f32 %v14928_v21, %v24660_v17  ;;  %v25023_v30 = vpop.f32.mrf.mxu0 }
 0x882   : > { %v17382_v40 = vpop.eup %17381  ;;  %v17063_v3 = vpop.f32.mrf.mxu1 }
 0x883   : > { %15734 = vst.msk [vmem:[%s24788_s21 + $0xd8] sm:$0xff] %vm15706_vm4, %v17382_v40  ;;  %17395 = vtanh.f32 %v15482_v52  ;;  %v15485_v54 = vadd.f32 %v24710_v51, %v15350_v58  ;;  %v15348_v1 = vmul.f32 %v24696_v29, %v14929_v16  ;;  %v14950_v37 = vadd.f32 %v17063_v3, %v24762_v26  ;;  %v14465_v13 = vpop.f32.mrf.mxu0 }
 0x884   : > { %v17384_v60 = vpop.eup %17383  ;;  %v14941_v18 = vpop.f32.mrf.mxu1 }
 0x885   : > { %15732 = vst.msk [vmem:[%s24788_s21 + $0xc8] sm:$0xff] %vm15706_vm4, %v17384_v60  ;;  %17397 = vtanh.f32 %v15485_v54  ;;  %v15483_v17 = vadd.f32 %v24710_v51, %v15348_v1  ;;  %v15353_v24 = vmul.f32 %v24696_v29, %v14950_v37  ;;  %v14942_v56 = vadd.f32 %v14941_v18, %v24721_v25  ;;  %v25035_v63 = vpop.f32.mrf.mxu0 }
 0x886   : > { %v17386_v31 = vpop.eup %17385  ;;  %v17064_v20 = vpop.f32.mrf.mxu1 }
 0x887   : > { %15737 = vst.msk [vmem:[%s24788_s21 + $0xf0] sm:$0xff] %vm15706_vm4, %v17386_v31  ;;  %17399 = vtanh.f32 %v15483_v17  ;;  %v15488_v26 = vadd.f32 %v24710_v51, %v15353_v24  ;;  %v15351_v15 = vmul.f32 %v24696_v29, %v14942_v56  ;;  %v14953_v50 = vadd.f32 %v17064_v20, %v24776_v12  ;;  %v14470_v2 = vpop.f32.mrf.mxu0 }
 0x888   : > { %v17388_v48 = vpop.eup %17387  ;;  %v14944_v32 = vpop.f32.mrf.mxu1 }
 0x889   : > { %15735 = vst.msk [vmem:[%s24788_s21 + $0xe0] sm:$0xff] %vm15706_vm4, %v17388_v48  ;;  %17401 = vtanh.f32 %v15488_v26  ;;  %v15486_v25 = vadd.f32 %v24710_v51, %v15351_v15  ;;  %v15354_v44 = vmul.f32 %v24696_v29, %v14953_v50  ;;  %v14945_v8 = vadd.f32 %v14944_v32, %v24741_v42  ;;  %v25047_v11 = vpop.f32.mrf.mxu0 }
 0x88a   : > { %v17390_v28 = vpop.eup %17389  ;;  %v17067_v55 = vpop.f32.mrf.mxu1 }
 0x88b   : > { %15738 = vst.msk [vmem:[%s24788_s21 + $0xf8] sm:$0xff] %vm15706_vm4, %v17390_v28  ;;  %17403 = vtanh.f32 %v15486_v25  ;;  %v15489_v12 = vadd.f32 %v24710_v51, %v15354_v44  ;;  %v15352_v19 = vmul.f32 %v24696_v29, %v14945_v8  ;;  %v14966_v36 = vadd.f32 %v17067_v55, %v24838_v41  ;;  %v14473_v62 = vpop.f32.mrf.mxu0 }
 0x88c   : > { %v17392_v23 = vpop.eup %17391  ;;  %v14957_v49 = vpop.f32.mrf.mxu1 }
 0x88d   : > { %15736 = vst.msk [vmem:[%s24788_s21 + $0xe8] sm:$0xff] %vm15706_vm4, %v17392_v23  ;;  %17405 = vtanh.f32 %v15489_v12  ;;  %v15487_v42 = vadd.f32 %v24710_v51, %v15352_v19  ;;  %v15357_v57 = vmul.f32 %v24696_v29, %v14966_v36  ;;  %v14958_v0 = vadd.f32 %v14957_v49, %v24800_v22  ;;  %v25059_v33 = vpop.f32.mrf.mxu0 }
 0x88e   : > { %v17394_v6 = vpop.eup %17393  ;;  %v17068_v45 = vpop.f32.mrf.mxu1 }
 0x88f   : > { %15741 = vst.msk [vmem:[%s24788_s21 + $0x110] sm:$0xff] %vm15706_vm4, %v17394_v6  ;;  %17407 = vtanh.f32 %v15487_v42  ;;  %v15492_v41 = vadd.f32 %v24710_v51, %v15357_v57  ;;  %v15355_v21 = vmul.f32 %v24696_v29, %v14958_v0  ;;  %v14969_v52 = vadd.f32 %v17068_v45, %v24857_v39  ;;  %v14478_v58 = vpop.f32.mrf.mxu0 }
 0x890   : > { %v17396_v16 = vpop.eup %17395  ;;  %v14960_v40 = vpop.f32.mrf.mxu1 }
 0x891   : > { %15739 = vst.msk [vmem:[%s24788_s21 + $0x100] sm:$0xff] %vm15706_vm4, %v17396_v16  ;;  %17409 = vtanh.f32 %v15492_v41  ;;  %v15490_v22 = vadd.f32 %v24710_v51, %v15355_v21  ;;  %v15358_v3 = vmul.f32 %v24696_v29, %v14969_v52  ;;  %v14961_v54 = vadd.f32 %v14960_v40, %v24812_v34  ;;  %v25071_v1 = vpop.f32.mrf.mxu0 }
 0x892   : > { %v17398_v37 = vpop.eup %17397  ;;  %v17071_v13 = vpop.f32.mrf.mxu1 }
 0x893   : > { %15742 = vst.msk [vmem:[%s24788_s21 + $0x118] sm:$0xff] %vm15706_vm4, %v17398_v37  ;;  %17411 = vtanh.f32 %v15490_v22  ;;  %v15493_v39 = vadd.f32 %v24710_v51, %v15358_v3  ;;  %v15356_v60 = vmul.f32 %v24696_v29, %v14961_v54  ;;  %v14982_v18 = vadd.f32 %v17071_v13, %v24922_v4  ;;  %v14481_v17 = vpop.f32.mrf.mxu0 }
 0x894   : > { %v17400_v24 = vpop.eup %17399  ;;  %v14973_v56 = vpop.f32.mrf.mxu1 }
 0x895   : > { %15740 = vst.msk [vmem:[%s24788_s21 + $0x108] sm:$0xff] %vm15706_vm4, %v17400_v24  ;;  %17413 = vtanh.f32 %v15493_v39  ;;  %v15491_v34 = vadd.f32 %v24710_v51, %v15356_v60  ;;  %v15361_v31 = vmul.f32 %v24696_v29, %v14982_v18  ;;  %v14974_v20 = vadd.f32 %v14973_v56, %v24881_v53  ;;  %v25083_v26 = vpop.f32.mrf.mxu0 }
 0x896   : > { %v17402_v15 = vpop.eup %17401  ;;  %v17072_v50 = vpop.f32.mrf.mxu1 }
 0x897   : > { %15745 = vst.msk [vmem:[%s24788_s21 + $0x130] sm:$0xff] %vm15706_vm4, %v17402_v15  ;;  %17415 = vtanh.f32 %v15491_v34  ;;  %v15496_v4 = vadd.f32 %v24710_v51, %v15361_v31  ;;  %v15359_v2 = vmul.f32 %v24696_v29, %v14974_v20  ;;  %v14985_v48 = vadd.f32 %v17072_v50, %v24934_v7  ;;  %v14486_v32 = vpop.f32.mrf.mxu0 }
 0x898   : > { %v17404_v25 = vpop.eup %17403  ;;  %v14976_v44 = vpop.f32.mrf.mxu1 }
 0x899   : > { %15743 = vst.msk [vmem:[%s24788_s21 + $0x120] sm:$0xff] %vm15706_vm4, %v17404_v25  ;;  %17417 = vtanh.f32 %v15496_v4  ;;  %v15494_v53 = vadd.f32 %v24710_v51, %v15359_v2  ;;  %v15362_v8 = vmul.f32 %v24696_v29, %v14985_v48  ;;  %v14977_v28 = vadd.f32 %v14976_v44, %v24898_v14  ;;  %v25095_v55 = vpop.f32.mrf.mxu0 }
 0x89a   : > { %v17406_v12 = vpop.eup %17405  ;;  %v17075_v19 = vpop.f32.mrf.mxu1 }
 0x89b   : > { %15746 = vst.msk [vmem:[%s24788_s21 + $0x138] sm:$0xff] %vm15706_vm4, %v17406_v12  ;;  %17419 = vtanh.f32 %v15494_v53  ;;  %v15497_v7 = vadd.f32 %v24710_v51, %v15362_v8  ;;  %v15360_v36 = vmul.f32 %v24696_v29, %v14977_v28  ;;  %v14998_v62 = vadd.f32 %v17075_v19, %v24987_v61  ;;  %v14489_v23 = vpop.f32.mrf.mxu0 }
 0x89c   : > { %v17408_v49 = vpop.eup %17407  ;;  %v14989_v42 = vpop.f32.mrf.mxu1 }
 0x89d   : > { %15744 = vst.msk [vmem:[%s24788_s21 + $0x128] sm:$0xff] %vm15706_vm4, %v17408_v49  ;;  %17421 = vtanh.f32 %v15497_v7  ;;  %v15495_v14 = vadd.f32 %v24710_v51, %v15360_v36  ;;  %v15365_v57 = vmul.f32 %v24696_v29, %v14998_v62  ;;  %v14990_v0 = vadd.f32 %v14989_v42, %v24958_v46  ;;  %v25107_v6 = vpop.f32.mrf.mxu0 }
 0x89e   : > { %v17410_v45 = vpop.eup %17409  ;;  %v17076_v41 = vpop.f32.mrf.mxu1 }
 0x89f   : > { %15749 = vst.msk [vmem:[%s24788_s21 + $0x150] sm:$0xff] %vm15706_vm4, %v17410_v45  ;;  %17423 = vtanh.f32 %v15495_v14  ;;  %v15500_v61 = vadd.f32 %v24710_v51, %v15365_v57  ;;  %v15363_v21 = vmul.f32 %v24696_v29, %v14990_v0  ;;  %v15001_v52 = vadd.f32 %v17076_v41, %v24999_v9  ;;  %v14494_v58 = vpop.f32.mrf.mxu0  ;;  %v25159_v0 = vld [vmem:[%s25564_s11] ss:$0 sm:$0xff] }
 0x8a0   : > { %v17412_v16 = vpop.eup %17411  ;;  %v14992_v40 = vpop.f32.mrf.mxu1 }
 0x8a1   : > { %15747 = vst.msk [vmem:[%s24788_s21 + $0x140] sm:$0xff] %vm15706_vm4, %v17412_v16  ;;  %17425 = vtanh.f32 %v15500_v61  ;;  %v15498_v46 = vadd.f32 %v24710_v51, %v15363_v21  ;;  %v15366_v22 = vmul.f32 %v24696_v29, %v15001_v52  ;;  %v14993_v3 = vadd.f32 %v14992_v40, %v24970_v38  ;;  %v25119_v54 = vpop.f32.mrf.mxu0 }
 0x8a2   : > { %v17414_v37 = vpop.eup %17413  ;;  %v17079_v13 = vpop.f32.mrf.mxu1 }
 0x8a3   : > { %15750 = vst.msk [vmem:[%s24788_s21 + $0x158] sm:$0xff] %vm15706_vm4, %v17414_v37  ;;  %17427 = vtanh.f32 %v15498_v46  ;;  %v15501_v9 = vadd.f32 %v24710_v51, %v15366_v22  ;;  %v15364_v39 = vmul.f32 %v24696_v29, %v14993_v3  ;;  %v15014_v60 = vadd.f32 %v17079_v13, %v25035_v63  ;;  %v14497_v18 = vpop.f32.mrf.mxu0 }
 0x8a4   : > { %v17416_v17 = vpop.eup %17415  ;;  %v15005_v24 = vpop.f32.mrf.mxu1 }
 0x8a5   : > { %15748 = vst.msk [vmem:[%s24788_s21 + $0x148] sm:$0xff] %vm15706_vm4, %v17416_v17  ;;  %17429 = vtanh.f32 %v15501_v9  ;;  %v15499_v38 = vadd.f32 %v24710_v51, %v15364_v39  ;;  %v15369_v56 = vmul.f32 %v24696_v29, %v15014_v60  ;;  %v15006_v34 = vadd.f32 %v15005_v24, %v25011_v5  ;;  %v14500_v31 = vpop.f32.mrf.mxu0 }
 0x8a6   : > { %v17418_v20 = vpop.eup %17417  ;;  %v17080_v15 = vpop.f32.mrf.mxu1 }
 0x8a7   : > { %15753 = vst.msk [vmem:[%s24788_s21 + $0x170] sm:$0xff] %vm15706_vm4, %v17418_v20  ;;  %17431 = vtanh.f32 %v15499_v38  ;;  %v15504_v63 = vadd.f32 %v24710_v51, %v15369_v56  ;;  %v15367_v50 = vmul.f32 %v24696_v29, %v15006_v34  ;;  %v15017_v4 = vadd.f32 %v17080_v15, %v25047_v11  ;;  %v14502_v2 = vpop.f32.mrf.mxu0 }
 0x8a8   : > { %v17420_v48 = vpop.eup %17419  ;;  %v15008_v32 = vpop.f32.mrf.mxu1 }
 0x8a9   : > { %15751 = vst.msk [vmem:[%s24788_s21 + $0x160] sm:$0xff] %vm15706_vm4, %v17420_v48  ;;  %17433 = vtanh.f32 %v15504_v63  ;;  %v15502_v5 = vadd.f32 %v24710_v51, %v15367_v50  ;;  %v15370_v25 = vmul.f32 %v24696_v29, %v15017_v4  ;;  %v15009_v44 = vadd.f32 %v15008_v32, %v25023_v30  ;;  %v14503_v53 = vpop.f32.mrf.mxu0 }
 0x8aa   : > { %v17422_v8 = vpop.eup %17421  ;;  %v17083_v28 = vpop.f32.mrf.mxu1 }
 0x8ab   : > { %15754 = vst.msk [vmem:[%s24788_s21 + $0x178] sm:$0xff] %vm15706_vm4, %v17422_v8  ;;  %17435 = vtanh.f32 %v15502_v5  ;;  %v15505_v11 = vadd.f32 %v24710_v51, %v15370_v25  ;;  %v15368_v12 = vmul.f32 %v24696_v29, %v15009_v44  ;;  %v15030_v19 = vadd.f32 %v17083_v28, %v25083_v26  ;;  %v14505_v7 = vpop.f32.mrf.mxu0 }
 0x8ac   : > { %v17424_v36 = vpop.eup %17423  ;;  %v15021_v62 = vpop.f32.mrf.mxu1 }
 0x8ad   : > { %15752 = vst.msk [vmem:[%s24788_s21 + $0x168] sm:$0xff] %vm15706_vm4, %v17424_v36  ;;  %17437 = vtanh.f32 %v15505_v11  ;;  %v15503_v30 = vadd.f32 %v24710_v51, %v15368_v12  ;;  %v15373_v23 = vmul.f32 %v24696_v29, %v15030_v19  ;;  %v15022_v49 = vadd.f32 %v15021_v62, %v25059_v33  ;;  %v25151_v42 = vpop.f32.mrf.mxu0 }
 0x8ae   : > { %v17426_v14 = vpop.eup %17425  ;;  %v17084_v57 = vpop.f32.mrf.mxu1 }
 0x8af   : > { %15757 = vst.msk [vmem:[%s24788_s21 + $0x190] sm:$0xff] %vm15706_vm4, %v17426_v14  ;;  %17439 = vtanh.f32 %v15503_v30  ;;  %v15508_v26 = vadd.f32 %v24710_v51, %v15373_v23  ;;  %v15371_v45 = vmul.f32 %v25159_v0, %v15022_v49  ;;  %v15033_v29 = vadd.f32 %v17084_v57, %v25095_v55  ;;  %v14510_v33 = vpop.f32.mrf.mxu0  ;;  %v25168_v51 = vld [vmem:[%s25565_s12] ss:$0 sm:$0xff] }
 0x8b0   : > { %v17428_v41 = vpop.eup %17427  ;;  %v15024_v61 = vpop.f32.mrf.mxu1 }
 0x8b1   : > { %15755 = vst.msk [vmem:[%s24788_s21 + $0x180] sm:$0xff] %vm15706_vm4, %v17428_v41  ;;  %17441 = vtanh.f32 %v15508_v26  ;;  %v15506_v21 = vadd.f32 %v25168_v51, %v15371_v45  ;;  %v15374_v52 = vmul.f32 %v25159_v0, %v15033_v29  ;;  %v15025_v58 = vadd.f32 %v15024_v61, %v25071_v1  ;;  %v25173_v16 = vpop.f32.mrf.mxu0 }
 0x8b2   : > { %v17430_v55 = vpop.eup %17429  ;;  %v17087_v40 = vpop.f32.mrf.mxu1 }
 0x8b3   : > { %15758 = vst.msk [vmem:[%s24788_s21 + $0x198] sm:$0xff] %vm15706_vm4, %v17430_v55  ;;  %17443 = vtanh.f32 %v15506_v21  ;;  %v15509_v46 = vadd.f32 %v25168_v51, %v15374_v52  ;;  %v15372_v22 = vmul.f32 %v25159_v0, %v15025_v58  ;;  %v15046_v3 = vadd.f32 %v17087_v40, %v14500_v31  ;;  %v14513_v37 = vpop.f32.mrf.mxu0 }
 0x8b4   : > { %v17432_v13 = vpop.eup %17431  ;;  %v15037_v9 = vpop.f32.mrf.mxu1 }
 0x8b5   : > { %15756 = vst.msk [vmem:[%s24788_s21 + $0x188] sm:$0xff] %vm15706_vm4, %v17432_v13  ;;  %17445 = vtanh.f32 %v15509_v46  ;;  %v15507_v1 = vadd.f32 %v25168_v51, %v15372_v22  ;;  %v15377_v39 = vmul.f32 %v25159_v0, %v15046_v3  ;;  %v15038_v60 = vadd.f32 %v15037_v9, %v25107_v6  ;;  %v14516_v18 = vpop.f32.mrf.mxu0 }
 0x8b6   : > { %v17434_v17 = vpop.eup %17433  ;;  %v17088_v24 = vpop.f32.mrf.mxu1 }
 0x8b7   : > { %15761 = vst.msk [vmem:[%s24788_s21 + $0x1b0] sm:$0xff] %vm15706_vm4, %v17434_v17  ;;  %17447 = vtanh.f32 %v15507_v1  ;;  %v15512_v38 = vadd.f32 %v25168_v51, %v15377_v39  ;;  %v15375_v56 = vmul.f32 %v25159_v0, %v15038_v60  ;;  %v15049_v34 = vadd.f32 %v17088_v24, %v14503_v53  ;;  %v14518_v31 = vpop.f32.mrf.mxu0 }
 0x8b8   : > { %v17436_v20 = vpop.eup %17435  ;;  %v15040_v15 = vpop.f32.mrf.mxu1 }
 0x8b9   : > { %15759 = vst.msk [vmem:[%s24788_s21 + $0x1a0] sm:$0xff] %vm15706_vm4, %v17436_v20  ;;  %17449 = vtanh.f32 %v15512_v38  ;;  %v15510_v6 = vadd.f32 %v25168_v51, %v15375_v56  ;;  %v15378_v63 = vmul.f32 %v25159_v0, %v15049_v34  ;;  %v15041_v50 = vadd.f32 %v15040_v15, %v25119_v54  ;;  %v14519_v4 = vpop.f32.mrf.mxu0 }
 0x8ba   : > { %v17438_v2 = vpop.eup %17437  ;;  %v17091_v48 = vpop.f32.mrf.mxu1 }
 0x8bb   : > { %15762 = vst.msk [vmem:[%s24788_s21 + $0x1b8] sm:$0xff] %vm15706_vm4, %v17438_v2  ;;  %17451 = vtanh.f32 %v15510_v6  ;;  %v15513_v32 = vadd.f32 %v25168_v51, %v15378_v63  ;;  %v15376_v5 = vmul.f32 %v25159_v0, %v15041_v50  ;;  %v15062_v25 = vadd.f32 %v17091_v48, %v14516_v18  ;;  %v14521_v44 = vpop.f32.mrf.mxu0 }
 0x8bc   : > { %v17440_v53 = vpop.eup %17439  ;;  %v15053_v8 = vpop.f32.mrf.mxu1 }
 0x8bd   : > { %15760 = vst.msk [vmem:[%s24788_s21 + $0x1a8] sm:$0xff] %vm15706_vm4, %v17440_v53  ;;  %17453 = vtanh.f32 %v15513_v32  ;;  %v15511_v54 = vadd.f32 %v25168_v51, %v15376_v5  ;;  %v15381_v28 = vmul.f32 %v25159_v0, %v15062_v25  ;;  %v15054_v11 = vadd.f32 %v15053_v8, %v25151_v42  ;;  %v14524_v12 = vpop.f32.mrf.mxu0 }
 0x8be   : > { %v17442_v19 = vpop.eup %17441  ;;  %v17092_v7 = vpop.f32.mrf.mxu1 }
 0x8bf   : > { %15765 = vst.msk [vmem:[%s24788_s21 + $0x1d0] sm:$0xff] %vm15706_vm4, %v17442_v19  ;;  %17455 = vtanh.f32 %v15511_v54  ;;  %v15516_v36 = vadd.f32 %v25168_v51, %v15381_v28  ;;  %v15379_v62 = vmul.f32 %v25159_v0, %v15054_v11  ;;  %v15065_v30 = vadd.f32 %v17092_v7, %v14519_v4  ;;  %v14526_v23 = vpop.f32.mrf.mxu0 }
 0x8c0   : > { %v17444_v49 = vpop.eup %17443  ;;  %v15056_v14 = vpop.f32.mrf.mxu1 }
 0x8c1   : > { %15763 = vst.msk [vmem:[%s24788_s21 + $0x1c0] sm:$0xff] %vm15706_vm4, %v17444_v49  ;;  %17457 = vtanh.f32 %v15516_v36  ;;  %v15514_v42 = vadd.f32 %v25168_v51, %v15379_v62  ;;  %v15382_v57 = vmul.f32 %v25159_v0, %v15065_v30  ;;  %v15057_v26 = vadd.f32 %v15056_v14, %v25173_v16  ;;  %v14527_v45 = vpop.f32.mrf.mxu0 }
 0x8c2   : > { %v17446_v29 = vpop.eup %17445  ;;  %v17095_v33 = vpop.f32.mrf.mxu1 }
 0x8c3   : > { %15766 = vst.msk [vmem:[%s24788_s21 + $0x1d8] sm:$0xff] %vm15706_vm4, %v17446_v29  ;;  %17459 = vtanh.f32 %v15514_v42  ;;  %v15517_v41 = vadd.f32 %v25168_v51, %v15382_v57  ;;  %v15380_v61 = vmul.f32 %v25159_v0, %v15057_v26  ;;  %v14529_v21 = vpop.f32.mrf.mxu0 }
 0x8c4   : > { %v17448_v52 = vpop.eup %17447  ;;  %v15069_v58 = vpop.f32.mrf.mxu1 }
 0x8c5   : > { %15764 = vst.msk [vmem:[%s24788_s21 + $0x1c8] sm:$0xff] %vm15706_vm4, %v17448_v52  ;;  %17461 = vtanh.f32 %v15517_v41  ;;  %v15515_v16 = vadd.f32 %v25168_v51, %v15380_v61  ;;  %v15070_v55 = vadd.f32 %v15069_v58, %v14524_v12  ;;  %v14532_v40 = vpop.f32.mrf.mxu0 }
 0x8c6   : > { %v17450_v46 = vpop.eup %17449  ;;  %v15078_v22 = vadd.f32 %v17095_v33, %v14532_v40  ;;  %v17096_v3 = vpop.f32.mrf.mxu1 }
 0x8c7   : > { %15769 = vst.msk [vmem:[%s24788_s21 + $0x1f0] sm:$0xff] %vm15706_vm4, %v17450_v46  ;;  %17463 = vtanh.f32 %v15515_v16  ;;  %v15383_v37 = vmul.f32 %v25159_v0, %v15070_v55  ;;  %v14534_v13 = vpop.f32.mrf.mxu0 }
 0x8c8   : > { %v17452_v9 = vpop.eup %17451  ;;  %v15385_v1 = vmul.f32 %v25159_v0, %v15078_v22  ;;  %v15072_v39 = vpop.f32.mrf.mxu1 }
 0x8c9   : > { %15767 = vst.msk [vmem:[%s24788_s21 + $0x1e0] sm:$0xff] %vm15706_vm4, %v17452_v9  ;;  %v15518_v60 = vadd.f32 %v25168_v51, %v15383_v37  ;;  %v15073_v18 = vadd.f32 %v15072_v39, %v14527_v45  ;;  %v14535_v17 = vpop.f32.mrf.mxu0 }
 0x8ca   : > { %v17454_v24 = vpop.eup %17453  ;;  %v15520_v38 = vadd.f32 %v25168_v51, %v15385_v1  ;;  %v15081_v56 = vadd.f32 %v17096_v3, %v14535_v17  ;;  %v17099_v34 = vpop.f32.mrf.mxu1 }
 0x8cb   : > { %15770 = vst.msk [vmem:[%s24788_s21 + $0x1f8] sm:$0xff] %vm15706_vm4, %v17454_v24  ;;  %17465 = vtanh.f32 %v15518_v60  ;;  %v15384_v31 = vmul.f32 %v25159_v0, %v15073_v18  ;;  %v14537_v20 = vpop.f32.mrf.mxu0 }
 0x8cc   : > { %v17456_v15 = vpop.eup %17455  ;;  %17467 = vtanh.f32 %v15520_v38  ;;  %v15386_v6 = vmul.f32 %v25159_v0, %v15081_v56  ;;  %v15085_v63 = vpop.f32.mrf.mxu1 }
 0x8cd   : > { %15768 = vst.msk [vmem:[%s24788_s21 + $0x1e8] sm:$0xff] %vm15706_vm4, %v17456_v15  ;;  %v15519_v50 = vadd.f32 %v25168_v51, %v15384_v31  ;;  %v14540_v4 = vpop.f32.mrf.mxu0 }
 0x8ce   : > { %v17458_v2 = vpop.eup %17457  ;;  %v15521_v48 = vadd.f32 %v25168_v51, %v15386_v6  ;;  %v15086_v32 = vadd.f32 %v15085_v63, %v14540_v4  ;;  %v17100_v5 = vpop.f32.mrf.mxu1 }
 0x8cf   : > { %15773 = vst.msk [vmem:[%s24788_s21 + $0x210] sm:$0xff] %vm15706_vm4, %v17458_v2  ;;  %17469 = vtanh.f32 %v15519_v50  ;;  %v14542_v25 = vpop.f32.mrf.mxu0 }
 0x8d0   : > { %v17460_v44 = vpop.eup %17459  ;;  %17471 = vtanh.f32 %v15521_v48  ;;  %v15387_v53 = vmul.f32 %v25159_v0, %v15086_v32  ;;  %v15088_v8 = vpop.f32.mrf.mxu1 }
 0x8d1   : > { %15771 = vst.msk [vmem:[%s24788_s21 + $0x200] sm:$0xff] %vm15706_vm4, %v17460_v44  ;;  %v14543_v54 = vpop.f32.mrf.mxu0 }
 0x8d2   : > { %v17462_v28 = vpop.eup %17461  ;;  %v15522_v11 = vadd.f32 %v25168_v51, %v15387_v53  ;;  %v15089_v12 = vadd.f32 %v15088_v8, %v14543_v54  ;;  %v17103_v19 = vpop.f32.mrf.mxu1 }
 0x8d3   : > { %15774 = vst.msk [vmem:[%s24788_s21 + $0x218] sm:$0xff] %vm15706_vm4, %v17462_v28  ;;  %v14545_v7 = vpop.f32.mrf.mxu0 }
 0x8d4   : > { %v17464_v36 = vpop.eup %17463  ;;  %17473 = vtanh.f32 %v15522_v11  ;;  %v15388_v62 = vmul.f32 %v25159_v0, %v15089_v12  ;;  %v15101_v30 = vpop.f32.mrf.mxu1 }
 0x8d5   : > { %15772 = vst.msk [vmem:[%s24788_s21 + $0x208] sm:$0xff] %vm15706_vm4, %v17464_v36  ;;  %v14548_v23 = vpop.f32.mrf.mxu0 }
 0x8d6   : > { %v15523_v49 = vadd.f32 %v25168_v51, %v15388_v62  ;;  %v15094_v14 = vadd.f32 %v17099_v34, %v14548_v23  ;;  %v17104_v42 = vpop.f32.mrf.mxu1 }
 0x8d7   : > { %v14550_v57 = vpop.f32.mrf.mxu0 }
 0x8d8   : > { %v17466_v26 = vpop.eup %17465  ;;  %17475 = vtanh.f32 %v15523_v49  ;;  %v15389_v45 = vmul.f32 %v25159_v0, %v15094_v14  ;;  %v15104_v29 = vpop.f32.mrf.mxu1 }
 0x8d9   : > { %v17468_v33 = vpop.eup %17467  ;;  %15775 = vst.msk [vmem:[%s24788_s21 + $0x220] sm:$0xff] %vm15706_vm4, %v17466_v26  ;;  %v14551_v41 = vpop.f32.mrf.mxu0 }
 0x8da   : > { %15777 = vst.msk [vmem:[%s24788_s21 + $0x230] sm:$0xff] %vm15706_vm4, %v17468_v33  ;;  %v15524_v61 = vadd.f32 %v25168_v51, %v15389_v45  ;;  %v15097_v21 = vadd.f32 %v17100_v5, %v14551_v41  ;;  %v25252_v52 = vpop.f32.mrf.mxu1 }
 0x8db   : > { %v14553_v58 = vpop.f32.mrf.mxu0 }
 0x8dc   : > { %v17470_v16 = vpop.eup %17469  ;;  %17477 = vtanh.f32 %v15524_v61  ;;  %v15390_v55 = vmul.f32 %v25159_v0, %v15097_v21  ;;  %v15117_v40 = vpop.f32.mrf.mxu1 }
 0x8dd   : > { %v17472_v46 = vpop.eup %17471  ;;  %15776 = vst.msk [vmem:[%s24788_s21 + $0x228] sm:$0xff] %vm15706_vm4, %v17470_v16  ;;  %v14556_v22 = vpop.f32.mrf.mxu0 }
 0x8de   : > { %15778 = vst.msk [vmem:[%s24788_s21 + $0x238] sm:$0xff] %vm15706_vm4, %v17472_v46  ;;  %v15525_v3 = vadd.f32 %v25168_v51, %v15390_v55  ;;  %v15102_v37 = vadd.f32 %v15101_v30, %v14556_v22  ;;  %v25260_v13 = vpop.f32.mrf.mxu1 }
 0x8df   : > { %v14558_v9 = vpop.f32.mrf.mxu0 }
 0x8e0   : > { %17479 = vtanh.f32 %v15525_v3  ;;  %v15391_v1 = vmul.f32 %v25159_v0, %v15102_v37  ;;  %v15120_v39 = vpop.f32.mrf.mxu1 }
 0x8e1   : > { %v17474_v60 = vpop.eup %17473  ;;  %v14559_v18 = vpop.f32.mrf.mxu0 }
 0x8e2   : > { %15779 = vst.msk [vmem:[%s24788_s21 + $0x240] sm:$0xff] %vm15706_vm4, %v17474_v60  ;;  %v15526_v17 = vadd.f32 %v25168_v51, %v15391_v1  ;;  %v15105_v24 = vadd.f32 %v15104_v29, %v14559_v18  ;;  %v25266_v38 = vpop.f32.mrf.mxu1 }
 0x8e3   : > { %v14561_v56 = vpop.f32.mrf.mxu0 }
 0x8e4   : > { %17481 = vtanh.f32 %v15526_v17  ;;  %v15392_v34 = vmul.f32 %v25159_v0, %v15105_v24  ;;  %v25269_v31 = vpop.f32.mrf.mxu1 }
 0x8e5   : > { %v17476_v20 = vpop.eup %17475  ;;  %v14564_v15 = vpop.f32.mrf.mxu0 }
 0x8e6   : > { %15780 = vst.msk [vmem:[%s24788_s21 + $0x248] sm:$0xff] %vm15706_vm4, %v17476_v20  ;;  %v15527_v6 = vadd.f32 %v25168_v51, %v15392_v34  ;;  %v15110_v63 = vadd.f32 %v17103_v19, %v14564_v15  ;;  %v25274_v50 = vpop.f32.mrf.mxu1 }
 0x8e7   : > { %v14566_v4 = vpop.f32.mrf.mxu0 }
 0x8e8   : > { %17483 = vtanh.f32 %v15527_v6  ;;  %v15393_v2 = vmul.f32 %v25159_v0, %v15110_v63  ;;  %v25277_v48 = vpop.f32.mrf.mxu1 }
 0x8e9   : > { %v17478_v32 = vpop.eup %17477  ;;  %v14567_v5 = vpop.f32.mrf.mxu0 }
 0x8ea   : > { %15781 = vst.msk [vmem:[%s24788_s21 + $0x250] sm:$0xff] %vm15706_vm4, %v17478_v32  ;;  %v15528_v25 = vadd.f32 %v25168_v51, %v15393_v2  ;;  %v15113_v44 = vadd.f32 %v17104_v42, %v14567_v5  ;;  %v25282_v53 = vpop.f32.mrf.mxu1  ;;  %v26523_v5 = vld [vmem:[#allocation117_spill] sm:$0xff] }
 0x8eb   : > { %v14569_v8 = vpop.f32.mrf.mxu0 }
 0x8ec   : > { %17485 = vtanh.f32 %v15528_v25  ;;  %v15394_v54 = vmul.f32 %v25159_v0, %v15113_v44  ;;  %v25285_v28 = vpop.f32.mrf.mxu1 }
 0x8ed   : > { %v17480_v11 = vpop.eup %17479  ;;  %v14572_v12 = vpop.f32.mrf.mxu0 }
 0x8ee   : > { %15782 = vst.msk [vmem:[%s24788_s21 + $0x258] sm:$0xff] %vm15706_vm4, %v17480_v11  ;;  %v15529_v19 = vadd.f32 %v25168_v51, %v15394_v54  ;;  %v15118_v7 = vadd.f32 %v15117_v40, %v14572_v12  ;;  %v25290_v36 = vpop.f32.mrf.mxu1  ;;  %v26524_v12 = vld [vmem:[#allocation118_spill] sm:$0xff] }
 0x8ef   : > { %v14574_v62 = vpop.f32.mrf.mxu0 }
 0x8f0   : > { %17487 = vtanh.f32 %v15529_v19  ;;  %v15395_v30 = vmul.f32 %v25159_v0, %v15118_v7  ;;  %v25293_v23 = vpop.f32.mrf.mxu1 }
 0x8f1   : > { %v17482_v49 = vpop.eup %17481  ;;  %v14575_v14 = vpop.f32.mrf.mxu0 }
 0x8f2   : > { %15783 = vst.msk [vmem:[%s24788_s21 + $0x260] sm:$0xff] %vm15706_vm4, %v17482_v49  ;;  %v15530_v42 = vadd.f32 %v25168_v51, %v15395_v30  ;;  %v15121_v57 = vadd.f32 %v15120_v39, %v14575_v14  ;;  %v25298_v26 = vpop.f32.mrf.mxu1 }
 0x8f3   : > { %v14577_v45 = vpop.f32.mrf.mxu0 }
 0x8f4   : > { %17489 = vtanh.f32 %v15530_v42  ;;  %v15396_v29 = vmul.f32 %v25159_v0, %v15121_v57  ;;  %v25301_v33 = vpop.f32.mrf.mxu1  ;;  %v26525_v42 = vld [vmem:[#allocation122_spill] sm:$0xff] }
 0x8f5   : > { %v17484_v41 = vpop.eup %17483  ;;  %v14580_v61 = vpop.f32.mrf.mxu0 }
 0x8f6   : > { %15784 = vst.msk [vmem:[%s24788_s21 + $0x268] sm:$0xff] %vm15706_vm4, %v17484_v41  ;;  %v15531_v21 = vadd.f32 %v25168_v51, %v15396_v29  ;;  %v15126_v58 = vadd.f32 %v25252_v52, %v14580_v61  ;;  %v25307_v16 = vpop.f32.mrf.mxu1 }
 0x8f7   : > { %v14582_v55 = vpop.f32.mrf.mxu0 }
 0x8f8   : > { %17491 = vtanh.f32 %v15531_v21  ;;  %v15397_v40 = vmul.f32 %v25159_v0, %v15126_v58  ;;  %v25310_v46 = vpop.f32.mrf.mxu1  ;;  %v26526_v55 = vld [vmem:[#allocation121_spill] sm:$0xff] }
 0x8f9   : > { %v17486_v22 = vpop.eup %17485  ;;  %v14583_v3 = vpop.f32.mrf.mxu0 }
 0x8fa   : > { %15785 = vst.msk [vmem:[%s24788_s21 + $0x270] sm:$0xff] %vm15706_vm4, %v17486_v22  ;;  %v15532_v37 = vadd.f32 %v25168_v51, %v15397_v40  ;;  %v15129_v9 = vadd.f32 %v25260_v13, %v14583_v3  ;;  %v25316_v1 = vpop.f32.mrf.mxu1 }
 0x8fb   : > { %v14585_v52 = vpop.f32.mrf.mxu0 }
 0x8fc   : > { %17493 = vtanh.f32 %v15532_v37  ;;  %v15398_v39 = vmul.f32 %v25159_v0, %v15129_v9  ;;  %v25319_v60 = vpop.f32.mrf.mxu1 }
 0x8fd   : > { %v17488_v18 = vpop.eup %17487  ;;  %v14588_v17 = vpop.f32.mrf.mxu0 }
 0x8fe   : > { %15786 = vst.msk [vmem:[%s24788_s21 + $0x278] sm:$0xff] %vm15706_vm4, %v17488_v18  ;;  %v15533_v24 = vadd.f32 %v25168_v51, %v15398_v39  ;;  %v15134_v56 = vadd.f32 %v25269_v31, %v14588_v17  ;;  %v25325_v34 = vpop.f32.mrf.mxu1 }
 0x8ff   : > { %v14590_v13 = vpop.f32.mrf.mxu0 }
 0x900   : > { %17495 = vtanh.f32 %v15533_v24  ;;  %v15399_v20 = vmul.f32 %v25159_v0, %v15134_v56  ;;  %v25328_v15 = vpop.f32.mrf.mxu1 }
 0x901   : > { %v17490_v6 = vpop.eup %17489  ;;  %v14591_v63 = vpop.f32.mrf.mxu0 }
 0x902   : > { %15787 = vst.msk [vmem:[%s24788_s21 + $0x280] sm:$0xff] %vm15706_vm4, %v17490_v6  ;;  %v15534_v4 = vadd.f32 %v25168_v51, %v15399_v20  ;;  %v15137_v2 = vadd.f32 %v25277_v48, %v14591_v63  ;;  %v17127_v32 = vpop.f32.mrf.mxu1  ;;  %v26527_v20 = vld [vmem:[#allocation120_spill] sm:$0xff] }
 0x903   : > { %v15206_v31 = vadd.f32 %v17127_v32, %v26523_v5  ;;  %v14593_v25 = vpop.f32.mrf.mxu0 }
 0x904   : > { %17497 = vtanh.f32 %v15534_v4  ;;  %v15400_v44 = vmul.f32 %v25159_v0, %v15137_v2  ;;  %v15197_v8 = vpop.f32.mrf.mxu1 }
 0x905   : > { %v17492_v54 = vpop.eup %17491  ;;  %v15417_v11 = vmul.f32 %v25159_v0, %v15206_v31  ;;  %v15198_v19 = vadd.f32 %v15197_v8, %v26524_v12  ;;  %v14596_v7 = vpop.f32.mrf.mxu0  ;;  %v26528_v31 = vld [vmem:[#allocation103_spill] sm:$0xff] }
 0x906   : > { %15788 = vst.msk [vmem:[%s24788_s21 + $0x288] sm:$0xff] %vm15706_vm4, %v17492_v54  ;;  %v15535_v62 = vadd.f32 %v25168_v51, %v15400_v44  ;;  %v15142_v48 = vadd.f32 %v25266_v38, %v14596_v7  ;;  %v17128_v30 = vpop.f32.mrf.mxu1 }
 0x907   : > { %v15552_v49 = vadd.f32 %v25168_v51, %v15417_v11  ;;  %v15415_v14 = vmul.f32 %v25159_v0, %v15198_v19  ;;  %v15209_v57 = vadd.f32 %v17128_v30, %v26525_v42  ;;  %v14598_v45 = vpop.f32.mrf.mxu0  ;;  %v26529_v19 = vld [vmem:[#allocation15_spill] sm:$0xff] }
 0x908   : > { %17499 = vtanh.f32 %v15535_v62  ;;  %v15401_v29 = vmul.f32 %v25159_v0, %v15142_v48  ;;  %v15200_v41 = vpop.f32.mrf.mxu1 }
 0x909   : > { %v17494_v61 = vpop.eup %17493  ;;  %17501 = vtanh.f32 %v15552_v49  ;;  %v15550_v21 = vadd.f32 %v25168_v51, %v15415_v14  ;;  %v15418_v58 = vmul.f32 %v25159_v0, %v15209_v57  ;;  %v15201_v38 = vadd.f32 %v15200_v41, %v26526_v55  ;;  %v14599_v40 = vpop.f32.mrf.mxu0  ;;  %v26530_v57 = vld [vmem:[#allocation106_spill] sm:$0xff] }
 0x90a   : > { %15789 = vst.msk [vmem:[%s24788_s21 + $0x290] sm:$0xff] %vm15706_vm4, %v17494_v61  ;;  %v15536_v22 = vadd.f32 %v25168_v51, %v15401_v29  ;;  %v15145_v3 = vadd.f32 %v25274_v50, %v14599_v40  ;;  %v17131_v37 = vpop.f32.mrf.mxu1  ;;  %v26531_v55 = vld [vmem:[#allocation102_spill] sm:$0xff] }
 0x90b   : > { %17503 = vtanh.f32 %v15550_v21  ;;  %v15553_v9 = vadd.f32 %v25168_v51, %v15418_v58  ;;  %v15416_v52 = vmul.f32 %v25159_v0, %v15201_v38  ;;  %v15222_v39 = vadd.f32 %v17131_v37, %v24448_v27  ;;  %v14601_v18 = vpop.f32.mrf.mxu0 }
 0x90c   : > { %17505 = vtanh.f32 %v15536_v22  ;;  %v15402_v17 = vmul.f32 %v25159_v0, %v15145_v3  ;;  %v15213_v24 = vpop.f32.mrf.mxu1 }
 0x90d   : > { %v17496_v56 = vpop.eup %17495  ;;  %17507 = vtanh.f32 %v15553_v9  ;;  %v15551_v13 = vadd.f32 %v25168_v51, %v15416_v52  ;;  %v15421_v50 = vmul.f32 %v25159_v0, %v15222_v39  ;;  %v15214_v6 = vadd.f32 %v15213_v24, %v26527_v20  ;;  %v14604_v63 = vpop.f32.mrf.mxu0 }
 0x90e   : > { %15790 = vst.msk [vmem:[%s24788_s21 + $0x298] sm:$0xff] %vm15706_vm4, %v17496_v56  ;;  %v15537_v4 = vadd.f32 %v25168_v51, %v15402_v17  ;;  %v15150_v27 = vadd.f32 %v25285_v28, %v14604_v63  ;;  %v17132_v2 = vpop.f32.mrf.mxu1 }
 0x90f   : > { %17509 = vtanh.f32 %v15551_v13  ;;  %v15556_v32 = vadd.f32 %v25168_v51, %v15421_v50  ;;  %v15419_v5 = vmul.f32 %v25159_v0, %v15214_v6  ;;  %v15225_v25 = vadd.f32 %v17132_v2, %v26528_v31  ;;  %v14606_v44 = vpop.f32.mrf.mxu0  ;;  %v26532_v6 = vld [vmem:[#allocation107_spill] sm:$0xff] }
 0x910   : > { %17511 = vtanh.f32 %v15537_v4  ;;  %v15403_v8 = vmul.f32 %v25159_v0, %v15150_v27  ;;  %v15216_v54 = vpop.f32.mrf.mxu1 }
 0x911   : > { %v17498_v11 = vpop.eup %17497  ;;  %17513 = vtanh.f32 %v15556_v32  ;;  %v15554_v12 = vadd.f32 %v25168_v51, %v15419_v5  ;;  %v15422_v28 = vmul.f32 %v25159_v0, %v15225_v25  ;;  %v15217_v7 = vadd.f32 %v15216_v54, %v26529_v19  ;;  %v14607_v62 = vpop.f32.mrf.mxu0 }
 0x912   : > { %15791 = vst.msk [vmem:[%s24788_s21 + $0x2a0] sm:$0xff] %vm15706_vm4, %v17498_v11  ;;  %v15538_v48 = vadd.f32 %v25168_v51, %v15403_v8  ;;  %v15153_v30 = vadd.f32 %v25293_v23, %v14607_v62  ;;  %v17135_v49 = vpop.f32.mrf.mxu1 }
 0x913   : > { %17515 = vtanh.f32 %v15554_v12  ;;  %v15557_v14 = vadd.f32 %v25168_v51, %v15422_v28  ;;  %v15420_v42 = vmul.f32 %v25159_v0, %v15217_v7  ;;  %v15238_v45 = vadd.f32 %v17135_v49, %v26530_v57  ;;  %v14609_v29 = vpop.f32.mrf.mxu0 }
 0x914   : > { %17517 = vtanh.f32 %v15538_v48  ;;  %v15404_v41 = vmul.f32 %v25159_v0, %v15153_v30  ;;  %v15229_v61 = vpop.f32.mrf.mxu1 }
 0x915   : > { %v17500_v21 = vpop.eup %17499  ;;  %17519 = vtanh.f32 %v15557_v14  ;;  %v15555_v58 = vadd.f32 %v25168_v51, %v15420_v42  ;;  %v15425_v23 = vmul.f32 %v25159_v0, %v15238_v45  ;;  %v15230_v38 = vadd.f32 %v15229_v61, %v26531_v55  ;;  %v14612_v40 = vpop.f32.mrf.mxu0 }
 0x916   : > { %v17502_v22 = vpop.eup %17501  ;;  %15792 = vst.msk [vmem:[%s24788_s21 + $0x2a8] sm:$0xff] %vm15706_vm4, %v17500_v21  ;;  %v15539_v3 = vadd.f32 %v25168_v51, %v15404_v41  ;;  %v15158_v37 = vadd.f32 %v25282_v53, %v14612_v40  ;;  %v17136_v9 = vpop.f32.mrf.mxu1  ;;  %v26533_v21 = vld [vmem:[#allocation110_spill] sm:$0xff] }
 0x917   : > { %15809 = vst.msk [vmem:[%s24788_s21 + $0x330] sm:$0xff] %vm15706_vm4, %v17502_v22  ;;  %17521 = vtanh.f32 %v15555_v58  ;;  %v15560_v52 = vadd.f32 %v25168_v51, %v15425_v23  ;;  %v15423_v39 = vmul.f32 %v25159_v0, %v15230_v38  ;;  %v15241_v18 = vadd.f32 %v17136_v9, %v24506_v43  ;;  %v14614_v17 = vpop.f32.mrf.mxu0 }
 0x918   : > { %v17504_v24 = vpop.eup %17503  ;;  %17523 = vtanh.f32 %v15539_v3  ;;  %v15405_v56 = vmul.f32 %v25159_v0, %v15158_v37  ;;  %v15232_v13 = vpop.f32.mrf.mxu1 }
 0x919   : > { %v17506_v50 = vpop.eup %17505  ;;  %15807 = vst.msk [vmem:[%s24788_s21 + $0x320] sm:$0xff] %vm15706_vm4, %v17504_v24  ;;  %17525 = vtanh.f32 %v15560_v52  ;;  %v15558_v53 = vadd.f32 %v25168_v51, %v15423_v39  ;;  %v15426_v20 = vmul.f32 %v25159_v0, %v15241_v18  ;;  %v15233_v63 = vadd.f32 %v15232_v13, %v26532_v6  ;;  %v14615_v4 = vpop.f32.mrf.mxu0 }
 0x91a   : > { %v17508_v27 = vpop.eup %17507  ;;  %15793 = vst.msk [vmem:[%s24788_s21 + $0x2b0] sm:$0xff] %vm15706_vm4, %v17506_v50  ;;  %v15540_v43 = vadd.f32 %v25168_v51, %v15405_v56  ;;  %v15161_v2 = vadd.f32 %v25290_v36, %v14615_v4  ;;  %v17139_v32 = vpop.f32.mrf.mxu1  ;;  %v26534_v56 = vld [vmem:[#allocation100_spill] sm:$0xff] }
 0x91b   : > { %15810 = vst.msk [vmem:[%s24788_s21 + $0x338] sm:$0xff] %vm15706_vm4, %v17508_v27  ;;  %17527 = vtanh.f32 %v15558_v53  ;;  %v15561_v5 = vadd.f32 %v25168_v51, %v15426_v20  ;;  %v15424_v31 = vmul.f32 %v25159_v0, %v15233_v63  ;;  %v15254_v25 = vadd.f32 %v17139_v32, %v24540_v35  ;;  %v14617_v44 = vpop.f32.mrf.mxu0  ;;  %v26535_v27 = vld [vmem:[#allocation109_spill] sm:$0xff] }
 0x91c   : > { %v17510_v8 = vpop.eup %17509  ;;  %17529 = vtanh.f32 %v15540_v43  ;;  %v15406_v54 = vmul.f32 %v25159_v0, %v15161_v2  ;;  %v15245_v11 = vpop.f32.mrf.mxu1 }
 0x91d   : > { %v17512_v12 = vpop.eup %17511  ;;  %15808 = vst.msk [vmem:[%s24788_s21 + $0x328] sm:$0xff] %vm15706_vm4, %v17510_v8  ;;  %17531 = vtanh.f32 %v15561_v5  ;;  %v15559_v36 = vadd.f32 %v25168_v51, %v15424_v31  ;;  %v15429_v28 = vmul.f32 %v25159_v0, %v15254_v25  ;;  %v15246_v19 = vadd.f32 %v15245_v11, %v24516_v10  ;;  %v14620_v7 = vpop.f32.mrf.mxu0  ;;  %v26536_v8 = vld [vmem:[#allocation101_spill] sm:$0xff] }
 0x91e   : > { %v17514_v62 = vpop.eup %17513  ;;  %15794 = vst.msk [vmem:[%s24788_s21 + $0x2b8] sm:$0xff] %vm15706_vm4, %v17512_v12  ;;  %v15541_v35 = vadd.f32 %v25168_v51, %v15406_v54  ;;  %v15166_v48 = vadd.f32 %v25301_v33, %v14620_v7  ;;  %v17140_v30 = vpop.f32.mrf.mxu1 }
 0x91f   : > { %15813 = vst.msk [vmem:[%s24788_s21 + $0x350] sm:$0xff] %vm15706_vm4, %v17514_v62  ;;  %17533 = vtanh.f32 %v15559_v36  ;;  %v15564_v49 = vadd.f32 %v25168_v51, %v15429_v28  ;;  %v15427_v14 = vmul.f32 %v25159_v0, %v15246_v19  ;;  %v15257_v10 = vadd.f32 %v17140_v30, %v24556_v59  ;;  %v14622_v42 = vpop.f32.mrf.mxu0 }
 0x920   : > { %v17516_v57 = vpop.eup %17515  ;;  %17535 = vtanh.f32 %v15541_v35  ;;  %v15407_v45 = vmul.f32 %v25159_v0, %v15166_v48  ;;  %v15248_v29 = vpop.f32.mrf.mxu1  ;;  %v26537_v35 = vld [vmem:[#allocation104_spill] sm:$0xff] }
 0x921   : > { %v17518_v41 = vpop.eup %17517  ;;  %15811 = vst.msk [vmem:[%s24788_s21 + $0x340] sm:$0xff] %vm15706_vm4, %v17516_v57  ;;  %17537 = vtanh.f32 %v15564_v49  ;;  %v15562_v33 = vadd.f32 %v25168_v51, %v15427_v14  ;;  %v15430_v61 = vmul.f32 %v25159_v0, %v15257_v10  ;;  %v15249_v58 = vadd.f32 %v15248_v29, %v26533_v21  ;;  %v14623_v23 = vpop.f32.mrf.mxu0 }
 0x922   : > { %v17520_v55 = vpop.eup %17519  ;;  %15795 = vst.msk [vmem:[%s24788_s21 + $0x2c0] sm:$0xff] %vm15706_vm4, %v17518_v41  ;;  %v15542_v59 = vadd.f32 %v25168_v51, %v15407_v45  ;;  %v15169_v38 = vadd.f32 %v25310_v46, %v14623_v23  ;;  %v17143_v40 = vpop.f32.mrf.mxu1  ;;  %v26538_v45 = vld [vmem:[#allocation105_spill] sm:$0xff] }
 0x923   : > { %15814 = vst.msk [vmem:[%s24788_s21 + $0x358] sm:$0xff] %vm15706_vm4, %v17520_v55  ;;  %17539 = vtanh.f32 %v15562_v33  ;;  %v15565_v22 = vadd.f32 %v25168_v51, %v15430_v61  ;;  %v15428_v3 = vmul.f32 %v25159_v0, %v15249_v58  ;;  %v15270_v37 = vadd.f32 %v17143_v40, %v24582_v47  ;;  %v14625_v9 = vpop.f32.mrf.mxu0 }
 0x924   : > { %v17522_v52 = vpop.eup %17521  ;;  %17541 = vtanh.f32 %v15542_v59  ;;  %v15408_v39 = vmul.f32 %v25159_v0, %v15169_v38  ;;  %v15261_v18 = vpop.f32.mrf.mxu1  ;;  %v26539_v59 = vld [vmem:[#allocation136_spill] sm:$0xff] }
 0x925   : > { %v17524_v17 = vpop.eup %17523  ;;  %15812 = vst.msk [vmem:[%s24788_s21 + $0x348] sm:$0xff] %vm15706_vm4, %v17522_v52  ;;  %17543 = vtanh.f32 %v15565_v22  ;;  %v15563_v46 = vadd.f32 %v25168_v51, %v15428_v3  ;;  %v15433_v24 = vmul.f32 %v25159_v0, %v15270_v37  ;;  %v15262_v13 = vadd.f32 %v15261_v18, %v26534_v56  ;;  %v14628_v50 = vpop.f32.mrf.mxu0 }
 0x926   : > { %v17526_v53 = vpop.eup %17525  ;;  %15796 = vst.msk [vmem:[%s24788_s21 + $0x2c8] sm:$0xff] %vm15706_vm4, %v17524_v17  ;;  %v15543_v47 = vadd.f32 %v25168_v51, %v15408_v39  ;;  %v15174_v20 = vadd.f32 %v25298_v26, %v14628_v50  ;;  %v17144_v6 = vpop.f32.mrf.mxu1  ;;  %v26540_v39 = vld [vmem:[#allocation108_spill] sm:$0xff] }
 0x927   : > { %15817 = vst.msk [vmem:[%s24788_s21 + $0x370] sm:$0xff] %vm15706_vm4, %v17526_v53  ;;  %17545 = vtanh.f32 %v15563_v46  ;;  %v15568_v63 = vadd.f32 %v25168_v51, %v15433_v24  ;;  %v15431_v4 = vmul.f32 %v25159_v0, %v15262_v13  ;;  %v15273_v43 = vadd.f32 %v17144_v6, %v26535_v27  ;;  %v14630_v2 = vpop.f32.mrf.mxu0 }
 0x928   : > { %v17528_v32 = vpop.eup %17527  ;;  %17547 = vtanh.f32 %v15543_v47  ;;  %v15409_v5 = vmul.f32 %v25159_v0, %v15174_v20  ;;  %v15264_v31 = vpop.f32.mrf.mxu1  ;;  %v26541_v47 = vld [vmem:[#allocation11_spill] sm:$0xff]  ;;  %v17593_v2 = vld [vmem:[%s25564_s11] ss:$0 sm:$0xff] }
 0x929   : > { %v17530_v25 = vpop.eup %17529  ;;  %15815 = vst.msk [vmem:[%s24788_s21 + $0x360] sm:$0xff] %vm15706_vm4, %v17528_v32  ;;  %17549 = vtanh.f32 %v15568_v63  ;;  %v15566_v26 = vadd.f32 %v25168_v51, %v15431_v4  ;;  %v15434_v44 = vmul.f32 %v25159_v0, %v15273_v43  ;;  %v15265_v54 = vadd.f32 %v15264_v31, %v26536_v8  ;;  %v14631_v11 = vpop.f32.mrf.mxu0 }
 0x92a   : > { %v17532_v12 = vpop.eup %17531  ;;  %15797 = vst.msk [vmem:[%s24788_s21 + $0x2d0] sm:$0xff] %vm15706_vm4, %v17530_v25  ;;  %v15544_v36 = vadd.f32 %v25168_v51, %v15409_v5  ;;  %v15177_v28 = vadd.f32 %v25307_v16, %v14631_v11  ;;  %v17147_v19 = vpop.f32.mrf.mxu1  ;;  %v26542_v5 = vld [vmem:[#allocation135_spill] sm:$0xff] }
 0x92b   : > { %15818 = vst.msk [vmem:[%s24788_s21 + $0x378] sm:$0xff] %vm15706_vm4, %v17532_v12  ;;  %17551 = vtanh.f32 %v15566_v26  ;;  %v15569_v7 = vadd.f32 %v25168_v51, %v15434_v44  ;;  %v15432_v62 = vmul.f32 %v25159_v0, %v15265_v54  ;;  %v15286_v48 = vadd.f32 %v17147_v19, %v26537_v35  ;;  %v14633_v30 = vpop.f32.mrf.mxu0  ;;  %v17594_v54 = vld [vmem:[%s25565_s12] ss:$0 sm:$0xff] }
 0x92c   : > { %v17534_v49 = vpop.eup %17533  ;;  %17553 = vtanh.f32 %v15544_v36  ;;  %v15410_v14 = vmul.f32 %v25159_v0, %v15177_v28  ;;  %v15277_v10 = vpop.f32.mrf.mxu1  ;;  %v26543_v36 = vld [vmem:[#allocation138_spill] sm:$0xff]  ;;  %v26544_v30 = vld [vmem:[#allocation140_spill] sm:$0xff] }
 0x92d   : > { %v17536_v42 = vpop.eup %17535  ;;  %15816 = vst.msk [vmem:[%s24788_s21 + $0x368] sm:$0xff] %vm15706_vm4, %v17534_v49  ;;  %17555 = vtanh.f32 %v15569_v7  ;;  %v15567_v16 = vadd.f32 %v25168_v51, %v15432_v62  ;;  %v15437_v57 = vmul.f32 %v25159_v0, %v15286_v48  ;;  %v15278_v29 = vadd.f32 %v15277_v10, %v26538_v45  ;;  %v14636_v41 = vpop.f32.mrf.mxu0 }
 0x92e   : > { %v17538_v33 = vpop.eup %17537  ;;  %15798 = vst.msk [vmem:[%s24788_s21 + $0x2d8] sm:$0xff] %vm15706_vm4, %v17536_v42  ;;  %v15545_v61 = vadd.f32 %v25168_v51, %v15410_v14  ;;  %v15182_v21 = vadd.f32 %v25319_v60, %v14636_v41  ;;  %v17148_v58 = vpop.f32.mrf.mxu1 }
 0x92f   : > { %15821 = vst.msk [vmem:[%s24788_s21 + $0x390] sm:$0xff] %vm15706_vm4, %v17538_v33  ;;  %17557 = vtanh.f32 %v15567_v16  ;;  %v15572_v23 = vadd.f32 %v25168_v51, %v15437_v57  ;;  %v15435_v55 = vmul.f32 %v25159_v0, %v15278_v29  ;;  %v15289_v38 = vadd.f32 %v17148_v58, %v26539_v59  ;;  %v14638_v40 = vpop.f32.mrf.mxu0 }
 0x930   : > { %v17540_v22 = vpop.eup %17539  ;;  %17559 = vtanh.f32 %v15545_v61  ;;  %v15411_v3 = vmul.f32 %v25159_v0, %v15182_v21  ;;  %v15280_v37 = vpop.f32.mrf.mxu1 }
 0x931   : > { %v17542_v9 = vpop.eup %17541  ;;  %15819 = vst.msk [vmem:[%s24788_s21 + $0x380] sm:$0xff] %vm15706_vm4, %v17540_v22  ;;  %17561 = vtanh.f32 %v15572_v23  ;;  %v15570_v60 = vadd.f32 %v25168_v51, %v15435_v55  ;;  %v15438_v52 = vmul.f32 %v25159_v0, %v15289_v38  ;;  %v15281_v18 = vadd.f32 %v15280_v37, %v26540_v39  ;;  %v14639_v17 = vpop.f32.mrf.mxu0 }
 0x932   : > { %v17544_v46 = vpop.eup %17543  ;;  %15799 = vst.msk [vmem:[%s24788_s21 + $0x2e0] sm:$0xff] %vm15706_vm4, %v17542_v9  ;;  %v15546_v24 = vadd.f32 %v25168_v51, %v15411_v3  ;;  %v15185_v56 = vadd.f32 %v25328_v15, %v14639_v17  ;;  %v17151_v13 = vpop.f32.mrf.mxu1 }
 0x933   : > { %15822 = vst.msk [vmem:[%s24788_s21 + $0x398] sm:$0xff] %vm15706_vm4, %v17544_v46  ;;  %17563 = vtanh.f32 %v15570_v60  ;;  %v15573_v50 = vadd.f32 %v25168_v51, %v15438_v52  ;;  %v15436_v53 = vmul.f32 %v25159_v0, %v15281_v18  ;;  %v15302_v20 = vadd.f32 %v17151_v13, %v26541_v47  ;;  %v14641_v6 = vpop.f32.mrf.mxu0 }
 0x934   : > { %v17546_v63 = vpop.eup %17545  ;;  %17565 = vtanh.f32 %v15546_v24  ;;  %v15412_v4 = vmul.f32 %v25159_v0, %v15185_v56  ;;  %v15293_v27 = vpop.f32.mrf.mxu1 }
 0x935   : > { %v17548_v43 = vpop.eup %17547  ;;  %15820 = vst.msk [vmem:[%s24788_s21 + $0x388] sm:$0xff] %vm15706_vm4, %v17546_v63  ;;  %17567 = vtanh.f32 %v15573_v50  ;;  %v15571_v15 = vadd.f32 %v25168_v51, %v15436_v53  ;;  %v15441_v32 = vmul.f32 %v17593_v2, %v15302_v20  ;;  %v15294_v31 = vadd.f32 %v15293_v27, %v26542_v5  ;;  %v14644_v25 = vpop.f32.mrf.mxu0 }
 0x936   : > { %v17550_v26 = vpop.eup %17549  ;;  %15800 = vst.msk [vmem:[%s24788_s21 + $0x2e8] sm:$0xff] %vm15706_vm4, %v17548_v43  ;;  %v15547_v0 = vadd.f32 %v25168_v51, %v15412_v4  ;;  %v15190_v44 = vadd.f32 %v25316_v1, %v14644_v25  ;;  %v17152_v8 = vpop.f32.mrf.mxu1 }
 0x937   : > { %15825 = vst.msk [vmem:[%s24788_s21 + $0x3b0] sm:$0xff] %vm15706_vm4, %v17550_v26  ;;  %17569 = vtanh.f32 %v15571_v15  ;;  %v15576_v11 = vadd.f32 %v17594_v54, %v15441_v32  ;;  %v15439_v12 = vmul.f32 %v17593_v2, %v15294_v31  ;;  %v15305_v28 = vadd.f32 %v17152_v8, %v26543_v36  ;;  %v14646_v19 = vpop.f32.mrf.mxu0 }
 0x938   : > { %v17552_v7 = vpop.eup %17551  ;;  %17571 = vtanh.f32 %v15547_v0  ;;  %v15413_v51 = vmul.f32 %v17593_v2, %v15190_v44  ;;  %v15296_v62 = vpop.f32.mrf.mxu1 }
 0x939   : > { %v17554_v1 = vpop.eup %17553  ;;  %15823 = vst.msk [vmem:[%s24788_s21 + $0x3a0] sm:$0xff] %vm15706_vm4, %v17552_v7  ;;  %17573 = vtanh.f32 %v15576_v11  ;;  %v15574_v35 = vadd.f32 %v17594_v54, %v15439_v12  ;;  %v15442_v48 = vmul.f32 %v17593_v2, %v15305_v28  ;;  %v15297_v49 = vadd.f32 %v15296_v62, %v26544_v30  ;;  %v14647_v14 = vpop.f32.mrf.mxu0 }
 0x93a   : > { %v17556_v10 = vpop.eup %17555  ;;  %15801 = vst.msk [vmem:[%s24788_s21 + $0x2f0] sm:$0xff] %vm15706_vm4, %v17554_v1  ;;  %v15548_v42 = vadd.f32 %v17594_v54, %v15413_v51  ;;  %v15193_v16 = vadd.f32 %v25325_v34, %v14647_v14 }
 0x93b   : > { %15826 = vst.msk [vmem:[%s24788_s21 + $0x3b8] sm:$0xff] %vm15706_vm4, %v17556_v10  ;;  %17575 = vtanh.f32 %v15574_v35  ;;  %v15577_v57 = vadd.f32 %v17594_v54, %v15442_v48  ;;  %v15440_v45 = vmul.f32 %v17593_v2, %v15297_v49  ;;  %v14649_v29 = vpop.f32.mrf.mxu0 }
 0x93c   : > { %v17558_v41 = vpop.eup %17557  ;;  %17577 = vtanh.f32 %v15548_v42  ;;  %v15414_v33 = vmul.f32 %v17593_v2, %v15193_v16 }
 0x93d   : > { %v17560_v61 = vpop.eup %17559  ;;  %15824 = vst.msk [vmem:[%s24788_s21 + $0x3a8] sm:$0xff] %vm15706_vm4, %v17558_v41  ;;  %17579 = vtanh.f32 %v15577_v57  ;;  %v15575_v21 = vadd.f32 %v17594_v54, %v15440_v45 }
 0x93e   : > { %v17562_v34 = vpop.eup %17561  ;;  %15802 = vst.msk [vmem:[%s24788_s21 + $0x2f8] sm:$0xff] %vm15706_vm4, %v17560_v61  ;;  %v15549_v58 = vadd.f32 %v17594_v54, %v15414_v33 }
 0x93f   : > { %15829 = vst.msk [vmem:[%s24788_s21 + $0x3d0] sm:$0xff] %vm15706_vm4, %v17562_v34  ;;  %17581 = vtanh.f32 %v15575_v21 }
 0x940   : > { %v17564_v23 = vpop.eup %17563  ;;  %17583 = vtanh.f32 %v15549_v58 }
 0x941   : > { %v17566_v55 = vpop.eup %17565  ;;  %15827 = vst.msk [vmem:[%s24788_s21 + $0x3c0] sm:$0xff] %vm15706_vm4, %v17564_v23 }
 0x942   : > { %v17568_v59 = vpop.eup %17567  ;;  %15803 = vst.msk [vmem:[%s24788_s21 + $0x300] sm:$0xff] %vm15706_vm4, %v17566_v55 }
 0x943   : > { %15830 = vst.msk [vmem:[%s24788_s21 + $0x3d8] sm:$0xff] %vm15706_vm4, %v17568_v59 }
 0x944   : > { %v17570_v38 = vpop.eup %17569 }
 0x945   : > { %v17572_v40 = vpop.eup %17571  ;;  %15828 = vst.msk [vmem:[%s24788_s21 + $0x3c8] sm:$0xff] %vm15706_vm4, %v17570_v38 }
 0x946   : > { %v17574_v22 = vpop.eup %17573  ;;  %15804 = vst.msk [vmem:[%s24788_s21 + $0x308] sm:$0xff] %vm15706_vm4, %v17572_v40 }
 0x947   : > { %15833 = vst.msk [vmem:[%s24788_s21 + $0x3f0] sm:$0xff] %vm15706_vm4, %v17574_v22 }
 0x948   : > { %v17576_v3 = vpop.eup %17575 }
 0x949   : > { %v17578_v37 = vpop.eup %17577  ;;  %15831 = vst.msk [vmem:[%s24788_s21 + $0x3e0] sm:$0xff] %vm15706_vm4, %v17576_v3 }
 0x94a   : > { %v17580_v9 = vpop.eup %17579  ;;  %15805 = vst.msk [vmem:[%s24788_s21 + $0x310] sm:$0xff] %vm15706_vm4, %v17578_v37 }
 0x94b   : > { %15834 = vst.msk [vmem:[%s24788_s21 + $0x3f8] sm:$0xff] %vm15706_vm4, %v17580_v9 }
 0x94c   : > { %v17582_v60 = vpop.eup %17581 }
 0x94d   : > { %v17584_v52 = vpop.eup %17583  ;;  %15832 = vst.msk [vmem:[%s24788_s21 + $0x3e8] sm:$0xff] %vm15706_vm4, %v17582_v60 }
 0x94e   : > { %15806 = vst.msk [vmem:[%s24788_s21 + $0x318] sm:$0xff] %vm15706_vm4, %v17584_v52 }
 0x94f PF: > { %s23_s25 = sadd.s32 1, %s17601_s25  }
 0x950   : > { %p20_p4 = scmp.ge.s32.totalorder %s23_s25, 4  }
 0x952   :  { %22 = sbr.rel (!%p20_p4) target bundleno = 1 (0x1), region = 102 }

</bundles_post_ra>
